<compile_context>
chip_gen: v7x
topology: tpu7x:2x2x1
jax: 0.10.0
libtpu: 0.0.40
codegen_flags: <defaults>
</compile_context>

<pallas_src>
import jax
import jax.numpy as jnp
from jax.experimental import pallas as pl
from jax.experimental.pallas import tpu as pltpu

ACTIONS = 2
BN_EPS = 1e-5
FC_TK = 1280  # k-tile for streaming fc1's weight (10*128 lanes; 6400/1280 = 5 steps)


# ---------------------------------------------------------------------------
# Pallas kernel 1: single-shot fused GEMM for the conv layers.
#   o = relu(a @ w + b)   with BN (eval-mode) scale/shift pre-folded into w / b.
# Whole operands live in VMEM (largest A here is 800x256 f32 ~ 0.8 MB).
# ---------------------------------------------------------------------------
def _conv_gemm_kernel(a_ref, w_ref, b_ref, o_ref):
    y = jnp.dot(a_ref[...], w_ref[...], preferred_element_type=jnp.float32)
    o_ref[...] = jnp.maximum(y + b_ref[...], 0.0).astype(o_ref.dtype)


def conv_gemm(a, w, b):
    M, K = a.shape
    K2, N = w.shape
    assert K == K2 and b.shape == (1, N)
    return pl.pallas_call(
        _conv_gemm_kernel,
        out_shape=jax.ShapeDtypeStruct((M, N), jnp.float32),
        grid=(1,),
        in_specs=[
            pl.BlockSpec((M, K), lambda i: (0, 0)),
            pl.BlockSpec((K, N), lambda i: (0, 0)),
            pl.BlockSpec((1, N), lambda i: (0, 0)),
        ],
        out_specs=pl.BlockSpec((M, N), lambda i: (0, 0)),
        compiler_params=pltpu.CompilerParams(dimension_semantics=("arbitrary",)),
    )(a, w, b)


# ---------------------------------------------------------------------------
# Pallas kernel 2: fused fc1 (+ReLU) + fc2.
# fc1's weight (6400, 512) is streamed along K; fc2 (512 -> 2, padded to 128
# lane-dense columns) runs in the epilogue of the last k step.
# ---------------------------------------------------------------------------
def _fc_fused_kernel(x_ref, w1_ref, b1_ref, w2_ref, b2_ref, o_ref, acc_ref):
    @pl.when(pl.program_id(0) == 0)
    def _():
        acc_ref[...] = jnp.zeros_like(acc_ref)

    acc_ref[...] += jnp.dot(x_ref[...], w1_ref[...],
                            preferred_element_type=jnp.float32)

    @pl.when(pl.program_id(0) == pl.num_programs(0) - 1)
    def _():
        h = jnp.maximum(acc_ref[...] + b1_ref[...], 0.0)                 # fc1+ReLU
        q = jnp.dot(h, w2_ref[...], preferred_element_type=jnp.float32)  # fc2
        o_ref[...] = (q + b2_ref[...]).astype(o_ref.dtype)


def fc_fused(x, w1, b1, w2p, b2p, *, tk=FC_TK):
    B, K = x.shape
    K2, H = w1.shape
    _, Np = w2p.shape
    assert K == K2 and K % tk == 0
    nk = K // tk
    return pl.pallas_call(
        _fc_fused_kernel,
        out_shape=jax.ShapeDtypeStruct((B, Np), jnp.float32),
        grid=(nk,),
        in_specs=[
            pl.BlockSpec((B, tk), lambda k: (0, k)),
            pl.BlockSpec((tk, H), lambda k: (k, 0)),
            pl.BlockSpec((1, H), lambda k: (0, 0)),
            pl.BlockSpec((H, Np), lambda k: (0, 0)),
            pl.BlockSpec((1, Np), lambda k: (0, 0)),
        ],
        out_specs=pl.BlockSpec((B, Np), lambda k: (0, 0)),
        scratch_shapes=[pltpu.VMEM((B, H), jnp.float32)],
        compiler_params=pltpu.CompilerParams(dimension_semantics=("arbitrary",)),
    )(x, w1, b1, w2p, b2p)


# ---------------------------------------------------------------------------
# Plain-JAX glue: NHWC im2col. Column order is (kh, kw, c) — the conv weights
# are reordered to match once at init, so no activation transpose is needed.
# ---------------------------------------------------------------------------
def im2col_nhwc(x, kh, kw, stride, pad):
    B, H, W, C = x.shape
    xp = jnp.pad(x, ((0, 0), (pad, pad), (pad, pad), (0, 0)))
    Ho = (H + 2 * pad - kh) // stride + 1
    Wo = (W + 2 * pad - kw) // stride + 1
    cols = []
    for i in range(kh):
        for j in range(kw):
            cols.append(
                xp[:, i : i + stride * Ho : stride, j : j + stride * Wo : stride, :])
    patches = jnp.stack(cols, axis=3)          # (B, Ho, Wo, kh*kw, C) — no transpose
    return patches.reshape(B * Ho * Wo, kh * kw * C), Ho, Wo


def conv_bn_relu(x_nhwc, w_mat, shift, *, kh, kw, stride, pad):
    """conv2d -> BatchNorm2d(eval) -> ReLU, with BN folded into w_mat/shift."""
    B = x_nhwc.shape[0]
    patches, Ho, Wo = im2col_nhwc(x_nhwc, kh, kw, stride, pad)
    y = conv_gemm(patches, w_mat, shift)       # (B*Ho*Wo, C_out)
    return y.reshape(B, Ho, Wo, -1)            # stays NHWC, no transpose


# ---------------------------------------------------------------------------
# Parameters: deterministic synthetic init in PyTorch layout, then a one-time
# preprocessing step (BN fold, layout reorder, fc column permutation, padding).
# ---------------------------------------------------------------------------
def init_params(key):
    ks = jax.random.split(key, 16)
    p = {}

    def w_init(k, shape, scale=0.05):
        return (scale * jax.random.normal(k, shape)).astype(jnp.float32)

    # conv1: (32, 4, 8, 8)
    p["w1"] = w_init(ks[0], (32, 4, 8, 8))
    p["b1"] = w_init(ks[1], (32,))
    p["g1"] = 1.0 + 0.1 * jax.random.normal(ks[2], (32,))
    p["be1"] = w_init(ks[3], (32,))
    p["m1"] = w_init(ks[4], (32,))
    p["v1"] = 0.5 + jax.random.uniform(ks[5], (32,))
    # conv2: (64, 32, 4, 4)
    p["w2"] = w_init(ks[6], (64, 32, 4, 4))
    p["b2"] = w_init(ks[7], (64,))
    p["g2"] = 1.0 + 0.1 * jax.random.normal(ks[8], (64,))
    p["be2"] = w_init(ks[9], (64,))
    p["m2"] = w_init(ks[10], (64,))
    p["v2"] = 0.5 + jax.random.uniform(ks[11], (64,))
    # conv3: (64, 64, 3, 3)
    p["w3"] = w_init(ks[12], (64, 64, 3, 3))
    p["b3"] = w_init(ks[13], (64,))
    kb = jax.random.split(ks[14], 8)
    p["g3"] = 1.0 + 0.1 * jax.random.normal(kb[0], (64,))
    p["be3"] = w_init(kb[1], (64,))
    p["m3"] = w_init(kb[2], (64,))
    p["v3"] = 0.5 + jax.random.uniform(kb[3], (64,))
    # fc1: (512, 6400), fc2: (2, 512)
    p["wf1"] = w_init(kb[4], (512, 64 * 10 * 10), scale=0.02)
    p["bf1"] = w_init(kb[5], (512,))
    p["wf2"] = w_init(kb[6], (ACTIONS, 512), scale=0.02)
    p["bf2"] = w_init(kb[7], (ACTIONS,))
    return {k: v.astype(jnp.float32) for k, v in p.items()}


def prepare_params(p):
    """One-time preprocessing: fold eval-mode BN into conv weights, reorder
    weights to NHWC im2col order, permute fc1 columns for the NHWC flatten,
    pad fc2 to lane-dense 128 columns."""
    q = {}

    def conv_prep(w, b, g, be, m, v):
        c_out, c_in, kh, kw = w.shape
        inv_std = g / jnp.sqrt(v + BN_EPS)                     # (C_out,)
        w_f = w * inv_std[:, None, None, None]                 # fold BN scale
        shift = (b - m) * inv_std + be                         # folded BN shift
        # (C_out, C_in, kh, kw) -> (kh, kw, C_in, C_out) -> (kh*kw*C_in, C_out)
        w_mat = w_f.transpose(2, 3, 1, 0).reshape(kh * kw * c_in, c_out)
        return (w_mat.astype(jnp.float32),
                shift.reshape(1, c_out).astype(jnp.float32))

    q["w1"], q["s1"] = conv_prep(p["w1"], p["b1"], p["g1"], p["be1"], p["m1"], p["v1"])
    q["w2"], q["s2"] = conv_prep(p["w2"], p["b2"], p["g2"], p["be2"], p["m2"], p["v2"])
    q["w3"], q["s3"] = conv_prep(p["w3"], p["b3"], p["g3"], p["be3"], p["m3"], p["v3"])

    # fc1: permute 6400 input columns from NCHW (c,h,w) order to NHWC (h,w,c).
    wf1 = p["wf1"].reshape(512, 64, 10, 10).transpose(0, 2, 3, 1).reshape(512, 6400)
    q["wf1"] = wf1.T.astype(jnp.float32)                       # (6400, 512)
    q["bf1"] = p["bf1"].reshape(1, 512).astype(jnp.float32)

    # fc2: (ACTIONS, 512) -> (512, 128) lane-dense zero-padded, bias likewise.
    w2 = p["wf2"].T.astype(jnp.float32)                        # (512, ACTIONS)
    q["wf2"] = jnp.pad(w2, ((0, 0), (0, 128 - ACTIONS)))
    q["bf2"] = jnp.pad(p["bf2"].reshape(1, ACTIONS).astype(jnp.float32),
                       ((0, 0), (0, 128 - ACTIONS)))
    return q


# ---------------------------------------------------------------------------
# Forward pass.
# ---------------------------------------------------------------------------
def flappy_bird_forward(q, x_nchw):
    # TODO(synk): BatchNorm implemented in eval mode (running stats); PyTorch
    # training-mode batch statistics are not reproduced here.
    x = x_nchw.transpose(0, 2, 3, 1)                                    # NCHW->NHWC once
    x = conv_bn_relu(x, q["w1"], q["s1"], kh=8, kw=8, stride=4, pad=2)  # (B,20,20,32)
    x = conv_bn_relu(x, q["w2"], q["s2"], kh=4, kw=4, stride=2, pad=1)  # (B,10,10,64)
    x = conv_bn_relu(x, q["w3"], q["s3"], kh=3, kw=3, stride=1, pad=1)  # (B,10,10,64)
    x = x.reshape(x.shape[0], -1)                                       # (B,6400) NHWC flatten
    q_out = fc_fused(x, q["wf1"], q["bf1"], q["wf2"], q["bf2"])         # (B,128)
    return q_out[:, :ACTIONS]


if __name__ == "__main__":
    key = jax.random.PRNGKey(0)
    kp, kx = jax.random.split(key)
    raw_params = init_params(kp)
    params = prepare_params(raw_params)   # one-time BN-fold / layout prep
    # Input shape implied by fc1 = 64*10*10: (batch, 4 frames, 80, 80)
    x = jax.random.normal(kx, (2, 4, 80, 80), dtype=jnp.float32)

    fwd = jax.jit(flappy_bird_forward)
    q_values = fwd(params, x)
    jax.block_until_ready(q_values)

    assert q_values.shape == (2, ACTIONS), q_values.shape
    assert q_values.dtype == jnp.float32
    assert bool(jnp.all(jnp.isfinite(q_values)))
    print("KERNEL_OK")
</pallas_src>

<mosaic_0001>
module attributes {stable_mosaic.version = 11 : i64} {
  func.func @_conv_gemm_kernel(%arg0: i32, %arg1: memref<800x256xf32, #tpu.memory_space<vmem>>, %arg2: memref<256x32xf32, #tpu.memory_space<vmem>>, %arg3: memref<1x32xf32, #tpu.memory_space<vmem>>, %arg4: memref<800x32xf32, #tpu.memory_space<vmem>>) attributes {dimension_semantics = [#tpu.dimension_semantics<arbitrary>], iteration_bounds = array<i64: 1>, scalar_prefetch = 0 : i64, scratch_operands = 0 : i64, tpu.core_type = #tpu.core_type<tc>, window_params = [{pipeline_mode = #tpu.pipeline_mode<synchronous>, transform_indices = @transform_0, window_bounds = array<i64: 800, 256>}, {pipeline_mode = #tpu.pipeline_mode<synchronous>, transform_indices = @transform_1, window_bounds = array<i64: 256, 32>}, {pipeline_mode = #tpu.pipeline_mode<synchronous>, transform_indices = @transform_2, window_bounds = array<i64: 1, 32>}, {pipeline_mode = #tpu.pipeline_mode<synchronous>, transform_indices = @transform_3, window_bounds = array<i64: 800, 32>}]} {
    %c0 = arith.constant 0 : index
    %c0_0 = arith.constant 0 : index
    %0 = vector.load %arg1[%c0, %c0_0] : memref<800x256xf32, #tpu.memory_space<vmem>>, vector<800x256xf32>
    %c0_1 = arith.constant 0 : index
    %c0_2 = arith.constant 0 : index
    %1 = vector.load %arg2[%c0_1, %c0_2] : memref<256x32xf32, #tpu.memory_space<vmem>>, vector<256x32xf32>
    %cst = arith.constant dense<0.000000e+00> : vector<800x32xf32>
    %2 = tpu.matmul %0, %1, %cst {dimension_numbers = #tpu.dot_dimension_numbers<[1], [0], [0], [1], [0, 0, 1, 1], [], []>} : vector<800x256xf32>, vector<256x32xf32>, vector<800x32xf32> -> vector<800x32xf32>
    %c0_3 = arith.constant 0 : index
    %c0_4 = arith.constant 0 : index
    %3 = vector.load %arg3[%c0_3, %c0_4] : memref<1x32xf32, #tpu.memory_space<vmem>>, vector<1x32xf32>
    %4 = vector.broadcast %3 : vector<1x32xf32> to vector<800x32xf32>
    %5 = arith.addf %2, %4 : vector<800x32xf32>
    %cst_5 = arith.constant 0.000000e+00 : f32
    %6 = vector.broadcast %cst_5 : f32 to vector<800x32xf32>
    %7 = arith.maximumf %5, %6 : vector<800x32xf32>
    %c0_6 = arith.constant 0 : index
    %c0_7 = arith.constant 0 : index
    %8 = vector.load %arg4[%c0_6, %c0_7] : memref<800x32xf32, #tpu.memory_space<vmem>>, vector<800x32xf32>
    tpu.vector_store %arg4[%c0_6, %c0_7], %7 {strides = array<i32>} : memref<800x32xf32, #tpu.memory_space<vmem>>, vector<800x32xf32>,
    return
  }
  func.func @transform_0(%arg0: i32) -> (i32, i32) {
    %c0_i32 = arith.constant 0 : i32
    %c0_i32_0 = arith.constant 0 : i32
    %c0_i32_1 = arith.constant 0 : i32
    return %c0_i32, %c0_i32_0 : i32, i32
  }
  func.func @transform_1(%arg0: i32) -> (i32, i32) {
    %c0_i32 = arith.constant 0 : i32
    %c0_i32_0 = arith.constant 0 : i32
    %c0_i32_1 = arith.constant 0 : i32
    return %c0_i32, %c0_i32_0 : i32, i32
  }
  func.func @transform_2(%arg0: i32) -> (i32, i32) {
    %c0_i32 = arith.constant 0 : i32
    %c0_i32_0 = arith.constant 0 : i32
    %c0_i32_1 = arith.constant 0 : i32
    return %c0_i32, %c0_i32_0 : i32, i32
  }
  func.func @transform_3(%arg0: i32) -> (i32, i32) {
    %c0_i32 = arith.constant 0 : i32
    %c0_i32_0 = arith.constant 0 : i32
    %c0_i32_1 = arith.constant 0 : i32
    return %c0_i32, %c0_i32_0 : i32, i32
  }
}

module attributes {stable_mosaic.version = 11 : i64} {
  func.func @_conv_gemm_kernel(%arg0: i32, %arg1: memref<200x512xf32, #tpu.memory_space<vmem>>, %arg2: memref<512x64xf32, #tpu.memory_space<vmem>>, %arg3: memref<1x64xf32, #tpu.memory_space<vmem>>, %arg4: memref<200x64xf32, #tpu.memory_space<vmem>>) attributes {dimension_semantics = [#tpu.dimension_semantics<arbitrary>], iteration_bounds = array<i64: 1>, scalar_prefetch = 0 : i64, scratch_operands = 0 : i64, tpu.core_type = #tpu.core_type<tc>, window_params = [{pipeline_mode = #tpu.pipeline_mode<synchronous>, transform_indices = @transform_0, window_bounds = array<i64: 200, 512>}, {pipeline_mode = #tpu.pipeline_mode<synchronous>, transform_indices = @transform_1, window_bounds = array<i64: 512, 64>}, {pipeline_mode = #tpu.pipeline_mode<synchronous>, transform_indices = @transform_2, window_bounds = array<i64: 1, 64>}, {pipeline_mode = #tpu.pipeline_mode<synchronous>, transform_indices = @transform_3, window_bounds = array<i64: 200, 64>}]} {
    %c0 = arith.constant 0 : index
    %c0_0 = arith.constant 0 : index
    %0 = vector.load %arg1[%c0, %c0_0] : memref<200x512xf32, #tpu.memory_space<vmem>>, vector<200x512xf32>
    %c0_1 = arith.constant 0 : index
    %c0_2 = arith.constant 0 : index
    %1 = vector.load %arg2[%c0_1, %c0_2] : memref<512x64xf32, #tpu.memory_space<vmem>>, vector<512x64xf32>
    %cst = arith.constant dense<0.000000e+00> : vector<200x64xf32>
    %2 = tpu.matmul %0, %1, %cst {dimension_numbers = #tpu.dot_dimension_numbers<[1], [0], [0], [1], [0, 0, 1, 1], [], []>} : vector<200x512xf32>, vector<512x64xf32>, vector<200x64xf32> -> vector<200x64xf32>
    %c0_3 = arith.constant 0 : index
    %c0_4 = arith.constant 0 : index
    %3 = vector.load %arg3[%c0_3, %c0_4] : memref<1x64xf32, #tpu.memory_space<vmem>>, vector<1x64xf32>
    %4 = vector.broadcast %3 : vector<1x64xf32> to vector<200x64xf32>
    %5 = arith.addf %2, %4 : vector<200x64xf32>
    %cst_5 = arith.constant 0.000000e+00 : f32
    %6 = vector.broadcast %cst_5 : f32 to vector<200x64xf32>
    %7 = arith.maximumf %5, %6 : vector<200x64xf32>
    %c0_6 = arith.constant 0 : index
    %c0_7 = arith.constant 0 : index
    %8 = vector.load %arg4[%c0_6, %c0_7] : memref<200x64xf32, #tpu.memory_space<vmem>>, vector<200x64xf32>
    tpu.vector_store %arg4[%c0_6, %c0_7], %7 {strides = array<i32>} : memref<200x64xf32, #tpu.memory_space<vmem>>, vector<200x64xf32>,
    return
  }
  func.func @transform_0(%arg0: i32) -> (i32, i32) {
    %c0_i32 = arith.constant 0 : i32
    %c0_i32_0 = arith.constant 0 : i32
    %c0_i32_1 = arith.constant 0 : i32
    return %c0_i32, %c0_i32_0 : i32, i32
  }
  func.func @transform_1(%arg0: i32) -> (i32, i32) {
    %c0_i32 = arith.constant 0 : i32
    %c0_i32_0 = arith.constant 0 : i32
    %c0_i32_1 = arith.constant 0 : i32
    return %c0_i32, %c0_i32_0 : i32, i32
  }
  func.func @transform_2(%arg0: i32) -> (i32, i32) {
    %c0_i32 = arith.constant 0 : i32
    %c0_i32_0 = arith.constant 0 : i32
    %c0_i32_1 = arith.constant 0 : i32
    return %c0_i32, %c0_i32_0 : i32, i32
  }
  func.func @transform_3(%arg0: i32) -> (i32, i32) {
    %c0_i32 = arith.constant 0 : i32
    %c0_i32_0 = arith.constant 0 : i32
    %c0_i32_1 = arith.constant 0 : i32
    return %c0_i32, %c0_i32_0 : i32, i32
  }
}

module attributes {stable_mosaic.version = 11 : i64} {
  func.func @_conv_gemm_kernel(%arg0: i32, %arg1: memref<200x576xf32, #tpu.memory_space<vmem>>, %arg2: memref<576x64xf32, #tpu.memory_space<vmem>>, %arg3: memref<1x64xf32, #tpu.memory_space<vmem>>, %arg4: memref<200x64xf32, #tpu.memory_space<vmem>>) attributes {dimension_semantics = [#tpu.dimension_semantics<arbitrary>], iteration_bounds = array<i64: 1>, scalar_prefetch = 0 : i64, scratch_operands = 0 : i64, tpu.core_type = #tpu.core_type<tc>, window_params = [{pipeline_mode = #tpu.pipeline_mode<synchronous>, transform_indices = @transform_0, window_bounds = array<i64: 200, 576>}, {pipeline_mode = #tpu.pipeline_mode<synchronous>, transform_indices = @transform_1, window_bounds = array<i64: 576, 64>}, {pipeline_mode = #tpu.pipeline_mode<synchronous>, transform_indices = @transform_2, window_bounds = array<i64: 1, 64>}, {pipeline_mode = #tpu.pipeline_mode<synchronous>, transform_indices = @transform_3, window_bounds = array<i64: 200, 64>}]} {
    %c0 = arith.constant 0 : index
    %c0_0 = arith.constant 0 : index
    %0 = vector.load %arg1[%c0, %c0_0] : memref<200x576xf32, #tpu.memory_space<vmem>>, vector<200x576xf32>
    %c0_1 = arith.constant 0 : index
    %c0_2 = arith.constant 0 : index
    %1 = vector.load %arg2[%c0_1, %c0_2] : memref<576x64xf32, #tpu.memory_space<vmem>>, vector<576x64xf32>
    %cst = arith.constant dense<0.000000e+00> : vector<200x64xf32>
    %2 = tpu.matmul %0, %1, %cst {dimension_numbers = #tpu.dot_dimension_numbers<[1], [0], [0], [1], [0, 0, 1, 1], [], []>} : vector<200x576xf32>, vector<576x64xf32>, vector<200x64xf32> -> vector<200x64xf32>
    %c0_3 = arith.constant 0 : index
    %c0_4 = arith.constant 0 : index
    %3 = vector.load %arg3[%c0_3, %c0_4] : memref<1x64xf32, #tpu.memory_space<vmem>>, vector<1x64xf32>
    %4 = vector.broadcast %3 : vector<1x64xf32> to vector<200x64xf32>
    %5 = arith.addf %2, %4 : vector<200x64xf32>
    %cst_5 = arith.constant 0.000000e+00 : f32
    %6 = vector.broadcast %cst_5 : f32 to vector<200x64xf32>
    %7 = arith.maximumf %5, %6 : vector<200x64xf32>
    %c0_6 = arith.constant 0 : index
    %c0_7 = arith.constant 0 : index
    %8 = vector.load %arg4[%c0_6, %c0_7] : memref<200x64xf32, #tpu.memory_space<vmem>>, vector<200x64xf32>
    tpu.vector_store %arg4[%c0_6, %c0_7], %7 {strides = array<i32>} : memref<200x64xf32, #tpu.memory_space<vmem>>, vector<200x64xf32>,
    return
  }
  func.func @transform_0(%arg0: i32) -> (i32, i32) {
    %c0_i32 = arith.constant 0 : i32
    %c0_i32_0 = arith.constant 0 : i32
    %c0_i32_1 = arith.constant 0 : i32
    return %c0_i32, %c0_i32_0 : i32, i32
  }
  func.func @transform_1(%arg0: i32) -> (i32, i32) {
    %c0_i32 = arith.constant 0 : i32
    %c0_i32_0 = arith.constant 0 : i32
    %c0_i32_1 = arith.constant 0 : i32
    return %c0_i32, %c0_i32_0 : i32, i32
  }
  func.func @transform_2(%arg0: i32) -> (i32, i32) {
    %c0_i32 = arith.constant 0 : i32
    %c0_i32_0 = arith.constant 0 : i32
    %c0_i32_1 = arith.constant 0 : i32
    return %c0_i32, %c0_i32_0 : i32, i32
  }
  func.func @transform_3(%arg0: i32) -> (i32, i32) {
    %c0_i32 = arith.constant 0 : i32
    %c0_i32_0 = arith.constant 0 : i32
    %c0_i32_1 = arith.constant 0 : i32
    return %c0_i32, %c0_i32_0 : i32, i32
  }
}

module attributes {stable_mosaic.version = 11 : i64} {
  func.func @_fc_fused_kernel(%arg0: i32, %arg1: memref<2x1280xf32, #tpu.memory_space<vmem>>, %arg2: memref<1280x512xf32, #tpu.memory_space<vmem>>, %arg3: memref<1x512xf32, #tpu.memory_space<vmem>>, %arg4: memref<512x128xf32, #tpu.memory_space<vmem>>, %arg5: memref<1x128xf32, #tpu.memory_space<vmem>>, %arg6: memref<2x128xf32, #tpu.memory_space<vmem>>, %arg7: memref<2x512xf32, #tpu.memory_space<vmem>>) attributes {dimension_semantics = [#tpu.dimension_semantics<arbitrary>], iteration_bounds = array<i64: 5>, scalar_prefetch = 0 : i64, scratch_operands = 1 : i64, tpu.core_type = #tpu.core_type<tc>, window_params = [{transform_indices = @transform_0, window_bounds = array<i64: 2, 1280>}, {transform_indices = @transform_1, window_bounds = array<i64: 1280, 512>}, {pipeline_mode = #tpu.pipeline_mode<synchronous>, transform_indices = @transform_2, window_bounds = array<i64: 1, 512>}, {pipeline_mode = #tpu.pipeline_mode<synchronous>, transform_indices = @transform_3, window_bounds = array<i64: 512, 128>}, {pipeline_mode = #tpu.pipeline_mode<synchronous>, transform_indices = @transform_4, window_bounds = array<i64: 1, 128>}, {pipeline_mode = #tpu.pipeline_mode<synchronous>, transform_indices = @transform_5, window_bounds = array<i64: 2, 128>}]} {
    %c0_i32 = arith.constant 0 : i32
    %0 = arith.cmpi eq, %arg0, %c0_i32 : i32
    %1 = arith.extui %0 : i1 to i32
    %c0_i32_0 = arith.constant 0 : i32
    %2 = arith.cmpi ne, %1, %c0_i32_0 : i32
    scf.if %2 {
      %cst_9 = arith.constant 0.000000e+00 : f32
      %12 = vector.broadcast %cst_9 : f32 to vector<2x512xf32>
      %c0_10 = arith.constant 0 : index
      %c0_11 = arith.constant 0 : index
      %13 = vector.load %arg7[%c0_10, %c0_11] : memref<2x512xf32, #tpu.memory_space<vmem>>, vector<2x512xf32>
      tpu.vector_store %arg7[%c0_10, %c0_11], %12 {strides = array<i32>} : memref<2x512xf32, #tpu.memory_space<vmem>>, vector<2x512xf32>,
    } else {
    }
    %c0 = arith.constant 0 : index
    %c0_1 = arith.constant 0 : index
    %3 = vector.load %arg7[%c0, %c0_1] : memref<2x512xf32, #tpu.memory_space<vmem>>, vector<2x512xf32>
    %c0_2 = arith.constant 0 : index
    %c0_3 = arith.constant 0 : index
    %4 = vector.load %arg1[%c0_2, %c0_3] : memref<2x1280xf32, #tpu.memory_space<vmem>>, vector<2x1280xf32>
    %c0_4 = arith.constant 0 : index
    %c0_5 = arith.constant 0 : index
    %5 = vector.load %arg2[%c0_4, %c0_5] : memref<1280x512xf32, #tpu.memory_space<vmem>>, vector<1280x512xf32>
    %cst = arith.constant dense<0.000000e+00> : vector<2x512xf32>
    %6 = tpu.matmul %4, %5, %cst {dimension_numbers = #tpu.dot_dimension_numbers<[1], [0], [0], [1], [0, 0, 1, 1], [], []>} : vector<2x1280xf32>, vector<1280x512xf32>, vector<2x512xf32> -> vector<2x512xf32>
    %7 = arith.addf %3, %6 : vector<2x512xf32>
    %c0_6 = arith.constant 0 : index
    %c0_7 = arith.constant 0 : index
    %8 = vector.load %arg7[%c0_6, %c0_7] : memref<2x512xf32, #tpu.memory_space<vmem>>, vector<2x512xf32>
    tpu.vector_store %arg7[%c0_6, %c0_7], %7 {strides = array<i32>} : memref<2x512xf32, #tpu.memory_space<vmem>>, vector<2x512xf32>,
    %c4_i32 = arith.constant 4 : i32
    %9 = arith.cmpi eq, %arg0, %c4_i32 : i32
    %10 = arith.extui %9 : i1 to i32
    %c0_i32_8 = arith.constant 0 : i32
    %11 = arith.cmpi ne, %10, %c0_i32_8 : i32
    scf.if %11 {
      %c0_9 = arith.constant 0 : index
      %c0_10 = arith.constant 0 : index
      %12 = vector.load %arg7[%c0_9, %c0_10] : memref<2x512xf32, #tpu.memory_space<vmem>>, vector<2x512xf32>
      %c0_11 = arith.constant 0 : index
      %c0_12 = arith.constant 0 : index
      %13 = vector.load %arg3[%c0_11, %c0_12] : memref<1x512xf32, #tpu.memory_space<vmem>>, vector<1x512xf32>
      %14 = vector.broadcast %13 : vector<1x512xf32> to vector<2x512xf32>
      %15 = arith.addf %12, %14 : vector<2x512xf32>
      %cst_13 = arith.constant 0.000000e+00 : f32
      %16 = vector.broadcast %cst_13 : f32 to vector<2x512xf32>
      %17 = arith.maximumf %15, %16 : vector<2x512xf32>
      %c0_14 = arith.constant 0 : index
      %c0_15 = arith.constant 0 : index
      %18 = vector.load %arg4[%c0_14, %c0_15] : memref<512x128xf32, #tpu.memory_space<vmem>>, vector<512x128xf32>
      %cst_16 = arith.constant dense<0.000000e+00> : vector<2x128xf32>
      %19 = tpu.matmul %17, %18, %cst_16 {dimension_numbers = #tpu.dot_dimension_numbers<[1], [0], [0], [1], [0, 0, 1, 1], [], []>} : vector<2x512xf32>, vector<512x128xf32>, vector<2x128xf32> -> vector<2x128xf32>
      %c0_17 = arith.constant 0 : index
      %c0_18 = arith.constant 0 : index
      %20 = vector.load %arg5[%c0_17, %c0_18] : memref<1x128xf32, #tpu.memory_space<vmem>>, vector<1x128xf32>
      %21 = vector.broadcast %20 : vector<1x128xf32> to vector<2x128xf32>
      %22 = arith.addf %19, %21 : vector<2x128xf32>
      %c0_19 = arith.constant 0 : index
      %c0_20 = arith.constant 0 : index
      %23 = vector.load %arg6[%c0_19, %c0_20] : memref<2x128xf32, #tpu.memory_space<vmem>>, vector<2x128xf32>
      tpu.vector_store %arg6[%c0_19, %c0_20], %22 {strides = array<i32>} : memref<2x128xf32, #tpu.memory_space<vmem>>, vector<2x128xf32>,
    } else {
    }
    return
  }
  func.func @transform_0(%arg0: i32) -> (i32, i32) {
    %c0_i32 = arith.constant 0 : i32
    %c0_i32_0 = arith.constant 0 : i32
    return %c0_i32, %arg0 : i32, i32
  }
  func.func @transform_1(%arg0: i32) -> (i32, i32) {
    %c0_i32 = arith.constant 0 : i32
    %c0_i32_0 = arith.constant 0 : i32
    return %arg0, %c0_i32 : i32, i32
  }
  func.func @transform_2(%arg0: i32) -> (i32, i32) {
    %c0_i32 = arith.constant 0 : i32
    %c0_i32_0 = arith.constant 0 : i32
    %c0_i32_1 = arith.constant 0 : i32
    return %c0_i32, %c0_i32_0 : i32, i32
  }
  func.func @transform_3(%arg0: i32) -> (i32, i32) {
    %c0_i32 = arith.constant 0 : i32
    %c0_i32_0 = arith.constant 0 : i32
    %c0_i32_1 = arith.constant 0 : i32
    return %c0_i32, %c0_i32_0 : i32, i32
  }
  func.func @transform_4(%arg0: i32) -> (i32, i32) {
    %c0_i32 = arith.constant 0 : i32
    %c0_i32_0 = arith.constant 0 : i32
    %c0_i32_1 = arith.constant 0 : i32
    return %c0_i32, %c0_i32_0 : i32, i32
  }
  func.func @transform_5(%arg0: i32) -> (i32, i32) {
    %c0_i32 = arith.constant 0 : i32
    %c0_i32_0 = arith.constant 0 : i32
    %c0_i32_1 = arith.constant 0 : i32
    return %c0_i32, %c0_i32_0 : i32, i32
  }
}

</mosaic_0001>

<bundles_post_ra>
// kernel: flappy_bird_forward.4
= control target key start
LH: loop header
LB: loop body
LE: loop exit
PB: predicated region body
PF: predicated region fallthrough
CT: control target
= control target key end

     0   :  { %v1105_v0 = vmov 0.0|0.0   ;;  %vm918_vm0 = vcmask 261120   ;;  %s2359_s1 = inlined_call_operand.vmem [shape: f32[256,32], index: 1, kind: input, shape index: {}]   ;;  %s2360_s0 = inlined_call_operand.vmem [shape: f32[800,256], index: 0, kind: input, shape index: {}]   ;;  %s2361_s2 = inlined_call_operand.vmem [shape: f32[1,32], index: 2, kind: input, shape index: {}]   ;;  %s2362_s3 = inlined_call_operand.vmem [shape: f32[800,32], index: 3, kind: output, shape index: {}]  }
   0x1   :  { %1024 = vmatprep.subr.bf16.mxu0 %v1105_v0  ;;  %1072 = vmatprep.subr.bf16.mxu1 %v1105_v0  ;;  %v214_v1 = vld [vmem:[%s2359_s1] sm:$0xff]  ;;  %v215_v2 = vld [vmem:[%s2359_s1 + $0x8] sm:$0xff]  ;;  %v216_v3 = vld [vmem:[%s2359_s1 + $0x10] sm:$0xff] }
   0x2   :  { %v1025_v4 = vpack.c.bf16 %v215_v2, %v214_v1  ;;  %v217_v5 = vld [vmem:[%s2359_s1 + $0x18] sm:$0xff]  ;;  %v218_v7 = vld [vmem:[%s2359_s1 + $0x20] sm:$0xff]  ;;  %v219_v8 = vld [vmem:[%s2359_s1 + $0x28] sm:$0xff] }
   0x3   :  { %v1028_v6 = vpack.c.bf16 %v217_v5, %v216_v3  ;;  %v1031_v9 = vpack.c.bf16 %v219_v8, %v218_v7  ;;  %v220_v10 = vld [vmem:[%s2359_s1 + $0x30] sm:$0xff]  ;;  %v221_v11 = vld [vmem:[%s2359_s1 + $0x38] sm:$0xff]  ;;  %v15_v12 = vld [vmem:[%s2360_s0 + $0x8] sm:$0xff] }
   0x4   :  { %1026 = vmatpush1.bf16.msra.mxu0 %v1025_v4  ;;  %1088 = vmatpush1.bf16.msra.mxu1 %v1025_v4  ;;  %v1034_v13 = vpack.c.bf16 %v221_v11, %v220_v10  ;;  %v115_v14 = vld [vmem:[%s2360_s0 + $0x328] sm:$0xff]  ;;  %v222_v15 = vld [vmem:[%s2359_s1 + $0x40] sm:$0xff]  ;;  %v224_v18 = vld [vmem:[%s2359_s1 + $0x50] sm:$0xff] }
   0x5   :  { %1027 = vmatprep.subr.bf16.mxu0 %v1105_v0  ;;  %1073 = vmatprep.subr.bf16.mxu1 %v1105_v0  ;;  %v223_v16 = vld [vmem:[%s2359_s1 + $0x48] sm:$0xff]  ;;  %v225_v19 = vld [vmem:[%s2359_s1 + $0x58] sm:$0xff]  ;;  %v226_v21 = vld [vmem:[%s2359_s1 + $0x60] sm:$0xff] }
   0x6   :  { %317 = vmatprep.mubr.f32.mxu0 %v15_v12  ;;  %567 = vmatprep.mubr.f32.mxu1 %v115_v14  ;;  %v1037_v17 = vpack.c.bf16 %v223_v16, %v222_v15  ;;  %v1040_v20 = vpack.c.bf16 %v225_v19, %v224_v18  ;;  %v227_v22 = vld [vmem:[%s2359_s1 + $0x68] sm:$0xff]  ;;  %v228_v24 = vld [vmem:[%s2359_s1 + $0x70] sm:$0xff]  ;;  %v229_v25 = vld [vmem:[%s2359_s1 + $0x78] sm:$0xff] }
   0x7   :  { %v1043_v23 = vpack.c.bf16 %v227_v22, %v226_v21  ;;  %v1046_v26 = vpack.c.bf16 %v229_v25, %v228_v24  ;;  %v230_v27 = vld [vmem:[%s2359_s1 + $0x80] sm:$0xff]  ;;  %v231_v28 = vld [vmem:[%s2359_s1 + $0x88] sm:$0xff]  ;;  %v232_v30 = vld [vmem:[%s2359_s1 + $0x90] sm:$0xff] }
   0x8   :  { %1029 = vmatpush1.bf16.msra.mxu0 %v1028_v6  ;;  %1089 = vmatpush1.bf16.msra.mxu1 %v1028_v6  ;;  %v1049_v29 = vpack.c.bf16 %v231_v28, %v230_v27  ;;  %v233_v31 = vld [vmem:[%s2359_s1 + $0x98] sm:$0xff]  ;;  %v234_v33 = vld [vmem:[%s2359_s1 + $0xa0] sm:$0xff]  ;;  %v235_v34 = vld [vmem:[%s2359_s1 + $0xa8] sm:$0xff] }
   0x9   :  { %1030 = vmatprep.subr.bf16.mxu0 %v1105_v0  ;;  %1074 = vmatprep.subr.bf16.mxu1 %v1105_v0  ;;  %v1052_v32 = vpack.c.bf16 %v233_v31, %v232_v30  ;;  %v1055_v35 = vpack.c.bf16 %v235_v34, %v234_v33  ;;  %v236_v36 = vld [vmem:[%s2359_s1 + $0xb0] sm:$0xff]  ;;  %v237_v37 = vld [vmem:[%s2359_s1 + $0xb8] sm:$0xff]  ;;  %v238_v39 = vld [vmem:[%s2359_s1 + $0xc0] sm:$0xff] }
   0xa   :  { %v1058_v38 = vpack.c.bf16 %v237_v37, %v236_v36  ;;  %v239_v40 = vld [vmem:[%s2359_s1 + $0xc8] sm:$0xff]  ;;  %v240_v42 = vld [vmem:[%s2359_s1 + $0xd0] sm:$0xff]  ;;  %v241_v43 = vld [vmem:[%s2359_s1 + $0xd8] sm:$0xff] }
   0xb   :  { %v1061_v41 = vpack.c.bf16 %v239_v40, %v238_v39  ;;  %v1064_v44 = vpack.c.bf16 %v241_v43, %v240_v42  ;;  %v242_v45 = vld [vmem:[%s2359_s1 + $0xe0] sm:$0xff]  ;;  %v243_v46 = vld [vmem:[%s2359_s1 + $0xe8] sm:$0xff]  ;;  %v244_v48 = vld [vmem:[%s2359_s1 + $0xf0] sm:$0xff] }
   0xc   :  { %1032 = vmatpush1.bf16.msra.mxu0 %v1031_v9  ;;  %1090 = vmatpush1.bf16.msra.mxu1 %v1031_v9  ;;  %v1067_v47 = vpack.c.bf16 %v243_v46, %v242_v45  ;;  %v245_v49 = vld [vmem:[%s2359_s1 + $0xf8] sm:$0xff]  ;;  %v14_v51 = vld [vmem:[%s2360_s0] sm:$0xff]  ;;  %v16_v55 = vld [vmem:[%s2360_s0 + $0x10] sm:$0xff] }
   0xd   :  { %1033 = vmatprep.subr.bf16.mxu0 %v1105_v0  ;;  %1075 = vmatprep.subr.bf16.mxu1 %v1105_v0  ;;  %v1070_v50 = vpack.c.bf16 %v245_v49, %v244_v48  ;;  %v114_v52 = vld [vmem:[%s2360_s0 + $0x320] sm:$0xff]  ;;  %v17_v53 = vld [vmem:[%s2360_s0 + $0x18] sm:$0xff]  ;;  %v116_v56 = vld [vmem:[%s2360_s0 + $0x330] sm:$0xff] }
   0xe   :  { %v117_v54 = vld [vmem:[%s2360_s0 + $0x338] sm:$0xff]  ;;  %v19_v57 = vld [vmem:[%s2360_s0 + $0x28] sm:$0xff]  ;;  %v18_v59 = vld [vmem:[%s2360_s0 + $0x20] sm:$0xff] }
   0xf   :  { %v119_v58 = vld [vmem:[%s2360_s0 + $0x348] sm:$0xff]  ;;  %v118_v60 = vld [vmem:[%s2360_s0 + $0x340] sm:$0xff]  ;;  %v21_v61 = vld [vmem:[%s2360_s0 + $0x38] sm:$0xff] }
  0x10   :  { %1035 = vmatpush1.bf16.msra.mxu0 %v1034_v13  ;;  %1091 = vmatpush1.bf16.msra.mxu1 %v1034_v13  ;;  %v121_v62 = vld [vmem:[%s2360_s0 + $0x358] sm:$0xff]  ;;  %v20_v63 = vld [vmem:[%s2360_s0 + $0x30] sm:$0xff]  ;;  %v23_v1 = vld [vmem:[%s2360_s0 + $0x48] sm:$0xff] }
  0x11   :  { %1036 = vmatprep.subr.bf16.mxu0 %v1105_v0  ;;  %1076 = vmatprep.subr.bf16.mxu1 %v1105_v0  ;;  %v123_v2 = vld [vmem:[%s2360_s0 + $0x368] sm:$0xff]  ;;  %v22_v3 = vld [vmem:[%s2360_s0 + $0x40] sm:$0xff]  ;;  %v25_v5 = vld [vmem:[%s2360_s0 + $0x58] sm:$0xff] }
  0x12   :  { %v122_v4 = vld [vmem:[%s2360_s0 + $0x360] sm:$0xff]  ;;  %v125_v6 = vld [vmem:[%s2360_s0 + $0x378] sm:$0xff]  ;;  %v24_v7 = vld [vmem:[%s2360_s0 + $0x50] sm:$0xff] }
  0x13   :  { %v124_v8 = vld [vmem:[%s2360_s0 + $0x370] sm:$0xff]  ;;  %v27_v9 = vld [vmem:[%s2360_s0 + $0x68] sm:$0xff]  ;;  %v26_v11 = vld [vmem:[%s2360_s0 + $0x60] sm:$0xff] }
  0x14   :  { %1038 = vmatpush1.bf16.msra.mxu0 %v1037_v17  ;;  %1092 = vmatpush1.bf16.msra.mxu1 %v1037_v17  ;;  %v127_v10 = vld [vmem:[%s2360_s0 + $0x388] sm:$0xff]  ;;  %v126_v12 = vld [vmem:[%s2360_s0 + $0x380] sm:$0xff]  ;;  %v29_v13 = vld [vmem:[%s2360_s0 + $0x78] sm:$0xff] }
  0x15   :  { %1039 = vmatprep.subr.bf16.mxu0 %v1105_v0  ;;  %1077 = vmatprep.subr.bf16.mxu1 %v1105_v0  ;;  %v129_v14 = vld [vmem:[%s2360_s0 + $0x398] sm:$0xff]  ;;  %v28_v15 = vld [vmem:[%s2360_s0 + $0x70] sm:$0xff]  ;;  %v31_v17 = vld [vmem:[%s2360_s0 + $0x88] sm:$0xff] }
  0x16   :  { %v128_v16 = vld [vmem:[%s2360_s0 + $0x390] sm:$0xff]  ;;  %v131_v18 = vld [vmem:[%s2360_s0 + $0x3a8] sm:$0xff]  ;;  %v30_v19 = vld [vmem:[%s2360_s0 + $0x80] sm:$0xff] }
  0x17   :  { %v33_v21 = vld [vmem:[%s2360_s0 + $0x98] sm:$0xff]  ;;  %v132_v24 = vld [vmem:[%s2360_s0 + $0x3b0] sm:$0xff]  ;;  %v35_v25 = vld [vmem:[%s2360_s0 + $0xa8] sm:$0xff] }
  0x18   :  { %1041 = vmatpush1.bf16.msra.mxu0 %v1040_v20  ;;  %1093 = vmatpush1.bf16.msra.mxu1 %v1040_v20  ;;  %v130_v20 = vld [vmem:[%s2360_s0 + $0x3a0] sm:$0xff]  ;;  %v133_v22 = vld [vmem:[%s2360_s0 + $0x3b8] sm:$0xff]  ;;  %v36_v31 = vld [vmem:[%s2360_s0 + $0xb0] sm:$0xff] }
  0x19   :  { %1042 = vmatprep.subr.bf16.mxu0 %v1105_v0  ;;  %1078 = vmatprep.subr.bf16.mxu1 %v1105_v0  ;;  %v34_v27 = vld [vmem:[%s2360_s0 + $0xa0] sm:$0xff]  ;;  %v137_v30 = vld [vmem:[%s2360_s0 + $0x3d8] sm:$0xff]  ;;  %v39_v33 = vld [vmem:[%s2360_s0 + $0xc8] sm:$0xff] }
  0x1a   :  { %v134_v28 = vld [vmem:[%s2360_s0 + $0x3c0] sm:$0xff]  ;;  %v139_v34 = vld [vmem:[%s2360_s0 + $0x3e8] sm:$0xff]  ;;  %v41_v37 = vld [vmem:[%s2360_s0 + $0xd8] sm:$0xff] }
  0x1b   :  { %v138_v36 = vld [vmem:[%s2360_s0 + $0x3e0] sm:$0xff]  ;;  %v40_v39 = vld [vmem:[%s2360_s0 + $0xd0] sm:$0xff]  ;;  %v143_v42 = vld [vmem:[%s2360_s0 + $0x408] sm:$0xff] }
  0x1c   :  { %1044 = vmatpush1.bf16.msra.mxu0 %v1043_v23  ;;  %1094 = vmatpush1.bf16.msra.mxu1 %v1043_v23  ;;  %v32_v23 = vld [vmem:[%s2360_s0 + $0x90] sm:$0xff]  ;;  %v42_v43 = vld [vmem:[%s2360_s0 + $0xe0] sm:$0xff]  ;;  %v45_v45 = vld [vmem:[%s2360_s0 + $0xf8] sm:$0xff] }
  0x1d   :  { %1045 = vmatprep.subr.bf16.mxu0 %v1105_v0  ;;  %1079 = vmatprep.subr.bf16.mxu1 %v1105_v0  ;;  %v140_v40 = vld [vmem:[%s2360_s0 + $0x3f0] sm:$0xff]  ;;  %v145_v46 = vld [vmem:[%s2360_s0 + $0x418] sm:$0xff]  ;;  %v47_v49 = vld [vmem:[%s2360_s0 + $0x108] sm:$0xff] }
  0x1e   :  { %v144_v48 = vld [vmem:[%s2360_s0 + $0x410] sm:$0xff] }
  0x20   :  { %1047 = vmatpush1.bf16.msra.mxu0 %v1046_v26  ;;  %1095 = vmatpush1.bf16.msra.mxu1 %v1046_v26  ;;  %v135_v26 = vld [vmem:[%s2360_s0 + $0x3c8] sm:$0xff] }
  0x21   :  { %1048 = vmatprep.subr.bf16.mxu0 %v1105_v0  ;;  %1080 = vmatprep.subr.bf16.mxu1 %v1105_v0 }
  0x24   :  { %1050 = vmatpush1.bf16.msra.mxu0 %v1049_v29  ;;  %1096 = vmatpush1.bf16.msra.mxu1 %v1049_v29  ;;  %v37_v29 = vld [vmem:[%s2360_s0 + $0xb8] sm:$0xff] }
  0x25   :  { %1051 = vmatprep.subr.bf16.mxu0 %v1105_v0  ;;  %1081 = vmatprep.subr.bf16.mxu1 %v1105_v0 }
  0x28   :  { %1053 = vmatpush1.bf16.msra.mxu0 %v1052_v32  ;;  %1097 = vmatpush1.bf16.msra.mxu1 %v1052_v32  ;;  %v136_v32 = vld [vmem:[%s2360_s0 + $0x3d0] sm:$0xff] }
  0x29   :  { %1054 = vmatprep.subr.bf16.mxu0 %v1105_v0  ;;  %1082 = vmatprep.subr.bf16.mxu1 %v1105_v0 }
  0x2c   :  { %1056 = vmatpush1.bf16.msra.mxu0 %v1055_v35  ;;  %1098 = vmatpush1.bf16.msra.mxu1 %v1055_v35  ;;  %v38_v35 = vld [vmem:[%s2360_s0 + $0xc0] sm:$0xff] }
  0x2d   :  { %1057 = vmatprep.subr.bf16.mxu0 %v1105_v0  ;;  %1083 = vmatprep.subr.bf16.mxu1 %v1105_v0 }
  0x30   :  { %1059 = vmatpush1.bf16.msra.mxu0 %v1058_v38  ;;  %1099 = vmatpush1.bf16.msra.mxu1 %v1058_v38  ;;  %v141_v38 = vld [vmem:[%s2360_s0 + $0x3f8] sm:$0xff] }
  0x31   :  { %1060 = vmatprep.subr.bf16.mxu0 %v1105_v0  ;;  %1084 = vmatprep.subr.bf16.mxu1 %v1105_v0 }
  0x34   :  { %1062 = vmatpush1.bf16.msra.mxu0 %v1061_v41  ;;  %1100 = vmatpush1.bf16.msra.mxu1 %v1061_v41  ;;  %v43_v41 = vld [vmem:[%s2360_s0 + $0xe8] sm:$0xff] }
  0x35   :  { %1063 = vmatprep.subr.bf16.mxu0 %v1105_v0  ;;  %1085 = vmatprep.subr.bf16.mxu1 %v1105_v0 }
  0x38   :  { %1065 = vmatpush1.bf16.msra.mxu0 %v1064_v44  ;;  %1101 = vmatpush1.bf16.msra.mxu1 %v1064_v44  ;;  %v142_v44 = vld [vmem:[%s2360_s0 + $0x400] sm:$0xff] }
  0x39   :  { %1066 = vmatprep.subr.bf16.mxu0 %v1105_v0  ;;  %1086 = vmatprep.subr.bf16.mxu1 %v1105_v0 }
  0x3c   :  { %1068 = vmatpush1.bf16.msra.mxu0 %v1067_v47  ;;  %1102 = vmatpush1.bf16.msra.mxu1 %v1067_v47  ;;  %v44_v47 = vld [vmem:[%s2360_s0 + $0xf0] sm:$0xff] }
  0x3d   :  { %1069 = vmatprep.subr.bf16.mxu0 %v1105_v0  ;;  %1087 = vmatprep.subr.bf16.mxu1 %v1105_v0  ;;  %v120_v0 = vld [vmem:[%s2360_s0 + $0x350] sm:$0xff] }
  0x40   :  { %1071 = vmatpush1.bf16.msra.mxu0 %v1070_v50  ;;  %1103 = vmatpush1.bf16.msra.mxu1 %v1070_v50  ;;  %v147_v50 = vld [vmem:[%s2360_s0 + $0x428] sm:$0xff] }
  0x43   :  { %318 = vmatmul.mubr.f32.vlgmr.msra.gmra.mrb[0].mxu0 %v14_v51  ;;  %568 = vmatmul.mubr.f32.vlgmr.msra.gmra.mrb[0].mxu1 %v114_v52  ;;  %v46_v51 = vld [vmem:[%s2360_s0 + $0x100] sm:$0xff] }
  0x44   :  { %322 = vmatprep.mubr.f32.mxu0 %v17_v53  ;;  %572 = vmatprep.mubr.f32.mxu1 %v117_v54  ;;  %v146_v52 = vld [vmem:[%s2360_s0 + $0x420] sm:$0xff]  ;;  %v49_v53 = vld [vmem:[%s2360_s0 + $0x118] sm:$0xff] }
  0x45   :  { %v149_v54 = vld [vmem:[%s2360_s0 + $0x438] sm:$0xff] }
  0x47   :  { %323 = vmatmul.mubr.f32.gmra.mrb[2].mxu0 %v16_v55  ;;  %573 = vmatmul.mubr.f32.gmra.mrb[2].mxu1 %v116_v56  ;;  %v48_v55 = vld [vmem:[%s2360_s0 + $0x110] sm:$0xff] }
  0x48   :  { %327 = vmatprep.mubr.f32.mxu0 %v19_v57  ;;  %577 = vmatprep.mubr.f32.mxu1 %v119_v58  ;;  %v148_v56 = vld [vmem:[%s2360_s0 + $0x430] sm:$0xff]  ;;  %v51_v57 = vld [vmem:[%s2360_s0 + $0x128] sm:$0xff] }
  0x49   :  { %v151_v58 = vld [vmem:[%s2360_s0 + $0x448] sm:$0xff] }
  0x4b   :  { %328 = vmatmul.mubr.f32.gmra.mrb[4].mxu0 %v18_v59  ;;  %578 = vmatmul.mubr.f32.gmra.mrb[4].mxu1 %v118_v60  ;;  %v50_v59 = vld [vmem:[%s2360_s0 + $0x120] sm:$0xff] }
  0x4c   :  { %332 = vmatprep.mubr.f32.mxu0 %v21_v61  ;;  %582 = vmatprep.mubr.f32.mxu1 %v121_v62  ;;  %v150_v60 = vld [vmem:[%s2360_s0 + $0x440] sm:$0xff]  ;;  %v53_v61 = vld [vmem:[%s2360_s0 + $0x138] sm:$0xff] }
  0x4d   :  { %v153_v62 = vld [vmem:[%s2360_s0 + $0x458] sm:$0xff] }
  0x4f   :  { %333 = vmatmul.mubr.f32.gmra.mrb[6].mxu0 %v20_v63  ;;  %583 = vmatmul.mubr.f32.gmra.mrb[6].mxu1 %v120_v0  ;;  %v52_v63 = vld [vmem:[%s2360_s0 + $0x130] sm:$0xff] }
  0x50   :  { %337 = vmatprep.mubr.f32.mxu0 %v23_v1  ;;  %587 = vmatprep.mubr.f32.mxu1 %v123_v2  ;;  %v152_v0 = vld [vmem:[%s2360_s0 + $0x450] sm:$0xff]  ;;  %v55_v1 = vld [vmem:[%s2360_s0 + $0x148] sm:$0xff] }
  0x51   :  { %v155_v2 = vld [vmem:[%s2360_s0 + $0x468] sm:$0xff] }
  0x53   :  { %338 = vmatmul.mubr.f32.gmra.mrb[8].mxu0 %v22_v3  ;;  %588 = vmatmul.mubr.f32.gmra.mrb[8].mxu1 %v122_v4  ;;  %v54_v3 = vld [vmem:[%s2360_s0 + $0x140] sm:$0xff] }
  0x54   :  { %342 = vmatprep.mubr.f32.mxu0 %v25_v5  ;;  %592 = vmatprep.mubr.f32.mxu1 %v125_v6  ;;  %v154_v4 = vld [vmem:[%s2360_s0 + $0x460] sm:$0xff]  ;;  %v57_v5 = vld [vmem:[%s2360_s0 + $0x158] sm:$0xff] }
  0x55   :  { %v157_v6 = vld [vmem:[%s2360_s0 + $0x478] sm:$0xff] }
  0x57   :  { %343 = vmatmul.mubr.f32.gmra.mrb[10].mxu0 %v24_v7  ;;  %593 = vmatmul.mubr.f32.gmra.mrb[10].mxu1 %v124_v8  ;;  %v56_v7 = vld [vmem:[%s2360_s0 + $0x150] sm:$0xff] }
  0x58   :  { %347 = vmatprep.mubr.f32.mxu0 %v27_v9  ;;  %597 = vmatprep.mubr.f32.mxu1 %v127_v10  ;;  %v156_v8 = vld [vmem:[%s2360_s0 + $0x470] sm:$0xff]  ;;  %v59_v9 = vld [vmem:[%s2360_s0 + $0x168] sm:$0xff] }
  0x59   :  { %v159_v10 = vld [vmem:[%s2360_s0 + $0x488] sm:$0xff] }
  0x5b   :  { %348 = vmatmul.mubr.f32.gmra.mrb[12].mxu0 %v26_v11  ;;  %598 = vmatmul.mubr.f32.gmra.mrb[12].mxu1 %v126_v12  ;;  %v58_v11 = vld [vmem:[%s2360_s0 + $0x160] sm:$0xff] }
  0x5c   :  { %352 = vmatprep.mubr.f32.mxu0 %v29_v13  ;;  %602 = vmatprep.mubr.f32.mxu1 %v129_v14  ;;  %v158_v12 = vld [vmem:[%s2360_s0 + $0x480] sm:$0xff]  ;;  %v61_v13 = vld [vmem:[%s2360_s0 + $0x178] sm:$0xff] }
  0x5d   :  { %v161_v14 = vld [vmem:[%s2360_s0 + $0x498] sm:$0xff] }
  0x5f   :  { %353 = vmatmul.mubr.f32.gmra.mrb[14].mxu0 %v28_v15  ;;  %603 = vmatmul.mubr.f32.gmra.mrb[14].mxu1 %v128_v16  ;;  %v60_v15 = vld [vmem:[%s2360_s0 + $0x170] sm:$0xff] }
  0x60   :  { %357 = vmatprep.mubr.f32.mxu0 %v31_v17  ;;  %607 = vmatprep.mubr.f32.mxu1 %v131_v18  ;;  %v160_v16 = vld [vmem:[%s2360_s0 + $0x490] sm:$0xff]  ;;  %v63_v17 = vld [vmem:[%s2360_s0 + $0x188] sm:$0xff] }
  0x61   :  { %v163_v18 = vld [vmem:[%s2360_s0 + $0x4a8] sm:$0xff] }
  0x63   :  { %358 = vmatmul.mubr.f32.gmra.mrb[16].mxu0 %v30_v19  ;;  %608 = vmatmul.mubr.f32.gmra.mrb[16].mxu1 %v130_v20  ;;  %v62_v19 = vld [vmem:[%s2360_s0 + $0x180] sm:$0xff] }
  0x64   :  { %362 = vmatprep.mubr.f32.mxu0 %v33_v21  ;;  %612 = vmatprep.mubr.f32.mxu1 %v133_v22  ;;  %v162_v20 = vld [vmem:[%s2360_s0 + $0x4a0] sm:$0xff]  ;;  %v65_v21 = vld [vmem:[%s2360_s0 + $0x198] sm:$0xff] }
  0x65   :  { %v165_v22 = vld [vmem:[%s2360_s0 + $0x4b8] sm:$0xff] }
  0x67   :  { %363 = vmatmul.mubr.f32.gmra.mrb[18].mxu0 %v32_v23  ;;  %613 = vmatmul.mubr.f32.gmra.mrb[18].mxu1 %v132_v24  ;;  %v64_v23 = vld [vmem:[%s2360_s0 + $0x190] sm:$0xff] }
  0x68   :  { %367 = vmatprep.mubr.f32.mxu0 %v35_v25  ;;  %617 = vmatprep.mubr.f32.mxu1 %v135_v26  ;;  %v164_v24 = vld [vmem:[%s2360_s0 + $0x4b0] sm:$0xff]  ;;  %v67_v25 = vld [vmem:[%s2360_s0 + $0x1a8] sm:$0xff] }
  0x69   :  { %v167_v26 = vld [vmem:[%s2360_s0 + $0x4c8] sm:$0xff] }
  0x6b   :  { %368 = vmatmul.mubr.f32.gmra.mrb[20].mxu0 %v34_v27  ;;  %618 = vmatmul.mubr.f32.gmra.mrb[20].mxu1 %v134_v28  ;;  %v66_v27 = vld [vmem:[%s2360_s0 + $0x1a0] sm:$0xff] }
  0x6c   :  { %372 = vmatprep.mubr.f32.mxu0 %v37_v29  ;;  %622 = vmatprep.mubr.f32.mxu1 %v137_v30  ;;  %v166_v28 = vld [vmem:[%s2360_s0 + $0x4c0] sm:$0xff]  ;;  %v69_v29 = vld [vmem:[%s2360_s0 + $0x1b8] sm:$0xff] }
  0x6d   :  { %v169_v30 = vld [vmem:[%s2360_s0 + $0x4d8] sm:$0xff] }
  0x6f   :  { %373 = vmatmul.mubr.f32.gmra.mrb[22].mxu0 %v36_v31  ;;  %623 = vmatmul.mubr.f32.gmra.mrb[22].mxu1 %v136_v32  ;;  %v68_v31 = vld [vmem:[%s2360_s0 + $0x1b0] sm:$0xff] }
  0x70   :  { %377 = vmatprep.mubr.f32.mxu0 %v39_v33  ;;  %627 = vmatprep.mubr.f32.mxu1 %v139_v34  ;;  %v168_v32 = vld [vmem:[%s2360_s0 + $0x4d0] sm:$0xff]  ;;  %v71_v33 = vld [vmem:[%s2360_s0 + $0x1c8] sm:$0xff] }
  0x71   :  { %v171_v34 = vld [vmem:[%s2360_s0 + $0x4e8] sm:$0xff] }
  0x73   :  { %378 = vmatmul.mubr.f32.gmra.mrb[24].mxu0 %v38_v35  ;;  %628 = vmatmul.mubr.f32.gmra.mrb[24].mxu1 %v138_v36  ;;  %v70_v35 = vld [vmem:[%s2360_s0 + $0x1c0] sm:$0xff] }
  0x74   :  { %382 = vmatprep.mubr.f32.mxu0 %v41_v37  ;;  %632 = vmatprep.mubr.f32.mxu1 %v141_v38  ;;  %v170_v36 = vld [vmem:[%s2360_s0 + $0x4e0] sm:$0xff]  ;;  %v73_v37 = vld [vmem:[%s2360_s0 + $0x1d8] sm:$0xff] }
  0x75   :  { %v173_v38 = vld [vmem:[%s2360_s0 + $0x4f8] sm:$0xff] }
  0x77   :  { %383 = vmatmul.mubr.f32.gmra.mrb[26].mxu0 %v40_v39  ;;  %633 = vmatmul.mubr.f32.gmra.mrb[26].mxu1 %v140_v40  ;;  %v72_v39 = vld [vmem:[%s2360_s0 + $0x1d0] sm:$0xff] }
  0x78   :  { %387 = vmatprep.mubr.f32.mxu0 %v43_v41  ;;  %637 = vmatprep.mubr.f32.mxu1 %v143_v42  ;;  %v172_v40 = vld [vmem:[%s2360_s0 + $0x4f0] sm:$0xff]  ;;  %v75_v41 = vld [vmem:[%s2360_s0 + $0x1e8] sm:$0xff] }
  0x79   :  { %v175_v42 = vld [vmem:[%s2360_s0 + $0x508] sm:$0xff] }
  0x7b   :  { %388 = vmatmul.mubr.f32.gmra.mrb[28].mxu0 %v42_v43  ;;  %638 = vmatmul.mubr.f32.gmra.mrb[28].mxu1 %v142_v44  ;;  %v74_v43 = vld [vmem:[%s2360_s0 + $0x1e0] sm:$0xff] }
  0x7c   :  { %392 = vmatprep.mubr.f32.mxu0 %v45_v45  ;;  %642 = vmatprep.mubr.f32.mxu1 %v145_v46  ;;  %v174_v44 = vld [vmem:[%s2360_s0 + $0x500] sm:$0xff]  ;;  %v77_v45 = vld [vmem:[%s2360_s0 + $0x1f8] sm:$0xff] }
  0x7d   :  { %v177_v46 = vld [vmem:[%s2360_s0 + $0x518] sm:$0xff] }
  0x7f   :  { %393 = vmatmul.mubr.f32.gmra.mrb[30].mxu0 %v44_v47  ;;  %643 = vmatmul.mubr.f32.gmra.mrb[30].mxu1 %v144_v48  ;;  %v76_v47 = vld [vmem:[%s2360_s0 + $0x1f0] sm:$0xff] }
  0x80   :  { %397 = vmatprep.mubr.f32.mxu0 %v47_v49  ;;  %647 = vmatprep.mubr.f32.mxu1 %v147_v50  ;;  %v176_v48 = vld [vmem:[%s2360_s0 + $0x510] sm:$0xff]  ;;  %v79_v49 = vld [vmem:[%s2360_s0 + $0x208] sm:$0xff] }
  0x81   :  { %v179_v50 = vld [vmem:[%s2360_s0 + $0x528] sm:$0xff] }
  0x83   :  { %398 = vmatmul.mubr.f32.gmra.mrb[32].mxu0 %v46_v51  ;;  %648 = vmatmul.mubr.f32.gmra.mrb[32].mxu1 %v146_v52  ;;  %v78_v51 = vld [vmem:[%s2360_s0 + $0x200] sm:$0xff] }
  0x84   :  { %402 = vmatprep.mubr.f32.mxu0 %v49_v53  ;;  %652 = vmatprep.mubr.f32.mxu1 %v149_v54  ;;  %v178_v52 = vld [vmem:[%s2360_s0 + $0x520] sm:$0xff]  ;;  %v81_v53 = vld [vmem:[%s2360_s0 + $0x218] sm:$0xff] }
  0x85   :  { %v181_v54 = vld [vmem:[%s2360_s0 + $0x538] sm:$0xff] }
  0x87   :  { %403 = vmatmul.mubr.f32.gmra.mrb[34].mxu0 %v48_v55  ;;  %653 = vmatmul.mubr.f32.gmra.mrb[34].mxu1 %v148_v56  ;;  %v80_v55 = vld [vmem:[%s2360_s0 + $0x210] sm:$0xff] }
  0x88   :  { %407 = vmatprep.mubr.f32.mxu0 %v51_v57  ;;  %657 = vmatprep.mubr.f32.mxu1 %v151_v58  ;;  %v180_v56 = vld [vmem:[%s2360_s0 + $0x530] sm:$0xff]  ;;  %v83_v57 = vld [vmem:[%s2360_s0 + $0x228] sm:$0xff] }
  0x89   :  { %v183_v58 = vld [vmem:[%s2360_s0 + $0x548] sm:$0xff] }
  0x8b   :  { %408 = vmatmul.mubr.f32.gmra.mrb[36].mxu0 %v50_v59  ;;  %658 = vmatmul.mubr.f32.gmra.mrb[36].mxu1 %v150_v60  ;;  %v82_v59 = vld [vmem:[%s2360_s0 + $0x220] sm:$0xff] }
  0x8c   :  { %412 = vmatprep.mubr.f32.mxu0 %v53_v61  ;;  %662 = vmatprep.mubr.f32.mxu1 %v153_v62  ;;  %v182_v60 = vld [vmem:[%s2360_s0 + $0x540] sm:$0xff]  ;;  %v85_v61 = vld [vmem:[%s2360_s0 + $0x238] sm:$0xff] }
  0x8d   :  { %v185_v62 = vld [vmem:[%s2360_s0 + $0x558] sm:$0xff] }
  0x8f   :  { %413 = vmatmul.mubr.f32.gmra.mrb[38].mxu0 %v52_v63  ;;  %663 = vmatmul.mubr.f32.gmra.mrb[38].mxu1 %v152_v0  ;;  %v84_v63 = vld [vmem:[%s2360_s0 + $0x230] sm:$0xff] }
  0x90   :  { %417 = vmatprep.mubr.f32.mxu0 %v55_v1  ;;  %667 = vmatprep.mubr.f32.mxu1 %v155_v2  ;;  %v184_v0 = vld [vmem:[%s2360_s0 + $0x550] sm:$0xff]  ;;  %v87_v1 = vld [vmem:[%s2360_s0 + $0x248] sm:$0xff] }
  0x91   :  { %v187_v2 = vld [vmem:[%s2360_s0 + $0x568] sm:$0xff] }
  0x93   :  { %418 = vmatmul.mubr.f32.gmra.mrb[40].mxu0 %v54_v3  ;;  %668 = vmatmul.mubr.f32.gmra.mrb[40].mxu1 %v154_v4  ;;  %v86_v3 = vld [vmem:[%s2360_s0 + $0x240] sm:$0xff] }
  0x94   :  { %422 = vmatprep.mubr.f32.mxu0 %v57_v5  ;;  %672 = vmatprep.mubr.f32.mxu1 %v157_v6  ;;  %v186_v4 = vld [vmem:[%s2360_s0 + $0x560] sm:$0xff]  ;;  %v89_v5 = vld [vmem:[%s2360_s0 + $0x258] sm:$0xff] }
  0x95   :  { %v189_v6 = vld [vmem:[%s2360_s0 + $0x578] sm:$0xff] }
  0x97   :  { %423 = vmatmul.mubr.f32.gmra.mrb[42].mxu0 %v56_v7  ;;  %673 = vmatmul.mubr.f32.gmra.mrb[42].mxu1 %v156_v8  ;;  %v88_v7 = vld [vmem:[%s2360_s0 + $0x250] sm:$0xff] }
  0x98   :  { %427 = vmatprep.mubr.f32.mxu0 %v59_v9  ;;  %677 = vmatprep.mubr.f32.mxu1 %v159_v10  ;;  %v188_v8 = vld [vmem:[%s2360_s0 + $0x570] sm:$0xff]  ;;  %v91_v9 = vld [vmem:[%s2360_s0 + $0x268] sm:$0xff] }
  0x99   :  { %v191_v10 = vld [vmem:[%s2360_s0 + $0x588] sm:$0xff] }
  0x9b   :  { %428 = vmatmul.mubr.f32.gmra.mrb[44].mxu0 %v58_v11  ;;  %678 = vmatmul.mubr.f32.gmra.mrb[44].mxu1 %v158_v12  ;;  %v90_v11 = vld [vmem:[%s2360_s0 + $0x260] sm:$0xff] }
  0x9c   :  { %432 = vmatprep.mubr.f32.mxu0 %v61_v13  ;;  %682 = vmatprep.mubr.f32.mxu1 %v161_v14  ;;  %v190_v12 = vld [vmem:[%s2360_s0 + $0x580] sm:$0xff]  ;;  %v93_v13 = vld [vmem:[%s2360_s0 + $0x278] sm:$0xff] }
  0x9d   :  { %v193_v14 = vld [vmem:[%s2360_s0 + $0x598] sm:$0xff] }
  0x9f   :  { %433 = vmatmul.mubr.f32.gmra.mrb[46].mxu0 %v60_v15  ;;  %683 = vmatmul.mubr.f32.gmra.mrb[46].mxu1 %v160_v16  ;;  %v92_v15 = vld [vmem:[%s2360_s0 + $0x270] sm:$0xff] }
  0xa0   :  { %437 = vmatprep.mubr.f32.mxu0 %v63_v17  ;;  %687 = vmatprep.mubr.f32.mxu1 %v163_v18  ;;  %v192_v16 = vld [vmem:[%s2360_s0 + $0x590] sm:$0xff]  ;;  %v95_v17 = vld [vmem:[%s2360_s0 + $0x288] sm:$0xff] }
  0xa1   :  { %v195_v18 = vld [vmem:[%s2360_s0 + $0x5a8] sm:$0xff] }
  0xa3   :  { %438 = vmatmul.mubr.f32.gmra.mrb[48].mxu0 %v62_v19  ;;  %688 = vmatmul.mubr.f32.gmra.mrb[48].mxu1 %v162_v20  ;;  %v94_v19 = vld [vmem:[%s2360_s0 + $0x280] sm:$0xff] }
  0xa4   :  { %442 = vmatprep.mubr.f32.mxu0 %v65_v21  ;;  %692 = vmatprep.mubr.f32.mxu1 %v165_v22  ;;  %v194_v20 = vld [vmem:[%s2360_s0 + $0x5a0] sm:$0xff]  ;;  %v97_v21 = vld [vmem:[%s2360_s0 + $0x298] sm:$0xff] }
  0xa5   :  { %v197_v22 = vld [vmem:[%s2360_s0 + $0x5b8] sm:$0xff] }
  0xa7   :  { %443 = vmatmul.mubr.f32.gmra.mrb[50].mxu0 %v64_v23  ;;  %693 = vmatmul.mubr.f32.gmra.mrb[50].mxu1 %v164_v24  ;;  %v96_v23 = vld [vmem:[%s2360_s0 + $0x290] sm:$0xff] }
  0xa8   :  { %447 = vmatprep.mubr.f32.mxu0 %v67_v25  ;;  %697 = vmatprep.mubr.f32.mxu1 %v167_v26  ;;  %v196_v24 = vld [vmem:[%s2360_s0 + $0x5b0] sm:$0xff]  ;;  %v99_v25 = vld [vmem:[%s2360_s0 + $0x2a8] sm:$0xff] }
  0xa9   :  { %v199_v26 = vld [vmem:[%s2360_s0 + $0x5c8] sm:$0xff] }
  0xab   :  { %448 = vmatmul.mubr.f32.gmra.mrb[52].mxu0 %v66_v27  ;;  %698 = vmatmul.mubr.f32.gmra.mrb[52].mxu1 %v166_v28  ;;  %v98_v27 = vld [vmem:[%s2360_s0 + $0x2a0] sm:$0xff] }
  0xac   :  { %452 = vmatprep.mubr.f32.mxu0 %v69_v29  ;;  %702 = vmatprep.mubr.f32.mxu1 %v169_v30  ;;  %v198_v28 = vld [vmem:[%s2360_s0 + $0x5c0] sm:$0xff]  ;;  %v101_v29 = vld [vmem:[%s2360_s0 + $0x2b8] sm:$0xff] }
  0xad   :  { %v201_v30 = vld [vmem:[%s2360_s0 + $0x5d8] sm:$0xff] }
  0xaf   :  { %453 = vmatmul.mubr.f32.gmra.mrb[54].mxu0 %v68_v31  ;;  %703 = vmatmul.mubr.f32.gmra.mrb[54].mxu1 %v168_v32  ;;  %v100_v31 = vld [vmem:[%s2360_s0 + $0x2b0] sm:$0xff] }
  0xb0   :  { %457 = vmatprep.mubr.f32.mxu0 %v71_v33  ;;  %707 = vmatprep.mubr.f32.mxu1 %v171_v34  ;;  %v200_v32 = vld [vmem:[%s2360_s0 + $0x5d0] sm:$0xff]  ;;  %v103_v33 = vld [vmem:[%s2360_s0 + $0x2c8] sm:$0xff] }
  0xb1   :  { %v203_v34 = vld [vmem:[%s2360_s0 + $0x5e8] sm:$0xff] }
  0xb3   :  { %458 = vmatmul.mubr.f32.gmra.mrb[56].mxu0 %v70_v35  ;;  %708 = vmatmul.mubr.f32.gmra.mrb[56].mxu1 %v170_v36  ;;  %v102_v35 = vld [vmem:[%s2360_s0 + $0x2c0] sm:$0xff] }
  0xb4   :  { %462 = vmatprep.mubr.f32.mxu0 %v73_v37  ;;  %712 = vmatprep.mubr.f32.mxu1 %v173_v38  ;;  %v202_v36 = vld [vmem:[%s2360_s0 + $0x5e0] sm:$0xff]  ;;  %v105_v37 = vld [vmem:[%s2360_s0 + $0x2d8] sm:$0xff] }
  0xb5   :  { %v205_v38 = vld [vmem:[%s2360_s0 + $0x5f8] sm:$0xff] }
  0xb7   :  { %463 = vmatmul.mubr.f32.gmra.mrb[58].mxu0 %v72_v39  ;;  %713 = vmatmul.mubr.f32.gmra.mrb[58].mxu1 %v172_v40  ;;  %v104_v39 = vld [vmem:[%s2360_s0 + $0x2d0] sm:$0xff] }
  0xb8   :  { %467 = vmatprep.mubr.f32.mxu0 %v75_v41  ;;  %717 = vmatprep.mubr.f32.mxu1 %v175_v42  ;;  %v204_v40 = vld [vmem:[%s2360_s0 + $0x5f0] sm:$0xff]  ;;  %v107_v41 = vld [vmem:[%s2360_s0 + $0x2e8] sm:$0xff] }
  0xb9   :  { %v207_v42 = vld [vmem:[%s2360_s0 + $0x608] sm:$0xff] }
  0xbb   :  { %468 = vmatmul.mubr.f32.gmra.mrb[60].mxu0 %v74_v43  ;;  %718 = vmatmul.mubr.f32.gmra.mrb[60].mxu1 %v174_v44  ;;  %v106_v43 = vld [vmem:[%s2360_s0 + $0x2e0] sm:$0xff] }
  0xbc   :  { %472 = vmatprep.mubr.f32.mxu0 %v77_v45  ;;  %722 = vmatprep.mubr.f32.mxu1 %v177_v46  ;;  %v206_v44 = vld [vmem:[%s2360_s0 + $0x600] sm:$0xff]  ;;  %v109_v45 = vld [vmem:[%s2360_s0 + $0x2f8] sm:$0xff] }
  0xbd   :  { %v209_v46 = vld [vmem:[%s2360_s0 + $0x618] sm:$0xff] }
  0xbf   :  { %473 = vmatmul.mubr.f32.gmra.mrb[62].mxu0 %v76_v47  ;;  %723 = vmatmul.mubr.f32.gmra.mrb[62].mxu1 %v176_v48  ;;  %v108_v47 = vld [vmem:[%s2360_s0 + $0x2f0] sm:$0xff] }
  0xc0   :  { %477 = vmatprep.mubr.f32.mxu0 %v79_v49  ;;  %727 = vmatprep.mubr.f32.mxu1 %v179_v50  ;;  %v208_v48 = vld [vmem:[%s2360_s0 + $0x610] sm:$0xff]  ;;  %v111_v49 = vld [vmem:[%s2360_s0 + $0x308] sm:$0xff] }
  0xc1   :  { %v211_v50 = vld [vmem:[%s2360_s0 + $0x628] sm:$0xff] }
  0xc3   :  { %478 = vmatmul.mubr.f32.gmra.mrb[64].mxu0 %v78_v51  ;;  %728 = vmatmul.mubr.f32.gmra.mrb[64].mxu1 %v178_v52  ;;  %v110_v51 = vld [vmem:[%s2360_s0 + $0x300] sm:$0xff] }
  0xc4   :  { %482 = vmatprep.mubr.f32.mxu0 %v81_v53  ;;  %732 = vmatprep.mubr.f32.mxu1 %v181_v54  ;;  %v210_v52 = vld [vmem:[%s2360_s0 + $0x620] sm:$0xff]  ;;  %v113_v53 = vld [vmem:[%s2360_s0 + $0x318] sm:$0xff] }
  0xc5   :  { %v213_v54 = vld [vmem:[%s2360_s0 + $0x638] sm:$0xff] }
  0xc7   :  { %483 = vmatmul.mubr.f32.gmra.mrb[66].mxu0 %v80_v55  ;;  %733 = vmatmul.mubr.f32.gmra.mrb[66].mxu1 %v180_v56  ;;  %v112_v55 = vld [vmem:[%s2360_s0 + $0x310] sm:$0xff] }
  0xc8   :  { %487 = vmatprep.mubr.f32.mxu0 %v83_v57  ;;  %737 = vmatprep.mubr.f32.mxu1 %v183_v58  ;;  %v212_v56 = vld [vmem:[%s2360_s0 + $0x630] sm:$0xff]  ;;  %v1857_v57 = vld [vmem:[%s2361_s2] ss:$0 sm:$0xff] }
  0xcb   :  { %488 = vmatmul.mubr.f32.gmra.mrb[68].mxu0 %v82_v59  ;;  %738 = vmatmul.mubr.f32.gmra.mrb[68].mxu1 %v182_v60 }
  0xcc   :  { %492 = vmatprep.mubr.f32.mxu0 %v85_v61  ;;  %742 = vmatprep.mubr.f32.mxu1 %v185_v62 }
  0xcf   :  { %493 = vmatmul.mubr.f32.gmra.mrb[70].mxu0 %v84_v63  ;;  %743 = vmatmul.mubr.f32.gmra.mrb[70].mxu1 %v184_v0 }
  0xd0   :  { %497 = vmatprep.mubr.f32.mxu0 %v87_v1  ;;  %747 = vmatprep.mubr.f32.mxu1 %v187_v2 }
  0xd3   :  { %498 = vmatmul.mubr.f32.gmra.mrb[72].mxu0 %v86_v3  ;;  %748 = vmatmul.mubr.f32.gmra.mrb[72].mxu1 %v186_v4 }
  0xd4   :  { %502 = vmatprep.mubr.f32.mxu0 %v89_v5  ;;  %752 = vmatprep.mubr.f32.mxu1 %v189_v6 }
  0xd7   :  { %503 = vmatmul.mubr.f32.gmra.mrb[74].mxu0 %v88_v7  ;;  %753 = vmatmul.mubr.f32.gmra.mrb[74].mxu1 %v188_v8 }
  0xd8   :  { %507 = vmatprep.mubr.f32.mxu0 %v91_v9  ;;  %757 = vmatprep.mubr.f32.mxu1 %v191_v10 }
  0xdb   :  { %508 = vmatmul.mubr.f32.gmra.mrb[76].mxu0 %v90_v11  ;;  %758 = vmatmul.mubr.f32.gmra.mrb[76].mxu1 %v190_v12 }
  0xdc   :  { %512 = vmatprep.mubr.f32.mxu0 %v93_v13  ;;  %762 = vmatprep.mubr.f32.mxu1 %v193_v14 }
  0xdf   :  { %513 = vmatmul.mubr.f32.gmra.mrb[78].mxu0 %v92_v15  ;;  %763 = vmatmul.mubr.f32.gmra.mrb[78].mxu1 %v192_v16 }
  0xe0   :  { %517 = vmatprep.mubr.f32.mxu0 %v95_v17  ;;  %767 = vmatprep.mubr.f32.mxu1 %v195_v18 }
  0xe3   :  { %518 = vmatmul.mubr.f32.gmra.mrb[80].mxu0 %v94_v19  ;;  %768 = vmatmul.mubr.f32.gmra.mrb[80].mxu1 %v194_v20 }
  0xe4   :  { %522 = vmatprep.mubr.f32.mxu0 %v97_v21  ;;  %772 = vmatprep.mubr.f32.mxu1 %v197_v22 }
  0xe7   :  { %523 = vmatmul.mubr.f32.gmra.mrb[82].mxu0 %v96_v23  ;;  %773 = vmatmul.mubr.f32.gmra.mrb[82].mxu1 %v196_v24 }
  0xe8   :  { %527 = vmatprep.mubr.f32.mxu0 %v99_v25  ;;  %777 = vmatprep.mubr.f32.mxu1 %v199_v26 }
  0xeb   :  { %528 = vmatmul.mubr.f32.gmra.mrb[84].mxu0 %v98_v27  ;;  %778 = vmatmul.mubr.f32.gmra.mrb[84].mxu1 %v198_v28 }
  0xec   :  { %532 = vmatprep.mubr.f32.mxu0 %v101_v29  ;;  %782 = vmatprep.mubr.f32.mxu1 %v201_v30 }
  0xef   :  { %533 = vmatmul.mubr.f32.gmra.mrb[86].mxu0 %v100_v31  ;;  %783 = vmatmul.mubr.f32.gmra.mrb[86].mxu1 %v200_v32 }
  0xf0   :  { %537 = vmatprep.mubr.f32.mxu0 %v103_v33  ;;  %787 = vmatprep.mubr.f32.mxu1 %v203_v34 }
  0xf3   :  { %538 = vmatmul.mubr.f32.gmra.mrb[88].mxu0 %v102_v35  ;;  %788 = vmatmul.mubr.f32.gmra.mrb[88].mxu1 %v202_v36 }
  0xf4   :  { %542 = vmatprep.mubr.f32.mxu0 %v105_v37  ;;  %792 = vmatprep.mubr.f32.mxu1 %v205_v38 }
  0xf7   :  { %543 = vmatmul.mubr.f32.gmra.mrb[90].mxu0 %v104_v39  ;;  %793 = vmatmul.mubr.f32.gmra.mrb[90].mxu1 %v204_v40 }
  0xf8   :  { %547 = vmatprep.mubr.f32.mxu0 %v107_v41  ;;  %797 = vmatprep.mubr.f32.mxu1 %v207_v42 }
  0xfb   :  { %548 = vmatmul.mubr.f32.gmra.mrb[92].mxu0 %v106_v43  ;;  %798 = vmatmul.mubr.f32.gmra.mrb[92].mxu1 %v206_v44 }
  0xfc   :  { %552 = vmatprep.mubr.f32.mxu0 %v109_v45  ;;  %802 = vmatprep.mubr.f32.mxu1 %v209_v46 }
  0xff   :  { %553 = vmatmul.mubr.f32.gmra.mrb[94].mxu0 %v108_v47  ;;  %803 = vmatmul.mubr.f32.gmra.mrb[94].mxu1 %v208_v48 }
 0x100   :  { %557 = vmatprep.mubr.f32.mxu0 %v111_v49  ;;  %807 = vmatprep.mubr.f32.mxu1 %v211_v50 }
 0x103   :  { %558 = vmatmul.mubr.f32.gmra.mrb[96].mxu0 %v110_v51  ;;  %808 = vmatmul.mubr.f32.gmra.mrb[96].mxu1 %v210_v52 }
 0x104   :  { %562 = vmatprep.mubr.f32.mxu0 %v113_v53  ;;  %812 = vmatprep.mubr.f32.mxu1 %v213_v54 }
 0x107   :  { %563 = vmatmul.mubr.f32.gmra.mrb[98].mxu0 %v112_v55  ;;  %813 = vmatmul.mubr.f32.gmra.mrb[98].mxu1 %v212_v56 }
 0x116   :  { %v319_v58 = vpop.f32.mrb[0].mxu0  ;;  %v569_v59 = vpop.f32.mrb[0].mxu1 }
 0x117   :  { %v320_v60 = vadd.f32 %v1857_v57, %v319_v58  ;;  %v570_v61 = vadd.f32 %v1857_v57, %v569_v59  ;;  %v321_v62 = vpop.f32.mrb[1].mxu0  ;;  %v571_v63 = vpop.f32.mrb[1].mxu1 }
 0x119   :  { %v818_v0 = vmax.f32 %v320_v60, 0.0  ;;  %v868_v1 = vmax.f32 %v570_v61, 0.0 }
 0x11a   :  { %v324_v2 = vpop.f32.mrb[2].mxu0  ;;  %v574_v3 = vpop.f32.mrb[2].mxu1 }
 0x11b   :  { %919 = vst.msk [vmem:[%s2362_s3] sm:$0xff] %vm918_vm0, %v818_v0  ;;  %969 = vst.msk [vmem:[%s2362_s3 + $0x190] sm:$0xff] %vm918_vm0, %v868_v1  ;;  %v325_v4 = vadd.f32 %v1857_v57, %v324_v2  ;;  %v575_v5 = vadd.f32 %v1857_v57, %v574_v3  ;;  %v326_v6 = vpop.f32.mrb[3].mxu0  ;;  %v576_v7 = vpop.f32.mrb[3].mxu1 }
 0x11d   :  { %v819_v8 = vmax.f32 %v325_v4, 0.0  ;;  %v869_v9 = vmax.f32 %v575_v5, 0.0 }
 0x11e   :  { %v329_v10 = vpop.f32.mrb[4].mxu0  ;;  %v579_v11 = vpop.f32.mrb[4].mxu1 }
 0x11f   :  { %920 = vst.msk [vmem:[%s2362_s3 + $0x8] sm:$0xff] %vm918_vm0, %v819_v8  ;;  %970 = vst.msk [vmem:[%s2362_s3 + $0x198] sm:$0xff] %vm918_vm0, %v869_v9  ;;  %v330_v12 = vadd.f32 %v1857_v57, %v329_v10  ;;  %v580_v13 = vadd.f32 %v1857_v57, %v579_v11  ;;  %v331_v14 = vpop.f32.mrb[5].mxu0  ;;  %v581_v15 = vpop.f32.mrb[5].mxu1 }
 0x121   :  { %v820_v16 = vmax.f32 %v330_v12, 0.0  ;;  %v870_v17 = vmax.f32 %v580_v13, 0.0 }
 0x122   :  { %v334_v18 = vpop.f32.mrb[6].mxu0  ;;  %v584_v19 = vpop.f32.mrb[6].mxu1 }
 0x123   :  { %921 = vst.msk [vmem:[%s2362_s3 + $0x10] sm:$0xff] %vm918_vm0, %v820_v16  ;;  %971 = vst.msk [vmem:[%s2362_s3 + $0x1a0] sm:$0xff] %vm918_vm0, %v870_v17  ;;  %v335_v20 = vadd.f32 %v1857_v57, %v334_v18  ;;  %v585_v21 = vadd.f32 %v1857_v57, %v584_v19  ;;  %v336_v22 = vpop.f32.mrb[7].mxu0  ;;  %v586_v23 = vpop.f32.mrb[7].mxu1 }
 0x125   :  { %v821_v24 = vmax.f32 %v335_v20, 0.0  ;;  %v871_v25 = vmax.f32 %v585_v21, 0.0 }
 0x126   :  { %v339_v26 = vpop.f32.mrb[8].mxu0  ;;  %v589_v27 = vpop.f32.mrb[8].mxu1 }
 0x127   :  { %922 = vst.msk [vmem:[%s2362_s3 + $0x18] sm:$0xff] %vm918_vm0, %v821_v24  ;;  %972 = vst.msk [vmem:[%s2362_s3 + $0x1a8] sm:$0xff] %vm918_vm0, %v871_v25  ;;  %v340_v28 = vadd.f32 %v1857_v57, %v339_v26  ;;  %v590_v29 = vadd.f32 %v1857_v57, %v589_v27  ;;  %v341_v30 = vpop.f32.mrb[9].mxu0  ;;  %v591_v31 = vpop.f32.mrb[9].mxu1 }
 0x129   :  { %v822_v32 = vmax.f32 %v340_v28, 0.0  ;;  %v872_v33 = vmax.f32 %v590_v29, 0.0 }
 0x12a   :  { %v344_v34 = vpop.f32.mrb[10].mxu0  ;;  %v594_v35 = vpop.f32.mrb[10].mxu1 }
 0x12b   :  { %923 = vst.msk [vmem:[%s2362_s3 + $0x20] sm:$0xff] %vm918_vm0, %v822_v32  ;;  %973 = vst.msk [vmem:[%s2362_s3 + $0x1b0] sm:$0xff] %vm918_vm0, %v872_v33  ;;  %v345_v36 = vadd.f32 %v1857_v57, %v344_v34  ;;  %v595_v37 = vadd.f32 %v1857_v57, %v594_v35  ;;  %v346_v38 = vpop.f32.mrb[11].mxu0  ;;  %v596_v39 = vpop.f32.mrb[11].mxu1 }
 0x12d   :  { %v823_v40 = vmax.f32 %v345_v36, 0.0  ;;  %v873_v41 = vmax.f32 %v595_v37, 0.0 }
 0x12e   :  { %v349_v42 = vpop.f32.mrb[12].mxu0  ;;  %v599_v43 = vpop.f32.mrb[12].mxu1 }
 0x12f   :  { %924 = vst.msk [vmem:[%s2362_s3 + $0x28] sm:$0xff] %vm918_vm0, %v823_v40  ;;  %974 = vst.msk [vmem:[%s2362_s3 + $0x1b8] sm:$0xff] %vm918_vm0, %v873_v41  ;;  %v350_v44 = vadd.f32 %v1857_v57, %v349_v42  ;;  %v600_v45 = vadd.f32 %v1857_v57, %v599_v43  ;;  %v351_v46 = vpop.f32.mrb[13].mxu0  ;;  %v601_v47 = vpop.f32.mrb[13].mxu1 }
 0x131   :  { %v824_v48 = vmax.f32 %v350_v44, 0.0  ;;  %v874_v49 = vmax.f32 %v600_v45, 0.0 }
 0x132   :  { %v354_v50 = vpop.f32.mrb[14].mxu0  ;;  %v604_v51 = vpop.f32.mrb[14].mxu1 }
 0x133   :  { %925 = vst.msk [vmem:[%s2362_s3 + $0x30] sm:$0xff] %vm918_vm0, %v824_v48  ;;  %975 = vst.msk [vmem:[%s2362_s3 + $0x1c0] sm:$0xff] %vm918_vm0, %v874_v49  ;;  %v355_v52 = vadd.f32 %v1857_v57, %v354_v50  ;;  %v605_v53 = vadd.f32 %v1857_v57, %v604_v51  ;;  %v356_v54 = vpop.f32.mrb[15].mxu0  ;;  %v606_v55 = vpop.f32.mrb[15].mxu1 }
 0x135   :  { %v825_v56 = vmax.f32 %v355_v52, 0.0  ;;  %v875_v58 = vmax.f32 %v605_v53, 0.0 }
 0x136   :  { %v359_v59 = vpop.f32.mrb[16].mxu0  ;;  %v609_v60 = vpop.f32.mrb[16].mxu1 }
 0x137   :  { %926 = vst.msk [vmem:[%s2362_s3 + $0x38] sm:$0xff] %vm918_vm0, %v825_v56  ;;  %976 = vst.msk [vmem:[%s2362_s3 + $0x1c8] sm:$0xff] %vm918_vm0, %v875_v58  ;;  %v360_v61 = vadd.f32 %v1857_v57, %v359_v59  ;;  %v610_v62 = vadd.f32 %v1857_v57, %v609_v60  ;;  %v361_v63 = vpop.f32.mrb[17].mxu0  ;;  %v611_v0 = vpop.f32.mrb[17].mxu1 }
 0x139   :  { %v826_v1 = vmax.f32 %v360_v61, 0.0  ;;  %v876_v2 = vmax.f32 %v610_v62, 0.0 }
 0x13a   :  { %v364_v3 = vpop.f32.mrb[18].mxu0  ;;  %v614_v4 = vpop.f32.mrb[18].mxu1 }
 0x13b   :  { %927 = vst.msk [vmem:[%s2362_s3 + $0x40] sm:$0xff] %vm918_vm0, %v826_v1  ;;  %977 = vst.msk [vmem:[%s2362_s3 + $0x1d0] sm:$0xff] %vm918_vm0, %v876_v2  ;;  %v365_v5 = vadd.f32 %v1857_v57, %v364_v3  ;;  %v615_v6 = vadd.f32 %v1857_v57, %v614_v4  ;;  %v366_v7 = vpop.f32.mrb[19].mxu0  ;;  %v616_v8 = vpop.f32.mrb[19].mxu1 }
 0x13d   :  { %v827_v9 = vmax.f32 %v365_v5, 0.0  ;;  %v877_v10 = vmax.f32 %v615_v6, 0.0 }
 0x13e   :  { %v369_v11 = vpop.f32.mrb[20].mxu0  ;;  %v619_v12 = vpop.f32.mrb[20].mxu1 }
 0x13f   :  { %928 = vst.msk [vmem:[%s2362_s3 + $0x48] sm:$0xff] %vm918_vm0, %v827_v9  ;;  %978 = vst.msk [vmem:[%s2362_s3 + $0x1d8] sm:$0xff] %vm918_vm0, %v877_v10  ;;  %v370_v13 = vadd.f32 %v1857_v57, %v369_v11  ;;  %v620_v14 = vadd.f32 %v1857_v57, %v619_v12  ;;  %v371_v15 = vpop.f32.mrb[21].mxu0  ;;  %v621_v16 = vpop.f32.mrb[21].mxu1 }
 0x141   :  { %v828_v17 = vmax.f32 %v370_v13, 0.0  ;;  %v878_v18 = vmax.f32 %v620_v14, 0.0 }
 0x142   :  { %v374_v19 = vpop.f32.mrb[22].mxu0  ;;  %v624_v20 = vpop.f32.mrb[22].mxu1 }
 0x143   :  { %929 = vst.msk [vmem:[%s2362_s3 + $0x50] sm:$0xff] %vm918_vm0, %v828_v17  ;;  %979 = vst.msk [vmem:[%s2362_s3 + $0x1e0] sm:$0xff] %vm918_vm0, %v878_v18  ;;  %v375_v21 = vadd.f32 %v1857_v57, %v374_v19  ;;  %v625_v22 = vadd.f32 %v1857_v57, %v624_v20  ;;  %v376_v23 = vpop.f32.mrb[23].mxu0  ;;  %v626_v24 = vpop.f32.mrb[23].mxu1 }
 0x145   :  { %v829_v25 = vmax.f32 %v375_v21, 0.0  ;;  %v879_v26 = vmax.f32 %v625_v22, 0.0 }
 0x146   :  { %v379_v27 = vpop.f32.mrb[24].mxu0  ;;  %v629_v28 = vpop.f32.mrb[24].mxu1 }
 0x147   :  { %930 = vst.msk [vmem:[%s2362_s3 + $0x58] sm:$0xff] %vm918_vm0, %v829_v25  ;;  %980 = vst.msk [vmem:[%s2362_s3 + $0x1e8] sm:$0xff] %vm918_vm0, %v879_v26  ;;  %v380_v29 = vadd.f32 %v1857_v57, %v379_v27  ;;  %v630_v30 = vadd.f32 %v1857_v57, %v629_v28  ;;  %v381_v31 = vpop.f32.mrb[25].mxu0  ;;  %v631_v32 = vpop.f32.mrb[25].mxu1 }
 0x149   :  { %v830_v33 = vmax.f32 %v380_v29, 0.0  ;;  %v880_v34 = vmax.f32 %v630_v30, 0.0 }
 0x14a   :  { %v384_v35 = vpop.f32.mrb[26].mxu0  ;;  %v634_v36 = vpop.f32.mrb[26].mxu1 }
 0x14b   :  { %931 = vst.msk [vmem:[%s2362_s3 + $0x60] sm:$0xff] %vm918_vm0, %v830_v33  ;;  %981 = vst.msk [vmem:[%s2362_s3 + $0x1f0] sm:$0xff] %vm918_vm0, %v880_v34  ;;  %v385_v37 = vadd.f32 %v1857_v57, %v384_v35  ;;  %v635_v38 = vadd.f32 %v1857_v57, %v634_v36  ;;  %v386_v39 = vpop.f32.mrb[27].mxu0  ;;  %v636_v40 = vpop.f32.mrb[27].mxu1 }
 0x14d   :  { %v831_v41 = vmax.f32 %v385_v37, 0.0  ;;  %v881_v42 = vmax.f32 %v635_v38, 0.0 }
 0x14e   :  { %v389_v43 = vpop.f32.mrb[28].mxu0  ;;  %v639_v44 = vpop.f32.mrb[28].mxu1 }
 0x14f   :  { %932 = vst.msk [vmem:[%s2362_s3 + $0x68] sm:$0xff] %vm918_vm0, %v831_v41  ;;  %982 = vst.msk [vmem:[%s2362_s3 + $0x1f8] sm:$0xff] %vm918_vm0, %v881_v42  ;;  %v390_v45 = vadd.f32 %v1857_v57, %v389_v43  ;;  %v640_v46 = vadd.f32 %v1857_v57, %v639_v44  ;;  %v391_v47 = vpop.f32.mrb[29].mxu0  ;;  %v641_v48 = vpop.f32.mrb[29].mxu1 }
 0x151   :  { %v832_v49 = vmax.f32 %v390_v45, 0.0  ;;  %v882_v50 = vmax.f32 %v640_v46, 0.0 }
 0x152   :  { %v394_v51 = vpop.f32.mrb[30].mxu0  ;;  %v644_v52 = vpop.f32.mrb[30].mxu1 }
 0x153   :  { %933 = vst.msk [vmem:[%s2362_s3 + $0x70] sm:$0xff] %vm918_vm0, %v832_v49  ;;  %983 = vst.msk [vmem:[%s2362_s3 + $0x200] sm:$0xff] %vm918_vm0, %v882_v50  ;;  %v395_v53 = vadd.f32 %v1857_v57, %v394_v51  ;;  %v645_v54 = vadd.f32 %v1857_v57, %v644_v52  ;;  %v396_v55 = vpop.f32.mrb[31].mxu0  ;;  %v646_v56 = vpop.f32.mrb[31].mxu1 }
 0x155   :  { %v833_v58 = vmax.f32 %v395_v53, 0.0  ;;  %v883_v59 = vmax.f32 %v645_v54, 0.0 }
 0x156   :  { %v399_v60 = vpop.f32.mrb[32].mxu0  ;;  %v649_v61 = vpop.f32.mrb[32].mxu1 }
 0x157   :  { %934 = vst.msk [vmem:[%s2362_s3 + $0x78] sm:$0xff] %vm918_vm0, %v833_v58  ;;  %984 = vst.msk [vmem:[%s2362_s3 + $0x208] sm:$0xff] %vm918_vm0, %v883_v59  ;;  %v400_v62 = vadd.f32 %v1857_v57, %v399_v60  ;;  %v650_v63 = vadd.f32 %v1857_v57, %v649_v61  ;;  %v401_v0 = vpop.f32.mrb[33].mxu0  ;;  %v651_v1 = vpop.f32.mrb[33].mxu1 }
 0x159   :  { %v834_v2 = vmax.f32 %v400_v62, 0.0  ;;  %v884_v3 = vmax.f32 %v650_v63, 0.0 }
 0x15a   :  { %v404_v4 = vpop.f32.mrb[34].mxu0  ;;  %v654_v5 = vpop.f32.mrb[34].mxu1 }
 0x15b   :  { %935 = vst.msk [vmem:[%s2362_s3 + $0x80] sm:$0xff] %vm918_vm0, %v834_v2  ;;  %985 = vst.msk [vmem:[%s2362_s3 + $0x210] sm:$0xff] %vm918_vm0, %v884_v3  ;;  %v405_v6 = vadd.f32 %v1857_v57, %v404_v4  ;;  %v655_v7 = vadd.f32 %v1857_v57, %v654_v5  ;;  %v406_v8 = vpop.f32.mrb[35].mxu0  ;;  %v656_v9 = vpop.f32.mrb[35].mxu1 }
 0x15d   :  { %v835_v10 = vmax.f32 %v405_v6, 0.0  ;;  %v885_v11 = vmax.f32 %v655_v7, 0.0 }
 0x15e   :  { %v409_v12 = vpop.f32.mrb[36].mxu0  ;;  %v659_v13 = vpop.f32.mrb[36].mxu1 }
 0x15f   :  { %936 = vst.msk [vmem:[%s2362_s3 + $0x88] sm:$0xff] %vm918_vm0, %v835_v10  ;;  %986 = vst.msk [vmem:[%s2362_s3 + $0x218] sm:$0xff] %vm918_vm0, %v885_v11  ;;  %v410_v14 = vadd.f32 %v1857_v57, %v409_v12  ;;  %v660_v15 = vadd.f32 %v1857_v57, %v659_v13  ;;  %v411_v16 = vpop.f32.mrb[37].mxu0  ;;  %v661_v17 = vpop.f32.mrb[37].mxu1 }
 0x161   :  { %v836_v18 = vmax.f32 %v410_v14, 0.0  ;;  %v886_v19 = vmax.f32 %v660_v15, 0.0 }
 0x162   :  { %v414_v20 = vpop.f32.mrb[38].mxu0  ;;  %v664_v21 = vpop.f32.mrb[38].mxu1 }
 0x163   :  { %937 = vst.msk [vmem:[%s2362_s3 + $0x90] sm:$0xff] %vm918_vm0, %v836_v18  ;;  %987 = vst.msk [vmem:[%s2362_s3 + $0x220] sm:$0xff] %vm918_vm0, %v886_v19  ;;  %v415_v22 = vadd.f32 %v1857_v57, %v414_v20  ;;  %v665_v23 = vadd.f32 %v1857_v57, %v664_v21  ;;  %v416_v24 = vpop.f32.mrb[39].mxu0  ;;  %v666_v25 = vpop.f32.mrb[39].mxu1 }
 0x165   :  { %v837_v26 = vmax.f32 %v415_v22, 0.0  ;;  %v887_v27 = vmax.f32 %v665_v23, 0.0 }
 0x166   :  { %v419_v28 = vpop.f32.mrb[40].mxu0  ;;  %v669_v29 = vpop.f32.mrb[40].mxu1 }
 0x167   :  { %938 = vst.msk [vmem:[%s2362_s3 + $0x98] sm:$0xff] %vm918_vm0, %v837_v26  ;;  %988 = vst.msk [vmem:[%s2362_s3 + $0x228] sm:$0xff] %vm918_vm0, %v887_v27  ;;  %v420_v30 = vadd.f32 %v1857_v57, %v419_v28  ;;  %v670_v31 = vadd.f32 %v1857_v57, %v669_v29  ;;  %v421_v32 = vpop.f32.mrb[41].mxu0  ;;  %v671_v33 = vpop.f32.mrb[41].mxu1 }
 0x169   :  { %v838_v34 = vmax.f32 %v420_v30, 0.0  ;;  %v888_v35 = vmax.f32 %v670_v31, 0.0 }
 0x16a   :  { %v424_v36 = vpop.f32.mrb[42].mxu0  ;;  %v674_v37 = vpop.f32.mrb[42].mxu1 }
 0x16b   :  { %939 = vst.msk [vmem:[%s2362_s3 + $0xa0] sm:$0xff] %vm918_vm0, %v838_v34  ;;  %989 = vst.msk [vmem:[%s2362_s3 + $0x230] sm:$0xff] %vm918_vm0, %v888_v35  ;;  %v425_v38 = vadd.f32 %v1857_v57, %v424_v36  ;;  %v675_v39 = vadd.f32 %v1857_v57, %v674_v37  ;;  %v426_v40 = vpop.f32.mrb[43].mxu0  ;;  %v676_v41 = vpop.f32.mrb[43].mxu1 }
 0x16d   :  { %v839_v42 = vmax.f32 %v425_v38, 0.0  ;;  %v889_v43 = vmax.f32 %v675_v39, 0.0 }
 0x16e   :  { %v429_v44 = vpop.f32.mrb[44].mxu0  ;;  %v679_v45 = vpop.f32.mrb[44].mxu1 }
 0x16f   :  { %940 = vst.msk [vmem:[%s2362_s3 + $0xa8] sm:$0xff] %vm918_vm0, %v839_v42  ;;  %990 = vst.msk [vmem:[%s2362_s3 + $0x238] sm:$0xff] %vm918_vm0, %v889_v43  ;;  %v430_v46 = vadd.f32 %v1857_v57, %v429_v44  ;;  %v680_v47 = vadd.f32 %v1857_v57, %v679_v45  ;;  %v431_v48 = vpop.f32.mrb[45].mxu0  ;;  %v681_v49 = vpop.f32.mrb[45].mxu1 }
 0x171   :  { %v840_v50 = vmax.f32 %v430_v46, 0.0  ;;  %v890_v51 = vmax.f32 %v680_v47, 0.0 }
 0x172   :  { %v434_v52 = vpop.f32.mrb[46].mxu0  ;;  %v684_v53 = vpop.f32.mrb[46].mxu1 }
 0x173   :  { %941 = vst.msk [vmem:[%s2362_s3 + $0xb0] sm:$0xff] %vm918_vm0, %v840_v50  ;;  %991 = vst.msk [vmem:[%s2362_s3 + $0x240] sm:$0xff] %vm918_vm0, %v890_v51  ;;  %v435_v54 = vadd.f32 %v1857_v57, %v434_v52  ;;  %v685_v55 = vadd.f32 %v1857_v57, %v684_v53  ;;  %v436_v56 = vpop.f32.mrb[47].mxu0  ;;  %v686_v58 = vpop.f32.mrb[47].mxu1 }
 0x175   :  { %v841_v59 = vmax.f32 %v435_v54, 0.0  ;;  %v891_v60 = vmax.f32 %v685_v55, 0.0 }
 0x176   :  { %v439_v61 = vpop.f32.mrb[48].mxu0  ;;  %v689_v62 = vpop.f32.mrb[48].mxu1 }
 0x177   :  { %942 = vst.msk [vmem:[%s2362_s3 + $0xb8] sm:$0xff] %vm918_vm0, %v841_v59  ;;  %992 = vst.msk [vmem:[%s2362_s3 + $0x248] sm:$0xff] %vm918_vm0, %v891_v60  ;;  %v440_v63 = vadd.f32 %v1857_v57, %v439_v61  ;;  %v690_v0 = vadd.f32 %v1857_v57, %v689_v62  ;;  %v441_v1 = vpop.f32.mrb[49].mxu0  ;;  %v691_v2 = vpop.f32.mrb[49].mxu1 }
 0x179   :  { %v842_v3 = vmax.f32 %v440_v63, 0.0  ;;  %v892_v4 = vmax.f32 %v690_v0, 0.0 }
 0x17a   :  { %v444_v5 = vpop.f32.mrb[50].mxu0  ;;  %v694_v6 = vpop.f32.mrb[50].mxu1 }
 0x17b   :  { %943 = vst.msk [vmem:[%s2362_s3 + $0xc0] sm:$0xff] %vm918_vm0, %v842_v3  ;;  %993 = vst.msk [vmem:[%s2362_s3 + $0x250] sm:$0xff] %vm918_vm0, %v892_v4  ;;  %v445_v7 = vadd.f32 %v1857_v57, %v444_v5  ;;  %v695_v8 = vadd.f32 %v1857_v57, %v694_v6  ;;  %v446_v9 = vpop.f32.mrb[51].mxu0  ;;  %v696_v10 = vpop.f32.mrb[51].mxu1 }
 0x17d   :  { %v843_v11 = vmax.f32 %v445_v7, 0.0  ;;  %v893_v12 = vmax.f32 %v695_v8, 0.0 }
 0x17e   :  { %v449_v13 = vpop.f32.mrb[52].mxu0  ;;  %v699_v14 = vpop.f32.mrb[52].mxu1 }
 0x17f   :  { %944 = vst.msk [vmem:[%s2362_s3 + $0xc8] sm:$0xff] %vm918_vm0, %v843_v11  ;;  %994 = vst.msk [vmem:[%s2362_s3 + $0x258] sm:$0xff] %vm918_vm0, %v893_v12  ;;  %v450_v15 = vadd.f32 %v1857_v57, %v449_v13  ;;  %v700_v16 = vadd.f32 %v1857_v57, %v699_v14  ;;  %v451_v17 = vpop.f32.mrb[53].mxu0  ;;  %v701_v18 = vpop.f32.mrb[53].mxu1 }
 0x181   :  { %v844_v19 = vmax.f32 %v450_v15, 0.0  ;;  %v894_v20 = vmax.f32 %v700_v16, 0.0 }
 0x182   :  { %v454_v21 = vpop.f32.mrb[54].mxu0  ;;  %v704_v22 = vpop.f32.mrb[54].mxu1 }
 0x183   :  { %945 = vst.msk [vmem:[%s2362_s3 + $0xd0] sm:$0xff] %vm918_vm0, %v844_v19  ;;  %995 = vst.msk [vmem:[%s2362_s3 + $0x260] sm:$0xff] %vm918_vm0, %v894_v20  ;;  %v455_v23 = vadd.f32 %v1857_v57, %v454_v21  ;;  %v705_v24 = vadd.f32 %v1857_v57, %v704_v22  ;;  %v456_v25 = vpop.f32.mrb[55].mxu0  ;;  %v706_v26 = vpop.f32.mrb[55].mxu1 }
 0x185   :  { %v845_v27 = vmax.f32 %v455_v23, 0.0  ;;  %v895_v28 = vmax.f32 %v705_v24, 0.0 }
 0x186   :  { %v459_v29 = vpop.f32.mrb[56].mxu0  ;;  %v709_v30 = vpop.f32.mrb[56].mxu1 }
 0x187   :  { %946 = vst.msk [vmem:[%s2362_s3 + $0xd8] sm:$0xff] %vm918_vm0, %v845_v27  ;;  %996 = vst.msk [vmem:[%s2362_s3 + $0x268] sm:$0xff] %vm918_vm0, %v895_v28  ;;  %v460_v31 = vadd.f32 %v1857_v57, %v459_v29  ;;  %v710_v32 = vadd.f32 %v1857_v57, %v709_v30  ;;  %v461_v33 = vpop.f32.mrb[57].mxu0  ;;  %v711_v34 = vpop.f32.mrb[57].mxu1 }
 0x189   :  { %v846_v35 = vmax.f32 %v460_v31, 0.0  ;;  %v896_v36 = vmax.f32 %v710_v32, 0.0 }
 0x18a   :  { %v464_v37 = vpop.f32.mrb[58].mxu0  ;;  %v714_v38 = vpop.f32.mrb[58].mxu1 }
 0x18b   :  { %947 = vst.msk [vmem:[%s2362_s3 + $0xe0] sm:$0xff] %vm918_vm0, %v846_v35  ;;  %997 = vst.msk [vmem:[%s2362_s3 + $0x270] sm:$0xff] %vm918_vm0, %v896_v36  ;;  %v465_v39 = vadd.f32 %v1857_v57, %v464_v37  ;;  %v715_v40 = vadd.f32 %v1857_v57, %v714_v38  ;;  %v466_v41 = vpop.f32.mrb[59].mxu0  ;;  %v716_v42 = vpop.f32.mrb[59].mxu1 }
 0x18d   :  { %v847_v43 = vmax.f32 %v465_v39, 0.0  ;;  %v897_v44 = vmax.f32 %v715_v40, 0.0 }
 0x18e   :  { %v469_v45 = vpop.f32.mrb[60].mxu0  ;;  %v719_v46 = vpop.f32.mrb[60].mxu1 }
 0x18f   :  { %948 = vst.msk [vmem:[%s2362_s3 + $0xe8] sm:$0xff] %vm918_vm0, %v847_v43  ;;  %998 = vst.msk [vmem:[%s2362_s3 + $0x278] sm:$0xff] %vm918_vm0, %v897_v44  ;;  %v470_v47 = vadd.f32 %v1857_v57, %v469_v45  ;;  %v720_v48 = vadd.f32 %v1857_v57, %v719_v46  ;;  %v471_v49 = vpop.f32.mrb[61].mxu0  ;;  %v721_v50 = vpop.f32.mrb[61].mxu1 }
 0x191   :  { %v848_v51 = vmax.f32 %v470_v47, 0.0  ;;  %v898_v52 = vmax.f32 %v720_v48, 0.0 }
 0x192   :  { %v474_v53 = vpop.f32.mrb[62].mxu0  ;;  %v724_v54 = vpop.f32.mrb[62].mxu1 }
 0x193   :  { %949 = vst.msk [vmem:[%s2362_s3 + $0xf0] sm:$0xff] %vm918_vm0, %v848_v51  ;;  %999 = vst.msk [vmem:[%s2362_s3 + $0x280] sm:$0xff] %vm918_vm0, %v898_v52  ;;  %v475_v55 = vadd.f32 %v1857_v57, %v474_v53  ;;  %v725_v56 = vadd.f32 %v1857_v57, %v724_v54  ;;  %v476_v58 = vpop.f32.mrb[63].mxu0  ;;  %v726_v59 = vpop.f32.mrb[63].mxu1 }
 0x195   :  { %v849_v60 = vmax.f32 %v475_v55, 0.0  ;;  %v899_v61 = vmax.f32 %v725_v56, 0.0 }
 0x196   :  { %v479_v62 = vpop.f32.mrb[64].mxu0  ;;  %v729_v63 = vpop.f32.mrb[64].mxu1 }
 0x197   :  { %950 = vst.msk [vmem:[%s2362_s3 + $0xf8] sm:$0xff] %vm918_vm0, %v849_v60  ;;  %1000 = vst.msk [vmem:[%s2362_s3 + $0x288] sm:$0xff] %vm918_vm0, %v899_v61  ;;  %v480_v0 = vadd.f32 %v1857_v57, %v479_v62  ;;  %v730_v1 = vadd.f32 %v1857_v57, %v729_v63  ;;  %v481_v2 = vpop.f32.mrb[65].mxu0  ;;  %v731_v3 = vpop.f32.mrb[65].mxu1 }
 0x199   :  { %v850_v4 = vmax.f32 %v480_v0, 0.0  ;;  %v900_v5 = vmax.f32 %v730_v1, 0.0 }
 0x19a   :  { %v484_v6 = vpop.f32.mrb[66].mxu0  ;;  %v734_v7 = vpop.f32.mrb[66].mxu1 }
 0x19b   :  { %951 = vst.msk [vmem:[%s2362_s3 + $0x100] sm:$0xff] %vm918_vm0, %v850_v4  ;;  %1001 = vst.msk [vmem:[%s2362_s3 + $0x290] sm:$0xff] %vm918_vm0, %v900_v5  ;;  %v485_v8 = vadd.f32 %v1857_v57, %v484_v6  ;;  %v735_v9 = vadd.f32 %v1857_v57, %v734_v7  ;;  %v486_v10 = vpop.f32.mrb[67].mxu0  ;;  %v736_v11 = vpop.f32.mrb[67].mxu1 }
 0x19d   :  { %v851_v12 = vmax.f32 %v485_v8, 0.0  ;;  %v901_v13 = vmax.f32 %v735_v9, 0.0 }
 0x19e   :  { %v489_v14 = vpop.f32.mrb[68].mxu0  ;;  %v739_v15 = vpop.f32.mrb[68].mxu1 }
 0x19f   :  { %952 = vst.msk [vmem:[%s2362_s3 + $0x108] sm:$0xff] %vm918_vm0, %v851_v12  ;;  %1002 = vst.msk [vmem:[%s2362_s3 + $0x298] sm:$0xff] %vm918_vm0, %v901_v13  ;;  %v490_v16 = vadd.f32 %v1857_v57, %v489_v14  ;;  %v740_v17 = vadd.f32 %v1857_v57, %v739_v15  ;;  %v491_v18 = vpop.f32.mrb[69].mxu0  ;;  %v741_v19 = vpop.f32.mrb[69].mxu1 }
 0x1a1   :  { %v852_v20 = vmax.f32 %v490_v16, 0.0  ;;  %v902_v21 = vmax.f32 %v740_v17, 0.0 }
 0x1a2   :  { %v494_v22 = vpop.f32.mrb[70].mxu0  ;;  %v744_v23 = vpop.f32.mrb[70].mxu1 }
 0x1a3   :  { %953 = vst.msk [vmem:[%s2362_s3 + $0x110] sm:$0xff] %vm918_vm0, %v852_v20  ;;  %1003 = vst.msk [vmem:[%s2362_s3 + $0x2a0] sm:$0xff] %vm918_vm0, %v902_v21  ;;  %v495_v24 = vadd.f32 %v1857_v57, %v494_v22  ;;  %v745_v25 = vadd.f32 %v1857_v57, %v744_v23  ;;  %v496_v26 = vpop.f32.mrb[71].mxu0  ;;  %v746_v27 = vpop.f32.mrb[71].mxu1 }
 0x1a5   :  { %v853_v28 = vmax.f32 %v495_v24, 0.0  ;;  %v903_v29 = vmax.f32 %v745_v25, 0.0 }
 0x1a6   :  { %v499_v30 = vpop.f32.mrb[72].mxu0  ;;  %v749_v31 = vpop.f32.mrb[72].mxu1 }
 0x1a7   :  { %954 = vst.msk [vmem:[%s2362_s3 + $0x118] sm:$0xff] %vm918_vm0, %v853_v28  ;;  %1004 = vst.msk [vmem:[%s2362_s3 + $0x2a8] sm:$0xff] %vm918_vm0, %v903_v29  ;;  %v500_v32 = vadd.f32 %v1857_v57, %v499_v30  ;;  %v750_v33 = vadd.f32 %v1857_v57, %v749_v31  ;;  %v501_v34 = vpop.f32.mrb[73].mxu0  ;;  %v751_v35 = vpop.f32.mrb[73].mxu1 }
 0x1a9   :  { %v854_v36 = vmax.f32 %v500_v32, 0.0  ;;  %v904_v37 = vmax.f32 %v750_v33, 0.0 }
 0x1aa   :  { %v504_v38 = vpop.f32.mrb[74].mxu0  ;;  %v754_v39 = vpop.f32.mrb[74].mxu1 }
 0x1ab   :  { %955 = vst.msk [vmem:[%s2362_s3 + $0x120] sm:$0xff] %vm918_vm0, %v854_v36  ;;  %1005 = vst.msk [vmem:[%s2362_s3 + $0x2b0] sm:$0xff] %vm918_vm0, %v904_v37  ;;  %v505_v40 = vadd.f32 %v1857_v57, %v504_v38  ;;  %v755_v41 = vadd.f32 %v1857_v57, %v754_v39  ;;  %v506_v42 = vpop.f32.mrb[75].mxu0  ;;  %v756_v43 = vpop.f32.mrb[75].mxu1 }
 0x1ad   :  { %v855_v44 = vmax.f32 %v505_v40, 0.0  ;;  %v905_v45 = vmax.f32 %v755_v41, 0.0 }
 0x1ae   :  { %v509_v46 = vpop.f32.mrb[76].mxu0  ;;  %v759_v47 = vpop.f32.mrb[76].mxu1 }
 0x1af   :  { %956 = vst.msk [vmem:[%s2362_s3 + $0x128] sm:$0xff] %vm918_vm0, %v855_v44  ;;  %1006 = vst.msk [vmem:[%s2362_s3 + $0x2b8] sm:$0xff] %vm918_vm0, %v905_v45  ;;  %v510_v48 = vadd.f32 %v1857_v57, %v509_v46  ;;  %v760_v49 = vadd.f32 %v1857_v57, %v759_v47  ;;  %v511_v50 = vpop.f32.mrb[77].mxu0  ;;  %v761_v51 = vpop.f32.mrb[77].mxu1 }
 0x1b1   :  { %v856_v52 = vmax.f32 %v510_v48, 0.0  ;;  %v906_v53 = vmax.f32 %v760_v49, 0.0 }
 0x1b2   :  { %v514_v54 = vpop.f32.mrb[78].mxu0  ;;  %v764_v55 = vpop.f32.mrb[78].mxu1 }
 0x1b3   :  { %957 = vst.msk [vmem:[%s2362_s3 + $0x130] sm:$0xff] %vm918_vm0, %v856_v52  ;;  %1007 = vst.msk [vmem:[%s2362_s3 + $0x2c0] sm:$0xff] %vm918_vm0, %v906_v53  ;;  %v515_v56 = vadd.f32 %v1857_v57, %v514_v54  ;;  %v765_v58 = vadd.f32 %v1857_v57, %v764_v55  ;;  %v516_v59 = vpop.f32.mrb[79].mxu0  ;;  %v766_v60 = vpop.f32.mrb[79].mxu1 }
 0x1b5   :  { %v857_v61 = vmax.f32 %v515_v56, 0.0  ;;  %v907_v62 = vmax.f32 %v765_v58, 0.0 }
 0x1b6   :  { %v519_v63 = vpop.f32.mrb[80].mxu0  ;;  %v769_v0 = vpop.f32.mrb[80].mxu1 }
 0x1b7   :  { %958 = vst.msk [vmem:[%s2362_s3 + $0x138] sm:$0xff] %vm918_vm0, %v857_v61  ;;  %1008 = vst.msk [vmem:[%s2362_s3 + $0x2c8] sm:$0xff] %vm918_vm0, %v907_v62  ;;  %v520_v1 = vadd.f32 %v1857_v57, %v519_v63  ;;  %v770_v2 = vadd.f32 %v1857_v57, %v769_v0  ;;  %v521_v3 = vpop.f32.mrb[81].mxu0  ;;  %v771_v4 = vpop.f32.mrb[81].mxu1 }
 0x1b9   :  { %v858_v5 = vmax.f32 %v520_v1, 0.0  ;;  %v908_v6 = vmax.f32 %v770_v2, 0.0 }
 0x1ba   :  { %v524_v7 = vpop.f32.mrb[82].mxu0  ;;  %v774_v8 = vpop.f32.mrb[82].mxu1 }
 0x1bb   :  { %959 = vst.msk [vmem:[%s2362_s3 + $0x140] sm:$0xff] %vm918_vm0, %v858_v5  ;;  %1009 = vst.msk [vmem:[%s2362_s3 + $0x2d0] sm:$0xff] %vm918_vm0, %v908_v6  ;;  %v525_v9 = vadd.f32 %v1857_v57, %v524_v7  ;;  %v775_v10 = vadd.f32 %v1857_v57, %v774_v8  ;;  %v526_v11 = vpop.f32.mrb[83].mxu0  ;;  %v776_v12 = vpop.f32.mrb[83].mxu1 }
 0x1bd   :  { %v859_v13 = vmax.f32 %v525_v9, 0.0  ;;  %v909_v14 = vmax.f32 %v775_v10, 0.0 }
 0x1be   :  { %v529_v15 = vpop.f32.mrb[84].mxu0  ;;  %v779_v16 = vpop.f32.mrb[84].mxu1 }
 0x1bf   :  { %960 = vst.msk [vmem:[%s2362_s3 + $0x148] sm:$0xff] %vm918_vm0, %v859_v13  ;;  %1010 = vst.msk [vmem:[%s2362_s3 + $0x2d8] sm:$0xff] %vm918_vm0, %v909_v14  ;;  %v530_v17 = vadd.f32 %v1857_v57, %v529_v15  ;;  %v780_v18 = vadd.f32 %v1857_v57, %v779_v16  ;;  %v531_v19 = vpop.f32.mrb[85].mxu0  ;;  %v781_v20 = vpop.f32.mrb[85].mxu1 }
 0x1c1   :  { %v860_v21 = vmax.f32 %v530_v17, 0.0  ;;  %v910_v22 = vmax.f32 %v780_v18, 0.0 }
 0x1c2   :  { %v534_v23 = vpop.f32.mrb[86].mxu0  ;;  %v784_v24 = vpop.f32.mrb[86].mxu1 }
 0x1c3   :  { %961 = vst.msk [vmem:[%s2362_s3 + $0x150] sm:$0xff] %vm918_vm0, %v860_v21  ;;  %1011 = vst.msk [vmem:[%s2362_s3 + $0x2e0] sm:$0xff] %vm918_vm0, %v910_v22  ;;  %v535_v25 = vadd.f32 %v1857_v57, %v534_v23  ;;  %v785_v26 = vadd.f32 %v1857_v57, %v784_v24  ;;  %v536_v27 = vpop.f32.mrb[87].mxu0  ;;  %v786_v28 = vpop.f32.mrb[87].mxu1 }
 0x1c5   :  { %v861_v29 = vmax.f32 %v535_v25, 0.0  ;;  %v911_v30 = vmax.f32 %v785_v26, 0.0 }
 0x1c6   :  { %v539_v31 = vpop.f32.mrb[88].mxu0  ;;  %v789_v32 = vpop.f32.mrb[88].mxu1 }
 0x1c7   :  { %962 = vst.msk [vmem:[%s2362_s3 + $0x158] sm:$0xff] %vm918_vm0, %v861_v29  ;;  %1012 = vst.msk [vmem:[%s2362_s3 + $0x2e8] sm:$0xff] %vm918_vm0, %v911_v30  ;;  %v540_v33 = vadd.f32 %v1857_v57, %v539_v31  ;;  %v790_v34 = vadd.f32 %v1857_v57, %v789_v32  ;;  %v541_v35 = vpop.f32.mrb[89].mxu0  ;;  %v791_v36 = vpop.f32.mrb[89].mxu1 }
 0x1c9   :  { %v862_v37 = vmax.f32 %v540_v33, 0.0  ;;  %v912_v38 = vmax.f32 %v790_v34, 0.0 }
 0x1ca   :  { %v544_v39 = vpop.f32.mrb[90].mxu0  ;;  %v794_v40 = vpop.f32.mrb[90].mxu1 }
 0x1cb   :  { %963 = vst.msk [vmem:[%s2362_s3 + $0x160] sm:$0xff] %vm918_vm0, %v862_v37  ;;  %1013 = vst.msk [vmem:[%s2362_s3 + $0x2f0] sm:$0xff] %vm918_vm0, %v912_v38  ;;  %v545_v41 = vadd.f32 %v1857_v57, %v544_v39  ;;  %v795_v42 = vadd.f32 %v1857_v57, %v794_v40  ;;  %v546_v43 = vpop.f32.mrb[91].mxu0  ;;  %v796_v44 = vpop.f32.mrb[91].mxu1 }
 0x1cd   :  { %v863_v45 = vmax.f32 %v545_v41, 0.0  ;;  %v913_v46 = vmax.f32 %v795_v42, 0.0 }
 0x1ce   :  { %v549_v47 = vpop.f32.mrb[92].mxu0  ;;  %v799_v48 = vpop.f32.mrb[92].mxu1 }
 0x1cf   :  { %964 = vst.msk [vmem:[%s2362_s3 + $0x168] sm:$0xff] %vm918_vm0, %v863_v45  ;;  %1014 = vst.msk [vmem:[%s2362_s3 + $0x2f8] sm:$0xff] %vm918_vm0, %v913_v46  ;;  %v550_v49 = vadd.f32 %v1857_v57, %v549_v47  ;;  %v800_v50 = vadd.f32 %v1857_v57, %v799_v48  ;;  %v551_v51 = vpop.f32.mrb[93].mxu0  ;;  %v801_v52 = vpop.f32.mrb[93].mxu1 }
 0x1d1   :  { %v864_v53 = vmax.f32 %v550_v49, 0.0  ;;  %v914_v54 = vmax.f32 %v800_v50, 0.0 }
 0x1d2   :  { %v554_v55 = vpop.f32.mrb[94].mxu0  ;;  %v804_v56 = vpop.f32.mrb[94].mxu1 }
 0x1d3   :  { %965 = vst.msk [vmem:[%s2362_s3 + $0x170] sm:$0xff] %vm918_vm0, %v864_v53  ;;  %1015 = vst.msk [vmem:[%s2362_s3 + $0x300] sm:$0xff] %vm918_vm0, %v914_v54  ;;  %v555_v58 = vadd.f32 %v1857_v57, %v554_v55  ;;  %v805_v59 = vadd.f32 %v1857_v57, %v804_v56  ;;  %v556_v60 = vpop.f32.mrb[95].mxu0  ;;  %v806_v61 = vpop.f32.mrb[95].mxu1 }
 0x1d5   :  { %v865_v62 = vmax.f32 %v555_v58, 0.0  ;;  %v915_v63 = vmax.f32 %v805_v59, 0.0 }
 0x1d6   :  { %v559_v0 = vpop.f32.mrb[96].mxu0  ;;  %v809_v1 = vpop.f32.mrb[96].mxu1 }
 0x1d7   :  { %966 = vst.msk [vmem:[%s2362_s3 + $0x178] sm:$0xff] %vm918_vm0, %v865_v62  ;;  %1016 = vst.msk [vmem:[%s2362_s3 + $0x308] sm:$0xff] %vm918_vm0, %v915_v63  ;;  %v560_v2 = vadd.f32 %v1857_v57, %v559_v0  ;;  %v810_v3 = vadd.f32 %v1857_v57, %v809_v1  ;;  %v561_v4 = vpop.f32.mrb[97].mxu0  ;;  %v811_v5 = vpop.f32.mrb[97].mxu1 }
 0x1d9   :  { %v866_v6 = vmax.f32 %v560_v2, 0.0  ;;  %v916_v7 = vmax.f32 %v810_v3, 0.0 }
 0x1da   :  { %v564_v8 = vpop.f32.mrb[98].mxu0  ;;  %v814_v9 = vpop.f32.mrb[98].mxu1 }
 0x1db   :  { %967 = vst.msk [vmem:[%s2362_s3 + $0x180] sm:$0xff] %vm918_vm0, %v866_v6  ;;  %1017 = vst.msk [vmem:[%s2362_s3 + $0x310] sm:$0xff] %vm918_vm0, %v916_v7  ;;  %v565_v10 = vadd.f32 %v1857_v57, %v564_v8  ;;  %v815_v11 = vadd.f32 %v1857_v57, %v814_v9  ;;  %v566_v12 = vpop.f32.mrb[99].mxu0  ;;  %v816_v13 = vpop.f32.mrb[99].mxu1 }
 0x1dd   :  { %v867_v14 = vmax.f32 %v565_v10, 0.0  ;;  %v917_v15 = vmax.f32 %v815_v11, 0.0 }
 0x1df   :  { %968 = vst.msk [vmem:[%s2362_s3 + $0x188] sm:$0xff] %vm918_vm0, %v867_v14  ;;  %1018 = vst.msk [vmem:[%s2362_s3 + $0x318] sm:$0xff] %vm918_vm0, %v917_v15 }

// kernel: flappy_bird_forward.5
= control target key start
LH: loop header
LB: loop body
LE: loop exit
PB: predicated region body
PF: predicated region fallthrough
CT: control target
= control target key end

     0   :  { %v768_v0 = vmov 0.0|0.0   ;;  %vm590_vm0 = vcmask 523264   ;;  %s1443_s1 = inlined_call_operand.vmem [shape: f32[512,64], index: 1, kind: input, shape index: {}]   ;;  %s1444_s0 = inlined_call_operand.vmem [shape: f32[200,512], index: 0, kind: input, shape index: {}]   ;;  %s1445_s2 = inlined_call_operand.vmem [shape: f32[1,64], index: 2, kind: input, shape index: {}]   ;;  %s1446_s3 = inlined_call_operand.vmem [shape: f32[200,64], index: 3, kind: output, shape index: {}]  }
   0x1   :  { %621 = vmatprep.subr.bf16.mxu1 %v768_v0  ;;  %v114_v1 = vld [vmem:[%s1443_s1] sm:$0xff]  ;;  %v115_v2 = vld [vmem:[%s1443_s1 + $0x8] sm:$0xff]  ;;  %669 = vmatprep.subr.bf16.mxu0 %v768_v0  ;;  %v116_v6 = vld [vmem:[%s1443_s1 + $0x10] sm:$0xff] }
   0x2   :  { %v146_v3 = vld [vmem:[%s1443_s1 + $0x100] sm:$0xff]  ;;  %v622_v4 = vpack.c.bf16 %v115_v2, %v114_v1  ;;  %v147_v5 = vld [vmem:[%s1443_s1 + $0x108] sm:$0xff]  ;;  %v117_v7 = vld [vmem:[%s1443_s1 + $0x18] sm:$0xff] }
   0x3   :  { %v670_v8 = vpack.c.bf16 %v147_v5, %v146_v3  ;;  %v148_v9 = vld [vmem:[%s1443_s1 + $0x110] sm:$0xff]  ;;  %v149_v10 = vld [vmem:[%s1443_s1 + $0x118] sm:$0xff]  ;;  %v625_v11 = vpack.c.bf16 %v117_v7, %v116_v6  ;;  %v118_v13 = vld [vmem:[%s1443_s1 + $0x20] sm:$0xff] }
   0x4   :  { %623 = vmatpush1.bf16.msra.mxu1 %v622_v4  ;;  %v673_v12 = vpack.c.bf16 %v149_v10, %v148_v9  ;;  %v119_v14 = vld [vmem:[%s1443_s1 + $0x28] sm:$0xff]  ;;  %v150_v15 = vld [vmem:[%s1443_s1 + $0x120] sm:$0xff]  ;;  %v120_v19 = vld [vmem:[%s1443_s1 + $0x30] sm:$0xff] }
   0x5   :  { %671 = vmatpush1.bf16.msra.mxu0 %v670_v8  ;;  %624 = vmatprep.subr.bf16.mxu1 %v768_v0  ;;  %v151_v16 = vld [vmem:[%s1443_s1 + $0x128] sm:$0xff]  ;;  %v628_v17 = vpack.c.bf16 %v119_v14, %v118_v13  ;;  %v121_v20 = vld [vmem:[%s1443_s1 + $0x38] sm:$0xff]  ;;  %v152_v21 = vld [vmem:[%s1443_s1 + $0x130] sm:$0xff] }
   0x6   :  { %672 = vmatprep.subr.bf16.mxu0 %v768_v0  ;;  %v676_v18 = vpack.c.bf16 %v151_v16, %v150_v15  ;;  %v153_v22 = vld [vmem:[%s1443_s1 + $0x138] sm:$0xff]  ;;  %v631_v23 = vpack.c.bf16 %v121_v20, %v120_v19  ;;  %v122_v25 = vld [vmem:[%s1443_s1 + $0x40] sm:$0xff]  ;;  %v123_v26 = vld [vmem:[%s1443_s1 + $0x48] sm:$0xff] }
   0x7   :  { %v679_v24 = vpack.c.bf16 %v153_v22, %v152_v21  ;;  %v154_v27 = vld [vmem:[%s1443_s1 + $0x140] sm:$0xff]  ;;  %v155_v28 = vld [vmem:[%s1443_s1 + $0x148] sm:$0xff]  ;;  %v634_v29 = vpack.c.bf16 %v123_v26, %v122_v25  ;;  %v124_v31 = vld [vmem:[%s1443_s1 + $0x50] sm:$0xff] }
   0x8   :  { %626 = vmatpush1.bf16.msra.mxu1 %v625_v11  ;;  %v682_v30 = vpack.c.bf16 %v155_v28, %v154_v27  ;;  %v125_v32 = vld [vmem:[%s1443_s1 + $0x58] sm:$0xff]  ;;  %v156_v33 = vld [vmem:[%s1443_s1 + $0x150] sm:$0xff]  ;;  %v126_v37 = vld [vmem:[%s1443_s1 + $0x60] sm:$0xff] }
   0x9   :  { %674 = vmatpush1.bf16.msra.mxu0 %v673_v12  ;;  %627 = vmatprep.subr.bf16.mxu1 %v768_v0  ;;  %v157_v34 = vld [vmem:[%s1443_s1 + $0x158] sm:$0xff]  ;;  %v637_v35 = vpack.c.bf16 %v125_v32, %v124_v31  ;;  %v127_v38 = vld [vmem:[%s1443_s1 + $0x68] sm:$0xff]  ;;  %v158_v39 = vld [vmem:[%s1443_s1 + $0x160] sm:$0xff] }
   0xa   :  { %675 = vmatprep.subr.bf16.mxu0 %v768_v0  ;;  %v685_v36 = vpack.c.bf16 %v157_v34, %v156_v33  ;;  %v159_v40 = vld [vmem:[%s1443_s1 + $0x168] sm:$0xff]  ;;  %v17_v42 = vld [vmem:[%s1444_s0 + $0x18] sm:$0xff]  ;;  %v640_v43 = vpack.c.bf16 %v127_v38, %v126_v37  ;;  %v128_v45 = vld [vmem:[%s1443_s1 + $0x70] sm:$0xff] }
   0xb   :  { %v15_v41 = vld [vmem:[%s1444_s0 + $0x8] sm:$0xff]  ;;  %439 = vmatprep.mubr.f32.mxu0 %v17_v42  ;;  %v688_v44 = vpack.c.bf16 %v159_v40, %v158_v39  ;;  %v129_v46 = vld [vmem:[%s1443_s1 + $0x78] sm:$0xff]  ;;  %v160_v47 = vld [vmem:[%s1443_s1 + $0x170] sm:$0xff] }
   0xc   :  { %629 = vmatpush1.bf16.msra.mxu1 %v628_v17  ;;  %249 = vmatprep.mubr.f32.mxu1 %v15_v41  ;;  %v161_v48 = vld [vmem:[%s1443_s1 + $0x178] sm:$0xff]  ;;  %v643_v49 = vpack.c.bf16 %v129_v46, %v128_v45  ;;  %v130_v51 = vld [vmem:[%s1443_s1 + $0x80] sm:$0xff]  ;;  %v131_v52 = vld [vmem:[%s1443_s1 + $0x88] sm:$0xff] }
   0xd   :  { %677 = vmatpush1.bf16.msra.mxu0 %v676_v18  ;;  %630 = vmatprep.subr.bf16.mxu1 %v768_v0  ;;  %v691_v50 = vpack.c.bf16 %v161_v48, %v160_v47  ;;  %v162_v53 = vld [vmem:[%s1443_s1 + $0x180] sm:$0xff]  ;;  %v163_v54 = vld [vmem:[%s1443_s1 + $0x188] sm:$0xff]  ;;  %v646_v55 = vpack.c.bf16 %v131_v52, %v130_v51  ;;  %v132_v57 = vld [vmem:[%s1443_s1 + $0x90] sm:$0xff] }
   0xe   :  { %678 = vmatprep.subr.bf16.mxu0 %v768_v0  ;;  %v694_v56 = vpack.c.bf16 %v163_v54, %v162_v53  ;;  %v133_v58 = vld [vmem:[%s1443_s1 + $0x98] sm:$0xff]  ;;  %v164_v59 = vld [vmem:[%s1443_s1 + $0x190] sm:$0xff]  ;;  %v134_v63 = vld [vmem:[%s1443_s1 + $0xa0] sm:$0xff] }
   0xf   :  { %v165_v60 = vld [vmem:[%s1443_s1 + $0x198] sm:$0xff]  ;;  %v649_v61 = vpack.c.bf16 %v133_v58, %v132_v57  ;;  %v135_v1 = vld [vmem:[%s1443_s1 + $0xa8] sm:$0xff]  ;;  %v166_v2 = vld [vmem:[%s1443_s1 + $0x1a0] sm:$0xff] }
  0x10   :  { %632 = vmatpush1.bf16.msra.mxu1 %v631_v23  ;;  %v697_v62 = vpack.c.bf16 %v165_v60, %v164_v59  ;;  %v167_v3 = vld [vmem:[%s1443_s1 + $0x1a8] sm:$0xff]  ;;  %v652_v4 = vpack.c.bf16 %v135_v1, %v134_v63  ;;  %v136_v6 = vld [vmem:[%s1443_s1 + $0xb0] sm:$0xff]  ;;  %v137_v7 = vld [vmem:[%s1443_s1 + $0xb8] sm:$0xff] }
  0x11   :  { %680 = vmatpush1.bf16.msra.mxu0 %v679_v24  ;;  %633 = vmatprep.subr.bf16.mxu1 %v768_v0  ;;  %v700_v5 = vpack.c.bf16 %v167_v3, %v166_v2  ;;  %v168_v8 = vld [vmem:[%s1443_s1 + $0x1b0] sm:$0xff]  ;;  %v169_v9 = vld [vmem:[%s1443_s1 + $0x1b8] sm:$0xff]  ;;  %v655_v10 = vpack.c.bf16 %v137_v7, %v136_v6  ;;  %v138_v12 = vld [vmem:[%s1443_s1 + $0xc0] sm:$0xff] }
  0x12   :  { %681 = vmatprep.subr.bf16.mxu0 %v768_v0  ;;  %v703_v11 = vpack.c.bf16 %v169_v9, %v168_v8  ;;  %v139_v13 = vld [vmem:[%s1443_s1 + $0xc8] sm:$0xff]  ;;  %v170_v14 = vld [vmem:[%s1443_s1 + $0x1c0] sm:$0xff]  ;;  %v140_v18 = vld [vmem:[%s1443_s1 + $0xd0] sm:$0xff] }
  0x13   :  { %v171_v15 = vld [vmem:[%s1443_s1 + $0x1c8] sm:$0xff]  ;;  %v658_v16 = vpack.c.bf16 %v139_v13, %v138_v12  ;;  %v141_v19 = vld [vmem:[%s1443_s1 + $0xd8] sm:$0xff]  ;;  %v172_v20 = vld [vmem:[%s1443_s1 + $0x1d0] sm:$0xff] }
  0x14   :  { %635 = vmatpush1.bf16.msra.mxu1 %v634_v29  ;;  %v706_v17 = vpack.c.bf16 %v171_v15, %v170_v14  ;;  %v173_v21 = vld [vmem:[%s1443_s1 + $0x1d8] sm:$0xff]  ;;  %v661_v22 = vpack.c.bf16 %v141_v19, %v140_v18  ;;  %v142_v24 = vld [vmem:[%s1443_s1 + $0xe0] sm:$0xff]  ;;  %v143_v25 = vld [vmem:[%s1443_s1 + $0xe8] sm:$0xff] }
  0x15   :  { %683 = vmatpush1.bf16.msra.mxu0 %v682_v30  ;;  %636 = vmatprep.subr.bf16.mxu1 %v768_v0  ;;  %v709_v23 = vpack.c.bf16 %v173_v21, %v172_v20  ;;  %v174_v26 = vld [vmem:[%s1443_s1 + $0x1e0] sm:$0xff]  ;;  %v175_v27 = vld [vmem:[%s1443_s1 + $0x1e8] sm:$0xff]  ;;  %v664_v28 = vpack.c.bf16 %v143_v25, %v142_v24  ;;  %v144_v30 = vld [vmem:[%s1443_s1 + $0xf0] sm:$0xff] }
  0x16   :  { %684 = vmatprep.subr.bf16.mxu0 %v768_v0  ;;  %v712_v29 = vpack.c.bf16 %v175_v27, %v174_v26  ;;  %v145_v31 = vld [vmem:[%s1443_s1 + $0xf8] sm:$0xff]  ;;  %v176_v32 = vld [vmem:[%s1443_s1 + $0x1f0] sm:$0xff]  ;;  %v19_v38 = vld [vmem:[%s1444_s0 + $0x28] sm:$0xff] }
  0x17   :  { %v177_v33 = vld [vmem:[%s1443_s1 + $0x1f8] sm:$0xff]  ;;  %v667_v34 = vpack.c.bf16 %v145_v31, %v144_v30  ;;  %v16_v37 = vld [vmem:[%s1444_s0 + $0x10] sm:$0xff]  ;;  %v23_v41 = vld [vmem:[%s1444_s0 + $0x48] sm:$0xff] }
  0x18   :  { %638 = vmatpush1.bf16.msra.mxu1 %v637_v35  ;;  %v715_v35 = vpack.c.bf16 %v177_v33, %v176_v32  ;;  %v21_v39 = vld [vmem:[%s1444_s0 + $0x38] sm:$0xff]  ;;  %v20_v40 = vld [vmem:[%s1444_s0 + $0x30] sm:$0xff]  ;;  %v27_v45 = vld [vmem:[%s1444_s0 + $0x68] sm:$0xff] }
  0x19   :  { %686 = vmatpush1.bf16.msra.mxu0 %v685_v36  ;;  %639 = vmatprep.subr.bf16.mxu1 %v768_v0  ;;  %v14_v36 = vld [vmem:[%s1444_s0] sm:$0xff]  ;;  %v25_v42 = vld [vmem:[%s1444_s0 + $0x58] sm:$0xff]  ;;  %v28_v48 = vld [vmem:[%s1444_s0 + $0x70] sm:$0xff] }
  0x1a   :  { %687 = vmatprep.subr.bf16.mxu0 %v768_v0  ;;  %v29_v46 = vld [vmem:[%s1444_s0 + $0x78] sm:$0xff]  ;;  %v26_v47 = vld [vmem:[%s1444_s0 + $0x60] sm:$0xff]  ;;  %v32_v52 = vld [vmem:[%s1444_s0 + $0x90] sm:$0xff] }
  0x1b   :  { %v30_v51 = vld [vmem:[%s1444_s0 + $0x80] sm:$0xff]  ;;  %v35_v53 = vld [vmem:[%s1444_s0 + $0xa8] sm:$0xff]  ;;  %v37_v54 = vld [vmem:[%s1444_s0 + $0xb8] sm:$0xff] }
  0x1c   :  { %641 = vmatpush1.bf16.msra.mxu1 %v640_v43  ;;  %v22_v43 = vld [vmem:[%s1444_s0 + $0x40] sm:$0xff]  ;;  %v39_v57 = vld [vmem:[%s1444_s0 + $0xc8] sm:$0xff]  ;;  %v41_v58 = vld [vmem:[%s1444_s0 + $0xd8] sm:$0xff] }
  0x1d   :  { %689 = vmatpush1.bf16.msra.mxu0 %v688_v44  ;;  %642 = vmatprep.subr.bf16.mxu1 %v768_v0  ;;  %v24_v44 = vld [vmem:[%s1444_s0 + $0x50] sm:$0xff]  ;;  %v38_v59 = vld [vmem:[%s1444_s0 + $0xc0] sm:$0xff]  ;;  %v47_v2 = vld [vmem:[%s1444_s0 + $0x108] sm:$0xff] }
  0x1e   :  { %690 = vmatprep.subr.bf16.mxu0 %v768_v0  ;;  %v40_v60 = vld [vmem:[%s1444_s0 + $0xd0] sm:$0xff]  ;;  %v42_v63 = vld [vmem:[%s1444_s0 + $0xe0] sm:$0xff]  ;;  %v49_v3 = vld [vmem:[%s1444_s0 + $0x118] sm:$0xff] }
  0x1f   :  { %v44_v1 = vld [vmem:[%s1444_s0 + $0xf0] sm:$0xff]  ;;  %v51_v6 = vld [vmem:[%s1444_s0 + $0x128] sm:$0xff]  ;;  %v53_v7 = vld [vmem:[%s1444_s0 + $0x138] sm:$0xff] }
  0x20   :  { %644 = vmatpush1.bf16.msra.mxu1 %v643_v49  ;;  %v31_v49 = vld [vmem:[%s1444_s0 + $0x88] sm:$0xff]  ;;  %v50_v8 = vld [vmem:[%s1444_s0 + $0x120] sm:$0xff]  ;;  %v52_v9 = vld [vmem:[%s1444_s0 + $0x130] sm:$0xff] }
  0x21   :  { %692 = vmatpush1.bf16.msra.mxu0 %v691_v50  ;;  %645 = vmatprep.subr.bf16.mxu1 %v768_v0  ;;  %v33_v50 = vld [vmem:[%s1444_s0 + $0x98] sm:$0xff]  ;;  %v54_v12 = vld [vmem:[%s1444_s0 + $0x140] sm:$0xff]  ;;  %v56_v13 = vld [vmem:[%s1444_s0 + $0x150] sm:$0xff] }
  0x22   :  { %693 = vmatprep.subr.bf16.mxu0 %v768_v0  ;;  %v59_v14 = vld [vmem:[%s1444_s0 + $0x168] sm:$0xff]  ;;  %v61_v15 = vld [vmem:[%s1444_s0 + $0x178] sm:$0xff]  ;;  %v62_v20 = vld [vmem:[%s1444_s0 + $0x180] sm:$0xff] }
  0x23   :  { %v63_v18 = vld [vmem:[%s1444_s0 + $0x188] sm:$0xff]  ;;  %v65_v19 = vld [vmem:[%s1444_s0 + $0x198] sm:$0xff]  ;;  %v64_v21 = vld [vmem:[%s1444_s0 + $0x190] sm:$0xff] }
  0x24   :  { %647 = vmatpush1.bf16.msra.mxu1 %v646_v55  ;;  %v34_v55 = vld [vmem:[%s1444_s0 + $0xa0] sm:$0xff]  ;;  %v68_v25 = vld [vmem:[%s1444_s0 + $0x1b0] sm:$0xff]  ;;  %v71_v26 = vld [vmem:[%s1444_s0 + $0x1c8] sm:$0xff] }
  0x25   :  { %695 = vmatpush1.bf16.msra.mxu0 %v694_v56  ;;  %648 = vmatprep.subr.bf16.mxu1 %v768_v0  ;;  %v36_v56 = vld [vmem:[%s1444_s0 + $0xb0] sm:$0xff]  ;;  %v66_v24 = vld [vmem:[%s1444_s0 + $0x1a0] sm:$0xff]  ;;  %v73_v27 = vld [vmem:[%s1444_s0 + $0x1d8] sm:$0xff] }
  0x26   :  { %696 = vmatprep.subr.bf16.mxu0 %v768_v0  ;;  %v75_v30 = vld [vmem:[%s1444_s0 + $0x1e8] sm:$0xff]  ;;  %v77_v31 = vld [vmem:[%s1444_s0 + $0x1f8] sm:$0xff]  ;;  %v74_v32 = vld [vmem:[%s1444_s0 + $0x1e0] sm:$0xff] }
  0x27   :  { %v76_v33 = vld [vmem:[%s1444_s0 + $0x1f0] sm:$0xff] }
  0x28   :  { %650 = vmatpush1.bf16.msra.mxu1 %v649_v61  ;;  %v43_v61 = vld [vmem:[%s1444_s0 + $0xe8] sm:$0xff] }
  0x29   :  { %698 = vmatpush1.bf16.msra.mxu0 %v697_v62  ;;  %651 = vmatprep.subr.bf16.mxu1 %v768_v0  ;;  %v45_v62 = vld [vmem:[%s1444_s0 + $0xf8] sm:$0xff] }
  0x2a   :  { %699 = vmatprep.subr.bf16.mxu0 %v768_v0 }
  0x2c   :  { %653 = vmatpush1.bf16.msra.mxu1 %v652_v4  ;;  %v46_v4 = vld [vmem:[%s1444_s0 + $0x100] sm:$0xff] }
  0x2d   :  { %701 = vmatpush1.bf16.msra.mxu0 %v700_v5  ;;  %654 = vmatprep.subr.bf16.mxu1 %v768_v0  ;;  %v48_v5 = vld [vmem:[%s1444_s0 + $0x110] sm:$0xff] }
  0x2e   :  { %702 = vmatprep.subr.bf16.mxu0 %v768_v0 }
  0x30   :  { %656 = vmatpush1.bf16.msra.mxu1 %v655_v10  ;;  %v55_v10 = vld [vmem:[%s1444_s0 + $0x148] sm:$0xff] }
  0x31   :  { %704 = vmatpush1.bf16.msra.mxu0 %v703_v11  ;;  %657 = vmatprep.subr.bf16.mxu1 %v768_v0  ;;  %v57_v11 = vld [vmem:[%s1444_s0 + $0x158] sm:$0xff] }
  0x32   :  { %705 = vmatprep.subr.bf16.mxu0 %v768_v0 }
  0x34   :  { %659 = vmatpush1.bf16.msra.mxu1 %v658_v16  ;;  %v58_v16 = vld [vmem:[%s1444_s0 + $0x160] sm:$0xff] }
  0x35   :  { %707 = vmatpush1.bf16.msra.mxu0 %v706_v17  ;;  %660 = vmatprep.subr.bf16.mxu1 %v768_v0  ;;  %v60_v17 = vld [vmem:[%s1444_s0 + $0x170] sm:$0xff] }
  0x36   :  { %708 = vmatprep.subr.bf16.mxu0 %v768_v0 }
  0x38   :  { %662 = vmatpush1.bf16.msra.mxu1 %v661_v22  ;;  %v67_v22 = vld [vmem:[%s1444_s0 + $0x1a8] sm:$0xff] }
  0x39   :  { %710 = vmatpush1.bf16.msra.mxu0 %v709_v23  ;;  %663 = vmatprep.subr.bf16.mxu1 %v768_v0  ;;  %v69_v23 = vld [vmem:[%s1444_s0 + $0x1b8] sm:$0xff] }
  0x3a   :  { %711 = vmatprep.subr.bf16.mxu0 %v768_v0 }
  0x3c   :  { %665 = vmatpush1.bf16.msra.mxu1 %v664_v28  ;;  %v70_v28 = vld [vmem:[%s1444_s0 + $0x1c0] sm:$0xff] }
  0x3d   :  { %713 = vmatpush1.bf16.msra.mxu0 %v712_v29  ;;  %666 = vmatprep.subr.bf16.mxu1 %v768_v0  ;;  %v72_v29 = vld [vmem:[%s1444_s0 + $0x1d0] sm:$0xff] }
  0x3e   :  { %714 = vmatprep.subr.bf16.mxu0 %v768_v0  ;;  %v18_v0 = vld [vmem:[%s1444_s0 + $0x20] sm:$0xff] }
  0x40   :  { %668 = vmatpush1.bf16.msra.mxu1 %v667_v34  ;;  %v79_v34 = vld [vmem:[%s1444_s0 + $0x208] sm:$0xff] }
  0x41   :  { %716 = vmatpush1.bf16.msra.mxu0 %v715_v35  ;;  %v81_v35 = vld [vmem:[%s1444_s0 + $0x218] sm:$0xff] }
  0x43   :  { %250 = vmatmul.mubr.f32.vlgmr.msra.gmra.mrb[0].mxu1 %v14_v36  ;;  %v78_v36 = vld [vmem:[%s1444_s0 + $0x200] sm:$0xff] }
  0x44   :  { %440 = vmatmul.mubr.f32.vlgmr.msra.gmra.mrb[0].mxu0 %v16_v37  ;;  %254 = vmatprep.mubr.f32.mxu1 %v19_v38  ;;  %v80_v37 = vld [vmem:[%s1444_s0 + $0x210] sm:$0xff]  ;;  %v83_v38 = vld [vmem:[%s1444_s0 + $0x228] sm:$0xff] }
  0x45   :  { %444 = vmatprep.mubr.f32.mxu0 %v21_v39  ;;  %v85_v39 = vld [vmem:[%s1444_s0 + $0x238] sm:$0xff] }
  0x47   :  { %255 = vmatmul.mubr.f32.gmra.mrb[2].mxu1 %v18_v0  ;;  %v82_v0 = vld [vmem:[%s1444_s0 + $0x220] sm:$0xff] }
  0x48   :  { %445 = vmatmul.mubr.f32.gmra.mrb[2].mxu0 %v20_v40  ;;  %259 = vmatprep.mubr.f32.mxu1 %v23_v41  ;;  %v84_v40 = vld [vmem:[%s1444_s0 + $0x230] sm:$0xff]  ;;  %v87_v41 = vld [vmem:[%s1444_s0 + $0x248] sm:$0xff] }
  0x49   :  { %449 = vmatprep.mubr.f32.mxu0 %v25_v42  ;;  %v89_v42 = vld [vmem:[%s1444_s0 + $0x258] sm:$0xff] }
  0x4b   :  { %260 = vmatmul.mubr.f32.gmra.mrb[4].mxu1 %v22_v43  ;;  %v86_v43 = vld [vmem:[%s1444_s0 + $0x240] sm:$0xff] }
  0x4c   :  { %450 = vmatmul.mubr.f32.gmra.mrb[4].mxu0 %v24_v44  ;;  %264 = vmatprep.mubr.f32.mxu1 %v27_v45  ;;  %v88_v44 = vld [vmem:[%s1444_s0 + $0x250] sm:$0xff]  ;;  %v91_v45 = vld [vmem:[%s1444_s0 + $0x268] sm:$0xff] }
  0x4d   :  { %454 = vmatprep.mubr.f32.mxu0 %v29_v46  ;;  %v93_v46 = vld [vmem:[%s1444_s0 + $0x278] sm:$0xff] }
  0x4f   :  { %265 = vmatmul.mubr.f32.gmra.mrb[6].mxu1 %v26_v47  ;;  %v90_v47 = vld [vmem:[%s1444_s0 + $0x260] sm:$0xff] }
  0x50   :  { %455 = vmatmul.mubr.f32.gmra.mrb[6].mxu0 %v28_v48  ;;  %269 = vmatprep.mubr.f32.mxu1 %v31_v49  ;;  %v92_v48 = vld [vmem:[%s1444_s0 + $0x270] sm:$0xff]  ;;  %v95_v49 = vld [vmem:[%s1444_s0 + $0x288] sm:$0xff] }
  0x51   :  { %459 = vmatprep.mubr.f32.mxu0 %v33_v50  ;;  %v97_v50 = vld [vmem:[%s1444_s0 + $0x298] sm:$0xff] }
  0x53   :  { %270 = vmatmul.mubr.f32.gmra.mrb[8].mxu1 %v30_v51  ;;  %v94_v51 = vld [vmem:[%s1444_s0 + $0x280] sm:$0xff] }
  0x54   :  { %460 = vmatmul.mubr.f32.gmra.mrb[8].mxu0 %v32_v52  ;;  %274 = vmatprep.mubr.f32.mxu1 %v35_v53  ;;  %v96_v52 = vld [vmem:[%s1444_s0 + $0x290] sm:$0xff]  ;;  %v99_v53 = vld [vmem:[%s1444_s0 + $0x2a8] sm:$0xff] }
  0x55   :  { %464 = vmatprep.mubr.f32.mxu0 %v37_v54  ;;  %v101_v54 = vld [vmem:[%s1444_s0 + $0x2b8] sm:$0xff] }
  0x57   :  { %275 = vmatmul.mubr.f32.gmra.mrb[10].mxu1 %v34_v55  ;;  %v98_v55 = vld [vmem:[%s1444_s0 + $0x2a0] sm:$0xff] }
  0x58   :  { %465 = vmatmul.mubr.f32.gmra.mrb[10].mxu0 %v36_v56  ;;  %279 = vmatprep.mubr.f32.mxu1 %v39_v57  ;;  %v100_v56 = vld [vmem:[%s1444_s0 + $0x2b0] sm:$0xff]  ;;  %v103_v57 = vld [vmem:[%s1444_s0 + $0x2c8] sm:$0xff] }
  0x59   :  { %469 = vmatprep.mubr.f32.mxu0 %v41_v58  ;;  %v105_v58 = vld [vmem:[%s1444_s0 + $0x2d8] sm:$0xff] }
  0x5b   :  { %280 = vmatmul.mubr.f32.gmra.mrb[12].mxu1 %v38_v59  ;;  %v102_v59 = vld [vmem:[%s1444_s0 + $0x2c0] sm:$0xff] }
  0x5c   :  { %470 = vmatmul.mubr.f32.gmra.mrb[12].mxu0 %v40_v60  ;;  %284 = vmatprep.mubr.f32.mxu1 %v43_v61  ;;  %v104_v60 = vld [vmem:[%s1444_s0 + $0x2d0] sm:$0xff]  ;;  %v107_v61 = vld [vmem:[%s1444_s0 + $0x2e8] sm:$0xff] }
  0x5d   :  { %474 = vmatprep.mubr.f32.mxu0 %v45_v62  ;;  %v109_v62 = vld [vmem:[%s1444_s0 + $0x2f8] sm:$0xff] }
  0x5f   :  { %285 = vmatmul.mubr.f32.gmra.mrb[14].mxu1 %v42_v63  ;;  %v106_v63 = vld [vmem:[%s1444_s0 + $0x2e0] sm:$0xff] }
  0x60   :  { %475 = vmatmul.mubr.f32.gmra.mrb[14].mxu0 %v44_v1  ;;  %289 = vmatprep.mubr.f32.mxu1 %v47_v2  ;;  %v108_v1 = vld [vmem:[%s1444_s0 + $0x2f0] sm:$0xff]  ;;  %v111_v2 = vld [vmem:[%s1444_s0 + $0x308] sm:$0xff] }
  0x61   :  { %479 = vmatprep.mubr.f32.mxu0 %v49_v3  ;;  %v113_v3 = vld [vmem:[%s1444_s0 + $0x318] sm:$0xff] }
  0x63   :  { %290 = vmatmul.mubr.f32.gmra.mrb[16].mxu1 %v46_v4  ;;  %v110_v4 = vld [vmem:[%s1444_s0 + $0x300] sm:$0xff] }
  0x64   :  { %480 = vmatmul.mubr.f32.gmra.mrb[16].mxu0 %v48_v5  ;;  %294 = vmatprep.mubr.f32.mxu1 %v51_v6  ;;  %v112_v5 = vld [vmem:[%s1444_s0 + $0x310] sm:$0xff]  ;;  %v1316_v6 = vld [vmem:[%s1445_s2] ss:$0 sm:$0xff] }
  0x65   :  { %484 = vmatprep.mubr.f32.mxu0 %v53_v7 }
  0x67   :  { %295 = vmatmul.mubr.f32.gmra.mrb[18].mxu1 %v50_v8 }
  0x68   :  { %485 = vmatmul.mubr.f32.gmra.mrb[18].mxu0 %v52_v9  ;;  %299 = vmatprep.mubr.f32.mxu1 %v55_v10 }
  0x69   :  { %489 = vmatprep.mubr.f32.mxu0 %v57_v11 }
  0x6b   :  { %300 = vmatmul.mubr.f32.gmra.mrb[20].mxu1 %v54_v12 }
  0x6c   :  { %490 = vmatmul.mubr.f32.gmra.mrb[20].mxu0 %v56_v13  ;;  %304 = vmatprep.mubr.f32.mxu1 %v59_v14 }
  0x6d   :  { %494 = vmatprep.mubr.f32.mxu0 %v61_v15 }
  0x6f   :  { %305 = vmatmul.mubr.f32.gmra.mrb[22].mxu1 %v58_v16 }
  0x70   :  { %495 = vmatmul.mubr.f32.gmra.mrb[22].mxu0 %v60_v17  ;;  %309 = vmatprep.mubr.f32.mxu1 %v63_v18 }
  0x71   :  { %499 = vmatprep.mubr.f32.mxu0 %v65_v19 }
  0x73   :  { %310 = vmatmul.mubr.f32.gmra.mrb[24].mxu1 %v62_v20 }
  0x74   :  { %500 = vmatmul.mubr.f32.gmra.mrb[24].mxu0 %v64_v21  ;;  %314 = vmatprep.mubr.f32.mxu1 %v67_v22 }
  0x75   :  { %504 = vmatprep.mubr.f32.mxu0 %v69_v23 }
  0x77   :  { %315 = vmatmul.mubr.f32.gmra.mrb[26].mxu1 %v66_v24 }
  0x78   :  { %505 = vmatmul.mubr.f32.gmra.mrb[26].mxu0 %v68_v25  ;;  %319 = vmatprep.mubr.f32.mxu1 %v71_v26 }
  0x79   :  { %509 = vmatprep.mubr.f32.mxu0 %v73_v27 }
  0x7b   :  { %320 = vmatmul.mubr.f32.gmra.mrb[28].mxu1 %v70_v28 }
  0x7c   :  { %510 = vmatmul.mubr.f32.gmra.mrb[28].mxu0 %v72_v29  ;;  %324 = vmatprep.mubr.f32.mxu1 %v75_v30 }
  0x7d   :  { %514 = vmatprep.mubr.f32.mxu0 %v77_v31 }
  0x7f   :  { %325 = vmatmul.mubr.f32.gmra.mrb[30].mxu1 %v74_v32 }
  0x80   :  { %515 = vmatmul.mubr.f32.gmra.mrb[30].mxu0 %v76_v33  ;;  %329 = vmatprep.mubr.f32.mxu1 %v79_v34 }
  0x81   :  { %519 = vmatprep.mubr.f32.mxu0 %v81_v35 }
  0x83   :  { %330 = vmatmul.mubr.f32.gmra.mrb[32].mxu1 %v78_v36 }
  0x84   :  { %520 = vmatmul.mubr.f32.gmra.mrb[32].mxu0 %v80_v37  ;;  %334 = vmatprep.mubr.f32.mxu1 %v83_v38 }
  0x85   :  { %524 = vmatprep.mubr.f32.mxu0 %v85_v39 }
  0x87   :  { %335 = vmatmul.mubr.f32.gmra.mrb[34].mxu1 %v82_v0 }
  0x88   :  { %525 = vmatmul.mubr.f32.gmra.mrb[34].mxu0 %v84_v40  ;;  %339 = vmatprep.mubr.f32.mxu1 %v87_v41 }
  0x89   :  { %529 = vmatprep.mubr.f32.mxu0 %v89_v42 }
  0x8b   :  { %340 = vmatmul.mubr.f32.gmra.mrb[36].mxu1 %v86_v43 }
  0x8c   :  { %530 = vmatmul.mubr.f32.gmra.mrb[36].mxu0 %v88_v44  ;;  %344 = vmatprep.mubr.f32.mxu1 %v91_v45 }
  0x8d   :  { %534 = vmatprep.mubr.f32.mxu0 %v93_v46 }
  0x8f   :  { %345 = vmatmul.mubr.f32.gmra.mrb[38].mxu1 %v90_v47 }
  0x90   :  { %535 = vmatmul.mubr.f32.gmra.mrb[38].mxu0 %v92_v48  ;;  %349 = vmatprep.mubr.f32.mxu1 %v95_v49 }
  0x91   :  { %539 = vmatprep.mubr.f32.mxu0 %v97_v50 }
  0x93   :  { %350 = vmatmul.mubr.f32.gmra.mrb[40].mxu1 %v94_v51 }
  0x94   :  { %540 = vmatmul.mubr.f32.gmra.mrb[40].mxu0 %v96_v52  ;;  %354 = vmatprep.mubr.f32.mxu1 %v99_v53 }
  0x95   :  { %544 = vmatprep.mubr.f32.mxu0 %v101_v54 }
  0x97   :  { %355 = vmatmul.mubr.f32.gmra.mrb[42].mxu1 %v98_v55 }
  0x98   :  { %545 = vmatmul.mubr.f32.gmra.mrb[42].mxu0 %v100_v56  ;;  %359 = vmatprep.mubr.f32.mxu1 %v103_v57 }
  0x99   :  { %549 = vmatprep.mubr.f32.mxu0 %v105_v58 }
  0x9b   :  { %360 = vmatmul.mubr.f32.gmra.mrb[44].mxu1 %v102_v59 }
  0x9c   :  { %550 = vmatmul.mubr.f32.gmra.mrb[44].mxu0 %v104_v60  ;;  %364 = vmatprep.mubr.f32.mxu1 %v107_v61 }
  0x9d   :  { %554 = vmatprep.mubr.f32.mxu0 %v109_v62 }
  0x9f   :  { %365 = vmatmul.mubr.f32.gmra.mrb[46].mxu1 %v106_v63 }
  0xa0   :  { %555 = vmatmul.mubr.f32.gmra.mrb[46].mxu0 %v108_v1  ;;  %369 = vmatprep.mubr.f32.mxu1 %v111_v2 }
  0xa1   :  { %559 = vmatprep.mubr.f32.mxu0 %v113_v3 }
  0xa3   :  { %370 = vmatmul.mubr.f32.gmra.mrb[48].mxu1 %v110_v4 }
  0xa4   :  { %560 = vmatmul.mubr.f32.gmra.mrb[48].mxu0 %v112_v5 }
 0x116   :  { %v251_v7 = vpop.f32.mrb[0].mxu1 }
 0x117   :  { %v252_v8 = vadd.f32 %v1316_v6, %v251_v7  ;;  %v253_v9 = vpop.f32.mrb[1].mxu1  ;;  %v441_v10 = vpop.f32.mrb[0].mxu0 }
 0x118   :  { %v443_v11 = vpop.f32.mrb[1].mxu0 }
 0x119   :  { %v442_v12 = vadd.f32 %v441_v10, %v252_v8 }
 0x11a   :  { %v256_v13 = vpop.f32.mrb[2].mxu1 }
 0x11b   :  { %v565_v14 = vmax.f32 %v442_v12, 0.0  ;;  %v257_v15 = vadd.f32 %v1316_v6, %v256_v13  ;;  %v258_v16 = vpop.f32.mrb[3].mxu1  ;;  %v446_v17 = vpop.f32.mrb[2].mxu0 }
 0x11c   :  { %v448_v18 = vpop.f32.mrb[3].mxu0 }
 0x11d   :  { %591 = vst.msk [vmem:[%s1446_s3] sm:$0xff] %vm590_vm0, %v565_v14  ;;  %v447_v19 = vadd.f32 %v446_v17, %v257_v15 }
 0x11e   :  { %v261_v20 = vpop.f32.mrb[4].mxu1 }
 0x11f   :  { %v566_v21 = vmax.f32 %v447_v19, 0.0  ;;  %v262_v22 = vadd.f32 %v1316_v6, %v261_v20  ;;  %v263_v23 = vpop.f32.mrb[5].mxu1  ;;  %v451_v24 = vpop.f32.mrb[4].mxu0 }
 0x120   :  { %v453_v25 = vpop.f32.mrb[5].mxu0 }
 0x121   :  { %592 = vst.msk [vmem:[%s1446_s3 + $0x8] sm:$0xff] %vm590_vm0, %v566_v21  ;;  %v452_v26 = vadd.f32 %v451_v24, %v262_v22 }
 0x122   :  { %v266_v27 = vpop.f32.mrb[6].mxu1 }
 0x123   :  { %v567_v28 = vmax.f32 %v452_v26, 0.0  ;;  %v267_v29 = vadd.f32 %v1316_v6, %v266_v27  ;;  %v268_v30 = vpop.f32.mrb[7].mxu1  ;;  %v456_v31 = vpop.f32.mrb[6].mxu0 }
 0x124   :  { %v458_v32 = vpop.f32.mrb[7].mxu0 }
 0x125   :  { %593 = vst.msk [vmem:[%s1446_s3 + $0x10] sm:$0xff] %vm590_vm0, %v567_v28  ;;  %v457_v33 = vadd.f32 %v456_v31, %v267_v29 }
 0x126   :  { %v271_v34 = vpop.f32.mrb[8].mxu1 }
 0x127   :  { %v568_v35 = vmax.f32 %v457_v33, 0.0  ;;  %v272_v36 = vadd.f32 %v1316_v6, %v271_v34  ;;  %v273_v37 = vpop.f32.mrb[9].mxu1  ;;  %v461_v38 = vpop.f32.mrb[8].mxu0 }
 0x128   :  { %v463_v39 = vpop.f32.mrb[9].mxu0 }
 0x129   :  { %594 = vst.msk [vmem:[%s1446_s3 + $0x18] sm:$0xff] %vm590_vm0, %v568_v35  ;;  %v462_v0 = vadd.f32 %v461_v38, %v272_v36 }
 0x12a   :  { %v276_v40 = vpop.f32.mrb[10].mxu1 }
 0x12b   :  { %v569_v41 = vmax.f32 %v462_v0, 0.0  ;;  %v277_v42 = vadd.f32 %v1316_v6, %v276_v40  ;;  %v278_v43 = vpop.f32.mrb[11].mxu1  ;;  %v466_v44 = vpop.f32.mrb[10].mxu0 }
 0x12c   :  { %v468_v45 = vpop.f32.mrb[11].mxu0 }
 0x12d   :  { %595 = vst.msk [vmem:[%s1446_s3 + $0x20] sm:$0xff] %vm590_vm0, %v569_v41  ;;  %v467_v46 = vadd.f32 %v466_v44, %v277_v42 }
 0x12e   :  { %v281_v47 = vpop.f32.mrb[12].mxu1 }
 0x12f   :  { %v570_v48 = vmax.f32 %v467_v46, 0.0  ;;  %v282_v49 = vadd.f32 %v1316_v6, %v281_v47  ;;  %v283_v50 = vpop.f32.mrb[13].mxu1  ;;  %v471_v51 = vpop.f32.mrb[12].mxu0 }
 0x130   :  { %v473_v52 = vpop.f32.mrb[13].mxu0 }
 0x131   :  { %596 = vst.msk [vmem:[%s1446_s3 + $0x28] sm:$0xff] %vm590_vm0, %v570_v48  ;;  %v472_v53 = vadd.f32 %v471_v51, %v282_v49 }
 0x132   :  { %v286_v54 = vpop.f32.mrb[14].mxu1 }
 0x133   :  { %v571_v55 = vmax.f32 %v472_v53, 0.0  ;;  %v287_v56 = vadd.f32 %v1316_v6, %v286_v54  ;;  %v288_v57 = vpop.f32.mrb[15].mxu1  ;;  %v476_v58 = vpop.f32.mrb[14].mxu0 }
 0x134   :  { %v478_v59 = vpop.f32.mrb[15].mxu0 }
 0x135   :  { %597 = vst.msk [vmem:[%s1446_s3 + $0x30] sm:$0xff] %vm590_vm0, %v571_v55  ;;  %v477_v60 = vadd.f32 %v476_v58, %v287_v56 }
 0x136   :  { %v291_v61 = vpop.f32.mrb[16].mxu1 }
 0x137   :  { %v572_v62 = vmax.f32 %v477_v60, 0.0  ;;  %v292_v63 = vadd.f32 %v1316_v6, %v291_v61  ;;  %v293_v1 = vpop.f32.mrb[17].mxu1  ;;  %v481_v2 = vpop.f32.mrb[16].mxu0 }
 0x138   :  { %v483_v3 = vpop.f32.mrb[17].mxu0 }
 0x139   :  { %598 = vst.msk [vmem:[%s1446_s3 + $0x38] sm:$0xff] %vm590_vm0, %v572_v62  ;;  %v482_v4 = vadd.f32 %v481_v2, %v292_v63 }
 0x13a   :  { %v296_v5 = vpop.f32.mrb[18].mxu1 }
 0x13b   :  { %v573_v7 = vmax.f32 %v482_v4, 0.0  ;;  %v297_v8 = vadd.f32 %v1316_v6, %v296_v5  ;;  %v298_v9 = vpop.f32.mrb[19].mxu1  ;;  %v486_v10 = vpop.f32.mrb[18].mxu0 }
 0x13c   :  { %v488_v11 = vpop.f32.mrb[19].mxu0 }
 0x13d   :  { %599 = vst.msk [vmem:[%s1446_s3 + $0x40] sm:$0xff] %vm590_vm0, %v573_v7  ;;  %v487_v12 = vadd.f32 %v486_v10, %v297_v8 }
 0x13e   :  { %v301_v13 = vpop.f32.mrb[20].mxu1 }
 0x13f   :  { %v574_v14 = vmax.f32 %v487_v12, 0.0  ;;  %v302_v15 = vadd.f32 %v1316_v6, %v301_v13  ;;  %v303_v16 = vpop.f32.mrb[21].mxu1  ;;  %v491_v17 = vpop.f32.mrb[20].mxu0 }
 0x140   :  { %v493_v18 = vpop.f32.mrb[21].mxu0 }
 0x141   :  { %600 = vst.msk [vmem:[%s1446_s3 + $0x48] sm:$0xff] %vm590_vm0, %v574_v14  ;;  %v492_v19 = vadd.f32 %v491_v17, %v302_v15 }
 0x142   :  { %v306_v20 = vpop.f32.mrb[22].mxu1 }
 0x143   :  { %v575_v21 = vmax.f32 %v492_v19, 0.0  ;;  %v307_v22 = vadd.f32 %v1316_v6, %v306_v20  ;;  %v308_v23 = vpop.f32.mrb[23].mxu1  ;;  %v496_v24 = vpop.f32.mrb[22].mxu0 }
 0x144   :  { %v498_v25 = vpop.f32.mrb[23].mxu0 }
 0x145   :  { %601 = vst.msk [vmem:[%s1446_s3 + $0x50] sm:$0xff] %vm590_vm0, %v575_v21  ;;  %v497_v26 = vadd.f32 %v496_v24, %v307_v22 }
 0x146   :  { %v311_v27 = vpop.f32.mrb[24].mxu1 }
 0x147   :  { %v576_v28 = vmax.f32 %v497_v26, 0.0  ;;  %v312_v29 = vadd.f32 %v1316_v6, %v311_v27  ;;  %v313_v30 = vpop.f32.mrb[25].mxu1  ;;  %v501_v31 = vpop.f32.mrb[24].mxu0 }
 0x148   :  { %v503_v32 = vpop.f32.mrb[25].mxu0 }
 0x149   :  { %602 = vst.msk [vmem:[%s1446_s3 + $0x58] sm:$0xff] %vm590_vm0, %v576_v28  ;;  %v502_v33 = vadd.f32 %v501_v31, %v312_v29 }
 0x14a   :  { %v316_v34 = vpop.f32.mrb[26].mxu1 }
 0x14b   :  { %v577_v35 = vmax.f32 %v502_v33, 0.0  ;;  %v317_v36 = vadd.f32 %v1316_v6, %v316_v34  ;;  %v318_v37 = vpop.f32.mrb[27].mxu1  ;;  %v506_v38 = vpop.f32.mrb[26].mxu0 }
 0x14c   :  { %v508_v39 = vpop.f32.mrb[27].mxu0 }
 0x14d   :  { %603 = vst.msk [vmem:[%s1446_s3 + $0x60] sm:$0xff] %vm590_vm0, %v577_v35  ;;  %v507_v0 = vadd.f32 %v506_v38, %v317_v36 }
 0x14e   :  { %v321_v40 = vpop.f32.mrb[28].mxu1 }
 0x14f   :  { %v578_v41 = vmax.f32 %v507_v0, 0.0  ;;  %v322_v42 = vadd.f32 %v1316_v6, %v321_v40  ;;  %v323_v43 = vpop.f32.mrb[29].mxu1  ;;  %v511_v44 = vpop.f32.mrb[28].mxu0 }
 0x150   :  { %v513_v45 = vpop.f32.mrb[29].mxu0 }
 0x151   :  { %604 = vst.msk [vmem:[%s1446_s3 + $0x68] sm:$0xff] %vm590_vm0, %v578_v41  ;;  %v512_v46 = vadd.f32 %v511_v44, %v322_v42 }
 0x152   :  { %v326_v47 = vpop.f32.mrb[30].mxu1 }
 0x153   :  { %v579_v48 = vmax.f32 %v512_v46, 0.0  ;;  %v327_v49 = vadd.f32 %v1316_v6, %v326_v47  ;;  %v328_v50 = vpop.f32.mrb[31].mxu1  ;;  %v516_v51 = vpop.f32.mrb[30].mxu0 }
 0x154   :  { %v518_v52 = vpop.f32.mrb[31].mxu0 }
 0x155   :  { %605 = vst.msk [vmem:[%s1446_s3 + $0x70] sm:$0xff] %vm590_vm0, %v579_v48  ;;  %v517_v53 = vadd.f32 %v516_v51, %v327_v49 }
 0x156   :  { %v331_v54 = vpop.f32.mrb[32].mxu1 }
 0x157   :  { %v580_v55 = vmax.f32 %v517_v53, 0.0  ;;  %v332_v56 = vadd.f32 %v1316_v6, %v331_v54  ;;  %v333_v57 = vpop.f32.mrb[33].mxu1  ;;  %v521_v58 = vpop.f32.mrb[32].mxu0 }
 0x158   :  { %v523_v59 = vpop.f32.mrb[33].mxu0 }
 0x159   :  { %606 = vst.msk [vmem:[%s1446_s3 + $0x78] sm:$0xff] %vm590_vm0, %v580_v55  ;;  %v522_v60 = vadd.f32 %v521_v58, %v332_v56 }
 0x15a   :  { %v336_v61 = vpop.f32.mrb[34].mxu1 }
 0x15b   :  { %v581_v62 = vmax.f32 %v522_v60, 0.0  ;;  %v337_v63 = vadd.f32 %v1316_v6, %v336_v61  ;;  %v338_v1 = vpop.f32.mrb[35].mxu1  ;;  %v526_v2 = vpop.f32.mrb[34].mxu0 }
 0x15c   :  { %v528_v3 = vpop.f32.mrb[35].mxu0 }
 0x15d   :  { %607 = vst.msk [vmem:[%s1446_s3 + $0x80] sm:$0xff] %vm590_vm0, %v581_v62  ;;  %v527_v4 = vadd.f32 %v526_v2, %v337_v63 }
 0x15e   :  { %v341_v5 = vpop.f32.mrb[36].mxu1 }
 0x15f   :  { %v582_v7 = vmax.f32 %v527_v4, 0.0  ;;  %v342_v8 = vadd.f32 %v1316_v6, %v341_v5  ;;  %v343_v9 = vpop.f32.mrb[37].mxu1  ;;  %v531_v10 = vpop.f32.mrb[36].mxu0 }
 0x160   :  { %v533_v11 = vpop.f32.mrb[37].mxu0 }
 0x161   :  { %608 = vst.msk [vmem:[%s1446_s3 + $0x88] sm:$0xff] %vm590_vm0, %v582_v7  ;;  %v532_v12 = vadd.f32 %v531_v10, %v342_v8 }
 0x162   :  { %v346_v13 = vpop.f32.mrb[38].mxu1 }
 0x163   :  { %v583_v14 = vmax.f32 %v532_v12, 0.0  ;;  %v347_v15 = vadd.f32 %v1316_v6, %v346_v13  ;;  %v348_v16 = vpop.f32.mrb[39].mxu1  ;;  %v536_v17 = vpop.f32.mrb[38].mxu0 }
 0x164   :  { %v538_v18 = vpop.f32.mrb[39].mxu0 }
 0x165   :  { %609 = vst.msk [vmem:[%s1446_s3 + $0x90] sm:$0xff] %vm590_vm0, %v583_v14  ;;  %v537_v19 = vadd.f32 %v536_v17, %v347_v15 }
 0x166   :  { %v351_v20 = vpop.f32.mrb[40].mxu1 }
 0x167   :  { %v584_v21 = vmax.f32 %v537_v19, 0.0  ;;  %v352_v22 = vadd.f32 %v1316_v6, %v351_v20  ;;  %v353_v23 = vpop.f32.mrb[41].mxu1  ;;  %v541_v24 = vpop.f32.mrb[40].mxu0 }
 0x168   :  { %v543_v25 = vpop.f32.mrb[41].mxu0 }
 0x169   :  { %610 = vst.msk [vmem:[%s1446_s3 + $0x98] sm:$0xff] %vm590_vm0, %v584_v21  ;;  %v542_v26 = vadd.f32 %v541_v24, %v352_v22 }
 0x16a   :  { %v356_v27 = vpop.f32.mrb[42].mxu1 }
 0x16b   :  { %v585_v28 = vmax.f32 %v542_v26, 0.0  ;;  %v357_v29 = vadd.f32 %v1316_v6, %v356_v27  ;;  %v358_v30 = vpop.f32.mrb[43].mxu1  ;;  %v546_v31 = vpop.f32.mrb[42].mxu0 }
 0x16c   :  { %v548_v32 = vpop.f32.mrb[43].mxu0 }
 0x16d   :  { %611 = vst.msk [vmem:[%s1446_s3 + $0xa0] sm:$0xff] %vm590_vm0, %v585_v28  ;;  %v547_v33 = vadd.f32 %v546_v31, %v357_v29 }
 0x16e   :  { %v361_v34 = vpop.f32.mrb[44].mxu1 }
 0x16f   :  { %v586_v35 = vmax.f32 %v547_v33, 0.0  ;;  %v362_v36 = vadd.f32 %v1316_v6, %v361_v34  ;;  %v363_v37 = vpop.f32.mrb[45].mxu1  ;;  %v551_v38 = vpop.f32.mrb[44].mxu0 }
 0x170   :  { %v553_v39 = vpop.f32.mrb[45].mxu0 }
 0x171   :  { %612 = vst.msk [vmem:[%s1446_s3 + $0xa8] sm:$0xff] %vm590_vm0, %v586_v35  ;;  %v552_v0 = vadd.f32 %v551_v38, %v362_v36 }
 0x172   :  { %v366_v40 = vpop.f32.mrb[46].mxu1 }
 0x173   :  { %v587_v41 = vmax.f32 %v552_v0, 0.0  ;;  %v367_v42 = vadd.f32 %v1316_v6, %v366_v40  ;;  %v368_v43 = vpop.f32.mrb[47].mxu1  ;;  %v556_v44 = vpop.f32.mrb[46].mxu0 }
 0x174   :  { %v558_v45 = vpop.f32.mrb[47].mxu0 }
 0x175   :  { %613 = vst.msk [vmem:[%s1446_s3 + $0xb0] sm:$0xff] %vm590_vm0, %v587_v41  ;;  %v557_v46 = vadd.f32 %v556_v44, %v367_v42 }
 0x176   :  { %v371_v47 = vpop.f32.mrb[48].mxu1 }
 0x177   :  { %v588_v48 = vmax.f32 %v557_v46, 0.0  ;;  %v372_v49 = vadd.f32 %v1316_v6, %v371_v47  ;;  %v373_v50 = vpop.f32.mrb[49].mxu1  ;;  %v561_v51 = vpop.f32.mrb[48].mxu0 }
 0x178   :  { %v563_v52 = vpop.f32.mrb[49].mxu0 }
 0x179   :  { %614 = vst.msk [vmem:[%s1446_s3 + $0xb8] sm:$0xff] %vm590_vm0, %v588_v48  ;;  %v562_v53 = vadd.f32 %v561_v51, %v372_v49 }
 0x17b   :  { %v589_v54 = vmax.f32 %v562_v53, 0.0 }
 0x17d   :  { %615 = vst.msk [vmem:[%s1446_s3 + $0xc0] sm:$0xff] %vm590_vm0, %v589_v54 }

// kernel: flappy_bird_forward.6
= control target key start
LH: loop header
LB: loop body
LE: loop exit
PB: predicated region body
PF: predicated region fallthrough
CT: control target
= control target key end

     0   :  { %v1311_v0 = vmov 0.0|0.0   ;;  %vm1312_vm0 = vmmov 0   ;;  %vm218_vm1 = vcmask 523264   ;;  %s2258_s1 = inlined_call_operand.vmem [shape: f32[576,64], index: 1, kind: input, shape index: {}]   ;;  %s2259_s0 = inlined_call_operand.vmem [shape: f32[200,576], index: 0, kind: input, shape index: {}]   ;;  %s2260_s2 = inlined_call_operand.vmem [shape: f32[1,64], index: 2, kind: input, shape index: {}]   ;;  %s2261_s3 = inlined_call_operand.vmem [shape: f32[200,64], index: 3, kind: output, shape index: {}]  }
   0x1   :  { %1068 = vmatprep.subr.bf16.mxu1 %v1311_v0  ;;  %1116 = vmatprep.subr.bf16.mxu0 %v1311_v0  ;;  %v139_v1 = vld [vmem:[%s2258_s1] sm:$0xff]  ;;  %v140_v2 = vld [vmem:[%s2258_s1 + $0x8] sm:$0xff]  ;;  %v141_v6 = vld [vmem:[%s2258_s1 + $0x10] sm:$0xff] }
   0x2   :  { %v171_v3 = vld [vmem:[%s2258_s1 + $0x100] sm:$0xff]  ;;  %v1069_v4 = vpack.c.bf16 %v140_v2, %v139_v1  ;;  %v172_v5 = vld [vmem:[%s2258_s1 + $0x108] sm:$0xff]  ;;  %v142_v7 = vld [vmem:[%s2258_s1 + $0x18] sm:$0xff] }
   0x3   :  { %v1354_v8 = vpack.c.bf16 %v172_v5, %v171_v3  ;;  %v173_v9 = vld [vmem:[%s2258_s1 + $0x110] sm:$0xff]  ;;  %v174_v10 = vld [vmem:[%s2258_s1 + $0x118] sm:$0xff]  ;;  %v1072_v11 = vpack.c.bf16 %v142_v7, %v141_v6  ;;  %v143_v13 = vld [vmem:[%s2258_s1 + $0x20] sm:$0xff] }
   0x4   :  { %1070 = vmatpush1.bf16.msra.mxu1 %v1069_v4  ;;  %v1364_v12 = vpack.c.bf16 %v174_v10, %v173_v9  ;;  %v144_v14 = vld [vmem:[%s2258_s1 + $0x28] sm:$0xff]  ;;  %v175_v15 = vld [vmem:[%s2258_s1 + $0x120] sm:$0xff]  ;;  %v145_v19 = vld [vmem:[%s2258_s1 + $0x30] sm:$0xff] }
   0x5   :  { %1118 = vmatpush1.bf16.msra.mxu0 %v1354_v8  ;;  %1071 = vmatprep.subr.bf16.mxu1 %v1311_v0  ;;  %v176_v16 = vld [vmem:[%s2258_s1 + $0x128] sm:$0xff]  ;;  %v1075_v17 = vpack.c.bf16 %v144_v14, %v143_v13  ;;  %v146_v20 = vld [vmem:[%s2258_s1 + $0x38] sm:$0xff]  ;;  %v177_v21 = vld [vmem:[%s2258_s1 + $0x130] sm:$0xff] }
   0x6   :  { %1119 = vmatprep.subr.bf16.mxu0 %v1311_v0  ;;  %v1381_v18 = vpack.c.bf16 %v176_v16, %v175_v15  ;;  %v178_v22 = vld [vmem:[%s2258_s1 + $0x138] sm:$0xff]  ;;  %v1078_v23 = vpack.c.bf16 %v146_v20, %v145_v19  ;;  %v147_v25 = vld [vmem:[%s2258_s1 + $0x40] sm:$0xff]  ;;  %v148_v26 = vld [vmem:[%s2258_s1 + $0x48] sm:$0xff] }
   0x7   :  { %v1398_v24 = vpack.c.bf16 %v178_v22, %v177_v21  ;;  %v179_v27 = vld [vmem:[%s2258_s1 + $0x140] sm:$0xff]  ;;  %v180_v28 = vld [vmem:[%s2258_s1 + $0x148] sm:$0xff]  ;;  %v1081_v29 = vpack.c.bf16 %v148_v26, %v147_v25  ;;  %v149_v31 = vld [vmem:[%s2258_s1 + $0x50] sm:$0xff] }
   0x8   :  { %1073 = vmatpush1.bf16.msra.mxu1 %v1072_v11  ;;  %v1415_v30 = vpack.c.bf16 %v180_v28, %v179_v27  ;;  %v150_v32 = vld [vmem:[%s2258_s1 + $0x58] sm:$0xff]  ;;  %v181_v33 = vld [vmem:[%s2258_s1 + $0x150] sm:$0xff]  ;;  %v151_v37 = vld [vmem:[%s2258_s1 + $0x60] sm:$0xff] }
   0x9   :  { %1121 = vmatpush1.bf16.msra.mxu0 %v1364_v12  ;;  %1074 = vmatprep.subr.bf16.mxu1 %v1311_v0  ;;  %v182_v34 = vld [vmem:[%s2258_s1 + $0x158] sm:$0xff]  ;;  %v1084_v35 = vpack.c.bf16 %v150_v32, %v149_v31  ;;  %v152_v38 = vld [vmem:[%s2258_s1 + $0x68] sm:$0xff]  ;;  %v183_v39 = vld [vmem:[%s2258_s1 + $0x160] sm:$0xff] }
   0xa   :  { %1122 = vmatprep.subr.bf16.mxu0 %v1311_v0  ;;  %v1432_v36 = vpack.c.bf16 %v182_v34, %v181_v33  ;;  %v184_v40 = vld [vmem:[%s2258_s1 + $0x168] sm:$0xff]  ;;  %v17_v42 = vld [vmem:[%s2259_s0 + $0x18] sm:$0xff]  ;;  %v1087_v43 = vpack.c.bf16 %v152_v38, %v151_v37  ;;  %v153_v45 = vld [vmem:[%s2258_s1 + $0x70] sm:$0xff] }
   0xb   :  { %v15_v41 = vld [vmem:[%s2259_s0 + $0x8] sm:$0xff]  ;;  %548 = vmatprep.mubr.f32.mxu0 %v17_v42  ;;  %v1455_v44 = vpack.c.bf16 %v184_v40, %v183_v39  ;;  %v154_v46 = vld [vmem:[%s2258_s1 + $0x78] sm:$0xff]  ;;  %v185_v47 = vld [vmem:[%s2258_s1 + $0x170] sm:$0xff] }
   0xc   :  { %1076 = vmatpush1.bf16.msra.mxu1 %v1075_v17  ;;  %358 = vmatprep.mubr.f32.mxu1 %v15_v41  ;;  %v186_v48 = vld [vmem:[%s2258_s1 + $0x178] sm:$0xff]  ;;  %v1090_v49 = vpack.c.bf16 %v154_v46, %v153_v45  ;;  %v155_v51 = vld [vmem:[%s2258_s1 + $0x80] sm:$0xff]  ;;  %v156_v52 = vld [vmem:[%s2258_s1 + $0x88] sm:$0xff] }
   0xd   :  { %1124 = vmatpush1.bf16.msra.mxu0 %v1381_v18  ;;  %1077 = vmatprep.subr.bf16.mxu1 %v1311_v0  ;;  %v1472_v50 = vpack.c.bf16 %v186_v48, %v185_v47  ;;  %v187_v53 = vld [vmem:[%s2258_s1 + $0x180] sm:$0xff]  ;;  %v188_v54 = vld [vmem:[%s2258_s1 + $0x188] sm:$0xff]  ;;  %v1093_v55 = vpack.c.bf16 %v156_v52, %v155_v51  ;;  %v157_v57 = vld [vmem:[%s2258_s1 + $0x90] sm:$0xff] }
   0xe   :  { %1125 = vmatprep.subr.bf16.mxu0 %v1311_v0  ;;  %v1489_v56 = vpack.c.bf16 %v188_v54, %v187_v53  ;;  %v158_v58 = vld [vmem:[%s2258_s1 + $0x98] sm:$0xff]  ;;  %v189_v59 = vld [vmem:[%s2258_s1 + $0x190] sm:$0xff]  ;;  %v159_v63 = vld [vmem:[%s2258_s1 + $0xa0] sm:$0xff] }
   0xf   :  { %v190_v60 = vld [vmem:[%s2258_s1 + $0x198] sm:$0xff]  ;;  %v1096_v61 = vpack.c.bf16 %v158_v58, %v157_v57  ;;  %v160_v1 = vld [vmem:[%s2258_s1 + $0xa8] sm:$0xff]  ;;  %v191_v2 = vld [vmem:[%s2258_s1 + $0x1a0] sm:$0xff] }
  0x10   :  { %1079 = vmatpush1.bf16.msra.mxu1 %v1078_v23  ;;  %v1506_v62 = vpack.c.bf16 %v190_v60, %v189_v59  ;;  %v192_v3 = vld [vmem:[%s2258_s1 + $0x1a8] sm:$0xff]  ;;  %v1099_v4 = vpack.c.bf16 %v160_v1, %v159_v63  ;;  %v161_v6 = vld [vmem:[%s2258_s1 + $0xb0] sm:$0xff]  ;;  %v162_v7 = vld [vmem:[%s2258_s1 + $0xb8] sm:$0xff] }
  0x11   :  { %1127 = vmatpush1.bf16.msra.mxu0 %v1398_v24  ;;  %1080 = vmatprep.subr.bf16.mxu1 %v1311_v0  ;;  %v1523_v5 = vpack.c.bf16 %v192_v3, %v191_v2  ;;  %v193_v9 = vld [vmem:[%s2258_s1 + $0x1b0] sm:$0xff]  ;;  %v194_v10 = vld [vmem:[%s2258_s1 + $0x1b8] sm:$0xff]  ;;  %v1102_v11 = vpack.c.bf16 %v162_v7, %v161_v6  ;;  %v163_v14 = vld [vmem:[%s2258_s1 + $0xc0] sm:$0xff] }
  0x12   :  { %1128 = vmatprep.subr.bf16.mxu0 %v1311_v0  ;;  %v1540_v13 = vpack.c.bf16 %v194_v10, %v193_v9  ;;  %v164_v15 = vld [vmem:[%s2258_s1 + $0xc8] sm:$0xff]  ;;  %v195_v16 = vld [vmem:[%s2258_s1 + $0x1c0] sm:$0xff]  ;;  %v165_v21 = vld [vmem:[%s2258_s1 + $0xd0] sm:$0xff] }
  0x13   :  { %v196_v17 = vld [vmem:[%s2258_s1 + $0x1c8] sm:$0xff]  ;;  %v1105_v19 = vpack.c.bf16 %v164_v15, %v163_v14  ;;  %v166_v22 = vld [vmem:[%s2258_s1 + $0xd8] sm:$0xff]  ;;  %v197_v23 = vld [vmem:[%s2258_s1 + $0x1d0] sm:$0xff] }
  0x14   :  { %1082 = vmatpush1.bf16.msra.mxu1 %v1081_v29  ;;  %v1557_v20 = vpack.c.bf16 %v196_v17, %v195_v16  ;;  %v198_v25 = vld [vmem:[%s2258_s1 + $0x1d8] sm:$0xff]  ;;  %v1108_v26 = vpack.c.bf16 %v166_v22, %v165_v21  ;;  %v167_v28 = vld [vmem:[%s2258_s1 + $0xe0] sm:$0xff]  ;;  %v168_v29 = vld [vmem:[%s2258_s1 + $0xe8] sm:$0xff] }
  0x15   :  { %1130 = vmatpush1.bf16.msra.mxu0 %v1415_v30  ;;  %1083 = vmatprep.subr.bf16.mxu1 %v1311_v0  ;;  %v1574_v27 = vpack.c.bf16 %v198_v25, %v197_v23  ;;  %v199_v31 = vld [vmem:[%s2258_s1 + $0x1e0] sm:$0xff]  ;;  %v200_v32 = vld [vmem:[%s2258_s1 + $0x1e8] sm:$0xff]  ;;  %v1111_v33 = vpack.c.bf16 %v168_v29, %v167_v28  ;;  %v170_v37 = vld [vmem:[%s2258_s1 + $0xf8] sm:$0xff] }
  0x16   :  { %1131 = vmatprep.subr.bf16.mxu0 %v1311_v0  ;;  %v1591_v34 = vpack.c.bf16 %v200_v32, %v199_v31  ;;  %v201_v38 = vld [vmem:[%s2258_s1 + $0x1f0] sm:$0xff]  ;;  %v202_v39 = vld [vmem:[%s2258_s1 + $0x1f8] sm:$0xff]  ;;  %v203_v42 = vld [vmem:[%s2258_s1 + $0x200] sm:$0xff] }
  0x17   :  { %v1608_v41 = vpack.c.bf16 %v202_v39, %v201_v38  ;;  %v14_v45 = vld [vmem:[%s2259_s0] sm:$0xff]  ;;  %v16_v46 = vld [vmem:[%s2259_s0 + $0x10] sm:$0xff]  ;;  %v206_v52 = vld [vmem:[%s2258_s1 + $0x218] sm:$0xff] }
  0x18   :  { %1085 = vmatpush1.bf16.msra.mxu1 %v1084_v35  ;;  %v169_v35 = vld [vmem:[%s2258_s1 + $0xf0] sm:$0xff]  ;;  %v19_v53 = vld [vmem:[%s2259_s0 + $0x28] sm:$0xff]  ;;  %v21_v54 = vld [vmem:[%s2259_s0 + $0x38] sm:$0xff] }
  0x19   :  { %1133 = vmatpush1.bf16.msra.mxu0 %v1432_v36  ;;  %1086 = vmatprep.subr.bf16.mxu1 %v1311_v0  ;;  %v1114_v40 = vpack.c.bf16 %v170_v37, %v169_v35  ;;  %v20_v48 = vld [vmem:[%s2259_s0 + $0x30] sm:$0xff]  ;;  %v27_v57 = vld [vmem:[%s2259_s0 + $0x68] sm:$0xff]  ;;  %v30_v63 = vld [vmem:[%s2259_s0 + $0x80] sm:$0xff] }
  0x1a   :  { %1134 = vmatprep.subr.bf16.mxu0 %v1311_v0  ;;  %v205_v51 = vld [vmem:[%s2258_s1 + $0x210] sm:$0xff]  ;;  %v208_v59 = vld [vmem:[%s2258_s1 + $0x228] sm:$0xff]  ;;  %v37_v9 = vld [vmem:[%s2259_s0 + $0xb8] sm:$0xff] }
  0x1b   :  { %v1168_v58 = vpack.c.bf16 %v206_v52, %v205_v51  ;;  %v24_v60 = vld [vmem:[%s2259_s0 + $0x50] sm:$0xff]  ;;  %v31_v6 = vld [vmem:[%s2259_s0 + $0x88] sm:$0xff]  ;;  %v42_v15 = vld [vmem:[%s2259_s0 + $0xe0] sm:$0xff] }
  0x1c   :  { %1088 = vmatpush1.bf16.msra.mxu1 %v1087_v43  ;;  %v204_v43 = vld [vmem:[%s2258_s1 + $0x208] sm:$0xff]  ;;  %v32_v1 = vld [vmem:[%s2259_s0 + $0x90] sm:$0xff]  ;;  %v41_v17 = vld [vmem:[%s2259_s0 + $0xd8] sm:$0xff] }
  0x1d   :  { %1136 = vmatpush1.bf16.msra.mxu0 %v1455_v44  ;;  %1089 = vmatprep.subr.bf16.mxu1 %v1311_v0  ;;  %v1165_v47 = vpack.c.bf16 %v204_v43, %v203_v42  ;;  %v209_v3 = vld [vmem:[%s2258_s1 + $0x230] sm:$0xff]  ;;  %v35_v7 = vld [vmem:[%s2259_s0 + $0xa8] sm:$0xff]  ;;  %v46_v22 = vld [vmem:[%s2259_s0 + $0x100] sm:$0xff] }
  0x1e   :  { %1137 = vmatprep.subr.bf16.mxu0 %v1311_v0  ;;  %v40_v14 = vld [vmem:[%s2259_s0 + $0xd0] sm:$0xff]  ;;  %v39_v16 = vld [vmem:[%s2259_s0 + $0xc8] sm:$0xff]  ;;  %v49_v25 = vld [vmem:[%s2259_s0 + $0x118] sm:$0xff] }
  0x1f   :  { %v44_v21 = vld [vmem:[%s2259_s0 + $0xf0] sm:$0xff]  ;;  %v57_v28 = vld [vmem:[%s2259_s0 + $0x158] sm:$0xff]  ;;  %v54_v29 = vld [vmem:[%s2259_s0 + $0x140] sm:$0xff] }
  0x20   :  { %1091 = vmatpush1.bf16.msra.mxu1 %v1090_v49  ;;  %v22_v49 = vld [vmem:[%s2259_s0 + $0x40] sm:$0xff]  ;;  %v52_v23 = vld [vmem:[%s2259_s0 + $0x130] sm:$0xff]  ;;  %v61_v35 = vld [vmem:[%s2259_s0 + $0x178] sm:$0xff] }
  0x21   :  { %1139 = vmatpush1.bf16.msra.mxu0 %v1472_v50  ;;  %1092 = vmatprep.subr.bf16.mxu1 %v1311_v0  ;;  %v56_v31 = vld [vmem:[%s2259_s0 + $0x150] sm:$0xff]  ;;  %v62_v32 = vld [vmem:[%s2259_s0 + $0x180] sm:$0xff]  ;;  %v67_v37 = vld [vmem:[%s2259_s0 + $0x1a8] sm:$0xff] }
  0x22   :  { %1140 = vmatprep.subr.bf16.mxu0 %v1311_v0  ;;  %v64_v38 = vld [vmem:[%s2259_s0 + $0x190] sm:$0xff]  ;;  %v66_v39 = vld [vmem:[%s2259_s0 + $0x1a0] sm:$0xff]  ;;  %v69_v42 = vld [vmem:[%s2259_s0 + $0x1b8] sm:$0xff] }
  0x23   :  { %v71_v43 = vld [vmem:[%s2259_s0 + $0x1c8] sm:$0xff]  ;;  %v18_v51 = vld [vmem:[%s2259_s0 + $0x20] sm:$0xff]  ;;  %v84_v52 = vld [vmem:[%s2259_s0 + $0x230] sm:$0xff] }
  0x24   :  { %1094 = vmatpush1.bf16.msra.mxu1 %v1093_v55  ;;  %v25_v55 = vld [vmem:[%s2259_s0 + $0x58] sm:$0xff] }
  0x25   :  { %1142 = vmatpush1.bf16.msra.mxu0 %v1489_v56  ;;  %1095 = vmatprep.subr.bf16.mxu1 %v1311_v0 }
  0x26   :  { %1143 = vmatprep.subr.bf16.mxu0 %v1311_v0 }
  0x28   :  { %1097 = vmatpush1.bf16.msra.mxu1 %v1096_v61  ;;  %v26_v61 = vld [vmem:[%s2259_s0 + $0x60] sm:$0xff] }
  0x29   :  { %1145 = vmatpush1.bf16.msra.mxu0 %v1506_v62  ;;  %1098 = vmatprep.subr.bf16.mxu1 %v1311_v0 }
  0x2a   :  { %1146 = vmatprep.subr.bf16.mxu0 %v1311_v0 }
  0x2c   :  { %1100 = vmatpush1.bf16.msra.mxu1 %v1099_v4  ;;  %v29_v4 = vld [vmem:[%s2259_s0 + $0x78] sm:$0xff] }
  0x2d   :  { %1148 = vmatpush1.bf16.msra.mxu0 %v1523_v5  ;;  %1101 = vmatprep.subr.bf16.mxu1 %v1311_v0 }
  0x2e   :  { %1149 = vmatprep.subr.bf16.mxu0 %v1311_v0 }
  0x30   :  { %1103 = vmatpush1.bf16.msra.mxu1 %v1102_v11  ;;  %v34_v11 = vld [vmem:[%s2259_s0 + $0xa0] sm:$0xff] }
  0x31   :  { %1151 = vmatpush1.bf16.msra.mxu0 %v1540_v13  ;;  %1104 = vmatprep.subr.bf16.mxu1 %v1311_v0 }
  0x32   :  { %1152 = vmatprep.subr.bf16.mxu0 %v1311_v0 }
  0x34   :  { %1106 = vmatpush1.bf16.msra.mxu1 %v1105_v19  ;;  %v47_v19 = vld [vmem:[%s2259_s0 + $0x108] sm:$0xff] }
  0x35   :  { %1154 = vmatpush1.bf16.msra.mxu0 %v1557_v20  ;;  %1107 = vmatprep.subr.bf16.mxu1 %v1311_v0 }
  0x36   :  { %1155 = vmatprep.subr.bf16.mxu0 %v1311_v0 }
  0x38   :  { %1109 = vmatpush1.bf16.msra.mxu1 %v1108_v26  ;;  %v51_v26 = vld [vmem:[%s2259_s0 + $0x128] sm:$0xff] }
  0x39   :  { %1157 = vmatpush1.bf16.msra.mxu0 %v1574_v27  ;;  %1110 = vmatprep.subr.bf16.mxu1 %v1311_v0 }
  0x3a   :  { %1158 = vmatprep.subr.bf16.mxu0 %v1311_v0 }
  0x3c   :  { %1112 = vmatpush1.bf16.msra.mxu1 %v1111_v33  ;;  %v59_v33 = vld [vmem:[%s2259_s0 + $0x168] sm:$0xff] }
  0x3d   :  { %1160 = vmatpush1.bf16.msra.mxu0 %v1591_v34  ;;  %1113 = vmatprep.subr.bf16.mxu1 %v1311_v0 }
  0x3e   :  { %1161 = vmatprep.subr.bf16.mxu0 %v1311_v0 }
  0x40   :  { %1115 = vmatpush1.bf16.msra.mxu1 %v1114_v40  ;;  %v72_v40 = vld [vmem:[%s2259_s0 + $0x1d0] sm:$0xff] }
  0x41   :  { %1163 = vmatpush1.bf16.msra.mxu0 %v1608_v41  ;;  %1176 = vmatprep.subr.bf16.mxu1 %v1311_v0 }
  0x42   :  { %1164 = vmatprep.subr.bf16.mxu0 %v1311_v0 }
  0x43   :  { %359 = vmatmul.mubr.f32.vlgmr.msra.gmra.mrb[0].mxu1 %v14_v45  ;;  %v77_v45 = vld [vmem:[%s2259_s0 + $0x1f8] sm:$0xff] }
  0x44   :  { %549 = vmatmul.mubr.f32.vlgmr.msra.gmra.mrb[0].mxu0 %v16_v46  ;;  %363 = vmatprep.mubr.f32.mxu1 %v20_v48  ;;  %v74_v46 = vld [vmem:[%s2259_s0 + $0x1e0] sm:$0xff]  ;;  %v79_v48 = vld [vmem:[%s2259_s0 + $0x208] sm:$0xff] }
  0x45   :  { %1166 = vmatpush3.bf16.msra.mxu0 %v1165_v47  ;;  %1192 = vmatpush1.bf16.msra.mxu1 %v1354_v8  ;;  %v207_v8 = vld [vmem:[%s2258_s1 + $0x220] sm:$0xff]  ;;  %v76_v47 = vld [vmem:[%s2259_s0 + $0x1f0] sm:$0xff] }
  0x46   :  { %553 = vmatprep.mubr.f32.mxu0 %v22_v49  ;;  %1177 = vmatprep.subr.bf16.mxu1 %v1311_v0  ;;  %v1171_v2 = vpack.c.bf16 %v208_v59, %v207_v8  ;;  %v1313_v49 = vmov 0.0   ;;  %v38_v8 = vld [vmem:[%s2259_s0 + $0xc0] sm:$0xff]  ;;  %v105_v59 = vld [vmem:[%s2259_s0 + $0x2d8] sm:$0xff] }
  0x47   :  { %364 = vmatmul.mubr.f32.gmra.mrb[2].mxu1 %v19_v53  ;;  %1167 = vmatprep.subr.bf16.mxu0 %v1311_v0  ;;  %v23_v53 = vld [vmem:[%s2259_s0 + $0x48] sm:$0xff] }
  0x48   :  { %554 = vmatmul.mubr.f32.gmra.mrb[2].mxu0 %v21_v54  ;;  %368 = vmatprep.mubr.f32.mxu1 %v25_v55  ;;  %v89_v54 = vld [vmem:[%s2259_s0 + $0x258] sm:$0xff]  ;;  %v28_v55 = vld [vmem:[%s2259_s0 + $0x70] sm:$0xff] }
  0x49   :  { %558 = vmatprep.mubr.f32.mxu0 %v27_v57  ;;  %1193 = vmatpush1.bf16.msra.mxu1 %v1364_v12  ;;  %v210_v12 = vld [vmem:[%s2258_s1 + $0x238] sm:$0xff]  ;;  %v94_v57 = vld [vmem:[%s2259_s0 + $0x280] sm:$0xff] }
  0x4a   :  { %1169 = vmatpush3.bf16.msra.mxu0 %v1168_v58  ;;  %1178 = vmatprep.subr.bf16.mxu1 %v1311_v0  ;;  %v1174_v10 = vpack.c.bf16 %v210_v12, %v209_v3  ;;  %v33_v58 = vld [vmem:[%s2259_s0 + $0x98] sm:$0xff]  ;;  %v114_v3 = vld [vmem:[%s2259_s0 + $0x320] sm:$0xff] }
  0x4b   :  { %369 = vmatmul.mubr.f32.gmra.mrb[4].mxu1 %v24_v60  ;;  %1170 = vmatprep.subr.bf16.mxu0 %v1311_v0  ;;  %v43_v60 = vld [vmem:[%s2259_s0 + $0xe8] sm:$0xff]  ;;  %v53_v12 = vld [vmem:[%s2259_s0 + $0x138] sm:$0xff] }
  0x4c   :  { %559 = vmatmul.mubr.f32.gmra.mrb[4].mxu0 %v26_v61  ;;  %373 = vmatprep.mubr.f32.mxu1 %v30_v63  ;;  %v110_v61 = vld [vmem:[%s2259_s0 + $0x300] sm:$0xff]  ;;  %v109_v63 = vld [vmem:[%s2259_s0 + $0x2f8] sm:$0xff] }
  0x4d   :  { %563 = vmatprep.mubr.f32.mxu0 %v32_v1  ;;  %1194 = vmatpush1.bf16.msra.mxu1 %v1381_v18  ;;  %v36_v18 = vld [vmem:[%s2259_s0 + $0xb0] sm:$0xff] }
  0x4e   :  { %1179 = vmatprep.subr.bf16.mxu1 %v1311_v0  ;;  %1172 = vmatpush3.bf16.msra.mxu0 %v1171_v2  ;;  %v48_v1 = vld [vmem:[%s2259_s0 + $0x110] sm:$0xff]  ;;  %v115_v2 = vld [vmem:[%s2259_s0 + $0x328] sm:$0xff] }
  0x4f   :  { %374 = vmatmul.mubr.f32.gmra.mrb[6].mxu1 %v29_v4  ;;  %1173 = vmatprep.subr.bf16.mxu0 %v1311_v0  ;;  %v120_v4 = vld [vmem:[%s2259_s0 + $0x350] sm:$0xff] }
  0x50   :  { %564 = vmatmul.mubr.f32.gmra.mrb[6].mxu0 %v31_v6  ;;  %378 = vmatprep.mubr.f32.mxu1 %v35_v7  ;;  %v119_v6 = vld [vmem:[%s2259_s0 + $0x348] sm:$0xff]  ;;  %v58_v7 = vld [vmem:[%s2259_s0 + $0x160] sm:$0xff] }
  0x51   :  { %568 = vmatprep.mubr.f32.mxu0 %v37_v9  ;;  %1195 = vmatpush1.bf16.msra.mxu1 %v1398_v24  ;;  %v45_v24 = vld [vmem:[%s2259_s0 + $0xf8] sm:$0xff] }
  0x52   :  { %1180 = vmatprep.subr.bf16.mxu1 %v1311_v0  ;;  %1175 = vmatpush3.bf16.msra.mxu0 %v1174_v10  ;;  %v125_v9 = vld [vmem:[%s2259_s0 + $0x378] sm:$0xff]  ;;  %v124_v10 = vld [vmem:[%s2259_s0 + $0x370] sm:$0xff] }
  0x53   :  { %379 = vmatmul.mubr.f32.gmra.mrb[8].mxu1 %v34_v11  ;;  %v63_v11 = vld [vmem:[%s2259_s0 + $0x188] sm:$0xff] }
  0x54   :  { %569 = vmatmul.mubr.f32.gmra.mrb[8].mxu0 %v36_v18  ;;  %383 = vmatprep.mubr.f32.mxu1 %v40_v14  ;;  %v130_v18 = vld [vmem:[%s2259_s0 + $0x3a0] sm:$0xff]  ;;  %v129_v14 = vld [vmem:[%s2259_s0 + $0x398] sm:$0xff] }
  0x55   :  { %573 = vmatprep.mubr.f32.mxu0 %v42_v15  ;;  %1196 = vmatpush1.bf16.msra.mxu1 %v1415_v30  ;;  %v50_v30 = vld [vmem:[%s2259_s0 + $0x120] sm:$0xff]  ;;  %v68_v15 = vld [vmem:[%s2259_s0 + $0x1b0] sm:$0xff] }
  0x56   :  { %1181 = vmatprep.subr.bf16.mxu1 %v1311_v0 }
  0x57   :  { %384 = vmatmul.mubr.f32.gmra.mrb[10].mxu1 %v39_v16  ;;  %v135_v16 = vld [vmem:[%s2259_s0 + $0x3c8] sm:$0xff] }
  0x58   :  { %574 = vmatmul.mubr.f32.gmra.mrb[10].mxu0 %v41_v17  ;;  %388 = vmatprep.mubr.f32.mxu1 %v45_v24  ;;  %v134_v17 = vld [vmem:[%s2259_s0 + $0x3c0] sm:$0xff]  ;;  %v73_v24 = vld [vmem:[%s2259_s0 + $0x1d8] sm:$0xff] }
  0x59   :  { %578 = vmatprep.mubr.f32.mxu0 %v47_v19  ;;  %1197 = vmatpush1.bf16.msra.mxu1 %v1432_v36  ;;  %v55_v36 = vld [vmem:[%s2259_s0 + $0x148] sm:$0xff]  ;;  %v82_v19 = vld [vmem:[%s2259_s0 + $0x220] sm:$0xff] }
  0x5a   :  { %1182 = vmatprep.subr.bf16.mxu1 %v1311_v0 }
  0x5b   :  { %389 = vmatmul.mubr.f32.gmra.mrb[12].mxu1 %v44_v21  ;;  %v81_v21 = vld [vmem:[%s2259_s0 + $0x218] sm:$0xff] }
  0x5c   :  { %579 = vmatmul.mubr.f32.gmra.mrb[12].mxu0 %v46_v22  ;;  %393 = vmatprep.mubr.f32.mxu1 %v50_v30  ;;  %v78_v22 = vld [vmem:[%s2259_s0 + $0x200] sm:$0xff]  ;;  %v87_v30 = vld [vmem:[%s2259_s0 + $0x248] sm:$0xff] }
  0x5d   :  { %583 = vmatprep.mubr.f32.mxu0 %v52_v23  ;;  %1198 = vmatpush1.bf16.msra.mxu1 %v1455_v44  ;;  %v60_v44 = vld [vmem:[%s2259_s0 + $0x170] sm:$0xff]  ;;  %v86_v23 = vld [vmem:[%s2259_s0 + $0x240] sm:$0xff] }
  0x5e   :  { %1183 = vmatprep.subr.bf16.mxu1 %v1311_v0 }
  0x5f   :  { %394 = vmatmul.mubr.f32.gmra.mrb[14].mxu1 %v49_v25  ;;  %v83_v25 = vld [vmem:[%s2259_s0 + $0x228] sm:$0xff] }
  0x60   :  { %584 = vmatmul.mubr.f32.gmra.mrb[14].mxu0 %v51_v26  ;;  %398 = vmatprep.mubr.f32.mxu1 %v55_v36  ;;  %v92_v26 = vld [vmem:[%s2259_s0 + $0x270] sm:$0xff]  ;;  %v91_v36 = vld [vmem:[%s2259_s0 + $0x268] sm:$0xff] }
  0x61   :  { %588 = vmatprep.mubr.f32.mxu0 %v57_v28  ;;  %1199 = vmatpush1.bf16.msra.mxu1 %v1472_v50  ;;  %v65_v50 = vld [vmem:[%s2259_s0 + $0x198] sm:$0xff]  ;;  %v88_v28 = vld [vmem:[%s2259_s0 + $0x250] sm:$0xff] }
  0x62   :  { %1184 = vmatprep.subr.bf16.mxu1 %v1311_v0 }
  0x63   :  { %399 = vmatmul.mubr.f32.gmra.mrb[16].mxu1 %v54_v29  ;;  %v97_v29 = vld [vmem:[%s2259_s0 + $0x298] sm:$0xff] }
  0x64   :  { %589 = vmatmul.mubr.f32.gmra.mrb[16].mxu0 %v56_v31  ;;  %403 = vmatprep.mubr.f32.mxu1 %v60_v44  ;;  %v96_v31 = vld [vmem:[%s2259_s0 + $0x290] sm:$0xff]  ;;  %v93_v44 = vld [vmem:[%s2259_s0 + $0x278] sm:$0xff] }
  0x65   :  { %593 = vmatprep.mubr.f32.mxu0 %v62_v32  ;;  %1200 = vmatpush1.bf16.msra.mxu1 %v1489_v56  ;;  %v70_v56 = vld [vmem:[%s2259_s0 + $0x1c0] sm:$0xff] }
  0x66   :  { %1185 = vmatprep.subr.bf16.mxu1 %v1311_v0  ;;  %v102_v32 = vld [vmem:[%s2259_s0 + $0x2c0] sm:$0xff] }
  0x67   :  { %404 = vmatmul.mubr.f32.gmra.mrb[18].mxu1 %v59_v33  ;;  %v101_v33 = vld [vmem:[%s2259_s0 + $0x2b8] sm:$0xff] }
  0x68   :  { %594 = vmatmul.mubr.f32.gmra.mrb[18].mxu0 %v61_v35  ;;  %408 = vmatprep.mubr.f32.mxu1 %v65_v50  ;;  %v98_v35 = vld [vmem:[%s2259_s0 + $0x2a0] sm:$0xff]  ;;  %v107_v50 = vld [vmem:[%s2259_s0 + $0x2e8] sm:$0xff] }
  0x69   :  { %598 = vmatprep.mubr.f32.mxu0 %v67_v37  ;;  %1201 = vmatpush1.bf16.msra.mxu1 %v1506_v62  ;;  %v75_v62 = vld [vmem:[%s2259_s0 + $0x1e8] sm:$0xff]  ;;  %v106_v37 = vld [vmem:[%s2259_s0 + $0x2e0] sm:$0xff] }
  0x6a   :  { %1186 = vmatprep.subr.bf16.mxu1 %v1311_v0 }
  0x6b   :  { %409 = vmatmul.mubr.f32.gmra.mrb[20].mxu1 %v64_v38  ;;  %v103_v38 = vld [vmem:[%s2259_s0 + $0x2c8] sm:$0xff] }
  0x6c   :  { %599 = vmatmul.mubr.f32.gmra.mrb[20].mxu0 %v66_v39  ;;  %413 = vmatprep.mubr.f32.mxu1 %v70_v56  ;;  %v112_v39 = vld [vmem:[%s2259_s0 + $0x310] sm:$0xff]  ;;  %v111_v56 = vld [vmem:[%s2259_s0 + $0x308] sm:$0xff] }
  0x6d   :  { %603 = vmatprep.mubr.f32.mxu0 %v72_v40  ;;  %1202 = vmatpush1.bf16.msra.mxu1 %v1523_v5  ;;  %v80_v5 = vld [vmem:[%s2259_s0 + $0x210] sm:$0xff] }
  0x6e   :  { %1187 = vmatprep.subr.bf16.mxu1 %v1311_v0  ;;  %v108_v40 = vld [vmem:[%s2259_s0 + $0x2f0] sm:$0xff] }
  0x6f   :  { %414 = vmatmul.mubr.f32.gmra.mrb[22].mxu1 %v69_v42  ;;  %v117_v42 = vld [vmem:[%s2259_s0 + $0x338] sm:$0xff] }
  0x70   :  { %604 = vmatmul.mubr.f32.gmra.mrb[22].mxu0 %v71_v43  ;;  %418 = vmatprep.mubr.f32.mxu1 %v75_v62  ;;  %v116_v43 = vld [vmem:[%s2259_s0 + $0x330] sm:$0xff]  ;;  %v113_v62 = vld [vmem:[%s2259_s0 + $0x318] sm:$0xff] }
  0x71   :  { %608 = vmatprep.mubr.f32.mxu0 %v77_v45  ;;  %1203 = vmatpush1.bf16.msra.mxu1 %v1540_v13  ;;  %v85_v13 = vld [vmem:[%s2259_s0 + $0x238] sm:$0xff]  ;;  %v122_v45 = vld [vmem:[%s2259_s0 + $0x360] sm:$0xff] }
  0x72   :  { %1188 = vmatprep.subr.bf16.mxu1 %v1311_v0 }
  0x73   :  { %419 = vmatmul.mubr.f32.gmra.mrb[24].mxu1 %v74_v46  ;;  %v121_v46 = vld [vmem:[%s2259_s0 + $0x358] sm:$0xff] }
  0x74   :  { %609 = vmatmul.mubr.f32.gmra.mrb[24].mxu0 %v76_v47  ;;  %423 = vmatprep.mubr.f32.mxu1 %v80_v5  ;;  %v118_v47 = vld [vmem:[%s2259_s0 + $0x340] sm:$0xff]  ;;  %v127_v5 = vld [vmem:[%s2259_s0 + $0x388] sm:$0xff] }
  0x75   :  { %993 = vmatprep.mubr.msk.f32.mxu0 %vm1312_vm0, %v1313_v49  ;;  %1204 = vmatpush1.bf16.msra.mxu1 %v1557_v20  ;;  %v90_v20 = vld [vmem:[%s2259_s0 + $0x260] sm:$0xff] }
  0x76   :  { %1189 = vmatprep.subr.bf16.mxu1 %v1311_v0 }
  0x77   :  { %424 = vmatmul.mubr.f32.gmra.mrb[26].mxu1 %v79_v48  ;;  %v126_v48 = vld [vmem:[%s2259_s0 + $0x380] sm:$0xff] }
  0x78   :  { %994 = vmatmul.mubr.msk.f32.vlgmr.msra.gmra.mrb[0].mxu0 %vm218_vm1, %v18_v51  ;;  %428 = vmatprep.mubr.f32.mxu1 %v85_v13  ;;  %v123_v51 = vld [vmem:[%s2259_s0 + $0x368] sm:$0xff]  ;;  %v132_v13 = vld [vmem:[%s2259_s0 + $0x3b0] sm:$0xff] }
  0x79   :  { %996 = vmatprep.mubr.msk.f32.mxu0 %vm1312_vm0, %v1313_v49  ;;  %1205 = vmatpush1.bf16.msra.mxu1 %v1574_v27  ;;  %v95_v27 = vld [vmem:[%s2259_s0 + $0x288] sm:$0xff] }
  0x7a   :  { %1190 = vmatprep.subr.bf16.mxu1 %v1311_v0 }
  0x7b   :  { %429 = vmatmul.mubr.f32.gmra.mrb[28].mxu1 %v84_v52  ;;  %v131_v52 = vld [vmem:[%s2259_s0 + $0x3a8] sm:$0xff] }
  0x7c   :  { %997 = vmatmul.mubr.msk.f32.gmra.mrb[2].mxu0 %vm218_vm1, %v23_v53  ;;  %433 = vmatprep.mubr.f32.mxu1 %v90_v20  ;;  %v128_v53 = vld [vmem:[%s2259_s0 + $0x390] sm:$0xff]  ;;  %v137_v20 = vld [vmem:[%s2259_s0 + $0x3d8] sm:$0xff] }
  0x7d   :  { %999 = vmatprep.mubr.msk.f32.mxu0 %vm1312_vm0, %v1313_v49  ;;  %1206 = vmatpush1.bf16.msra.mxu1 %v1591_v34  ;;  %v100_v34 = vld [vmem:[%s2259_s0 + $0x2b0] sm:$0xff] }
  0x7e   :  { %1191 = vmatprep.subr.bf16.mxu1 %v1311_v0  ;;  %v99_v0 = vld [vmem:[%s2259_s0 + $0x2a8] sm:$0xff] }
  0x7f   :  { %434 = vmatmul.mubr.f32.gmra.mrb[30].mxu1 %v89_v54  ;;  %v136_v54 = vld [vmem:[%s2259_s0 + $0x3d0] sm:$0xff] }
  0x80   :  { %1000 = vmatmul.mubr.msk.f32.gmra.mrb[4].mxu0 %vm218_vm1, %v28_v55  ;;  %438 = vmatprep.mubr.f32.mxu1 %v95_v27  ;;  %v133_v55 = vld [vmem:[%s2259_s0 + $0x3b8] sm:$0xff]  ;;  %v138_v27 = vld [vmem:[%s2259_s0 + $0x3e0] sm:$0xff] }
  0x81   :  { %1002 = vmatprep.mubr.msk.f32.mxu0 %vm1312_vm0, %v1313_v49  ;;  %1207 = vmatpush1.bf16.msra.mxu1 %v1608_v41  ;;  %v104_v41 = vld [vmem:[%s2259_s0 + $0x2d0] sm:$0xff] }
  0x83   :  { %439 = vmatmul.mubr.f32.gmra.mrb[32].mxu1 %v94_v57 }
  0x84   :  { %1003 = vmatmul.mubr.msk.f32.gmra.mrb[6].mxu0 %vm218_vm1, %v33_v58  ;;  %443 = vmatprep.mubr.f32.mxu1 %v100_v34 }
  0x85   :  { %1005 = vmatprep.mubr.msk.f32.mxu0 %vm1312_vm0, %v1313_v49 }
  0x87   :  { %444 = vmatmul.mubr.f32.gmra.mrb[34].mxu1 %v99_v0 }
  0x88   :  { %1006 = vmatmul.mubr.msk.f32.gmra.mrb[8].mxu0 %vm218_vm1, %v38_v8  ;;  %448 = vmatprep.mubr.f32.mxu1 %v105_v59 }
  0x89   :  { %1008 = vmatprep.mubr.msk.f32.mxu0 %vm1312_vm0, %v1313_v49 }
  0x8b   :  { %449 = vmatmul.mubr.f32.gmra.mrb[36].mxu1 %v104_v41 }
  0x8c   :  { %1009 = vmatmul.mubr.msk.f32.gmra.mrb[10].mxu0 %vm218_vm1, %v43_v60  ;;  %453 = vmatprep.mubr.f32.mxu1 %v110_v61 }
  0x8d   :  { %1011 = vmatprep.mubr.msk.f32.mxu0 %vm1312_vm0, %v1313_v49 }
  0x8f   :  { %454 = vmatmul.mubr.f32.gmra.mrb[38].mxu1 %v109_v63 }
  0x90   :  { %1012 = vmatmul.mubr.msk.f32.gmra.mrb[12].mxu0 %vm218_vm1, %v48_v1  ;;  %458 = vmatprep.mubr.f32.mxu1 %v115_v2 }
  0x91   :  { %1014 = vmatprep.mubr.msk.f32.mxu0 %vm1312_vm0, %v1313_v49 }
  0x93   :  { %459 = vmatmul.mubr.f32.gmra.mrb[40].mxu1 %v114_v3 }
  0x94   :  { %1015 = vmatmul.mubr.msk.f32.gmra.mrb[14].mxu0 %vm218_vm1, %v53_v12  ;;  %463 = vmatprep.mubr.f32.mxu1 %v120_v4 }
  0x95   :  { %1017 = vmatprep.mubr.msk.f32.mxu0 %vm1312_vm0, %v1313_v49 }
  0x97   :  { %464 = vmatmul.mubr.f32.gmra.mrb[42].mxu1 %v119_v6 }
  0x98   :  { %1018 = vmatmul.mubr.msk.f32.gmra.mrb[16].mxu0 %vm218_vm1, %v58_v7  ;;  %468 = vmatprep.mubr.f32.mxu1 %v125_v9 }
  0x99   :  { %1020 = vmatprep.mubr.msk.f32.mxu0 %vm1312_vm0, %v1313_v49 }
  0x9b   :  { %469 = vmatmul.mubr.f32.gmra.mrb[44].mxu1 %v124_v10 }
  0x9c   :  { %1021 = vmatmul.mubr.msk.f32.gmra.mrb[18].mxu0 %vm218_vm1, %v63_v11  ;;  %473 = vmatprep.mubr.f32.mxu1 %v130_v18 }
  0x9d   :  { %1023 = vmatprep.mubr.msk.f32.mxu0 %vm1312_vm0, %v1313_v49 }
  0x9f   :  { %474 = vmatmul.mubr.f32.gmra.mrb[46].mxu1 %v129_v14 }
  0xa0   :  { %1024 = vmatmul.mubr.msk.f32.gmra.mrb[20].mxu0 %vm218_vm1, %v68_v15  ;;  %478 = vmatprep.mubr.f32.mxu1 %v135_v16 }
  0xa1   :  { %1026 = vmatprep.mubr.msk.f32.mxu0 %vm1312_vm0, %v1313_v49 }
  0xa3   :  { %479 = vmatmul.mubr.f32.gmra.mrb[48].mxu1 %v134_v17  ;;  %v2127_v17 = vld [vmem:[%s2260_s2] ss:$0 sm:$0xff] }
  0xa4   :  { %1027 = vmatmul.mubr.msk.f32.gmra.mrb[22].mxu0 %vm218_vm1, %v73_v24  ;;  %613 = vmatprep.mubr.f32.mxu1 %v82_v19 }
  0xa5   :  { %1029 = vmatprep.mubr.msk.f32.mxu0 %vm1312_vm0, %v1313_v49 }
  0xa7   :  { %614 = vmatmul.mubr.f32.vlgmr.msra.gmra.mrb[26].mxu1 %v81_v21 }
  0xa8   :  { %1030 = vmatmul.mubr.msk.f32.gmra.mrb[24].mxu0 %vm218_vm1, %v78_v22  ;;  %618 = vmatprep.mubr.f32.mxu1 %v87_v30 }
  0xa9   :  { %1032 = vmatprep.mubr.msk.f32.mxu0 %vm1312_vm0, %v1313_v49 }
  0xab   :  { %619 = vmatmul.mubr.f32.gmra.mrb[28].mxu1 %v86_v23 }
  0xac   :  { %1033 = vmatmul.mubr.msk.f32.gmra.mrb[26].mxu0 %vm218_vm1, %v83_v25  ;;  %623 = vmatprep.mubr.f32.mxu1 %v92_v26 }
  0xad   :  { %1035 = vmatprep.mubr.msk.f32.mxu0 %vm1312_vm0, %v1313_v49 }
  0xaf   :  { %624 = vmatmul.mubr.f32.gmra.mrb[30].mxu1 %v91_v36 }
  0xb0   :  { %1036 = vmatmul.mubr.msk.f32.gmra.mrb[28].mxu0 %vm218_vm1, %v88_v28  ;;  %628 = vmatprep.mubr.f32.mxu1 %v97_v29 }
  0xb1   :  { %1038 = vmatprep.mubr.msk.f32.mxu0 %vm1312_vm0, %v1313_v49 }
  0xb3   :  { %629 = vmatmul.mubr.f32.gmra.mrb[32].mxu1 %v96_v31 }
  0xb4   :  { %1039 = vmatmul.mubr.msk.f32.gmra.mrb[30].mxu0 %vm218_vm1, %v93_v44  ;;  %633 = vmatprep.mubr.f32.mxu1 %v102_v32 }
  0xb5   :  { %1041 = vmatprep.mubr.msk.f32.mxu0 %vm1312_vm0, %v1313_v49 }
  0xb7   :  { %634 = vmatmul.mubr.f32.gmra.mrb[34].mxu1 %v101_v33 }
  0xb8   :  { %1042 = vmatmul.mubr.msk.f32.gmra.mrb[32].mxu0 %vm218_vm1, %v98_v35  ;;  %638 = vmatprep.mubr.f32.mxu1 %v107_v50 }
  0xb9   :  { %1044 = vmatprep.mubr.msk.f32.mxu0 %vm1312_vm0, %v1313_v49 }
  0xbb   :  { %639 = vmatmul.mubr.f32.gmra.mrb[36].mxu1 %v106_v37 }
  0xbc   :  { %1045 = vmatmul.mubr.msk.f32.gmra.mrb[34].mxu0 %vm218_vm1, %v103_v38  ;;  %643 = vmatprep.mubr.f32.mxu1 %v112_v39 }
  0xbd   :  { %1047 = vmatprep.mubr.msk.f32.mxu0 %vm1312_vm0, %v1313_v49 }
  0xbf   :  { %644 = vmatmul.mubr.f32.gmra.mrb[38].mxu1 %v111_v56 }
  0xc0   :  { %1048 = vmatmul.mubr.msk.f32.gmra.mrb[36].mxu0 %vm218_vm1, %v108_v40  ;;  %648 = vmatprep.mubr.f32.mxu1 %v117_v42 }
  0xc1   :  { %1050 = vmatprep.mubr.msk.f32.mxu0 %vm1312_vm0, %v1313_v49 }
  0xc3   :  { %649 = vmatmul.mubr.f32.gmra.mrb[40].mxu1 %v116_v43 }
  0xc4   :  { %1051 = vmatmul.mubr.msk.f32.gmra.mrb[38].mxu0 %vm218_vm1, %v113_v62  ;;  %653 = vmatprep.mubr.f32.mxu1 %v122_v45 }
  0xc5   :  { %1053 = vmatprep.mubr.msk.f32.mxu0 %vm1312_vm0, %v1313_v49 }
  0xc7   :  { %654 = vmatmul.mubr.f32.gmra.mrb[42].mxu1 %v121_v46 }
  0xc8   :  { %1054 = vmatmul.mubr.msk.f32.gmra.mrb[40].mxu0 %vm218_vm1, %v118_v47  ;;  %658 = vmatprep.mubr.f32.mxu1 %v127_v5 }
  0xc9   :  { %1056 = vmatprep.mubr.msk.f32.mxu0 %vm1312_vm0, %v1313_v49 }
  0xcb   :  { %659 = vmatmul.mubr.f32.gmra.mrb[44].mxu1 %v126_v48 }
  0xcc   :  { %1057 = vmatmul.mubr.msk.f32.gmra.mrb[42].mxu0 %vm218_vm1, %v123_v51  ;;  %663 = vmatprep.mubr.f32.mxu1 %v132_v13 }
  0xcd   :  { %1059 = vmatprep.mubr.msk.f32.mxu0 %vm1312_vm0, %v1313_v49 }
  0xcf   :  { %664 = vmatmul.mubr.f32.gmra.mrb[46].mxu1 %v131_v52 }
  0xd0   :  { %1060 = vmatmul.mubr.msk.f32.gmra.mrb[44].mxu0 %vm218_vm1, %v128_v53  ;;  %668 = vmatprep.mubr.f32.mxu1 %v137_v20 }
  0xd1   :  { %1062 = vmatprep.mubr.msk.f32.mxu0 %vm1312_vm0, %v1313_v49 }
  0xd3   :  { %669 = vmatmul.mubr.f32.gmra.mrb[48].mxu1 %v136_v54 }
  0xd4   :  { %1063 = vmatmul.mubr.msk.f32.gmra.mrb[46].mxu0 %vm218_vm1, %v133_v55 }
  0xd5   :  { %1065 = vmatprep.mubr.msk.f32.mxu0 %vm1312_vm0, %v1313_v49 }
  0xd8   :  { %1066 = vmatmul.mubr.msk.f32.gmra.mrb[48].mxu0 %vm218_vm1, %v138_v27 }
 0x116   :  { %v360_v57 = vpop.f32.mrb[0].mxu1 }
 0x117   :  { %v362_v58 = vpop.f32.mrb[1].mxu1  ;;  %v361_v19 = vadd.f32 %v2127_v17, %v360_v57 }
 0x11a   :  { %v365_v34 = vpop.f32.mrb[2].mxu1 }
 0x11b   :  { %v367_v0 = vpop.f32.mrb[3].mxu1  ;;  %v366_v23 = vadd.f32 %v2127_v17, %v365_v34 }
 0x11e   :  { %v370_v8 = vpop.f32.mrb[4].mxu1 }
 0x11f   :  { %v372_v59 = vpop.f32.mrb[5].mxu1  ;;  %v371_v29 = vadd.f32 %v2127_v17, %v370_v8 }
 0x122   :  { %v375_v41 = vpop.f32.mrb[6].mxu1 }
 0x123   :  { %v377_v60 = vpop.f32.mrb[7].mxu1  ;;  %v376_v35 = vadd.f32 %v2127_v17, %v375_v41 }
 0x126   :  { %v380_v61 = vpop.f32.mrb[8].mxu1 }
 0x127   :  { %v382_v63 = vpop.f32.mrb[9].mxu1  ;;  %v381_v56 = vadd.f32 %v2127_v17, %v380_v61 }
 0x12a   :  { %v385_v1 = vpop.f32.mrb[10].mxu1 }
 0x12b   :  { %v387_v2 = vpop.f32.mrb[11].mxu1  ;;  %v386_v45 = vadd.f32 %v2127_v17, %v385_v1 }
 0x12e   :  { %v390_v3 = vpop.f32.mrb[12].mxu1 }
 0x12f   :  { %v392_v49 = vpop.f32.mrb[13].mxu1  ;;  %v391_v51 = vadd.f32 %v2127_v17, %v390_v3 }
 0x132   :  { %v395_v12 = vpop.f32.mrb[14].mxu1 }
 0x133   :  { %v397_v4 = vpop.f32.mrb[15].mxu1  ;;  %v396_v54 = vadd.f32 %v2127_v17, %v395_v12 }
 0x136   :  { %v400_v6 = vpop.f32.mrb[16].mxu1 }
 0x137   :  { %v402_v7 = vpop.f32.mrb[17].mxu1  ;;  %v401_v34 = vadd.f32 %v2127_v17, %v400_v6 }
 0x13a   :  { %v2116_v9 = vpop.f32.mrb[18].mxu1 }
 0x13b   :  { %v407_v10 = vpop.f32.mrb[19].mxu1  ;;  %v406_v60 = vadd.f32 %v2127_v17, %v2116_v9 }
 0x13e   :  { %v2118_v11 = vpop.f32.mrb[20].mxu1 }
 0x13f   :  { %v412_v18 = vpop.f32.mrb[21].mxu1  ;;  %v411_v3 = vadd.f32 %v2127_v17, %v2118_v11 }
 0x142   :  { %v2120_v14 = vpop.f32.mrb[22].mxu1 }
 0x143   :  { %v417_v15 = vpop.f32.mrb[23].mxu1  ;;  %v416_v7 = vadd.f32 %v2127_v17, %v2120_v14 }
 0x146   :  { %v2122_v16 = vpop.f32.mrb[24].mxu1 }
 0x147   :  { %v422_v24 = vpop.f32.mrb[25].mxu1  ;;  %v421_v15 = vadd.f32 %v2127_v17, %v2122_v16 }
 0x14b   :  { %v740_v21 = vpop.f32.mrb[0].mxu0 }
 0x14c   :  { %v1209_v22 = vadd.f32 %v740_v21, %v361_v19  ;;  %v995_v30 = vpop.f32.mrb[1].mxu0 }
 0x14e   :  { %v864_v25 = vmax.f32 %v1209_v22, 0.0 }
 0x14f   :  { %v745_v26 = vpop.f32.mrb[2].mxu0 }
 0x150   :  { %889 = vst.msk [vmem:[%s2261_s3] sm:$0xff] %vm218_vm1, %v864_v25  ;;  %v1211_v36 = vadd.f32 %v745_v26, %v366_v23  ;;  %v998_v28 = vpop.f32.mrb[3].mxu0 }
 0x152   :  { %v865_v31 = vmax.f32 %v1211_v36, 0.0 }
 0x153   :  { %v750_v44 = vpop.f32.mrb[4].mxu0 }
 0x154   :  { %890 = vst.msk [vmem:[%s2261_s3 + $0x8] sm:$0xff] %vm218_vm1, %v865_v31  ;;  %v1213_v32 = vadd.f32 %v750_v44, %v371_v29  ;;  %v1001_v33 = vpop.f32.mrb[5].mxu0 }
 0x156   :  { %v866_v50 = vmax.f32 %v1213_v32, 0.0 }
 0x157   :  { %v755_v37 = vpop.f32.mrb[6].mxu0 }
 0x158   :  { %891 = vst.msk [vmem:[%s2261_s3 + $0x10] sm:$0xff] %vm218_vm1, %v866_v50  ;;  %v1215_v38 = vadd.f32 %v755_v37, %v376_v35  ;;  %v1004_v39 = vpop.f32.mrb[7].mxu0 }
 0x15a   :  { %v867_v40 = vmax.f32 %v1215_v38, 0.0 }
 0x15b   :  { %v760_v42 = vpop.f32.mrb[8].mxu0 }
 0x15c   :  { %892 = vst.msk [vmem:[%s2261_s3 + $0x18] sm:$0xff] %vm218_vm1, %v867_v40  ;;  %v1217_v43 = vadd.f32 %v760_v42, %v381_v56  ;;  %v1007_v62 = vpop.f32.mrb[9].mxu0 }
 0x15e   :  { %v868_v46 = vmax.f32 %v1217_v43, 0.0 }
 0x15f   :  { %v765_v47 = vpop.f32.mrb[10].mxu0 }
 0x160   :  { %893 = vst.msk [vmem:[%s2261_s3 + $0x20] sm:$0xff] %vm218_vm1, %v868_v46  ;;  %v1219_v5 = vadd.f32 %v765_v47, %v386_v45  ;;  %v1010_v48 = vpop.f32.mrb[11].mxu0 }
 0x162   :  { %v869_v13 = vmax.f32 %v1219_v5, 0.0 }
 0x163   :  { %v770_v52 = vpop.f32.mrb[12].mxu0 }
 0x164   :  { %894 = vst.msk [vmem:[%s2261_s3 + $0x28] sm:$0xff] %vm218_vm1, %v869_v13  ;;  %v1221_v53 = vadd.f32 %v770_v52, %v391_v51  ;;  %v1013_v20 = vpop.f32.mrb[13].mxu0 }
 0x166   :  { %v870_v55 = vmax.f32 %v1221_v53, 0.0 }
 0x167   :  { %v775_v27 = vpop.f32.mrb[14].mxu0 }
 0x168   :  { %895 = vst.msk [vmem:[%s2261_s3 + $0x30] sm:$0xff] %vm218_vm1, %v870_v55  ;;  %v1223_v57 = vadd.f32 %v775_v27, %v396_v54  ;;  %v1016_v58 = vpop.f32.mrb[15].mxu0 }
 0x16a   :  { %v871_v0 = vmax.f32 %v1223_v57, 0.0 }
 0x16b   :  { %v780_v8 = vpop.f32.mrb[16].mxu0 }
 0x16c   :  { %896 = vst.msk [vmem:[%s2261_s3 + $0x38] sm:$0xff] %vm218_vm1, %v871_v0  ;;  %v1225_v59 = vadd.f32 %v780_v8, %v401_v34  ;;  %v1019_v41 = vpop.f32.mrb[17].mxu0 }
 0x16e   :  { %v872_v61 = vmax.f32 %v1225_v59, 0.0 }
 0x16f   :  { %v785_v63 = vpop.f32.mrb[18].mxu0 }
 0x170   :  { %897 = vst.msk [vmem:[%s2261_s3 + $0x40] sm:$0xff] %vm218_vm1, %v872_v61  ;;  %v1227_v1 = vadd.f32 %v785_v63, %v406_v60  ;;  %v1022_v2 = vpop.f32.mrb[19].mxu0 }
 0x172   :  { %v873_v49 = vmax.f32 %v1227_v1, 0.0 }
 0x173   :  { %v790_v12 = vpop.f32.mrb[20].mxu0 }
 0x174   :  { %898 = vst.msk [vmem:[%s2261_s3 + $0x48] sm:$0xff] %vm218_vm1, %v873_v49  ;;  %v1229_v4 = vadd.f32 %v790_v12, %v411_v3  ;;  %v1025_v6 = vpop.f32.mrb[21].mxu0 }
 0x176   :  { %v874_v9 = vmax.f32 %v1229_v4, 0.0 }
 0x177   :  { %v795_v10 = vpop.f32.mrb[22].mxu0 }
 0x178   :  { %899 = vst.msk [vmem:[%s2261_s3 + $0x50] sm:$0xff] %vm218_vm1, %v874_v9  ;;  %v1231_v11 = vadd.f32 %v795_v10, %v416_v7  ;;  %v1028_v18 = vpop.f32.mrb[23].mxu0 }
 0x17a   :  { %v875_v24 = vmax.f32 %v1231_v11, 0.0  ;;  %v615_v19 = vpop.f32.mrb[26].mxu1 }
 0x17b   :  { %v800_v21 = vpop.f32.mrb[24].mxu0  ;;  %v617_v22 = vpop.f32.mrb[27].mxu1  ;;  %v1234_v23 = vadd.f32 %v2127_v17, %v615_v19 }
 0x17c   :  { %900 = vst.msk [vmem:[%s2261_s3 + $0x58] sm:$0xff] %vm218_vm1, %v875_v24  ;;  %v1233_v14 = vadd.f32 %v800_v21, %v421_v15  ;;  %v1031_v30 = vpop.f32.mrb[25].mxu0 }
 0x17e   :  { %v876_v25 = vmax.f32 %v1233_v14, 0.0  ;;  %v620_v26 = vpop.f32.mrb[28].mxu1 }
 0x17f   :  { %v805_v36 = vpop.f32.mrb[26].mxu0  ;;  %v622_v28 = vpop.f32.mrb[29].mxu1  ;;  %v1236_v31 = vadd.f32 %v2127_v17, %v620_v26 }
 0x180   :  { %901 = vst.msk [vmem:[%s2261_s3 + $0x60] sm:$0xff] %vm218_vm1, %v876_v25  ;;  %v1235_v16 = vadd.f32 %v1234_v23, %v805_v36  ;;  %v1034_v29 = vpop.f32.mrb[27].mxu0 }
 0x182   :  { %v877_v44 = vmax.f32 %v1235_v16, 0.0  ;;  %v625_v32 = vpop.f32.mrb[30].mxu1 }
 0x183   :  { %v810_v33 = vpop.f32.mrb[28].mxu0  ;;  %v627_v35 = vpop.f32.mrb[31].mxu1  ;;  %v1238_v38 = vadd.f32 %v2127_v17, %v625_v32 }
 0x184   :  { %902 = vst.msk [vmem:[%s2261_s3 + $0x68] sm:$0xff] %vm218_vm1, %v877_v44  ;;  %v1237_v50 = vadd.f32 %v1236_v31, %v810_v33  ;;  %v1037_v37 = vpop.f32.mrb[29].mxu0 }
 0x186   :  { %v878_v39 = vmax.f32 %v1237_v50, 0.0  ;;  %v630_v56 = vpop.f32.mrb[32].mxu1 }
 0x187   :  { %v815_v40 = vpop.f32.mrb[30].mxu0  ;;  %v632_v42 = vpop.f32.mrb[33].mxu1  ;;  %v1240_v45 = vadd.f32 %v2127_v17, %v630_v56 }
 0x188   :  { %903 = vst.msk [vmem:[%s2261_s3 + $0x70] sm:$0xff] %vm218_vm1, %v878_v39  ;;  %v1239_v43 = vadd.f32 %v1238_v38, %v815_v40  ;;  %v1040_v62 = vpop.f32.mrb[31].mxu0 }
 0x18a   :  { %v879_v46 = vmax.f32 %v1239_v43, 0.0  ;;  %v635_v47 = vpop.f32.mrb[34].mxu1 }
 0x18b   :  { %v820_v5 = vpop.f32.mrb[32].mxu0  ;;  %v637_v48 = vpop.f32.mrb[35].mxu1  ;;  %v1242_v52 = vadd.f32 %v2127_v17, %v635_v47 }
 0x18c   :  { %904 = vst.msk [vmem:[%s2261_s3 + $0x78] sm:$0xff] %vm218_vm1, %v879_v46  ;;  %v1241_v51 = vadd.f32 %v1240_v45, %v820_v5  ;;  %v1043_v13 = vpop.f32.mrb[33].mxu0 }
 0x18e   :  { %v880_v53 = vmax.f32 %v1241_v51, 0.0  ;;  %v640_v20 = vpop.f32.mrb[36].mxu1 }
 0x18f   :  { %v825_v54 = vpop.f32.mrb[34].mxu0  ;;  %v642_v55 = vpop.f32.mrb[37].mxu1  ;;  %v1244_v58 = vadd.f32 %v2127_v17, %v640_v20 }
 0x190   :  { %905 = vst.msk [vmem:[%s2261_s3 + $0x80] sm:$0xff] %vm218_vm1, %v880_v53  ;;  %v1243_v27 = vadd.f32 %v1242_v52, %v825_v54  ;;  %v1046_v57 = vpop.f32.mrb[35].mxu0 }
 0x192   :  { %v881_v34 = vmax.f32 %v1243_v27, 0.0  ;;  %v645_v0 = vpop.f32.mrb[38].mxu1 }
 0x193   :  { %v830_v8 = vpop.f32.mrb[36].mxu0  ;;  %v647_v59 = vpop.f32.mrb[39].mxu1  ;;  %v1246_v61 = vadd.f32 %v2127_v17, %v645_v0 }
 0x194   :  { %906 = vst.msk [vmem:[%s2261_s3 + $0x88] sm:$0xff] %vm218_vm1, %v881_v34  ;;  %v1245_v41 = vadd.f32 %v1244_v58, %v830_v8  ;;  %v1049_v60 = vpop.f32.mrb[37].mxu0 }
 0x196   :  { %v882_v63 = vmax.f32 %v1245_v41, 0.0  ;;  %v650_v1 = vpop.f32.mrb[40].mxu1 }
 0x197   :  { %v835_v2 = vpop.f32.mrb[38].mxu0  ;;  %v652_v3 = vpop.f32.mrb[41].mxu1  ;;  %v1248_v4 = vadd.f32 %v2127_v17, %v650_v1 }
 0x198   :  { %907 = vst.msk [vmem:[%s2261_s3 + $0x90] sm:$0xff] %vm218_vm1, %v882_v63  ;;  %v1247_v49 = vadd.f32 %v1246_v61, %v835_v2  ;;  %v1052_v12 = vpop.f32.mrb[39].mxu0 }
 0x19a   :  { %v883_v6 = vmax.f32 %v1247_v49, 0.0  ;;  %v655_v7 = vpop.f32.mrb[42].mxu1 }
 0x19b   :  { %v840_v9 = vpop.f32.mrb[40].mxu0  ;;  %v657_v10 = vpop.f32.mrb[43].mxu1  ;;  %v1250_v15 = vadd.f32 %v2127_v17, %v655_v7 }
 0x19c   :  { %908 = vst.msk [vmem:[%s2261_s3 + $0x98] sm:$0xff] %vm218_vm1, %v883_v6  ;;  %v1249_v11 = vadd.f32 %v1248_v4, %v840_v9  ;;  %v1055_v18 = vpop.f32.mrb[41].mxu0 }
 0x19e   :  { %v884_v24 = vmax.f32 %v1249_v11, 0.0  ;;  %v660_v19 = vpop.f32.mrb[44].mxu1 }
 0x19f   :  { %v845_v21 = vpop.f32.mrb[42].mxu0  ;;  %v662_v22 = vpop.f32.mrb[45].mxu1  ;;  %v1252_v23 = vadd.f32 %v2127_v17, %v660_v19 }
 0x1a0   :  { %909 = vst.msk [vmem:[%s2261_s3 + $0xa0] sm:$0xff] %vm218_vm1, %v884_v24  ;;  %v1251_v14 = vadd.f32 %v1250_v15, %v845_v21  ;;  %v1058_v30 = vpop.f32.mrb[43].mxu0 }
 0x1a2   :  { %v885_v25 = vmax.f32 %v1251_v14, 0.0  ;;  %v665_v26 = vpop.f32.mrb[46].mxu1 }
 0x1a3   :  { %v850_v36 = vpop.f32.mrb[44].mxu0  ;;  %v667_v28 = vpop.f32.mrb[47].mxu1  ;;  %v1254_v31 = vadd.f32 %v2127_v17, %v665_v26 }
 0x1a4   :  { %910 = vst.msk [vmem:[%s2261_s3 + $0xa8] sm:$0xff] %vm218_vm1, %v885_v25  ;;  %v1253_v16 = vadd.f32 %v1252_v23, %v850_v36  ;;  %v1061_v29 = vpop.f32.mrb[45].mxu0 }
 0x1a6   :  { %v886_v44 = vmax.f32 %v1253_v16, 0.0  ;;  %v670_v32 = vpop.f32.mrb[48].mxu1 }
 0x1a7   :  { %v855_v33 = vpop.f32.mrb[46].mxu0  ;;  %v672_v35 = vpop.f32.mrb[49].mxu1  ;;  %v1256_v38 = vadd.f32 %v2127_v17, %v670_v32 }
 0x1a8   :  { %911 = vst.msk [vmem:[%s2261_s3 + $0xb0] sm:$0xff] %vm218_vm1, %v886_v44  ;;  %v1255_v50 = vadd.f32 %v1254_v31, %v855_v33  ;;  %v1064_v37 = vpop.f32.mrb[47].mxu0 }
 0x1aa   :  { %v887_v39 = vmax.f32 %v1255_v50, 0.0 }
 0x1ab   :  { %v860_v56 = vpop.f32.mrb[48].mxu0 }
 0x1ac   :  { %912 = vst.msk [vmem:[%s2261_s3 + $0xb8] sm:$0xff] %vm218_vm1, %v887_v39  ;;  %v1257_v40 = vadd.f32 %v1256_v38, %v860_v56  ;;  %v1067_v42 = vpop.f32.mrb[49].mxu0 }
 0x1ae   :  { %v888_v43 = vmax.f32 %v1257_v40, 0.0 }
 0x1b0   :  { %913 = vst.msk [vmem:[%s2261_s3 + $0xc0] sm:$0xff] %vm218_vm1, %v888_v43 }

// kernel: flappy_bird_forward.7
= control target key start
LH: loop header
LB: loop body
LE: loop exit
PB: predicated region body
PF: predicated region fallthrough
CT: control target
= control target key end

     0   :  { %10 = vsyncpa [#allocation4], 0  ;;  %s2907_s18 = smov 0   ;;  %s3857_s0 = inlined_call_operand.vmem [shape: f32[2,6400], index: 0, kind: input, shape index: {}]   ;;  %s3858_s1 = inlined_call_operand.vmem [shape: f32[6400,512], index: 1, kind: input, shape index: {}]   ;;  %s3859_s2 = inlined_call_operand.vmem [shape: f32[1,512], index: 2, kind: input, shape index: {}]   ;;  %s3860_s3 = inlined_call_operand.vmem [shape: f32[512,128], index: 3, kind: input, shape index: {}]   ;;  %s3861_s4 = inlined_call_operand.vmem [shape: f32[1,128], index: 4, kind: input, shape index: {}]   ;;  %s3862_s5 = inlined_call_operand.hbm [shape: f32[2,128], index: 5, kind: output, shape index: {}]  }
   0x1 LB: > { %s2913_s19 = sadd.s32 4294967295, %s2872_s18   ;;  %p2014_p0 = scmp.ge.s32.totalorder %s2872_s18, 1  ;;  %s2872_s18 = sphi %s2907_s18, %s16_s18  }
   0x2   : > { %p196_p1 = scmp.lt.s32.totalorder %s2872_s18, 6 }
   0x4   : > { %p197_p2 = pnand %p2014_p0, %p196_p1 }
   0x5   : > { %s225_s20 = smul.u32 (!%p197_p2), 10, %s2913_s19  ;;  %p2018_p5 = scmp.ne.s32.totalorder (!%p197_p2), %s2913_s19, 0 }
   0x6   : > { %200 = sbr.rel (%p197_p2) target bundleno = 831 (0x33f), region = 40 }
   0x7   : > { %s231_s21 = smul.u32 (!%p197_p2), 160, %s2913_s19  ;;  %p226_p3 = scmp.lt.s32.totalorder (!%p197_p2), %s225_s20, 49 }
   0x9   : > { %p232_p4 = scmp.lt.s32.totalorder (!%p197_p2), %s231_s21, 799 }
   0xd   : > { %s3864_s20 = smov (!%p226_p3, %s225_s20), 49  ;;  %s3866_s21 = smov (!%p232_p4, %s231_s21), 799 }
   0xe   : > { %s2015_s22 = sshll.u32 %s3864_s20, 1  ;;  %s2026_s26 = sshll.u32 %s3866_s21, 5  ;;  %v2874_v0 = vmov (!%p2018_p5), 0.0  }
   0xf   : > { %s2922_s25 = scalar_lea.vmem %s3857_s0, %s2015_s22  ;;  %s2927_s29 = scalar_lea.vmem %s3858_s1, %s2026_s26  ;;  %242 = vst [vmem:[#allocation2] sm:$0xff] (!%p2018_p5), %v2874_v0 }
  0x10   : > { %241 = sbr.rel (%p2018_p5) target bundleno = 23 (0x17), region = 44 }
  0x17 PF: > { %v248_v1 = vld [vmem:[%s2927_s29 + $0x8] sm:$0xff]  ;;  %v250_v3 = vld [vmem:[%s2927_s29 + $0x18] sm:$0xff]  ;;  %v247_v6 = vld [vmem:[%s2927_s29] sm:$0xff]  ;;  %p2020_p6 = scmp.ne.s32.totalorder %s2913_s19, 4 }
  0x18   : > { %v252_v2 = vld [vmem:[%s2927_s29 + $0x28] sm:$0xff]  ;;  %v254_v5 = vld [vmem:[%s2927_s29 + $0x38] sm:$0xff]  ;;  %v251_v7 = vld [vmem:[%s2927_s29 + $0x20] sm:$0xff] }
  0x19   : > { %v2097_v4 = vpack.c.bf16 %v252_v2, %v248_v1  ;;  %v2417_v8 = vpack.c.bf16 %v254_v5, %v250_v3  ;;  %v2099_v9 = vpack.c.bf16 %v251_v7, %v247_v6  ;;  %v249_v10 = vld [vmem:[%s2927_s29 + $0x10] sm:$0xff]  ;;  %v256_v12 = vld [vmem:[%s2927_s29 + $0x48] sm:$0xff]  ;;  %v258_v15 = vld [vmem:[%s2927_s29 + $0x58] sm:$0xff] }
  0x1a   : > { %v253_v11 = vld [vmem:[%s2927_s29 + $0x30] sm:$0xff]  ;;  %v260_v14 = vld [vmem:[%s2927_s29 + $0x68] sm:$0xff]  ;;  %v262_v16 = vld [vmem:[%s2927_s29 + $0x78] sm:$0xff] }
  0x1b   : > { %2098 = vmatprep.subr.bf16.mxu0 %v2097_v4  ;;  %v2419_v13 = vpack.c.bf16 %v253_v11, %v249_v10  ;;  %2418 = vmatprep.subr.bf16.mxu1 %v2417_v8  ;;  %v2101_v17 = vpack.c.bf16 %v260_v14, %v256_v12  ;;  %v2421_v18 = vpack.c.bf16 %v262_v16, %v258_v15  ;;  %v255_v19 = vld [vmem:[%s2927_s29 + $0x40] sm:$0xff]  ;;  %v257_v21 = vld [vmem:[%s2927_s29 + $0x50] sm:$0xff]  ;;  %v264_v24 = vld [vmem:[%s2927_s29 + $0x88] sm:$0xff] }
  0x1c   : > { %2100 = vmatpush1.bf16.msra.mxu0 %v2099_v9  ;;  %v259_v20 = vld [vmem:[%s2927_s29 + $0x60] sm:$0xff]  ;;  %v261_v23 = vld [vmem:[%s2927_s29 + $0x70] sm:$0xff]  ;;  %v268_v25 = vld [vmem:[%s2927_s29 + $0xa8] sm:$0xff] }
  0x1d   : > { %2420 = vmatpush1.bf16.msra.mxu1 %v2419_v13  ;;  %v2103_v22 = vpack.c.bf16 %v259_v20, %v255_v19  ;;  %2102 = vmatprep.subr.bf16.mxu0 %v2101_v17  ;;  %v2423_v26 = vpack.c.bf16 %v261_v23, %v257_v21  ;;  %v2105_v27 = vpack.c.bf16 %v268_v25, %v264_v24  ;;  %v266_v28 = vld [vmem:[%s2927_s29 + $0x98] sm:$0xff]  ;;  %v263_v30 = vld [vmem:[%s2927_s29 + $0x80] sm:$0xff]  ;;  %v265_v33 = vld [vmem:[%s2927_s29 + $0x90] sm:$0xff] }
  0x1e   : > { %2422 = vmatprep.subr.bf16.mxu1 %v2421_v18  ;;  %v270_v29 = vld [vmem:[%s2927_s29 + $0xb8] sm:$0xff]  ;;  %v267_v32 = vld [vmem:[%s2927_s29 + $0xa0] sm:$0xff]  ;;  %v269_v34 = vld [vmem:[%s2927_s29 + $0xb0] sm:$0xff] }
  0x1f   : > { %v2425_v31 = vpack.c.bf16 %v270_v29, %v266_v28  ;;  %v2107_v35 = vpack.c.bf16 %v267_v32, %v263_v30  ;;  %v272_v36 = vld [vmem:[%s2927_s29 + $0xc8] sm:$0xff]  ;;  %v274_v38 = vld [vmem:[%s2927_s29 + $0xd8] sm:$0xff]  ;;  %v2427_v39 = vpack.c.bf16 %v269_v34, %v265_v33  ;;  %v271_v42 = vld [vmem:[%s2927_s29 + $0xc0] sm:$0xff] }
  0x20   : > { %2104 = vmatpush1.bf16.msra.mxu0 %v2103_v22  ;;  %v276_v37 = vld [vmem:[%s2927_s29 + $0xe8] sm:$0xff]  ;;  %v278_v41 = vld [vmem:[%s2927_s29 + $0xf8] sm:$0xff]  ;;  %v275_v43 = vld [vmem:[%s2927_s29 + $0xe0] sm:$0xff] }
  0x21   : > { %2424 = vmatpush1.bf16.msra.mxu1 %v2423_v26  ;;  %2106 = vmatprep.subr.bf16.mxu0 %v2105_v27  ;;  %v2109_v40 = vpack.c.bf16 %v276_v37, %v272_v36  ;;  %v2429_v44 = vpack.c.bf16 %v278_v41, %v274_v38  ;;  %v273_v45 = vld [vmem:[%s2927_s29 + $0xd0] sm:$0xff]  ;;  %v280_v47 = vld [vmem:[%s2927_s29 + $0x108] sm:$0xff]  ;;  %v282_v49 = vld [vmem:[%s2927_s29 + $0x118] sm:$0xff]  ;;  %v2111_v51 = vpack.c.bf16 %v275_v43, %v271_v42 }
  0x22   : > { %2426 = vmatprep.subr.bf16.mxu1 %v2425_v31  ;;  %v277_v46 = vld [vmem:[%s2927_s29 + $0xf0] sm:$0xff]  ;;  %v284_v48 = vld [vmem:[%s2927_s29 + $0x128] sm:$0xff]  ;;  %v286_v50 = vld [vmem:[%s2927_s29 + $0x138] sm:$0xff] }
  0x23   : > { %v2431_v52 = vpack.c.bf16 %v277_v46, %v273_v45  ;;  %v2113_v53 = vpack.c.bf16 %v284_v48, %v280_v47  ;;  %v279_v54 = vld [vmem:[%s2927_s29 + $0x100] sm:$0xff]  ;;  %v281_v56 = vld [vmem:[%s2927_s29 + $0x110] sm:$0xff]  ;;  %v2433_v57 = vpack.c.bf16 %v286_v50, %v282_v49  ;;  %v288_v59 = vld [vmem:[%s2927_s29 + $0x148] sm:$0xff]  ;;  %v2875_v47 = vmov 1983009808  }
  0x24   : > { %2108 = vmatpush1.bf16.msra.mxu0 %v2107_v35  ;;  %v283_v55 = vld [vmem:[%s2927_s29 + $0x120] sm:$0xff]  ;;  %v285_v58 = vld [vmem:[%s2927_s29 + $0x130] sm:$0xff]  ;;  %v292_v60 = vld [vmem:[%s2927_s29 + $0x168] sm:$0xff]  ;;  %v892_v48 = vunpack.c.l.s4 %v2875_v47  ;;  %v894_v49 = vlaneseq }
  0x25   : > { %2428 = vmatpush1.bf16.msra.mxu1 %v2427_v39  ;;  %2110 = vmatprep.subr.bf16.mxu0 %v2109_v40  ;;  %v290_v61 = vld [vmem:[%s2927_s29 + $0x158] sm:$0xff]  ;;  %v2115_v63 = vpack.c.bf16 %v283_v55, %v279_v54  ;;  %v2435_v0 = vpack.c.bf16 %v285_v58, %v281_v56  ;;  %v2117_v1 = vpack.c.bf16 %v292_v60, %v288_v59  ;;  %v287_v2 = vld [vmem:[%s2927_s29 + $0x140] sm:$0xff]  ;;  %v289_v4 = vld [vmem:[%s2927_s29 + $0x150] sm:$0xff] }
  0x26   : > { %2430 = vmatprep.subr.bf16.mxu1 %v2429_v44  ;;  %v294_v62 = vld [vmem:[%s2927_s29 + $0x178] sm:$0xff]  ;;  %v291_v3 = vld [vmem:[%s2927_s29 + $0x160] sm:$0xff]  ;;  %v293_v6 = vld [vmem:[%s2927_s29 + $0x170] sm:$0xff] }
  0x27   : > { %v2437_v5 = vpack.c.bf16 %v294_v62, %v290_v61  ;;  %v296_v7 = vld [vmem:[%s2927_s29 + $0x188] sm:$0xff]  ;;  %v298_v9 = vld [vmem:[%s2927_s29 + $0x198] sm:$0xff]  ;;  %v2119_v11 = vpack.c.bf16 %v291_v3, %v287_v2  ;;  %v2439_v12 = vpack.c.bf16 %v293_v6, %v289_v4  ;;  %v295_v14 = vld [vmem:[%s2927_s29 + $0x180] sm:$0xff]  ;;  %v893_v62 = vunpack.c.0.s8 %v892_v48 }
  0x28   : > { %2112 = vmatpush1.bf16.msra.mxu0 %v2111_v51  ;;  %v300_v8 = vld [vmem:[%s2927_s29 + $0x1a8] sm:$0xff]  ;;  %v302_v10 = vld [vmem:[%s2927_s29 + $0x1b8] sm:$0xff]  ;;  %v299_v15 = vld [vmem:[%s2927_s29 + $0x1a0] sm:$0xff] }
  0x29   : > { %2432 = vmatpush1.bf16.msra.mxu1 %v2431_v52  ;;  %2114 = vmatprep.subr.bf16.mxu0 %v2113_v53  ;;  %v2121_v13 = vpack.c.bf16 %v300_v8, %v296_v7  ;;  %v297_v16 = vld [vmem:[%s2927_s29 + $0x190] sm:$0xff]  ;;  %v2441_v17 = vpack.c.bf16 %v302_v10, %v298_v9  ;;  %v304_v19 = vld [vmem:[%s2927_s29 + $0x1c8] sm:$0xff]  ;;  %v306_v21 = vld [vmem:[%s2927_s29 + $0x1d8] sm:$0xff]  ;;  %v2123_v23 = vpack.c.bf16 %v299_v15, %v295_v14 }
  0x2a   : > { %2434 = vmatprep.subr.bf16.mxu1 %v2433_v57  ;;  %v301_v18 = vld [vmem:[%s2927_s29 + $0x1b0] sm:$0xff]  ;;  %v308_v20 = vld [vmem:[%s2927_s29 + $0x1e8] sm:$0xff]  ;;  %v310_v22 = vld [vmem:[%s2927_s29 + $0x1f8] sm:$0xff] }
  0x2b   : > { %v2443_v24 = vpack.c.bf16 %v301_v18, %v297_v16  ;;  %v2125_v25 = vpack.c.bf16 %v308_v20, %v304_v19  ;;  %v303_v26 = vld [vmem:[%s2927_s29 + $0x1c0] sm:$0xff]  ;;  %v305_v28 = vld [vmem:[%s2927_s29 + $0x1d0] sm:$0xff]  ;;  %v2445_v29 = vpack.c.bf16 %v310_v22, %v306_v21  ;;  %v312_v31 = vld [vmem:[%s2927_s29 + $0x208] sm:$0xff] }
  0x2c   : > { %2116 = vmatpush1.bf16.msra.mxu0 %v2115_v63  ;;  %v307_v27 = vld [vmem:[%s2927_s29 + $0x1e0] sm:$0xff]  ;;  %v309_v30 = vld [vmem:[%s2927_s29 + $0x1f0] sm:$0xff]  ;;  %v316_v32 = vld [vmem:[%s2927_s29 + $0x228] sm:$0xff]  ;;  %v3014_v63 = vshrl.u32 %v894_v49, 7 }
  0x2d   : > { %2436 = vmatpush1.bf16.msra.mxu1 %v2435_v0  ;;  %2118 = vmatprep.subr.bf16.mxu0 %v2117_v1  ;;  %v314_v33 = vld [vmem:[%s2927_s29 + $0x218] sm:$0xff]  ;;  %v2127_v35 = vpack.c.bf16 %v307_v27, %v303_v26  ;;  %v2447_v36 = vpack.c.bf16 %v309_v30, %v305_v28  ;;  %v2129_v37 = vpack.c.bf16 %v316_v32, %v312_v31  ;;  %v311_v38 = vld [vmem:[%s2927_s29 + $0x200] sm:$0xff]  ;;  %v313_v40 = vld [vmem:[%s2927_s29 + $0x210] sm:$0xff] }
  0x2e   : > { %2438 = vmatprep.subr.bf16.mxu1 %v2437_v5  ;;  %v318_v34 = vld [vmem:[%s2927_s29 + $0x238] sm:$0xff]  ;;  %v315_v39 = vld [vmem:[%s2927_s29 + $0x220] sm:$0xff]  ;;  %v317_v42 = vld [vmem:[%s2927_s29 + $0x230] sm:$0xff] }
  0x2f   : > { %v2449_v41 = vpack.c.bf16 %v318_v34, %v314_v33  ;;  %v320_v43 = vld [vmem:[%s2927_s29 + $0x248] sm:$0xff]  ;;  %v322_v45 = vld [vmem:[%s2927_s29 + $0x258] sm:$0xff]  ;;  %v2131_v50 = vpack.c.bf16 %v315_v39, %v311_v38  ;;  %v2451_v51 = vpack.c.bf16 %v317_v42, %v313_v40  ;;  %v319_v53 = vld [vmem:[%s2927_s29 + $0x240] sm:$0xff] }
  0x30   : > { %2120 = vmatpush1.bf16.msra.mxu0 %v2119_v11  ;;  %v324_v44 = vld [vmem:[%s2927_s29 + $0x268] sm:$0xff]  ;;  %v326_v46 = vld [vmem:[%s2927_s29 + $0x278] sm:$0xff]  ;;  %v323_v54 = vld [vmem:[%s2927_s29 + $0x260] sm:$0xff] }
  0x31   : > { %2440 = vmatpush1.bf16.msra.mxu1 %v2439_v12  ;;  %2122 = vmatprep.subr.bf16.mxu0 %v2121_v13  ;;  %v2133_v52 = vpack.c.bf16 %v324_v44, %v320_v43  ;;  %v321_v55 = vld [vmem:[%s2927_s29 + $0x250] sm:$0xff]  ;;  %v2453_v56 = vpack.c.bf16 %v326_v46, %v322_v45  ;;  %v328_v58 = vld [vmem:[%s2927_s29 + $0x288] sm:$0xff]  ;;  %v330_v60 = vld [vmem:[%s2927_s29 + $0x298] sm:$0xff]  ;;  %v2135_v0 = vpack.c.bf16 %v323_v54, %v319_v53 }
  0x32   : > { %2442 = vmatprep.subr.bf16.mxu1 %v2441_v17  ;;  %v325_v57 = vld [vmem:[%s2927_s29 + $0x270] sm:$0xff]  ;;  %v332_v59 = vld [vmem:[%s2927_s29 + $0x2a8] sm:$0xff]  ;;  %v334_v61 = vld [vmem:[%s2927_s29 + $0x2b8] sm:$0xff]  ;;  %v3025_v12 = vsub.s32 %v893_v62, %v3014_v63 }
  0x33   : > { %v2455_v1 = vpack.c.bf16 %v325_v57, %v321_v55  ;;  %v2137_v2 = vpack.c.bf16 %v332_v59, %v328_v58  ;;  %v327_v3 = vld [vmem:[%s2927_s29 + $0x280] sm:$0xff]  ;;  %v329_v5 = vld [vmem:[%s2927_s29 + $0x290] sm:$0xff]  ;;  %v2457_v6 = vpack.c.bf16 %v334_v61, %v330_v60  ;;  %v336_v8 = vld [vmem:[%s2927_s29 + $0x2c8] sm:$0xff] }
  0x34   : > { %2124 = vmatpush1.bf16.msra.mxu0 %v2123_v23  ;;  %v331_v4 = vld [vmem:[%s2927_s29 + $0x2a0] sm:$0xff]  ;;  %v333_v7 = vld [vmem:[%s2927_s29 + $0x2b0] sm:$0xff]  ;;  %v340_v9 = vld [vmem:[%s2927_s29 + $0x2e8] sm:$0xff] }
  0x35   : > { %2444 = vmatpush1.bf16.msra.mxu1 %v2443_v24  ;;  %2126 = vmatprep.subr.bf16.mxu0 %v2125_v25  ;;  %v338_v10 = vld [vmem:[%s2927_s29 + $0x2d8] sm:$0xff]  ;;  %v2139_v13 = vpack.c.bf16 %v331_v4, %v327_v3  ;;  %v335_v14 = vld [vmem:[%s2927_s29 + $0x2c0] sm:$0xff]  ;;  %v2459_v15 = vpack.c.bf16 %v333_v7, %v329_v5  ;;  %v2141_v16 = vpack.c.bf16 %v340_v9, %v336_v8  ;;  %v337_v18 = vld [vmem:[%s2927_s29 + $0x2d0] sm:$0xff] }
  0x36   : > { %2446 = vmatprep.subr.bf16.mxu1 %v2445_v29  ;;  %v342_v11 = vld [vmem:[%s2927_s29 + $0x2f8] sm:$0xff]  ;;  %v339_v17 = vld [vmem:[%s2927_s29 + $0x2e0] sm:$0xff]  ;;  %v341_v19 = vld [vmem:[%s2927_s29 + $0x2f0] sm:$0xff] }
  0x37   : > { %v2461_v20 = vpack.c.bf16 %v342_v11, %v338_v10  ;;  %v344_v21 = vld [vmem:[%s2927_s29 + $0x308] sm:$0xff]  ;;  %v3034_v23 = vld [vmem:[%s2922_s25] sm:$0xff]  ;;  %v346_v24 = vld [vmem:[%s2927_s29 + $0x318] sm:$0xff]  ;;  %v2143_v27 = vpack.c.bf16 %v339_v17, %v335_v14  ;;  %v2463_v28 = vpack.c.bf16 %v341_v19, %v337_v18 }
  0x38   : > { %2128 = vmatpush1.bf16.msra.mxu0 %v2127_v35  ;;  %v348_v22 = vld [vmem:[%s2927_s29 + $0x328] sm:$0xff]  ;;  %v350_v25 = vld [vmem:[%s2927_s29 + $0x338] sm:$0xff]  ;;  %v3040_v26 = vrot.slane %v3034_v23, %v3025_v12  ;;  %v343_v30 = vld [vmem:[%s2927_s29 + $0x300] sm:$0xff]  ;;  %v890_v9 = vcombine.high %v3034_v23, %v3034_v23 }
  0x39   : > { %2448 = vmatpush1.bf16.msra.mxu1 %v2447_v36  ;;  %2130 = vmatprep.subr.bf16.mxu0 %v2129_v37  ;;  %v2145_v29 = vpack.c.bf16 %v348_v22, %v344_v21  ;;  %v347_v31 = vld [vmem:[%s2927_s29 + $0x320] sm:$0xff]  ;;  %v345_v32 = vld [vmem:[%s2927_s29 + $0x310] sm:$0xff]  ;;  %v2465_v34 = vpack.c.bf16 %v350_v25, %v346_v24  ;;  %v352_v36 = vld [vmem:[%s2927_s29 + $0x348] sm:$0xff] }
  0x3a   : > { %2450 = vmatprep.subr.bf16.mxu1 %v2449_v41  ;;  %v905_v33 = vcombine.high %v3040_v26, %v3040_v26  ;;  %v349_v35 = vld [vmem:[%s2927_s29 + $0x330] sm:$0xff]  ;;  %v356_v37 = vld [vmem:[%s2927_s29 + $0x368] sm:$0xff]  ;;  %v354_v38 = vld [vmem:[%s2927_s29 + $0x358] sm:$0xff]  ;;  %v2147_v40 = vpack.c.bf16 %v347_v31, %v343_v30  ;;  %v3085_v25 = vrot.slane %v890_v9, %v3025_v12 }
  0x3b   : > { %v358_v39 = vld [vmem:[%s2927_s29 + $0x378] sm:$0xff]  ;;  %v2467_v41 = vpack.c.bf16 %v349_v35, %v345_v32  ;;  %v2149_v42 = vpack.c.bf16 %v356_v37, %v352_v36  ;;  %v351_v43 = vld [vmem:[%s2927_s29 + $0x340] sm:$0xff]  ;;  %v353_v45 = vld [vmem:[%s2927_s29 + $0x350] sm:$0xff] }
  0x3c   : > { %2132 = vmatpush1.bf16.msra.mxu0 %v2131_v50  ;;  %1006 = vmatprep.mubr.f32.mxu0 %v905_v33  ;;  %v355_v44 = vld [vmem:[%s2927_s29 + $0x360] sm:$0xff]  ;;  %v2469_v46 = vpack.c.bf16 %v358_v39, %v354_v38  ;;  %v357_v47 = vld [vmem:[%s2927_s29 + $0x370] sm:$0xff]  ;;  %v360_v48 = vld [vmem:[%s2927_s29 + $0x388] sm:$0xff]  ;;  %v906_v39 = vcombine.high %v3085_v25, %v3085_v25 }
  0x3d   : > { %2452 = vmatpush1.bf16.msra.mxu1 %v2451_v51  ;;  %2134 = vmatprep.subr.bf16.mxu0 %v2133_v52  ;;  %v364_v49 = vld [vmem:[%s2927_s29 + $0x3a8] sm:$0xff]  ;;  %v362_v50 = vld [vmem:[%s2927_s29 + $0x398] sm:$0xff]  ;;  %v2151_v52 = vpack.c.bf16 %v355_v44, %v351_v43  ;;  %v2471_v53 = vpack.c.bf16 %v357_v47, %v353_v45  ;;  %v359_v55 = vld [vmem:[%s2927_s29 + $0x380] sm:$0xff] }
  0x3e   : > { %2454 = vmatprep.subr.bf16.mxu1 %v2453_v56  ;;  %1361 = vmatprep.mubr.f32.mxu1 %v905_v33  ;;  %v366_v51 = vld [vmem:[%s2927_s29 + $0x3b8] sm:$0xff]  ;;  %v2153_v54 = vpack.c.bf16 %v364_v49, %v360_v48  ;;  %v363_v56 = vld [vmem:[%s2927_s29 + $0x3a0] sm:$0xff]  ;;  %v361_v57 = vld [vmem:[%s2927_s29 + $0x390] sm:$0xff] }
  0x3f   : > { %v2473_v58 = vpack.c.bf16 %v366_v51, %v362_v50  ;;  %v365_v59 = vld [vmem:[%s2927_s29 + $0x3b0] sm:$0xff]  ;;  %v368_v60 = vld [vmem:[%s2927_s29 + $0x3c8] sm:$0xff]  ;;  %v370_v62 = vld [vmem:[%s2927_s29 + $0x3d8] sm:$0xff] }
  0x40   : > { %2136 = vmatpush1.bf16.msra.mxu0 %v2135_v0  ;;  %v372_v61 = vld [vmem:[%s2927_s29 + $0x3e8] sm:$0xff]  ;;  %v374_v0 = vld [vmem:[%s2927_s29 + $0x3f8] sm:$0xff]  ;;  %v367_v4 = vld [vmem:[%s2927_s29 + $0x3c0] sm:$0xff] }
  0x41   : > { %2456 = vmatpush1.bf16.msra.mxu1 %v2455_v1  ;;  %2138 = vmatprep.subr.bf16.mxu0 %v2137_v2  ;;  %v2155_v1 = vpack.c.bf16 %v363_v56, %v359_v55  ;;  %v2475_v2 = vpack.c.bf16 %v365_v59, %v361_v57  ;;  %v2157_v3 = vpack.c.bf16 %v372_v61, %v368_v60  ;;  %v371_v5 = vld [vmem:[%s2927_s29 + $0x3e0] sm:$0xff]  ;;  %v373_v8 = vld [vmem:[%s2927_s29 + $0x3f0] sm:$0xff]  ;;  %v376_v10 = vld [vmem:[%s2927_s29 + $0x408] sm:$0xff] }
  0x42   : > { %2458 = vmatprep.subr.bf16.mxu1 %v2457_v6  ;;  %v369_v6 = vld [vmem:[%s2927_s29 + $0x3d0] sm:$0xff]  ;;  %v2477_v7 = vpack.c.bf16 %v374_v0, %v370_v62  ;;  %v380_v11 = vld [vmem:[%s2927_s29 + $0x428] sm:$0xff]  ;;  %v382_v14 = vld [vmem:[%s2927_s29 + $0x438] sm:$0xff] }
  0x43   : > { %v2161_v17 = vpack.c.bf16 %v380_v11, %v376_v10  ;;  %v375_v18 = vld [vmem:[%s2927_s29 + $0x400] sm:$0xff]  ;;  %v381_v22 = vld [vmem:[%s2927_s29 + $0x430] sm:$0xff]  ;;  %v384_v23 = vld [vmem:[%s2927_s29 + $0x448] sm:$0xff] }
  0x44   : > { %2140 = vmatpush1.bf16.msra.mxu0 %v2139_v13  ;;  %v378_v13 = vld [vmem:[%s2927_s29 + $0x418] sm:$0xff]  ;;  %v379_v19 = vld [vmem:[%s2927_s29 + $0x420] sm:$0xff]  ;;  %v388_v24 = vld [vmem:[%s2927_s29 + $0x468] sm:$0xff] }
  0x45   : > { %2460 = vmatpush1.bf16.msra.mxu1 %v2459_v15  ;;  %2142 = vmatprep.subr.bf16.mxu0 %v2141_v16  ;;  %v2159_v15 = vpack.c.bf16 %v371_v5, %v367_v4  ;;  %v2479_v16 = vpack.c.bf16 %v373_v8, %v369_v6  ;;  %v2481_v21 = vpack.c.bf16 %v382_v14, %v378_v13  ;;  %v383_v32 = vld [vmem:[%s2927_s29 + $0x440] sm:$0xff]  ;;  %v389_v36 = vld [vmem:[%s2927_s29 + $0x470] sm:$0xff]  ;;  %v392_v37 = vld [vmem:[%s2927_s29 + $0x488] sm:$0xff] }
  0x46   : > { %2462 = vmatprep.subr.bf16.mxu1 %v2461_v20  ;;  %v377_v20 = vld [vmem:[%s2927_s29 + $0x410] sm:$0xff]  ;;  %v2165_v31 = vpack.c.bf16 %v388_v24, %v384_v23  ;;  %v387_v33 = vld [vmem:[%s2927_s29 + $0x460] sm:$0xff]  ;;  %v396_v38 = vld [vmem:[%s2927_s29 + $0x4a8] sm:$0xff] }
  0x47   : > { %v2483_v30 = vpack.c.bf16 %v381_v22, %v377_v20  ;;  %v2169_v44 = vpack.c.bf16 %v396_v38, %v392_v37  ;;  %v391_v45 = vld [vmem:[%s2927_s29 + $0x480] sm:$0xff]  ;;  %v393_v47 = vld [vmem:[%s2927_s29 + $0x490] sm:$0xff]  ;;  %v400_v50 = vld [vmem:[%s2927_s29 + $0x4c8] sm:$0xff] }
  0x48   : > { %2144 = vmatpush1.bf16.msra.mxu0 %v2143_v27  ;;  %v386_v27 = vld [vmem:[%s2927_s29 + $0x458] sm:$0xff]  ;;  %v397_v49 = vld [vmem:[%s2927_s29 + $0x4b0] sm:$0xff]  ;;  %v404_v51 = vld [vmem:[%s2927_s29 + $0x4e8] sm:$0xff] }
  0x49   : > { %2464 = vmatpush1.bf16.msra.mxu1 %v2463_v28  ;;  %2146 = vmatprep.subr.bf16.mxu0 %v2145_v29  ;;  %v390_v28 = vld [vmem:[%s2927_s29 + $0x478] sm:$0xff]  ;;  %v2163_v29 = vpack.c.bf16 %v379_v19, %v375_v18  ;;  %v2173_v55 = vpack.c.bf16 %v404_v51, %v400_v50  ;;  %v399_v56 = vld [vmem:[%s2927_s29 + $0x4c0] sm:$0xff]  ;;  %v405_v60 = vld [vmem:[%s2927_s29 + $0x4f0] sm:$0xff] }
  0x4a   : > { %2466 = vmatprep.subr.bf16.mxu1 %v2465_v34  ;;  %v385_v34 = vld [vmem:[%s2927_s29 + $0x450] sm:$0xff]  ;;  %v2485_v35 = vpack.c.bf16 %v390_v28, %v386_v27  ;;  %v403_v57 = vld [vmem:[%s2927_s29 + $0x4e0] sm:$0xff]  ;;  %v408_v61 = vld [vmem:[%s2927_s29 + $0x508] sm:$0xff] }
  0x4b   : > { %v2487_v43 = vpack.c.bf16 %v389_v36, %v385_v34  ;;  %v412_v62 = vld [vmem:[%s2927_s29 + $0x528] sm:$0xff]  ;;  %v410_v0 = vld [vmem:[%s2927_s29 + $0x518] sm:$0xff]  ;;  %v407_v5 = vld [vmem:[%s2927_s29 + $0x500] sm:$0xff] }
  0x4c   : > { %2148 = vmatpush1.bf16.msra.mxu0 %v2147_v40  ;;  %v394_v40 = vld [vmem:[%s2927_s29 + $0x498] sm:$0xff]  ;;  %v2177_v4 = vpack.c.bf16 %v412_v62, %v408_v61  ;;  %v411_v6 = vld [vmem:[%s2927_s29 + $0x520] sm:$0xff]  ;;  %v413_v9 = vld [vmem:[%s2927_s29 + $0x530] sm:$0xff] }
  0x4d   : > { %2468 = vmatpush1.bf16.msra.mxu1 %v2467_v41  ;;  %2150 = vmatprep.subr.bf16.mxu0 %v2149_v42  ;;  %v398_v41 = vld [vmem:[%s2927_s29 + $0x4b8] sm:$0xff]  ;;  %v2167_v42 = vpack.c.bf16 %v387_v33, %v383_v32  ;;  %v416_v10 = vld [vmem:[%s2927_s29 + $0x548] sm:$0xff]  ;;  %v415_v18 = vld [vmem:[%s2927_s29 + $0x540] sm:$0xff] }
  0x4e   : > { %2470 = vmatprep.subr.bf16.mxu1 %v2469_v46  ;;  %v395_v46 = vld [vmem:[%s2927_s29 + $0x4a0] sm:$0xff]  ;;  %v2489_v48 = vpack.c.bf16 %v398_v41, %v394_v40  ;;  %v420_v11 = vld [vmem:[%s2927_s29 + $0x568] sm:$0xff]  ;;  %v418_v13 = vld [vmem:[%s2927_s29 + $0x558] sm:$0xff] }
  0x4f   : > { %v422_v14 = vld [vmem:[%s2927_s29 + $0x578] sm:$0xff]  ;;  %v419_v19 = vld [vmem:[%s2927_s29 + $0x560] sm:$0xff]  ;;  %v417_v20 = vld [vmem:[%s2927_s29 + $0x550] sm:$0xff] }
  0x50   : > { %2152 = vmatpush1.bf16.msra.mxu0 %v2151_v52  ;;  %v406_v52 = vld [vmem:[%s2927_s29 + $0x4f8] sm:$0xff]  ;;  %v421_v22 = vld [vmem:[%s2927_s29 + $0x570] sm:$0xff]  ;;  %v424_v23 = vld [vmem:[%s2927_s29 + $0x588] sm:$0xff] }
  0x51   : > { %2472 = vmatpush1.bf16.msra.mxu1 %v2471_v53  ;;  %2154 = vmatprep.subr.bf16.mxu0 %v2153_v54  ;;  %v2171_v53 = vpack.c.bf16 %v395_v46, %v391_v45  ;;  %v2491_v54 = vpack.c.bf16 %v397_v49, %v393_v47  ;;  %v428_v24 = vld [vmem:[%s2927_s29 + $0x5a8] sm:$0xff]  ;;  %v426_v27 = vld [vmem:[%s2927_s29 + $0x598] sm:$0xff]  ;;  %v423_v32 = vld [vmem:[%s2927_s29 + $0x580] sm:$0xff] }
  0x52   : > { %2474 = vmatprep.subr.bf16.mxu1 %v2473_v58  ;;  %v401_v58 = vld [vmem:[%s2927_s29 + $0x4d0] sm:$0xff]  ;;  %v430_v28 = vld [vmem:[%s2927_s29 + $0x5b8] sm:$0xff]  ;;  %v427_v33 = vld [vmem:[%s2927_s29 + $0x5a0] sm:$0xff] }
  0x53   : > { %v425_v34 = vld [vmem:[%s2927_s29 + $0x590] sm:$0xff]  ;;  %v432_v37 = vld [vmem:[%s2927_s29 + $0x5c8] sm:$0xff]  ;;  %v438_v40 = vld [vmem:[%s2927_s29 + $0x5f8] sm:$0xff]  ;;  %v2187_v41 = vpack.c.bf16 %v427_v33, %v423_v32 }
  0x54   : > { %2156 = vmatpush1.bf16.msra.mxu0 %v2155_v1  ;;  %v414_v1 = vld [vmem:[%s2927_s29 + $0x538] sm:$0xff]  ;;  %v429_v36 = vld [vmem:[%s2927_s29 + $0x5b0] sm:$0xff]  ;;  %v436_v38 = vld [vmem:[%s2927_s29 + $0x5e8] sm:$0xff] }
  0x55   : > { %2476 = vmatpush1.bf16.msra.mxu1 %v2475_v2  ;;  %2158 = vmatprep.subr.bf16.mxu0 %v2157_v3  ;;  %v2175_v2 = vpack.c.bf16 %v403_v57, %v399_v56  ;;  %v2495_v3 = vpack.c.bf16 %v405_v60, %v401_v58  ;;  %v2497_v8 = vpack.c.bf16 %v414_v1, %v410_v0  ;;  %v435_v45 = vld [vmem:[%s2927_s29 + $0x5e0] sm:$0xff]  ;;  %v433_v46 = vld [vmem:[%s2927_s29 + $0x5d0] sm:$0xff]  ;;  %v440_v49 = vld [vmem:[%s2927_s29 + $0x608] sm:$0xff] }
  0x56   : > { %2478 = vmatprep.subr.bf16.mxu1 %v2477_v7  ;;  %v409_v7 = vld [vmem:[%s2927_s29 + $0x510] sm:$0xff]  ;;  %v444_v50 = vld [vmem:[%s2927_s29 + $0x628] sm:$0xff]  ;;  %v442_v51 = vld [vmem:[%s2927_s29 + $0x618] sm:$0xff] }
  0x57   : > { %v443_v56 = vld [vmem:[%s2927_s29 + $0x620] sm:$0xff]  ;;  %v441_v57 = vld [vmem:[%s2927_s29 + $0x610] sm:$0xff]  ;;  %v448_v60 = vld [vmem:[%s2927_s29 + $0x648] sm:$0xff] }
  0x58   : > { %2160 = vmatpush1.bf16.msra.mxu0 %v2159_v15  ;;  %v2179_v15 = vpack.c.bf16 %v411_v6, %v407_v5  ;;  %v452_v61 = vld [vmem:[%s2927_s29 + $0x668] sm:$0xff]  ;;  %v450_v62 = vld [vmem:[%s2927_s29 + $0x658] sm:$0xff]  ;;  %v451_v5 = vld [vmem:[%s2927_s29 + $0x660] sm:$0xff] }
  0x59   : > { %2480 = vmatpush1.bf16.msra.mxu1 %v2479_v16  ;;  %2162 = vmatprep.subr.bf16.mxu0 %v2161_v17  ;;  %v2499_v16 = vpack.c.bf16 %v413_v9, %v409_v7  ;;  %v2181_v17 = vpack.c.bf16 %v420_v11, %v416_v10  ;;  %v454_v0 = vld [vmem:[%s2927_s29 + $0x678] sm:$0xff]  ;;  %v449_v6 = vld [vmem:[%s2927_s29 + $0x650] sm:$0xff]  ;;  %v456_v9 = vld [vmem:[%s2927_s29 + $0x688] sm:$0xff] }
  0x5a   : > { %2482 = vmatprep.subr.bf16.mxu1 %v2481_v21  ;;  %v2501_v21 = vpack.c.bf16 %v422_v14, %v418_v13  ;;  %v2517_v7 = vpack.c.bf16 %v454_v0, %v450_v62  ;;  %v460_v10 = vld [vmem:[%s2927_s29 + $0x6a8] sm:$0xff]  ;;  %v458_v11 = vld [vmem:[%s2927_s29 + $0x698] sm:$0xff]  ;;  %v467_v32 = vld [vmem:[%s2927_s29 + $0x6e0] sm:$0xff] }
  0x5b   : > { %1007 = vmatmul.mubr.f32.vlgmr.msra.gmra.mrb[0].mxu0 %v3040_v26  ;;  %v462_v13 = vld [vmem:[%s2927_s29 + $0x6b8] sm:$0xff]  ;;  %v465_v33 = vld [vmem:[%s2927_s29 + $0x6d0] sm:$0xff] }
  0x5c   : > { %2164 = vmatpush1.bf16.msra.mxu0 %v2163_v29  ;;  %1362 = vmatmul.mubr.f32.vlgmr.msra.gmra.mrb[0].mxu1 %v3040_v26  ;;  %v402_v26 = vld [vmem:[%s2927_s29 + $0x4d8] sm:$0xff]  ;;  %v2183_v29 = vpack.c.bf16 %v419_v19, %v415_v18  ;;  %v459_v18 = vld [vmem:[%s2927_s29 + $0x6a0] sm:$0xff]  ;;  %v457_v19 = vld [vmem:[%s2927_s29 + $0x690] sm:$0xff] }
  0x5d   : > { %2484 = vmatpush1.bf16.msra.mxu1 %v2483_v30  ;;  %2166 = vmatprep.subr.bf16.mxu0 %v2165_v31  ;;  %v2493_v59 = vpack.c.bf16 %v406_v52, %v402_v26  ;;  %v2503_v30 = vpack.c.bf16 %v421_v22, %v417_v20  ;;  %v2185_v31 = vpack.c.bf16 %v428_v24, %v424_v23  ;;  %v446_v26 = vld [vmem:[%s2927_s29 + $0x638] sm:$0xff]  ;;  %v464_v22 = vld [vmem:[%s2927_s29 + $0x6c8] sm:$0xff] }
  0x5e   : > { %2486 = vmatprep.subr.bf16.mxu1 %v2485_v35  ;;  %1077 = vmatprep.mubr.f32.mxu0 %v906_v39  ;;  %v2505_v35 = vpack.c.bf16 %v430_v28, %v426_v27  ;;  %v2513_v58 = vpack.c.bf16 %v446_v26, %v442_v51  ;;  %v2521_v20 = vpack.c.bf16 %v462_v13, %v458_v11  ;;  %v468_v23 = vld [vmem:[%s2927_s29 + $0x6e8] sm:$0xff]  ;;  %v466_v24 = vld [vmem:[%s2927_s29 + $0x6d8] sm:$0xff] }
  0x5f   : > { %1432 = vmatprep.mubr.f32.mxu1 %v906_v39  ;;  %v434_v39 = vld [vmem:[%s2927_s29 + $0x5d8] sm:$0xff] }
  0x60   : > { %2168 = vmatpush1.bf16.msra.mxu0 %v2167_v42  ;;  %v2507_v42 = vpack.c.bf16 %v429_v36, %v425_v34  ;;  %v2509_v47 = vpack.c.bf16 %v438_v40, %v434_v39  ;;  %v470_v27 = vld [vmem:[%s2927_s29 + $0x6f8] sm:$0xff]  ;;  %v472_v36 = vld [vmem:[%s2927_s29 + $0x708] sm:$0xff] }
  0x61   : > { %2488 = vmatpush1.bf16.msra.mxu1 %v2487_v43  ;;  %2170 = vmatprep.subr.bf16.mxu0 %v2169_v44  ;;  %v2189_v43 = vpack.c.bf16 %v436_v38, %v432_v37  ;;  %v431_v44 = vld [vmem:[%s2927_s29 + $0x5c0] sm:$0xff]  ;;  %v2525_v34 = vpack.c.bf16 %v470_v27, %v466_v24  ;;  %v476_v37 = vld [vmem:[%s2927_s29 + $0x728] sm:$0xff]  ;;  %v474_v38 = vld [vmem:[%s2927_s29 + $0x718] sm:$0xff] }
  0x62   : > { %2490 = vmatprep.subr.bf16.mxu1 %v2489_v48  ;;  %v437_v48 = vld [vmem:[%s2927_s29 + $0x5f0] sm:$0xff]  ;;  %v2191_v52 = vpack.c.bf16 %v435_v45, %v431_v44  ;;  %v478_v39 = vld [vmem:[%s2927_s29 + $0x738] sm:$0xff]  ;;  %v475_v44 = vld [vmem:[%s2927_s29 + $0x720] sm:$0xff] }
  0x63   : > { %v473_v45 = vld [vmem:[%s2927_s29 + $0x710] sm:$0xff]  ;;  %v486_v51 = vld [vmem:[%s2927_s29 + $0x778] sm:$0xff] }
  0x64   : > { %2172 = vmatpush1.bf16.msra.mxu0 %v2171_v53  ;;  %v2511_v53 = vpack.c.bf16 %v437_v48, %v433_v46  ;;  %v2529_v46 = vpack.c.bf16 %v478_v39, %v474_v38  ;;  %v480_v48 = vld [vmem:[%s2927_s29 + $0x748] sm:$0xff]  ;;  %v494_v62 = vld [vmem:[%s2927_s29 + $0x7b8] sm:$0xff] }
  0x65   : > { %2492 = vmatpush1.bf16.msra.mxu1 %v2491_v54  ;;  %2174 = vmatprep.subr.bf16.mxu0 %v2173_v55  ;;  %v2193_v54 = vpack.c.bf16 %v444_v50, %v440_v49  ;;  %v439_v55 = vld [vmem:[%s2927_s29 + $0x600] sm:$0xff]  ;;  %v484_v49 = vld [vmem:[%s2927_s29 + $0x768] sm:$0xff]  ;;  %v482_v50 = vld [vmem:[%s2927_s29 + $0x758] sm:$0xff] }
  0x66   : > { %2494 = vmatprep.subr.bf16.mxu1 %v2493_v59  ;;  %v445_v59 = vld [vmem:[%s2927_s29 + $0x630] sm:$0xff]  ;;  %v2195_v1 = vpack.c.bf16 %v443_v56, %v439_v55  ;;  %v483_v55 = vld [vmem:[%s2927_s29 + $0x760] sm:$0xff]  ;;  %v502_v11 = vld [vmem:[%s2927_s29 + $0x7f8] sm:$0xff] }
  0x67   : > { %v481_v56 = vld [vmem:[%s2927_s29 + $0x750] sm:$0xff]  ;;  %v510_v24 = vld [vmem:[%s2927_s29 + $0x838] sm:$0xff] }
  0x68   : > { %2176 = vmatpush1.bf16.msra.mxu0 %v2175_v2  ;;  %v2515_v2 = vpack.c.bf16 %v445_v59, %v441_v57  ;;  %v2533_v57 = vpack.c.bf16 %v486_v51, %v482_v50  ;;  %v488_v59 = vld [vmem:[%s2927_s29 + $0x788] sm:$0xff]  ;;  %v518_v38 = vld [vmem:[%s2927_s29 + $0x878] sm:$0xff] }
  0x69   : > { %2496 = vmatpush1.bf16.msra.mxu1 %v2495_v3  ;;  %2178 = vmatprep.subr.bf16.mxu0 %v2177_v4  ;;  %v2197_v3 = vpack.c.bf16 %v452_v61, %v448_v60  ;;  %v447_v4 = vld [vmem:[%s2927_s29 + $0x640] sm:$0xff]  ;;  %v492_v60 = vld [vmem:[%s2927_s29 + $0x7a8] sm:$0xff]  ;;  %v490_v61 = vld [vmem:[%s2927_s29 + $0x798] sm:$0xff] }
  0x6a   : > { %2498 = vmatprep.subr.bf16.mxu1 %v2497_v8  ;;  %v453_v8 = vld [vmem:[%s2927_s29 + $0x670] sm:$0xff]  ;;  %v2199_v14 = vpack.c.bf16 %v451_v5, %v447_v4  ;;  %v491_v4 = vld [vmem:[%s2927_s29 + $0x7a0] sm:$0xff]  ;;  %v524_v50 = vld [vmem:[%s2927_s29 + $0x8a8] sm:$0xff] }
  0x6b   : > { %v489_v5 = vld [vmem:[%s2927_s29 + $0x790] sm:$0xff]  ;;  %v522_v51 = vld [vmem:[%s2927_s29 + $0x898] sm:$0xff] }
  0x6c   : > { %2180 = vmatpush1.bf16.msra.mxu0 %v2179_v15  ;;  %v2519_v15 = vpack.c.bf16 %v453_v8, %v449_v6  ;;  %v2537_v6 = vpack.c.bf16 %v494_v62, %v490_v61  ;;  %v496_v8 = vld [vmem:[%s2927_s29 + $0x7c8] sm:$0xff] }
  0x6d   : > { %2500 = vmatpush1.bf16.msra.mxu1 %v2499_v16  ;;  %2182 = vmatprep.subr.bf16.mxu0 %v2181_v17  ;;  %v2201_v16 = vpack.c.bf16 %v460_v10, %v456_v9  ;;  %v455_v17 = vld [vmem:[%s2927_s29 + $0x680] sm:$0xff]  ;;  %v500_v9 = vld [vmem:[%s2927_s29 + $0x7e8] sm:$0xff]  ;;  %v498_v10 = vld [vmem:[%s2927_s29 + $0x7d8] sm:$0xff] }
  0x6e   : > { %2502 = vmatprep.subr.bf16.mxu1 %v2501_v21  ;;  %v461_v21 = vld [vmem:[%s2927_s29 + $0x6b0] sm:$0xff]  ;;  %v2203_v28 = vpack.c.bf16 %v459_v18, %v455_v17  ;;  %v499_v17 = vld [vmem:[%s2927_s29 + $0x7e0] sm:$0xff]  ;;  %v528_v61 = vld [vmem:[%s2927_s29 + $0x8c8] sm:$0xff] }
  0x6f   : > { %v497_v18 = vld [vmem:[%s2927_s29 + $0x7d0] sm:$0xff]  ;;  %v532_v62 = vld [vmem:[%s2927_s29 + $0x8e8] sm:$0xff] }
  0x70   : > { %2184 = vmatpush1.bf16.msra.mxu0 %v2183_v29  ;;  %v2523_v29 = vpack.c.bf16 %v461_v21, %v457_v19  ;;  %v2541_v19 = vpack.c.bf16 %v502_v11, %v498_v10  ;;  %v504_v21 = vld [vmem:[%s2927_s29 + $0x808] sm:$0xff]  ;;  %v538_v11 = vld [vmem:[%s2927_s29 + $0x918] sm:$0xff] }
  0x71   : > { %2504 = vmatpush1.bf16.msra.mxu1 %v2503_v30  ;;  %2186 = vmatprep.subr.bf16.mxu0 %v2185_v31  ;;  %v2205_v30 = vpack.c.bf16 %v468_v23, %v464_v22  ;;  %v463_v31 = vld [vmem:[%s2927_s29 + $0x6c0] sm:$0xff]  ;;  %v508_v22 = vld [vmem:[%s2927_s29 + $0x828] sm:$0xff]  ;;  %v506_v23 = vld [vmem:[%s2927_s29 + $0x818] sm:$0xff] }
  0x72   : > { %2506 = vmatprep.subr.bf16.mxu1 %v2505_v35  ;;  %v469_v35 = vld [vmem:[%s2927_s29 + $0x6f0] sm:$0xff]  ;;  %v2207_v40 = vpack.c.bf16 %v467_v32, %v463_v31  ;;  %v507_v31 = vld [vmem:[%s2927_s29 + $0x820] sm:$0xff]  ;;  %v540_v10 = vld [vmem:[%s2927_s29 + $0x928] sm:$0xff] }
  0x73   : > { %v505_v32 = vld [vmem:[%s2927_s29 + $0x810] sm:$0xff] }
  0x74   : > { %2188 = vmatpush1.bf16.msra.mxu0 %v2187_v41  ;;  %v2527_v41 = vpack.c.bf16 %v469_v35, %v465_v33  ;;  %v2545_v33 = vpack.c.bf16 %v510_v24, %v506_v23  ;;  %v512_v35 = vld [vmem:[%s2927_s29 + $0x848] sm:$0xff]  ;;  %v546_v24 = vld [vmem:[%s2927_s29 + $0x958] sm:$0xff] }
  0x75   : > { %2508 = vmatpush1.bf16.msra.mxu1 %v2507_v42  ;;  %2190 = vmatprep.subr.bf16.mxu0 %v2189_v43  ;;  %v2209_v42 = vpack.c.bf16 %v476_v37, %v472_v36  ;;  %v471_v43 = vld [vmem:[%s2927_s29 + $0x700] sm:$0xff]  ;;  %v516_v36 = vld [vmem:[%s2927_s29 + $0x868] sm:$0xff]  ;;  %v514_v37 = vld [vmem:[%s2927_s29 + $0x858] sm:$0xff] }
  0x76   : > { %2510 = vmatprep.subr.bf16.mxu1 %v2509_v47  ;;  %v477_v47 = vld [vmem:[%s2927_s29 + $0x730] sm:$0xff]  ;;  %v2211_v26 = vpack.c.bf16 %v475_v44, %v471_v43  ;;  %v511_v43 = vld [vmem:[%s2927_s29 + $0x840] sm:$0xff]  ;;  %v548_v23 = vld [vmem:[%s2927_s29 + $0x968] sm:$0xff] }
  0x77   : > { %v515_v44 = vld [vmem:[%s2927_s29 + $0x860] sm:$0xff] }
  0x78   : > { %2192 = vmatpush1.bf16.msra.mxu0 %v2191_v52  ;;  %v2531_v52 = vpack.c.bf16 %v477_v47, %v473_v45  ;;  %v513_v45 = vld [vmem:[%s2927_s29 + $0x850] sm:$0xff]  ;;  %v2549_v47 = vpack.c.bf16 %v518_v38, %v514_v37  ;;  %v556_v37 = vld [vmem:[%s2927_s29 + $0x9a8] sm:$0xff]  ;;  %v554_v38 = vld [vmem:[%s2927_s29 + $0x998] sm:$0xff] }
  0x79   : > { %2512 = vmatpush1.bf16.msra.mxu1 %v2511_v53  ;;  %2194 = vmatprep.subr.bf16.mxu0 %v2193_v54  ;;  %v2213_v53 = vpack.c.bf16 %v484_v49, %v480_v48  ;;  %v479_v54 = vld [vmem:[%s2927_s29 + $0x740] sm:$0xff]  ;;  %v517_v48 = vld [vmem:[%s2927_s29 + $0x870] sm:$0xff]  ;;  %v520_v49 = vld [vmem:[%s2927_s29 + $0x888] sm:$0xff] }
  0x7a   : > { %2514 = vmatprep.subr.bf16.mxu1 %v2513_v58  ;;  %v485_v58 = vld [vmem:[%s2927_s29 + $0x770] sm:$0xff]  ;;  %v2215_v0 = vpack.c.bf16 %v483_v55, %v479_v54  ;;  %v2551_v54 = vpack.c.bf16 %v517_v48, %v513_v45  ;;  %v2233_v55 = vpack.c.bf16 %v524_v50, %v520_v49  ;;  %v555_v45 = vld [vmem:[%s2927_s29 + $0x9a0] sm:$0xff]  ;;  %v560_v50 = vld [vmem:[%s2927_s29 + $0x9c8] sm:$0xff] }
  0x7b   : > { %v557_v49 = vld [vmem:[%s2927_s29 + $0x9b0] sm:$0xff] }
  0x7c   : > { %2196 = vmatpush1.bf16.msra.mxu0 %v2195_v1  ;;  %v2535_v1 = vpack.c.bf16 %v485_v58, %v481_v56  ;;  %v519_v56 = vld [vmem:[%s2927_s29 + $0x880] sm:$0xff]  ;;  %v521_v58 = vld [vmem:[%s2927_s29 + $0x890] sm:$0xff] }
  0x7d   : > { %2516 = vmatpush1.bf16.msra.mxu1 %v2515_v2  ;;  %2198 = vmatprep.subr.bf16.mxu0 %v2197_v3  ;;  %v2217_v2 = vpack.c.bf16 %v492_v60, %v488_v59  ;;  %v487_v3 = vld [vmem:[%s2927_s29 + $0x780] sm:$0xff]  ;;  %v525_v60 = vld [vmem:[%s2927_s29 + $0x8b0] sm:$0xff] }
  0x7e   : > { %2518 = vmatprep.subr.bf16.mxu1 %v2517_v7  ;;  %v493_v7 = vld [vmem:[%s2927_s29 + $0x7b0] sm:$0xff]  ;;  %v2219_v13 = vpack.c.bf16 %v491_v4, %v487_v3  ;;  %v2237_v3 = vpack.c.bf16 %v532_v62, %v528_v61  ;;  %v527_v4 = vld [vmem:[%s2927_s29 + $0x8c0] sm:$0xff]  ;;  %v568_v61 = vld [vmem:[%s2927_s29 + $0xa08] sm:$0xff] }
  0x7f   : > { %v572_v62 = vld [vmem:[%s2927_s29 + $0xa28] sm:$0xff] }
  0x80   : > { %2200 = vmatpush1.bf16.msra.mxu0 %v2199_v14  ;;  %v2539_v14 = vpack.c.bf16 %v493_v7, %v489_v5  ;;  %v531_v5 = vld [vmem:[%s2927_s29 + $0x8e0] sm:$0xff] }
  0x81   : > { %2520 = vmatpush1.bf16.msra.mxu1 %v2519_v15  ;;  %2202 = vmatprep.subr.bf16.mxu0 %v2201_v16  ;;  %v2221_v15 = vpack.c.bf16 %v500_v9, %v496_v8  ;;  %v495_v16 = vld [vmem:[%s2927_s29 + $0x7c0] sm:$0xff]  ;;  %v533_v8 = vld [vmem:[%s2927_s29 + $0x8f0] sm:$0xff]  ;;  %v536_v9 = vld [vmem:[%s2927_s29 + $0x908] sm:$0xff] }
  0x82   : > { %2522 = vmatprep.subr.bf16.mxu1 %v2521_v20  ;;  %v501_v20 = vld [vmem:[%s2927_s29 + $0x7f0] sm:$0xff]  ;;  %v2223_v27 = vpack.c.bf16 %v499_v17, %v495_v16  ;;  %v2241_v16 = vpack.c.bf16 %v540_v10, %v536_v9  ;;  %v535_v17 = vld [vmem:[%s2927_s29 + $0x900] sm:$0xff]  ;;  %v576_v9 = vld [vmem:[%s2927_s29 + $0xa48] sm:$0xff] }
  0x83   : > { %v580_v10 = vld [vmem:[%s2927_s29 + $0xa68] sm:$0xff] }
  0x84   : > { %2204 = vmatpush1.bf16.msra.mxu0 %v2203_v28  ;;  %v2543_v28 = vpack.c.bf16 %v501_v20, %v497_v18  ;;  %v539_v18 = vld [vmem:[%s2927_s29 + $0x920] sm:$0xff] }
  0x85   : > { %2524 = vmatpush1.bf16.msra.mxu1 %v2523_v29  ;;  %2206 = vmatprep.subr.bf16.mxu0 %v2205_v30  ;;  %v2225_v29 = vpack.c.bf16 %v508_v22, %v504_v21  ;;  %v503_v30 = vld [vmem:[%s2927_s29 + $0x800] sm:$0xff]  ;;  %v541_v21 = vld [vmem:[%s2927_s29 + $0x930] sm:$0xff]  ;;  %v544_v22 = vld [vmem:[%s2927_s29 + $0x948] sm:$0xff] }
  0x86   : > { %2526 = vmatprep.subr.bf16.mxu1 %v2525_v34  ;;  %v509_v34 = vld [vmem:[%s2927_s29 + $0x830] sm:$0xff]  ;;  %v2227_v39 = vpack.c.bf16 %v507_v31, %v503_v30  ;;  %v2245_v30 = vpack.c.bf16 %v548_v23, %v544_v22  ;;  %v543_v31 = vld [vmem:[%s2927_s29 + $0x940] sm:$0xff]  ;;  %v584_v22 = vld [vmem:[%s2927_s29 + $0xa88] sm:$0xff] }
  0x87   : > { %v588_v23 = vld [vmem:[%s2927_s29 + $0xaa8] sm:$0xff] }
  0x88   : > { %2208 = vmatpush1.bf16.msra.mxu0 %v2207_v40  ;;  %v3222_v40 = vld [vmem:[%s2922_s25 + $0x8] sm:$0xff] }
  0x89   : > { %2528 = vmatpush1.bf16.msra.mxu1 %v2527_v41  ;;  %2210 = vmatprep.subr.bf16.mxu0 %v2209_v42  ;;  %v2547_v41 = vpack.c.bf16 %v509_v34, %v505_v32  ;;  %v2229_v42 = vpack.c.bf16 %v516_v36, %v512_v35  ;;  %v547_v32 = vld [vmem:[%s2927_s29 + $0x960] sm:$0xff]  ;;  %v549_v35 = vld [vmem:[%s2927_s29 + $0x970] sm:$0xff]  ;;  %v552_v36 = vld [vmem:[%s2927_s29 + $0x988] sm:$0xff] }
  0x8a   : > { %2530 = vmatprep.subr.bf16.mxu1 %v2529_v46  ;;  %v3229_v46 = vrot.slane %v3222_v40, %v3025_v12 }
  0x8c   : > { %2212 = vmatpush1.bf16.msra.mxu0 %v2211_v26  ;;  %v526_v26 = vld [vmem:[%s2927_s29 + $0x8b8] sm:$0xff] }
  0x8d   : > { %2532 = vmatpush1.bf16.msra.mxu1 %v2531_v52  ;;  %2214 = vmatprep.subr.bf16.mxu0 %v2213_v53  ;;  %v922_v52 = vcombine.high %v3229_v46, %v3229_v46  ;;  %v2231_v53 = vpack.c.bf16 %v515_v44, %v511_v43  ;;  %v2553_v59 = vpack.c.bf16 %v526_v26, %v522_v51  ;;  %v551_v44 = vld [vmem:[%s2927_s29 + $0x980] sm:$0xff]  ;;  %v564_v51 = vld [vmem:[%s2927_s29 + $0x9e8] sm:$0xff]  ;;  %v562_v26 = vld [vmem:[%s2927_s29 + $0x9d8] sm:$0xff] }
  0x8e   : > { %2534 = vmatprep.subr.bf16.mxu1 %v2533_v57  ;;  %v523_v57 = vld [vmem:[%s2927_s29 + $0x8a0] sm:$0xff]  ;;  %v2249_v43 = vpack.c.bf16 %v556_v37, %v552_v36  ;;  %v592_v36 = vld [vmem:[%s2927_s29 + $0xac8] sm:$0xff] }
  0x8f   : > { %v596_v37 = vld [vmem:[%s2927_s29 + $0xae8] sm:$0xff] }
  0x90   : > { %2216 = vmatpush1.bf16.msra.mxu0 %v2215_v0  ;;  %v534_v0 = vld [vmem:[%s2927_s29 + $0x8f8] sm:$0xff] }
  0x91   : > { %2536 = vmatpush1.bf16.msra.mxu1 %v2535_v1  ;;  %2218 = vmatprep.subr.bf16.mxu0 %v2217_v2  ;;  %v2235_v1 = vpack.c.bf16 %v523_v57, %v519_v56  ;;  %v2555_v2 = vpack.c.bf16 %v525_v60, %v521_v58  ;;  %v559_v56 = vld [vmem:[%s2927_s29 + $0x9c0] sm:$0xff]  ;;  %v561_v58 = vld [vmem:[%s2927_s29 + $0x9d0] sm:$0xff] }
  0x92   : > { %2538 = vmatprep.subr.bf16.mxu1 %v2537_v6  ;;  %v529_v6 = vld [vmem:[%s2927_s29 + $0x8d0] sm:$0xff]  ;;  %v563_v57 = vld [vmem:[%s2927_s29 + $0x9e0] sm:$0xff] }
  0x93   : > { %v565_v60 = vld [vmem:[%s2927_s29 + $0x9f0] sm:$0xff] }
  0x94   : > { %2220 = vmatpush1.bf16.msra.mxu0 %v2219_v13  ;;  %v542_v13 = vld [vmem:[%s2927_s29 + $0x938] sm:$0xff] }
  0x95   : > { %2540 = vmatpush1.bf16.msra.mxu1 %v2539_v14  ;;  %2222 = vmatprep.subr.bf16.mxu0 %v2221_v15  ;;  %v2239_v14 = vpack.c.bf16 %v531_v5, %v527_v4  ;;  %v2559_v15 = vpack.c.bf16 %v533_v8, %v529_v6  ;;  %v2561_v20 = vpack.c.bf16 %v542_v13, %v538_v11  ;;  %v567_v4 = vld [vmem:[%s2927_s29 + $0xa00] sm:$0xff]  ;;  %v569_v6 = vld [vmem:[%s2927_s29 + $0xa10] sm:$0xff]  ;;  %v578_v11 = vld [vmem:[%s2927_s29 + $0xa58] sm:$0xff] }
  0x96   : > { %2542 = vmatprep.subr.bf16.mxu1 %v2541_v19  ;;  %v537_v19 = vld [vmem:[%s2927_s29 + $0x910] sm:$0xff]  ;;  %v571_v5 = vld [vmem:[%s2927_s29 + $0xa20] sm:$0xff]  ;;  %v582_v13 = vld [vmem:[%s2927_s29 + $0xa78] sm:$0xff] }
  0x97   : > { %v573_v8 = vld [vmem:[%s2927_s29 + $0xa30] sm:$0xff] }
  0x98   : > { %2224 = vmatpush1.bf16.msra.mxu0 %v2223_v27  ;;  %v550_v27 = vld [vmem:[%s2927_s29 + $0x978] sm:$0xff] }
  0x99   : > { %2544 = vmatpush1.bf16.msra.mxu1 %v2543_v28  ;;  %2226 = vmatprep.subr.bf16.mxu0 %v2225_v29  ;;  %v2243_v28 = vpack.c.bf16 %v539_v18, %v535_v17  ;;  %v2563_v29 = vpack.c.bf16 %v541_v21, %v537_v19  ;;  %v2565_v34 = vpack.c.bf16 %v550_v27, %v546_v24  ;;  %v575_v17 = vld [vmem:[%s2927_s29 + $0xa40] sm:$0xff]  ;;  %v577_v19 = vld [vmem:[%s2927_s29 + $0xa50] sm:$0xff]  ;;  %v586_v24 = vld [vmem:[%s2927_s29 + $0xa98] sm:$0xff] }
  0x9a   : > { %2546 = vmatprep.subr.bf16.mxu1 %v2545_v33  ;;  %v545_v33 = vld [vmem:[%s2927_s29 + $0x950] sm:$0xff]  ;;  %v579_v18 = vld [vmem:[%s2927_s29 + $0xa60] sm:$0xff]  ;;  %v590_v27 = vld [vmem:[%s2927_s29 + $0xab8] sm:$0xff] }
  0x9b   : > { %1078 = vmatmul.mubr.f32.vlgmr.msra.gmra.mrb[0].mxu0 %v3085_v25  ;;  %v581_v21 = vld [vmem:[%s2927_s29 + $0xa70] sm:$0xff] }
  0x9c   : > { %2228 = vmatpush1.bf16.msra.mxu0 %v2227_v39  ;;  %1433 = vmatmul.mubr.f32.vlgmr.msra.gmra.mrb[0].mxu1 %v3085_v25  ;;  %v530_v25 = vld [vmem:[%s2927_s29 + $0x8d8] sm:$0xff] }
  0x9d   : > { %2548 = vmatpush1.bf16.msra.mxu1 %v2547_v41  ;;  %2230 = vmatprep.subr.bf16.mxu0 %v2229_v42  ;;  %v2557_v7 = vpack.c.bf16 %v534_v0, %v530_v25  ;;  %v558_v39 = vld [vmem:[%s2927_s29 + $0x9b8] sm:$0xff]  ;;  %v2247_v41 = vpack.c.bf16 %v547_v32, %v543_v31  ;;  %v2567_v42 = vpack.c.bf16 %v549_v35, %v545_v33  ;;  %v583_v31 = vld [vmem:[%s2927_s29 + $0xa80] sm:$0xff]  ;;  %v585_v33 = vld [vmem:[%s2927_s29 + $0xa90] sm:$0xff] }
  0x9e   : > { %2550 = vmatprep.subr.bf16.mxu1 %v2549_v47  ;;  %1148 = vmatprep.mubr.f32.mxu0 %v922_v52  ;;  %v553_v47 = vld [vmem:[%s2927_s29 + $0x990] sm:$0xff]  ;;  %v2569_v48 = vpack.c.bf16 %v558_v39, %v554_v38  ;;  %v570_v25 = vld [vmem:[%s2927_s29 + $0xa18] sm:$0xff]  ;;  %v587_v32 = vld [vmem:[%s2927_s29 + $0xaa0] sm:$0xff] }
  0x9f   : > { %1503 = vmatprep.mubr.f32.mxu1 %v922_v52  ;;  %v566_v52 = vld [vmem:[%s2927_s29 + $0x9f8] sm:$0xff]  ;;  %v589_v35 = vld [vmem:[%s2927_s29 + $0xab0] sm:$0xff] }
  0xa0   : > { %2232 = vmatpush1.bf16.msra.mxu0 %v2231_v53  ;;  %v2251_v53 = vpack.c.bf16 %v555_v45, %v551_v44  ;;  %v574_v0 = vld [vmem:[%s2927_s29 + $0xa38] sm:$0xff]  ;;  %v591_v44 = vld [vmem:[%s2927_s29 + $0xac0] sm:$0xff] }
  0xa1   : > { %2552 = vmatpush1.bf16.msra.mxu1 %v2551_v54  ;;  %2234 = vmatprep.subr.bf16.mxu0 %v2233_v55  ;;  %v2571_v54 = vpack.c.bf16 %v557_v49, %v553_v47  ;;  %v2253_v55 = vpack.c.bf16 %v564_v51, %v560_v50  ;;  %v594_v38 = vld [vmem:[%s2927_s29 + $0xad8] sm:$0xff]  ;;  %v595_v45 = vld [vmem:[%s2927_s29 + $0xae0] sm:$0xff]  ;;  %v593_v47 = vld [vmem:[%s2927_s29 + $0xad0] sm:$0xff] }
  0xa2   : > { %2554 = vmatprep.subr.bf16.mxu1 %v2553_v59  ;;  %v2573_v59 = vpack.c.bf16 %v566_v52, %v562_v26  ;;  %v598_v39 = vld [vmem:[%s2927_s29 + $0xaf8] sm:$0xff]  ;;  %v597_v49 = vld [vmem:[%s2927_s29 + $0xaf0] sm:$0xff]  ;;  %v600_v50 = vld [vmem:[%s2927_s29 + $0xb08] sm:$0xff] }
  0xa3   : > { %v604_v51 = vld [vmem:[%s2927_s29 + $0xb28] sm:$0xff]  ;;  %v602_v26 = vld [vmem:[%s2927_s29 + $0xb18] sm:$0xff] }
  0xa4   : > { %2236 = vmatpush1.bf16.msra.mxu0 %v2235_v1  ;;  %v2255_v1 = vpack.c.bf16 %v563_v57, %v559_v56  ;;  %v606_v52 = vld [vmem:[%s2927_s29 + $0xb38] sm:$0xff]  ;;  %v599_v56 = vld [vmem:[%s2927_s29 + $0xb00] sm:$0xff] }
  0xa5   : > { %2556 = vmatpush1.bf16.msra.mxu1 %v2555_v2  ;;  %2238 = vmatprep.subr.bf16.mxu0 %v2237_v3  ;;  %v2575_v2 = vpack.c.bf16 %v565_v60, %v561_v58  ;;  %v2257_v3 = vpack.c.bf16 %v572_v62, %v568_v61  ;;  %v603_v57 = vld [vmem:[%s2927_s29 + $0xb20] sm:$0xff]  ;;  %v601_v58 = vld [vmem:[%s2927_s29 + $0xb10] sm:$0xff]  ;;  %v608_v61 = vld [vmem:[%s2927_s29 + $0xb48] sm:$0xff] }
  0xa6   : > { %2558 = vmatprep.subr.bf16.mxu1 %v2557_v7  ;;  %v2577_v7 = vpack.c.bf16 %v574_v0, %v570_v25  ;;  %v605_v60 = vld [vmem:[%s2927_s29 + $0xb30] sm:$0xff]  ;;  %v612_v62 = vld [vmem:[%s2927_s29 + $0xb68] sm:$0xff]  ;;  %v610_v25 = vld [vmem:[%s2927_s29 + $0xb58] sm:$0xff] }
  0xa7   : > { %v614_v0 = vld [vmem:[%s2927_s29 + $0xb78] sm:$0xff] }
  0xa8   : > { %2240 = vmatpush1.bf16.msra.mxu0 %v2239_v14  ;;  %v2259_v14 = vpack.c.bf16 %v571_v5, %v567_v4  ;;  %v607_v4 = vld [vmem:[%s2927_s29 + $0xb40] sm:$0xff] }
  0xa9   : > { %2560 = vmatpush1.bf16.msra.mxu1 %v2559_v15  ;;  %2242 = vmatprep.subr.bf16.mxu0 %v2241_v16  ;;  %v2579_v15 = vpack.c.bf16 %v573_v8, %v569_v6  ;;  %v2261_v16 = vpack.c.bf16 %v580_v10, %v576_v9  ;;  %v611_v5 = vld [vmem:[%s2927_s29 + $0xb60] sm:$0xff]  ;;  %v609_v6 = vld [vmem:[%s2927_s29 + $0xb50] sm:$0xff]  ;;  %v616_v9 = vld [vmem:[%s2927_s29 + $0xb88] sm:$0xff] }
  0xaa   : > { %2562 = vmatprep.subr.bf16.mxu1 %v2561_v20  ;;  %v2581_v20 = vpack.c.bf16 %v582_v13, %v578_v11  ;;  %v613_v8 = vld [vmem:[%s2927_s29 + $0xb70] sm:$0xff]  ;;  %v620_v10 = vld [vmem:[%s2927_s29 + $0xba8] sm:$0xff]  ;;  %v618_v11 = vld [vmem:[%s2927_s29 + $0xb98] sm:$0xff] }
  0xab   : > { %v622_v13 = vld [vmem:[%s2927_s29 + $0xbb8] sm:$0xff] }
  0xac   : > { %2244 = vmatpush1.bf16.msra.mxu0 %v2243_v28  ;;  %v2263_v28 = vpack.c.bf16 %v579_v18, %v575_v17  ;;  %v615_v17 = vld [vmem:[%s2927_s29 + $0xb80] sm:$0xff] }
  0xad   : > { %2564 = vmatpush1.bf16.msra.mxu1 %v2563_v29  ;;  %2246 = vmatprep.subr.bf16.mxu0 %v2245_v30  ;;  %v2583_v29 = vpack.c.bf16 %v581_v21, %v577_v19  ;;  %v2265_v30 = vpack.c.bf16 %v588_v23, %v584_v22  ;;  %v619_v18 = vld [vmem:[%s2927_s29 + $0xba0] sm:$0xff]  ;;  %v617_v19 = vld [vmem:[%s2927_s29 + $0xb90] sm:$0xff]  ;;  %v624_v22 = vld [vmem:[%s2927_s29 + $0xbc8] sm:$0xff] }
  0xae   : > { %2566 = vmatprep.subr.bf16.mxu1 %v2565_v34  ;;  %v2585_v34 = vpack.c.bf16 %v590_v27, %v586_v24  ;;  %v621_v21 = vld [vmem:[%s2927_s29 + $0xbb0] sm:$0xff]  ;;  %v628_v23 = vld [vmem:[%s2927_s29 + $0xbe8] sm:$0xff]  ;;  %v626_v24 = vld [vmem:[%s2927_s29 + $0xbd8] sm:$0xff] }
  0xaf   : > { %v630_v27 = vld [vmem:[%s2927_s29 + $0xbf8] sm:$0xff] }
  0xb0   : > { %2248 = vmatpush1.bf16.msra.mxu0 %v2247_v41  ;;  %v2267_v41 = vpack.c.bf16 %v587_v32, %v583_v31  ;;  %v623_v31 = vld [vmem:[%s2927_s29 + $0xbc0] sm:$0xff] }
  0xb1   : > { %2568 = vmatpush1.bf16.msra.mxu1 %v2567_v42  ;;  %2250 = vmatprep.subr.bf16.mxu0 %v2249_v43  ;;  %v2587_v42 = vpack.c.bf16 %v589_v35, %v585_v33  ;;  %v2269_v43 = vpack.c.bf16 %v596_v37, %v592_v36  ;;  %v627_v32 = vld [vmem:[%s2927_s29 + $0xbe0] sm:$0xff]  ;;  %v625_v33 = vld [vmem:[%s2927_s29 + $0xbd0] sm:$0xff]  ;;  %v632_v36 = vld [vmem:[%s2927_s29 + $0xc08] sm:$0xff] }
  0xb2   : > { %2570 = vmatprep.subr.bf16.mxu1 %v2569_v48  ;;  %v2589_v48 = vpack.c.bf16 %v598_v39, %v594_v38  ;;  %v629_v35 = vld [vmem:[%s2927_s29 + $0xbf0] sm:$0xff]  ;;  %v636_v37 = vld [vmem:[%s2927_s29 + $0xc28] sm:$0xff]  ;;  %v907_v38 = vcombine.high %v3222_v40, %v3222_v40  ;;  %v634_v39 = vld [vmem:[%s2927_s29 + $0xc18] sm:$0xff] }
  0xb3   : > { %v637_v40 = vld [vmem:[%s2927_s29 + $0xc30] sm:$0xff] }
  0xb4   : > { %2252 = vmatpush1.bf16.msra.mxu0 %v2251_v53  ;;  %v2271_v53 = vpack.c.bf16 %v595_v45, %v591_v44  ;;  %v2289_v44 = vpack.c.bf16 %v636_v37, %v632_v36  ;;  %v631_v45 = vld [vmem:[%s2927_s29 + $0xc00] sm:$0xff]  ;;  %v669_v36 = vld [vmem:[%s2927_s29 + $0xd30] sm:$0xff]  ;;  %v672_v37 = vld [vmem:[%s2927_s29 + $0xd48] sm:$0xff] }
  0xb5   : > { %2572 = vmatpush1.bf16.msra.mxu1 %v2571_v54  ;;  %2254 = vmatprep.subr.bf16.mxu0 %v2253_v55  ;;  %v2591_v54 = vpack.c.bf16 %v597_v49, %v593_v47  ;;  %v2273_v55 = vpack.c.bf16 %v604_v51, %v600_v50  ;;  %v635_v47 = vld [vmem:[%s2927_s29 + $0xc20] sm:$0xff]  ;;  %v640_v50 = vld [vmem:[%s2927_s29 + $0xc48] sm:$0xff] }
  0xb6   : > { %2574 = vmatprep.subr.bf16.mxu1 %v2573_v59  ;;  %v2593_v59 = vpack.c.bf16 %v606_v52, %v602_v26  ;;  %v644_v51 = vld [vmem:[%s2927_s29 + $0xc68] sm:$0xff]  ;;  %v3361_v26 = vrot.slane %v907_v38, %v3025_v12  ;;  %v642_v52 = vld [vmem:[%s2927_s29 + $0xc58] sm:$0xff] }
  0xb7   : > { %v676_v38 = vld [vmem:[%s2927_s29 + $0xd68] sm:$0xff] }
  0xb8   : > { %2256 = vmatpush1.bf16.msra.mxu0 %v2255_v1  ;;  %v2275_v1 = vpack.c.bf16 %v603_v57, %v599_v56  ;;  %v2293_v56 = vpack.c.bf16 %v644_v51, %v640_v50  ;;  %v639_v57 = vld [vmem:[%s2927_s29 + $0xc40] sm:$0xff]  ;;  %v680_v50 = vld [vmem:[%s2927_s29 + $0xd88] sm:$0xff] }
  0xb9   : > { %2576 = vmatpush1.bf16.msra.mxu1 %v2575_v2  ;;  %2258 = vmatprep.subr.bf16.mxu0 %v2257_v3  ;;  %v2595_v2 = vpack.c.bf16 %v605_v60, %v601_v58  ;;  %v2277_v3 = vpack.c.bf16 %v612_v62, %v608_v61  ;;  %v643_v58 = vld [vmem:[%s2927_s29 + $0xc60] sm:$0xff]  ;;  %v645_v61 = vld [vmem:[%s2927_s29 + $0xc70] sm:$0xff]  ;;  %v648_v62 = vld [vmem:[%s2927_s29 + $0xc88] sm:$0xff] }
  0xba   : > { %2578 = vmatprep.subr.bf16.mxu1 %v2577_v7  ;;  %v2597_v7 = vpack.c.bf16 %v614_v0, %v610_v25  ;;  %v652_v25 = vld [vmem:[%s2927_s29 + $0xca8] sm:$0xff]  ;;  %v923_v0 = vcombine.high %v3361_v26, %v3361_v26 }
  0xbb   : > { %v684_v51 = vld [vmem:[%s2927_s29 + $0xda8] sm:$0xff] }
  0xbc   : > { %2260 = vmatpush1.bf16.msra.mxu0 %v2259_v14  ;;  %v2279_v14 = vpack.c.bf16 %v611_v5, %v607_v4  ;;  %v2297_v5 = vpack.c.bf16 %v652_v25, %v648_v62  ;;  %v688_v62 = vld [vmem:[%s2927_s29 + $0xdc8] sm:$0xff] }
  0xbd   : > { %2580 = vmatpush1.bf16.msra.mxu1 %v2579_v15  ;;  %2262 = vmatprep.subr.bf16.mxu0 %v2261_v16  ;;  %v2599_v15 = vpack.c.bf16 %v613_v8, %v609_v6  ;;  %v2281_v16 = vpack.c.bf16 %v620_v10, %v616_v9  ;;  %v647_v6 = vld [vmem:[%s2927_s29 + $0xc80] sm:$0xff]  ;;  %v649_v8 = vld [vmem:[%s2927_s29 + $0xc90] sm:$0xff]  ;;  %v692_v25 = vld [vmem:[%s2927_s29 + $0xde8] sm:$0xff] }
  0xbe   : > { %2582 = vmatprep.subr.bf16.mxu1 %v2581_v20  ;;  %v2601_v20 = vpack.c.bf16 %v622_v13, %v618_v11  ;;  %v653_v10 = vld [vmem:[%s2927_s29 + $0xcb0] sm:$0xff]  ;;  %v656_v11 = vld [vmem:[%s2927_s29 + $0xcc8] sm:$0xff] }
  0xbf   : > { %v660_v13 = vld [vmem:[%s2927_s29 + $0xce8] sm:$0xff] }
  0xc0   : > { %2264 = vmatpush1.bf16.msra.mxu0 %v2263_v28  ;;  %v2283_v28 = vpack.c.bf16 %v619_v18, %v615_v17  ;;  %v2301_v17 = vpack.c.bf16 %v660_v13, %v656_v11  ;;  %v655_v18 = vld [vmem:[%s2927_s29 + $0xcc0] sm:$0xff]  ;;  %v700_v11 = vld [vmem:[%s2927_s29 + $0xe28] sm:$0xff]  ;;  %v698_v13 = vld [vmem:[%s2927_s29 + $0xe18] sm:$0xff] }
  0xc1   : > { %2584 = vmatpush1.bf16.msra.mxu1 %v2583_v29  ;;  %2266 = vmatprep.subr.bf16.mxu0 %v2265_v30  ;;  %v2603_v29 = vpack.c.bf16 %v621_v21, %v617_v19  ;;  %v2285_v30 = vpack.c.bf16 %v628_v23, %v624_v22  ;;  %v659_v19 = vld [vmem:[%s2927_s29 + $0xce0] sm:$0xff]  ;;  %v661_v22 = vld [vmem:[%s2927_s29 + $0xcf0] sm:$0xff]  ;;  %v664_v23 = vld [vmem:[%s2927_s29 + $0xd08] sm:$0xff] }
  0xc2   : > { %2586 = vmatprep.subr.bf16.mxu1 %v2585_v34  ;;  %v2605_v34 = vpack.c.bf16 %v630_v27, %v626_v24  ;;  %v668_v24 = vld [vmem:[%s2927_s29 + $0xd28] sm:$0xff]  ;;  %v666_v27 = vld [vmem:[%s2927_s29 + $0xd18] sm:$0xff] }
  0xc4   : > { %2268 = vmatpush1.bf16.msra.mxu0 %v2267_v41  ;;  %v638_v41 = vld [vmem:[%s2927_s29 + $0xc38] sm:$0xff] }
  0xc5   : > { %2588 = vmatpush1.bf16.msra.mxu1 %v2587_v42  ;;  %2270 = vmatprep.subr.bf16.mxu0 %v2269_v43  ;;  %v2287_v42 = vpack.c.bf16 %v627_v32, %v623_v31  ;;  %v2607_v43 = vpack.c.bf16 %v629_v35, %v625_v33  ;;  %v2609_v49 = vpack.c.bf16 %v638_v41, %v634_v39  ;;  %v663_v32 = vld [vmem:[%s2927_s29 + $0xd00] sm:$0xff]  ;;  %v674_v39 = vld [vmem:[%s2927_s29 + $0xd58] sm:$0xff] }
  0xc6   : > { %2590 = vmatprep.subr.bf16.mxu1 %v2589_v48  ;;  %v633_v48 = vld [vmem:[%s2927_s29 + $0xc10] sm:$0xff]  ;;  %v2305_v31 = vpack.c.bf16 %v668_v24, %v664_v23  ;;  %v667_v33 = vld [vmem:[%s2927_s29 + $0xd20] sm:$0xff]  ;;  %v678_v41 = vld [vmem:[%s2927_s29 + $0xd78] sm:$0xff] }
  0xc7   : > { %v708_v23 = vld [vmem:[%s2927_s29 + $0xe68] sm:$0xff]  ;;  %v706_v24 = vld [vmem:[%s2927_s29 + $0xe58] sm:$0xff] }
  0xc8   : > { %2272 = vmatpush1.bf16.msra.mxu0 %v2271_v53  ;;  %v646_v53 = vld [vmem:[%s2927_s29 + $0xc78] sm:$0xff] }
  0xc9   : > { %2592 = vmatpush1.bf16.msra.mxu1 %v2591_v54  ;;  %2274 = vmatprep.subr.bf16.mxu0 %v2273_v55  ;;  %v2291_v54 = vpack.c.bf16 %v635_v47, %v631_v45  ;;  %v2611_v55 = vpack.c.bf16 %v637_v40, %v633_v48  ;;  %v2613_v60 = vpack.c.bf16 %v646_v53, %v642_v52  ;;  %v671_v45 = vld [vmem:[%s2927_s29 + $0xd40] sm:$0xff]  ;;  %v673_v48 = vld [vmem:[%s2927_s29 + $0xd50] sm:$0xff]  ;;  %v682_v52 = vld [vmem:[%s2927_s29 + $0xd98] sm:$0xff] }
  0xca   : > { %2594 = vmatprep.subr.bf16.mxu1 %v2593_v59  ;;  %v641_v59 = vld [vmem:[%s2927_s29 + $0xc50] sm:$0xff]  ;;  %v675_v47 = vld [vmem:[%s2927_s29 + $0xd60] sm:$0xff]  ;;  %v686_v53 = vld [vmem:[%s2927_s29 + $0xdb8] sm:$0xff] }
  0xcb   : > { %v2615_v4 = vpack.c.bf16 %v645_v61, %v641_v59  ;;  %v677_v40 = vld [vmem:[%s2927_s29 + $0xd70] sm:$0xff] }
  0xcc   : > { %2276 = vmatpush1.bf16.msra.mxu0 %v2275_v1  ;;  %v650_v1 = vld [vmem:[%s2927_s29 + $0xc98] sm:$0xff]  ;;  %v681_v59 = vld [vmem:[%s2927_s29 + $0xd90] sm:$0xff] }
  0xcd   : > { %2596 = vmatpush1.bf16.msra.mxu1 %v2595_v2  ;;  %2278 = vmatprep.subr.bf16.mxu0 %v2277_v3  ;;  %v654_v2 = vld [vmem:[%s2927_s29 + $0xcb8] sm:$0xff]  ;;  %v2295_v3 = vpack.c.bf16 %v643_v58, %v639_v57  ;;  %v679_v57 = vld [vmem:[%s2927_s29 + $0xd80] sm:$0xff]  ;;  %v685_v61 = vld [vmem:[%s2927_s29 + $0xdb0] sm:$0xff] }
  0xce   : > { %2598 = vmatprep.subr.bf16.mxu1 %v2597_v7  ;;  %v651_v7 = vld [vmem:[%s2927_s29 + $0xca0] sm:$0xff]  ;;  %v2617_v9 = vpack.c.bf16 %v654_v2, %v650_v1  ;;  %v694_v1 = vld [vmem:[%s2927_s29 + $0xdf8] sm:$0xff] }
  0xcf   : > { %v683_v58 = vld [vmem:[%s2927_s29 + $0xda0] sm:$0xff] }
  0xd0   : > { %2280 = vmatpush1.bf16.msra.mxu0 %v2279_v14  ;;  %v662_v14 = vld [vmem:[%s2927_s29 + $0xcf8] sm:$0xff]  ;;  %v2315_v2 = vpack.c.bf16 %v683_v58, %v679_v57  ;;  %v723_v57 = vld [vmem:[%s2927_s29 + $0xee0] sm:$0xff]  ;;  %v721_v58 = vld [vmem:[%s2927_s29 + $0xed0] sm:$0xff] }
  0xd1   : > { %2600 = vmatpush1.bf16.msra.mxu1 %v2599_v15  ;;  %2282 = vmatprep.subr.bf16.mxu0 %v2281_v16  ;;  %v2299_v15 = vpack.c.bf16 %v651_v7, %v647_v6  ;;  %v2619_v16 = vpack.c.bf16 %v653_v10, %v649_v8  ;;  %v691_v6 = vld [vmem:[%s2927_s29 + $0xde0] sm:$0xff]  ;;  %v689_v7 = vld [vmem:[%s2927_s29 + $0xdd0] sm:$0xff]  ;;  %v696_v10 = vld [vmem:[%s2927_s29 + $0xe08] sm:$0xff] }
  0xd2   : > { %2602 = vmatprep.subr.bf16.mxu1 %v2601_v20  ;;  %v657_v20 = vld [vmem:[%s2927_s29 + $0xcd0] sm:$0xff] }
  0xd4   : > { %2284 = vmatpush1.bf16.msra.mxu0 %v2283_v28  ;;  %v670_v28 = vld [vmem:[%s2927_s29 + $0xd38] sm:$0xff] }
  0xd5   : > { %2604 = vmatpush1.bf16.msra.mxu1 %v2603_v29  ;;  %2286 = vmatprep.subr.bf16.mxu0 %v2285_v30  ;;  %v2303_v29 = vpack.c.bf16 %v659_v19, %v655_v18  ;;  %v2623_v30 = vpack.c.bf16 %v661_v22, %v657_v20  ;;  %v2625_v35 = vpack.c.bf16 %v670_v28, %v666_v27  ;;  %v699_v18 = vld [vmem:[%s2927_s29 + $0xe20] sm:$0xff]  ;;  %v697_v19 = vld [vmem:[%s2927_s29 + $0xe10] sm:$0xff]  ;;  %v704_v22 = vld [vmem:[%s2927_s29 + $0xe48] sm:$0xff] }
  0xd6   : > { %2606 = vmatprep.subr.bf16.mxu1 %v2605_v34  ;;  %v665_v34 = vld [vmem:[%s2927_s29 + $0xd10] sm:$0xff]  ;;  %v710_v27 = vld [vmem:[%s2927_s29 + $0xe78] sm:$0xff] }
  0xd8   : > { %2288 = vmatpush1.bf16.msra.mxu0 %v2287_v42  ;;  %v2307_v42 = vpack.c.bf16 %v667_v33, %v663_v32  ;;  %v707_v32 = vld [vmem:[%s2927_s29 + $0xe60] sm:$0xff]  ;;  %v705_v33 = vld [vmem:[%s2927_s29 + $0xe50] sm:$0xff] }
  0xd9   : > { %2608 = vmatpush1.bf16.msra.mxu1 %v2607_v43  ;;  %2290 = vmatprep.subr.bf16.mxu0 %v2289_v44  ;;  %v2627_v43 = vpack.c.bf16 %v669_v36, %v665_v34  ;;  %v2309_v44 = vpack.c.bf16 %v676_v38, %v672_v37  ;;  %v2645_v34 = vpack.c.bf16 %v710_v27, %v706_v24  ;;  %v712_v36 = vld [vmem:[%s2927_s29 + $0xe88] sm:$0xff]  ;;  %v714_v38 = vld [vmem:[%s2927_s29 + $0xe98] sm:$0xff] }
  0xda   : > { %2610 = vmatprep.subr.bf16.mxu1 %v2609_v49  ;;  %v2629_v49 = vpack.c.bf16 %v678_v41, %v674_v39  ;;  %v716_v37 = vld [vmem:[%s2927_s29 + $0xea8] sm:$0xff]  ;;  %v718_v39 = vld [vmem:[%s2927_s29 + $0xeb8] sm:$0xff] }
  0xdb   : > { %1149 = vmatmul.mubr.f32.vlgmr.msra.gmra.mrb[0].mxu0 %v3229_v46  ;;  %v750_v24 = vld [vmem:[%s2927_s29 + $0xfb8] sm:$0xff] }
  0xdc   : > { %2292 = vmatpush1.bf16.msra.mxu0 %v2291_v54  ;;  %1504 = vmatmul.mubr.f32.vlgmr.msra.gmra.mrb[0].mxu1 %v3229_v46  ;;  %v658_v46 = vld [vmem:[%s2927_s29 + $0xcd8] sm:$0xff]  ;;  %v2311_v54 = vpack.c.bf16 %v675_v47, %v671_v45  ;;  %v715_v45 = vld [vmem:[%s2927_s29 + $0xea0] sm:$0xff]  ;;  %v713_v47 = vld [vmem:[%s2927_s29 + $0xe90] sm:$0xff] }
  0xdd   : > { %2612 = vmatpush1.bf16.msra.mxu1 %v2611_v55  ;;  %2294 = vmatprep.subr.bf16.mxu0 %v2293_v56  ;;  %v2621_v21 = vpack.c.bf16 %v662_v14, %v658_v46  ;;  %v2631_v55 = vpack.c.bf16 %v677_v40, %v673_v48  ;;  %v2313_v56 = vpack.c.bf16 %v684_v51, %v680_v50  ;;  %v702_v46 = vld [vmem:[%s2927_s29 + $0xe38] sm:$0xff]  ;;  %v720_v40 = vld [vmem:[%s2927_s29 + $0xec8] sm:$0xff] }
  0xde   : > { %2614 = vmatprep.subr.bf16.mxu1 %v2613_v60  ;;  %1219 = vmatprep.mubr.f32.mxu0 %v923_v0  ;;  %v2633_v60 = vpack.c.bf16 %v686_v53, %v682_v52  ;;  %v2641_v20 = vpack.c.bf16 %v702_v46, %v698_v13  ;;  %v2649_v48 = vpack.c.bf16 %v718_v39, %v714_v38  ;;  %v724_v50 = vld [vmem:[%s2927_s29 + $0xee8] sm:$0xff]  ;;  %v722_v51 = vld [vmem:[%s2927_s29 + $0xed8] sm:$0xff] }
  0xdf   : > { %1574 = vmatprep.mubr.f32.mxu1 %v923_v0  ;;  %v690_v0 = vld [vmem:[%s2927_s29 + $0xdd8] sm:$0xff] }
  0xe0   : > { %2296 = vmatpush1.bf16.msra.mxu0 %v2295_v3  ;;  %v2635_v3 = vpack.c.bf16 %v685_v61, %v681_v59  ;;  %v2637_v8 = vpack.c.bf16 %v694_v1, %v690_v0  ;;  %v726_v52 = vld [vmem:[%s2927_s29 + $0xef8] sm:$0xff]  ;;  %v728_v61 = vld [vmem:[%s2927_s29 + $0xf08] sm:$0xff] }
  0xe1   : > { %2616 = vmatpush1.bf16.msra.mxu1 %v2615_v4  ;;  %2298 = vmatprep.subr.bf16.mxu0 %v2297_v5  ;;  %v2317_v4 = vpack.c.bf16 %v692_v25, %v688_v62  ;;  %v687_v5 = vld [vmem:[%s2927_s29 + $0xdc0] sm:$0xff]  ;;  %v2653_v59 = vpack.c.bf16 %v726_v52, %v722_v51  ;;  %v732_v62 = vld [vmem:[%s2927_s29 + $0xf28] sm:$0xff]  ;;  %v730_v25 = vld [vmem:[%s2927_s29 + $0xf18] sm:$0xff] }
  0xe2   : > { %2618 = vmatprep.subr.bf16.mxu1 %v2617_v9  ;;  %v693_v9 = vld [vmem:[%s2927_s29 + $0xdf0] sm:$0xff]  ;;  %v2319_v14 = vpack.c.bf16 %v691_v6, %v687_v5  ;;  %v734_v0 = vld [vmem:[%s2927_s29 + $0xf38] sm:$0xff]  ;;  %v731_v5 = vld [vmem:[%s2927_s29 + $0xf20] sm:$0xff] }
  0xe3   : > { %v729_v6 = vld [vmem:[%s2927_s29 + $0xf10] sm:$0xff]  ;;  %v742_v13 = vld [vmem:[%s2927_s29 + $0xf78] sm:$0xff] }
  0xe4   : > { %2300 = vmatpush1.bf16.msra.mxu0 %v2299_v15  ;;  %v2639_v15 = vpack.c.bf16 %v693_v9, %v689_v7  ;;  %v2657_v7 = vpack.c.bf16 %v734_v0, %v730_v25  ;;  %v736_v9 = vld [vmem:[%s2927_s29 + $0xf48] sm:$0xff]  ;;  %v758_v38 = vld [vmem:[%s2927_s29 + $0xff8] sm:$0xff]  ;;  %v3498_v0 = vld.sshfl [vmem:[%s2922_s25 + $0x10] sm:$0x33 pattern:$0x76325410] }
  0xe5   : > { %2620 = vmatpush1.bf16.msra.mxu1 %v2619_v16  ;;  %2302 = vmatprep.subr.bf16.mxu0 %v2301_v17  ;;  %v2321_v16 = vpack.c.bf16 %v700_v11, %v696_v10  ;;  %v695_v17 = vld [vmem:[%s2927_s29 + $0xe00] sm:$0xff]  ;;  %v740_v10 = vld [vmem:[%s2927_s29 + $0xf68] sm:$0xff]  ;;  %v738_v11 = vld [vmem:[%s2927_s29 + $0xf58] sm:$0xff] }
  0xe6   : > { %2622 = vmatprep.subr.bf16.mxu1 %v2621_v21  ;;  %v701_v21 = vld [vmem:[%s2927_s29 + $0xe30] sm:$0xff]  ;;  %v2323_v28 = vpack.c.bf16 %v699_v18, %v695_v17  ;;  %v739_v17 = vld [vmem:[%s2927_s29 + $0xf60] sm:$0xff]  ;;  %v766_v51 = vld [vmem:[%s2927_s29 + $0x1038] sm:$0xff] }
  0xe7   : > { %v737_v18 = vld [vmem:[%s2927_s29 + $0xf50] sm:$0xff]  ;;  %v774_v25 = vld [vmem:[%s2927_s29 + $0x1078] sm:$0xff] }
  0xe8   : > { %2304 = vmatpush1.bf16.msra.mxu0 %v2303_v29  ;;  %v2643_v29 = vpack.c.bf16 %v701_v21, %v697_v19  ;;  %v2661_v19 = vpack.c.bf16 %v742_v13, %v738_v11  ;;  %v744_v21 = vld [vmem:[%s2927_s29 + $0xf88] sm:$0xff]  ;;  %v931_v11 = vcombine.high %v3498_v0, %v3498_v0  ;;  %v778_v13 = vld [vmem:[%s2927_s29 + $0x1098] sm:$0xff] }
  0xe9   : > { %2624 = vmatpush1.bf16.msra.mxu1 %v2623_v30  ;;  %2306 = vmatprep.subr.bf16.mxu0 %v2305_v31  ;;  %v2325_v30 = vpack.c.bf16 %v708_v23, %v704_v22  ;;  %v703_v31 = vld [vmem:[%s2927_s29 + $0xe40] sm:$0xff]  ;;  %v748_v22 = vld [vmem:[%s2927_s29 + $0xfa8] sm:$0xff]  ;;  %v746_v23 = vld [vmem:[%s2927_s29 + $0xf98] sm:$0xff] }
  0xea   : > { %2626 = vmatprep.subr.bf16.mxu1 %v2625_v35  ;;  %v709_v35 = vld [vmem:[%s2927_s29 + $0xe70] sm:$0xff]  ;;  %v2327_v41 = vpack.c.bf16 %v707_v32, %v703_v31  ;;  %v747_v31 = vld [vmem:[%s2927_s29 + $0xfa0] sm:$0xff] }
  0xeb   : > { %v745_v32 = vld [vmem:[%s2927_s29 + $0xf90] sm:$0xff] }
  0xec   : > { %2308 = vmatpush1.bf16.msra.mxu0 %v2307_v42  ;;  %v2647_v42 = vpack.c.bf16 %v709_v35, %v705_v33  ;;  %v2665_v33 = vpack.c.bf16 %v750_v24, %v746_v23  ;;  %v752_v35 = vld [vmem:[%s2927_s29 + $0xfc8] sm:$0xff]  ;;  %v790_v24 = vld [vmem:[%s2927_s29 + $0x10f8] sm:$0xff] }
  0xed   : > { %2628 = vmatpush1.bf16.msra.mxu1 %v2627_v43  ;;  %2310 = vmatprep.subr.bf16.mxu0 %v2309_v44  ;;  %v2329_v43 = vpack.c.bf16 %v716_v37, %v712_v36  ;;  %v711_v44 = vld [vmem:[%s2927_s29 + $0xe80] sm:$0xff]  ;;  %v756_v36 = vld [vmem:[%s2927_s29 + $0xfe8] sm:$0xff]  ;;  %v754_v37 = vld [vmem:[%s2927_s29 + $0xfd8] sm:$0xff] }
  0xee   : > { %2630 = vmatprep.subr.bf16.mxu1 %v2629_v49  ;;  %v717_v49 = vld [vmem:[%s2927_s29 + $0xeb0] sm:$0xff]  ;;  %v2331_v53 = vpack.c.bf16 %v715_v45, %v711_v44  ;;  %v755_v44 = vld [vmem:[%s2927_s29 + $0xfe0] sm:$0xff]  ;;  %v788_v23 = vld [vmem:[%s2927_s29 + $0x10e8] sm:$0xff] }
  0xef   : > { %v753_v45 = vld [vmem:[%s2927_s29 + $0xfd0] sm:$0xff] }
  0xf0   : > { %2312 = vmatpush1.bf16.msra.mxu0 %v2311_v54  ;;  %v2651_v54 = vpack.c.bf16 %v717_v49, %v713_v47  ;;  %v2669_v47 = vpack.c.bf16 %v758_v38, %v754_v37  ;;  %v760_v49 = vld [vmem:[%s2927_s29 + $0x1008] sm:$0xff]  ;;  %v794_v37 = vld [vmem:[%s2927_s29 + $0x1118] sm:$0xff] }
  0xf1   : > { %2632 = vmatpush1.bf16.msra.mxu1 %v2631_v55  ;;  %2314 = vmatprep.subr.bf16.mxu0 %v2313_v56  ;;  %v2333_v55 = vpack.c.bf16 %v724_v50, %v720_v40  ;;  %v719_v56 = vld [vmem:[%s2927_s29 + $0xec0] sm:$0xff]  ;;  %v764_v40 = vld [vmem:[%s2927_s29 + $0x1028] sm:$0xff]  ;;  %v762_v50 = vld [vmem:[%s2927_s29 + $0x1018] sm:$0xff] }
  0xf2   : > { %2634 = vmatprep.subr.bf16.mxu1 %v2633_v60  ;;  %v725_v60 = vld [vmem:[%s2927_s29 + $0xef0] sm:$0xff]  ;;  %v2335_v1 = vpack.c.bf16 %v723_v57, %v719_v56  ;;  %v763_v56 = vld [vmem:[%s2927_s29 + $0x1020] sm:$0xff]  ;;  %v798_v38 = vld [vmem:[%s2927_s29 + $0x1138] sm:$0xff] }
  0xf3   : > { %v761_v57 = vld [vmem:[%s2927_s29 + $0x1010] sm:$0xff] }
  0xf4   : > { %2316 = vmatpush1.bf16.msra.mxu0 %v2315_v2  ;;  %v2655_v2 = vpack.c.bf16 %v725_v60, %v721_v58  ;;  %v2673_v58 = vpack.c.bf16 %v766_v51, %v762_v50  ;;  %v768_v60 = vld [vmem:[%s2927_s29 + $0x1048] sm:$0xff]  ;;  %v802_v50 = vld [vmem:[%s2927_s29 + $0x1158] sm:$0xff] }
  0xf5   : > { %2636 = vmatpush1.bf16.msra.mxu1 %v2635_v3  ;;  %2318 = vmatprep.subr.bf16.mxu0 %v2317_v4  ;;  %v2337_v3 = vpack.c.bf16 %v732_v62, %v728_v61  ;;  %v727_v4 = vld [vmem:[%s2927_s29 + $0xf00] sm:$0xff]  ;;  %v772_v61 = vld [vmem:[%s2927_s29 + $0x1068] sm:$0xff]  ;;  %v770_v62 = vld [vmem:[%s2927_s29 + $0x1058] sm:$0xff] }
  0xf6   : > { %2638 = vmatprep.subr.bf16.mxu1 %v2637_v8  ;;  %v733_v8 = vld [vmem:[%s2927_s29 + $0xf30] sm:$0xff]  ;;  %v2339_v46 = vpack.c.bf16 %v731_v5, %v727_v4  ;;  %v767_v4 = vld [vmem:[%s2927_s29 + $0x1040] sm:$0xff]  ;;  %v806_v51 = vld [vmem:[%s2927_s29 + $0x1178] sm:$0xff] }
  0xf7   : > { %v771_v5 = vld [vmem:[%s2927_s29 + $0x1060] sm:$0xff] }
  0xf8   : > { %2320 = vmatpush1.bf16.msra.mxu0 %v2319_v14  ;;  %v2659_v14 = vpack.c.bf16 %v733_v8, %v729_v6  ;;  %v769_v6 = vld [vmem:[%s2927_s29 + $0x1050] sm:$0xff] }
  0xf9   : > { %2640 = vmatpush1.bf16.msra.mxu1 %v2639_v15  ;;  %2322 = vmatprep.subr.bf16.mxu0 %v2321_v16  ;;  %v2341_v15 = vpack.c.bf16 %v740_v10, %v736_v9  ;;  %v735_v16 = vld [vmem:[%s2927_s29 + $0xf40] sm:$0xff]  ;;  %v773_v8 = vld [vmem:[%s2927_s29 + $0x1070] sm:$0xff]  ;;  %v776_v9 = vld [vmem:[%s2927_s29 + $0x1088] sm:$0xff] }
  0xfa   : > { %2642 = vmatprep.subr.bf16.mxu1 %v2641_v20  ;;  %v741_v20 = vld [vmem:[%s2927_s29 + $0xf70] sm:$0xff]  ;;  %v2343_v27 = vpack.c.bf16 %v739_v17, %v735_v16  ;;  %v780_v10 = vld [vmem:[%s2927_s29 + $0x10a8] sm:$0xff]  ;;  %v775_v17 = vld [vmem:[%s2927_s29 + $0x1080] sm:$0xff] }
  0xfb   : > { %v2361_v16 = vpack.c.bf16 %v780_v10, %v776_v9  ;;  %v816_v9 = vld [vmem:[%s2927_s29 + $0x11c8] sm:$0xff] }
  0xfc   : > { %2324 = vmatpush1.bf16.msra.mxu0 %v2323_v28  ;;  %v2663_v28 = vpack.c.bf16 %v741_v20, %v737_v18  ;;  %v779_v18 = vld [vmem:[%s2927_s29 + $0x10a0] sm:$0xff]  ;;  %v820_v10 = vld [vmem:[%s2927_s29 + $0x11e8] sm:$0xff] }
  0xfd   : > { %2644 = vmatpush1.bf16.msra.mxu1 %v2643_v29  ;;  %2326 = vmatprep.subr.bf16.mxu0 %v2325_v30  ;;  %v2345_v29 = vpack.c.bf16 %v748_v22, %v744_v21  ;;  %v743_v30 = vld [vmem:[%s2927_s29 + $0xf80] sm:$0xff]  ;;  %v781_v21 = vld [vmem:[%s2927_s29 + $0x10b0] sm:$0xff]  ;;  %v784_v22 = vld [vmem:[%s2927_s29 + $0x10c8] sm:$0xff] }
  0xfe   : > { %2646 = vmatprep.subr.bf16.mxu1 %v2645_v34  ;;  %v749_v34 = vld [vmem:[%s2927_s29 + $0xfb0] sm:$0xff]  ;;  %v2347_v39 = vpack.c.bf16 %v747_v31, %v743_v30  ;;  %v783_v30 = vld [vmem:[%s2927_s29 + $0x10c0] sm:$0xff] }
  0xff   : > { %v787_v31 = vld [vmem:[%s2927_s29 + $0x10e0] sm:$0xff] }
 0x100   : > { %2328 = vmatpush1.bf16.msra.mxu0 %v2327_v41  ;;  %v2667_v41 = vpack.c.bf16 %v749_v34, %v745_v32  ;;  %v785_v32 = vld [vmem:[%s2927_s29 + $0x10d0] sm:$0xff] }
 0x101   : > { %2648 = vmatpush1.bf16.msra.mxu1 %v2647_v42  ;;  %2330 = vmatprep.subr.bf16.mxu0 %v2329_v43  ;;  %v2349_v42 = vpack.c.bf16 %v756_v36, %v752_v35  ;;  %v751_v43 = vld [vmem:[%s2927_s29 + $0xfc0] sm:$0xff]  ;;  %v789_v34 = vld [vmem:[%s2927_s29 + $0x10f0] sm:$0xff]  ;;  %v792_v35 = vld [vmem:[%s2927_s29 + $0x1108] sm:$0xff] }
 0x102   : > { %2650 = vmatprep.subr.bf16.mxu1 %v2649_v48  ;;  %v757_v48 = vld [vmem:[%s2927_s29 + $0xff0] sm:$0xff]  ;;  %v2351_v52 = vpack.c.bf16 %v755_v44, %v751_v43  ;;  %v796_v36 = vld [vmem:[%s2927_s29 + $0x1128] sm:$0xff]  ;;  %v791_v43 = vld [vmem:[%s2927_s29 + $0x1100] sm:$0xff] }
 0x103   : > { %v795_v44 = vld [vmem:[%s2927_s29 + $0x1120] sm:$0xff] }
 0x104   : > { %2332 = vmatpush1.bf16.msra.mxu0 %v2331_v53  ;;  %v2671_v53 = vpack.c.bf16 %v757_v48, %v753_v45  ;;  %v793_v45 = vld [vmem:[%s2927_s29 + $0x1110] sm:$0xff] }
 0x105   : > { %2652 = vmatpush1.bf16.msra.mxu1 %v2651_v54  ;;  %2334 = vmatprep.subr.bf16.mxu0 %v2333_v55  ;;  %v2353_v54 = vpack.c.bf16 %v764_v40, %v760_v49  ;;  %v759_v55 = vld [vmem:[%s2927_s29 + $0x1000] sm:$0xff]  ;;  %v797_v48 = vld [vmem:[%s2927_s29 + $0x1130] sm:$0xff]  ;;  %v800_v49 = vld [vmem:[%s2927_s29 + $0x1148] sm:$0xff] }
 0x106   : > { %2654 = vmatprep.subr.bf16.mxu1 %v2653_v59  ;;  %v765_v59 = vld [vmem:[%s2927_s29 + $0x1030] sm:$0xff]  ;;  %v804_v40 = vld [vmem:[%s2927_s29 + $0x1168] sm:$0xff] }
 0x108   : > { %2336 = vmatpush1.bf16.msra.mxu0 %v2335_v1  ;;  %v2355_v1 = vpack.c.bf16 %v763_v56, %v759_v55  ;;  %v799_v55 = vld [vmem:[%s2927_s29 + $0x1140] sm:$0xff] }
 0x109   : > { %2656 = vmatpush1.bf16.msra.mxu1 %v2655_v2  ;;  %2338 = vmatprep.subr.bf16.mxu0 %v2337_v3  ;;  %v2675_v2 = vpack.c.bf16 %v765_v59, %v761_v57  ;;  %v2357_v3 = vpack.c.bf16 %v772_v61, %v768_v60  ;;  %v803_v56 = vld [vmem:[%s2927_s29 + $0x1160] sm:$0xff]  ;;  %v801_v57 = vld [vmem:[%s2927_s29 + $0x1150] sm:$0xff]  ;;  %v808_v60 = vld [vmem:[%s2927_s29 + $0x1188] sm:$0xff] }
 0x10a   : > { %2658 = vmatprep.subr.bf16.mxu1 %v2657_v7  ;;  %v2677_v7 = vpack.c.bf16 %v774_v25, %v770_v62  ;;  %v805_v59 = vld [vmem:[%s2927_s29 + $0x1170] sm:$0xff]  ;;  %v812_v61 = vld [vmem:[%s2927_s29 + $0x11a8] sm:$0xff]  ;;  %v810_v62 = vld [vmem:[%s2927_s29 + $0x1198] sm:$0xff] }
 0x10b   : > { %v814_v25 = vld [vmem:[%s2927_s29 + $0x11b8] sm:$0xff] }
 0x10c   : > { %2340 = vmatpush1.bf16.msra.mxu0 %v2339_v46  ;;  %v782_v46 = vld [vmem:[%s2927_s29 + $0x10b8] sm:$0xff] }
 0x10d   : > { %2660 = vmatpush1.bf16.msra.mxu1 %v2659_v14  ;;  %2342 = vmatprep.subr.bf16.mxu0 %v2341_v15  ;;  %v2359_v14 = vpack.c.bf16 %v771_v5, %v767_v4  ;;  %v2679_v15 = vpack.c.bf16 %v773_v8, %v769_v6  ;;  %v2681_v20 = vpack.c.bf16 %v782_v46, %v778_v13  ;;  %v807_v4 = vld [vmem:[%s2927_s29 + $0x1180] sm:$0xff]  ;;  %v809_v6 = vld [vmem:[%s2927_s29 + $0x1190] sm:$0xff]  ;;  %v822_v13 = vld [vmem:[%s2927_s29 + $0x11f8] sm:$0xff] }
 0x10e   : > { %2662 = vmatprep.subr.bf16.mxu1 %v2661_v19  ;;  %v777_v19 = vld [vmem:[%s2927_s29 + $0x1090] sm:$0xff]  ;;  %v811_v5 = vld [vmem:[%s2927_s29 + $0x11a0] sm:$0xff] }
 0x10f   : > { %v813_v8 = vld [vmem:[%s2927_s29 + $0x11b0] sm:$0xff]  ;;  %v2379_v46 = vpack.c.bf16 %v811_v5, %v807_v4  ;;  %v851_v4 = vld [vmem:[%s2927_s29 + $0x12e0] sm:$0xff] }
 0x110   : > { %2344 = vmatpush1.bf16.msra.mxu0 %v2343_v27  ;;  %v2363_v27 = vpack.c.bf16 %v779_v18, %v775_v17  ;;  %v819_v17 = vld [vmem:[%s2927_s29 + $0x11e0] sm:$0xff]  ;;  %v817_v18 = vld [vmem:[%s2927_s29 + $0x11d0] sm:$0xff] }
 0x111   : > { %2664 = vmatpush1.bf16.msra.mxu1 %v2663_v28  ;;  %2346 = vmatprep.subr.bf16.mxu0 %v2345_v29  ;;  %v2683_v28 = vpack.c.bf16 %v781_v21, %v777_v19  ;;  %v2365_v29 = vpack.c.bf16 %v788_v23, %v784_v22  ;;  %v824_v21 = vld [vmem:[%s2927_s29 + $0x1208] sm:$0xff]  ;;  %v826_v23 = vld [vmem:[%s2927_s29 + $0x1218] sm:$0xff]  ;;  %v849_v5 = vld [vmem:[%s2927_s29 + $0x12d0] sm:$0xff] }
 0x112   : > { %2666 = vmatprep.subr.bf16.mxu1 %v2665_v33  ;;  %v828_v22 = vld [vmem:[%s2927_s29 + $0x1228] sm:$0xff] }
 0x114   : > { %2348 = vmatpush1.bf16.msra.mxu0 %v2347_v39  ;;  %v2367_v39 = vpack.c.bf16 %v787_v31, %v783_v30  ;;  %v827_v30 = vld [vmem:[%s2927_s29 + $0x1220] sm:$0xff]  ;;  %v825_v31 = vld [vmem:[%s2927_s29 + $0x1210] sm:$0xff] }
 0x115   : > { %2668 = vmatpush1.bf16.msra.mxu1 %v2667_v41  ;;  %2350 = vmatprep.subr.bf16.mxu0 %v2349_v42  ;;  %v2687_v41 = vpack.c.bf16 %v789_v34, %v785_v32  ;;  %v2369_v42 = vpack.c.bf16 %v796_v36, %v792_v35  ;;  %v832_v34 = vld [vmem:[%s2927_s29 + $0x1248] sm:$0xff]  ;;  %v834_v36 = vld [vmem:[%s2927_s29 + $0x1258] sm:$0xff] }
 0x116   : > { %2670 = vmatprep.subr.bf16.mxu1 %v2669_v47  ;;  %v2689_v47 = vpack.c.bf16 %v798_v38, %v794_v37  ;;  %v836_v35 = vld [vmem:[%s2927_s29 + $0x1268] sm:$0xff]  ;;  %v838_v37 = vld [vmem:[%s2927_s29 + $0x1278] sm:$0xff] }
 0x118   : > { %2352 = vmatpush1.bf16.msra.mxu0 %v2351_v52  ;;  %v2371_v52 = vpack.c.bf16 %v795_v44, %v791_v43  ;;  %v835_v43 = vld [vmem:[%s2927_s29 + $0x1260] sm:$0xff]  ;;  %v833_v44 = vld [vmem:[%s2927_s29 + $0x1250] sm:$0xff] }
 0x119   : > { %2672 = vmatpush1.bf16.msra.mxu1 %v2671_v53  ;;  %2354 = vmatprep.subr.bf16.mxu0 %v2353_v54  ;;  %v2691_v53 = vpack.c.bf16 %v797_v48, %v793_v45  ;;  %v2373_v54 = vpack.c.bf16 %v804_v40, %v800_v49  ;;  %v2709_v45 = vpack.c.bf16 %v838_v37, %v834_v36  ;;  %v840_v48 = vld [vmem:[%s2927_s29 + $0x1288] sm:$0xff]  ;;  %v842_v40 = vld [vmem:[%s2927_s29 + $0x1298] sm:$0xff] }
 0x11a   : > { %2674 = vmatprep.subr.bf16.mxu1 %v2673_v58  ;;  %v2693_v58 = vpack.c.bf16 %v806_v51, %v802_v50  ;;  %v844_v49 = vld [vmem:[%s2927_s29 + $0x12a8] sm:$0xff]  ;;  %v846_v50 = vld [vmem:[%s2927_s29 + $0x12b8] sm:$0xff] }
 0x11b   : > { %1220 = vmatmul.mubr.f32.vlgmr.msra.gmra.mrb[0].mxu0 %v3361_v26  ;;  %v878_v36 = vld [vmem:[%s2927_s29 + $0x13b8] sm:$0xff] }
 0x11c   : > { %2356 = vmatpush1.bf16.msra.mxu0 %v2355_v1  ;;  %1575 = vmatmul.mubr.f32.vlgmr.msra.gmra.mrb[0].mxu1 %v3361_v26  ;;  %v786_v26 = vld [vmem:[%s2927_s29 + $0x10d8] sm:$0xff]  ;;  %v2375_v1 = vpack.c.bf16 %v803_v56, %v799_v55  ;;  %v843_v55 = vld [vmem:[%s2927_s29 + $0x12a0] sm:$0xff]  ;;  %v841_v56 = vld [vmem:[%s2927_s29 + $0x1290] sm:$0xff] }
 0x11d   : > { %2676 = vmatpush1.bf16.msra.mxu1 %v2675_v2  ;;  %2358 = vmatprep.subr.bf16.mxu0 %v2357_v3  ;;  %v2685_v33 = vpack.c.bf16 %v790_v24, %v786_v26  ;;  %v2695_v2 = vpack.c.bf16 %v805_v59, %v801_v57  ;;  %v2377_v3 = vpack.c.bf16 %v812_v61, %v808_v60  ;;  %v830_v26 = vld [vmem:[%s2927_s29 + $0x1238] sm:$0xff]  ;;  %v848_v59 = vld [vmem:[%s2927_s29 + $0x12c8] sm:$0xff] }
 0x11e   : > { %2678 = vmatprep.subr.bf16.mxu1 %v2677_v7  ;;  %1290 = vmatprep.mubr.f32.mxu0 %v931_v11  ;;  %v2697_v7 = vpack.c.bf16 %v814_v25, %v810_v62  ;;  %v2705_v32 = vpack.c.bf16 %v830_v26, %v826_v23  ;;  %v2713_v57 = vpack.c.bf16 %v846_v50, %v842_v40  ;;  %v852_v60 = vld [vmem:[%s2927_s29 + $0x12e8] sm:$0xff]  ;;  %v850_v61 = vld [vmem:[%s2927_s29 + $0x12d8] sm:$0xff] }
 0x11f   : > { %1645 = vmatprep.mubr.f32.mxu1 %v931_v11  ;;  %v818_v11 = vld [vmem:[%s2927_s29 + $0x11d8] sm:$0xff] }
 0x120   : > { %2360 = vmatpush1.bf16.msra.mxu0 %v2359_v14  ;;  %v2699_v14 = vpack.c.bf16 %v813_v8, %v809_v6  ;;  %v2701_v19 = vpack.c.bf16 %v822_v13, %v818_v11  ;;  %v854_v62 = vld [vmem:[%s2927_s29 + $0x12f8] sm:$0xff]  ;;  %v856_v8 = vld [vmem:[%s2927_s29 + $0x1308] sm:$0xff] }
 0x121   : > { %2680 = vmatpush1.bf16.msra.mxu1 %v2679_v15  ;;  %2362 = vmatprep.subr.bf16.mxu0 %v2361_v16  ;;  %v2381_v15 = vpack.c.bf16 %v820_v10, %v816_v9  ;;  %v815_v16 = vld [vmem:[%s2927_s29 + $0x11c0] sm:$0xff]  ;;  %v2717_v6 = vpack.c.bf16 %v854_v62, %v850_v61  ;;  %v860_v9 = vld [vmem:[%s2927_s29 + $0x1328] sm:$0xff]  ;;  %v858_v10 = vld [vmem:[%s2927_s29 + $0x1318] sm:$0xff] }
 0x122   : > { %2682 = vmatprep.subr.bf16.mxu1 %v2681_v20  ;;  %v821_v20 = vld [vmem:[%s2927_s29 + $0x11f0] sm:$0xff]  ;;  %v2383_v24 = vpack.c.bf16 %v819_v17, %v815_v16  ;;  %v862_v11 = vld [vmem:[%s2927_s29 + $0x1338] sm:$0xff]  ;;  %v859_v16 = vld [vmem:[%s2927_s29 + $0x1320] sm:$0xff] }
 0x123   : > { %v857_v17 = vld [vmem:[%s2927_s29 + $0x1310] sm:$0xff]  ;;  %v870_v23 = vld [vmem:[%s2927_s29 + $0x1378] sm:$0xff] }
 0x124   : > { %2364 = vmatpush1.bf16.msra.mxu0 %v2363_v27  ;;  %v2703_v27 = vpack.c.bf16 %v821_v20, %v817_v18  ;;  %v2721_v18 = vpack.c.bf16 %v862_v11, %v858_v10  ;;  %v864_v20 = vld [vmem:[%s2927_s29 + $0x1348] sm:$0xff]  ;;  %v886_v40 = vld [vmem:[%s2927_s29 + $0x13f8] sm:$0xff] }
 0x125   : > { %2684 = vmatpush1.bf16.msra.mxu1 %v2683_v28  ;;  %2366 = vmatprep.subr.bf16.mxu0 %v2365_v29  ;;  %v2385_v28 = vpack.c.bf16 %v828_v22, %v824_v21  ;;  %v823_v29 = vld [vmem:[%s2927_s29 + $0x1200] sm:$0xff]  ;;  %v868_v21 = vld [vmem:[%s2927_s29 + $0x1368] sm:$0xff]  ;;  %v866_v22 = vld [vmem:[%s2927_s29 + $0x1358] sm:$0xff] }
 0x126   : > { %2686 = vmatprep.subr.bf16.mxu1 %v2685_v33  ;;  %v829_v33 = vld [vmem:[%s2927_s29 + $0x1230] sm:$0xff]  ;;  %v2387_v38 = vpack.c.bf16 %v827_v30, %v823_v29  ;;  %v867_v29 = vld [vmem:[%s2927_s29 + $0x1360] sm:$0xff]  ;;  %v1720_v11 = vld [vmem:[%s3860_s3 + $0x8] sm:$0xff] (!%p2020_p6) }
 0x127   : > { %v865_v30 = vld [vmem:[%s2927_s29 + $0x1350] sm:$0xff] }
 0x128   : > { %2368 = vmatpush1.bf16.msra.mxu0 %v2367_v39  ;;  %v2707_v39 = vpack.c.bf16 %v829_v33, %v825_v31  ;;  %v2725_v31 = vpack.c.bf16 %v870_v23, %v866_v22  ;;  %v872_v33 = vld [vmem:[%s2927_s29 + $0x1388] sm:$0xff]  ;;  %v1722_v22 = vld [vmem:[%s3860_s3 + $0x18] sm:$0xff] (!%p2020_p6) }
 0x129   : > { %2688 = vmatpush1.bf16.msra.mxu1 %v2687_v41  ;;  %2370 = vmatprep.subr.bf16.mxu0 %v2369_v42  ;;  %v2389_v41 = vpack.c.bf16 %v836_v35, %v832_v34  ;;  %v831_v42 = vld [vmem:[%s2927_s29 + $0x1240] sm:$0xff]  ;;  %v876_v34 = vld [vmem:[%s2927_s29 + $0x13a8] sm:$0xff]  ;;  %v874_v35 = vld [vmem:[%s2927_s29 + $0x1398] sm:$0xff] }
 0x12a   : > { %2690 = vmatprep.subr.bf16.mxu1 %v2689_v47  ;;  %v837_v47 = vld [vmem:[%s2927_s29 + $0x1270] sm:$0xff]  ;;  %v2391_v51 = vpack.c.bf16 %v835_v43, %v831_v42  ;;  %v875_v42 = vld [vmem:[%s2927_s29 + $0x13a0] sm:$0xff] }
 0x12b   : > { %v873_v43 = vld [vmem:[%s2927_s29 + $0x1390] sm:$0xff] }
 0x12c   : > { %2372 = vmatpush1.bf16.msra.mxu0 %v2371_v52  ;;  %v2711_v52 = vpack.c.bf16 %v837_v47, %v833_v44  ;;  %v2729_v44 = vpack.c.bf16 %v878_v36, %v874_v35  ;;  %v880_v47 = vld [vmem:[%s2927_s29 + $0x13c8] sm:$0xff]  ;;  %v1723_v35 = vld [vmem:[%s3860_s3 + $0x20] sm:$0xff] (!%p2020_p6) }
 0x12d   : > { %2692 = vmatpush1.bf16.msra.mxu1 %v2691_v53  ;;  %2374 = vmatprep.subr.bf16.mxu0 %v2373_v54  ;;  %v2393_v53 = vpack.c.bf16 %v844_v49, %v840_v48  ;;  %v839_v54 = vld [vmem:[%s2927_s29 + $0x1280] sm:$0xff]  ;;  %v884_v48 = vld [vmem:[%s2927_s29 + $0x13e8] sm:$0xff]  ;;  %v882_v49 = vld [vmem:[%s2927_s29 + $0x13d8] sm:$0xff] }
 0x12e   : > { %2694 = vmatprep.subr.bf16.mxu1 %v2693_v58  ;;  %v845_v58 = vld [vmem:[%s2927_s29 + $0x12b0] sm:$0xff]  ;;  %v2395_v25 = vpack.c.bf16 %v843_v55, %v839_v54  ;;  %v883_v54 = vld [vmem:[%s2927_s29 + $0x13e0] sm:$0xff]  ;;  %v2733_v55 = vpack.c.bf16 %v886_v40, %v882_v49  ;;  %v1724_v36 = vld [vmem:[%s3860_s3 + $0x28] sm:$0xff] (!%p2020_p6) }
 0x12f   : > { %v1726_v40 = vld [vmem:[%s3860_s3 + $0x38] sm:$0xff] (!%p2020_p6) }
 0x130   : > { %2376 = vmatpush1.bf16.msra.mxu0 %v2375_v1  ;;  %v2715_v1 = vpack.c.bf16 %v845_v58, %v841_v56  ;;  %v881_v56 = vld [vmem:[%s2927_s29 + $0x13d0] sm:$0xff] }
 0x131   : > { %2696 = vmatpush1.bf16.msra.mxu1 %v2695_v2  ;;  %2378 = vmatprep.subr.bf16.mxu0 %v2377_v3  ;;  %v2397_v2 = vpack.c.bf16 %v852_v60, %v848_v59  ;;  %v847_v3 = vld [vmem:[%s2927_s29 + $0x12c0] sm:$0xff] }
 0x132   : > { %2698 = vmatprep.subr.bf16.mxu1 %v2697_v7  ;;  %v853_v7 = vld [vmem:[%s2927_s29 + $0x12f0] sm:$0xff]  ;;  %v2399_v13 = vpack.c.bf16 %v851_v4, %v847_v3 }
 0x134   : > { %2380 = vmatpush1.bf16.msra.mxu0 %v2379_v46  ;;  %v2719_v46 = vpack.c.bf16 %v853_v7, %v849_v5  ;;  %v243_v5 = vld [vmem:[#allocation2] sm:$0xff] }
 0x135   : > { %2700 = vmatpush1.bf16.msra.mxu1 %v2699_v14  ;;  %2382 = vmatprep.subr.bf16.mxu0 %v2381_v15  ;;  %v2401_v14 = vpack.c.bf16 %v860_v9, %v856_v8  ;;  %v855_v15 = vld [vmem:[%s2927_s29 + $0x1300] sm:$0xff]  ;;  %v1736_v8 = vld [vmem:[%s3860_s3 + $0x88] sm:$0xff] (!%p2020_p6) }
 0x136   : > { %2702 = vmatprep.subr.bf16.mxu1 %v2701_v19  ;;  %v861_v19 = vld [vmem:[%s2927_s29 + $0x1330] sm:$0xff]  ;;  %v2403_v26 = vpack.c.bf16 %v859_v16, %v855_v15  ;;  %v1719_v9 = vld [vmem:[%s3860_s3] sm:$0xff] (!%p2020_p6) }
 0x137   : > { %v1751_v16 = vld [vmem:[%s3860_s3 + $0x100] sm:$0xff] (!%p2020_p6) }
 0x138   : > { %2384 = vmatpush1.bf16.msra.mxu0 %v2383_v24  ;;  %v2723_v24 = vpack.c.bf16 %v861_v19, %v857_v17  ;;  %v1752_v17 = vld [vmem:[%s3860_s3 + $0x108] sm:$0xff] (!%p2020_p6) }
 0x139   : > { %2704 = vmatpush1.bf16.msra.mxu1 %v2703_v27  ;;  %2386 = vmatprep.subr.bf16.mxu0 %v2385_v28  ;;  %v2405_v27 = vpack.c.bf16 %v868_v21, %v864_v20  ;;  %v863_v28 = vld [vmem:[%s2927_s29 + $0x1340] sm:$0xff]  ;;  %v2771_v19 = vpack.c.bf16 (!%p2020_p6), %v1752_v17, %v1751_v16  ;;  %v1738_v20 = vld [vmem:[%s3860_s3 + $0x98] sm:$0xff] (!%p2020_p6)  ;;  %v1721_v21 = vld [vmem:[%s3860_s3 + $0x10] sm:$0xff] (!%p2020_p6)  ;;  %v1685_v17 = vsub.s32 (!%p2020_p6), 0, %v3014_v63 }
 0x13a   : > { %2706 = vmatprep.subr.bf16.mxu1 %v2705_v32  ;;  %v869_v32 = vld [vmem:[%s2927_s29 + $0x1370] sm:$0xff]  ;;  %v2407_v37 = vpack.c.bf16 %v867_v29, %v863_v28  ;;  %v1748_v16 = vld [vmem:[%s3860_s3 + $0xe8] sm:$0xff] (!%p2020_p6) }
 0x13b   : > { %v1753_v28 = vld [vmem:[%s3860_s3 + $0x110] sm:$0xff] (!%p2020_p6) }
 0x13c   : > { %2388 = vmatpush1.bf16.msra.mxu0 %v2387_v38  ;;  %v2727_v38 = vpack.c.bf16 %v869_v32, %v865_v30  ;;  %v1754_v30 = vld [vmem:[%s3860_s3 + $0x118] sm:$0xff] (!%p2020_p6)  ;;  %v1740_v32 = vld [vmem:[%s3860_s3 + $0xa8] sm:$0xff] (!%p2020_p6) }
 0x13d   : > { %2708 = vmatpush1.bf16.msra.mxu1 %v2707_v39  ;;  %2390 = vmatprep.subr.bf16.mxu0 %v2389_v41  ;;  %v2409_v39 = vpack.c.bf16 %v876_v34, %v872_v33  ;;  %v871_v41 = vld [vmem:[%s2927_s29 + $0x1380] sm:$0xff]  ;;  %v2775_v33 = vpack.c.bf16 (!%p2020_p6), %v1754_v30, %v1753_v28  ;;  %v1732_v28 = vld [vmem:[%s3860_s3 + $0x68] sm:$0xff] (!%p2020_p6) }
 0x13e   : > { %2710 = vmatprep.subr.bf16.mxu1 %v2709_v45  ;;  %v877_v45 = vld [vmem:[%s2927_s29 + $0x13b0] sm:$0xff]  ;;  %v2411_v50 = vpack.c.bf16 %v875_v42, %v871_v41  ;;  %v1756_v41 = vld [vmem:[%s3860_s3 + $0x128] sm:$0xff] (!%p2020_p6)  ;;  %v2747_v42 = vpack.c.bf16 (!%p2020_p6), %v1724_v36, %v1723_v35 }
 0x140   : > { %2392 = vmatpush1.bf16.msra.mxu0 %v2391_v51  ;;  %v2731_v51 = vpack.c.bf16 %v877_v45, %v873_v43  ;;  %v1742_v45 = vld [vmem:[%s3860_s3 + $0xb8] sm:$0xff] (!%p2020_p6) }
 0x141   : > { %2712 = vmatpush1.bf16.msra.mxu1 %v2711_v52  ;;  %2394 = vmatprep.subr.bf16.mxu0 %v2393_v53  ;;  %v2413_v52 = vpack.c.bf16 %v884_v48, %v880_v47  ;;  %v879_v53 = vld [vmem:[%s2927_s29 + $0x13c0] sm:$0xff]  ;;  %v1725_v47 = vld [vmem:[%s3860_s3 + $0x30] sm:$0xff] (!%p2020_p6) }
 0x142   : > { %2714 = vmatprep.subr.bf16.mxu1 %v2713_v57  ;;  %v885_v57 = vld [vmem:[%s2927_s29 + $0x13f0] sm:$0xff]  ;;  %v2415_v58 = vpack.c.bf16 %v883_v54, %v879_v53  ;;  %v1758_v54 = vld [vmem:[%s3860_s3 + $0x138] sm:$0xff] (!%p2020_p6) }
 0x143   : > { %v2735_v59 = vpack.c.bf16 %v885_v57, %v881_v56  ;;  %v1757_v53 = vld [vmem:[%s3860_s3 + $0x130] sm:$0xff] (!%p2020_p6)  ;;  %v1744_v56 = vld [vmem:[%s3860_s3 + $0xc8] sm:$0xff] (!%p2020_p6)  ;;  %v2751_v57 = vpack.c.bf16 (!%p2020_p6), %v1726_v40, %v1725_v47  ;;  %v1734_v47 = vld [vmem:[%s3860_s3 + $0x78] sm:$0xff] (!%p2020_p6) }
 0x144   : > { %2396 = vmatpush1.bf16.msra.mxu0 %v2395_v25  ;;  %v1765_v40 = vld [vmem:[%s3860_s3 + $0x170] sm:$0xff] (!%p2020_p6) }
 0x145   : > { %2716 = vmatpush1.bf16.msra.mxu1 %v2715_v1  ;;  %2398 = vmatprep.subr.bf16.mxu0 %v2397_v2 }
 0x146   : > { %2718 = vmatprep.subr.bf16.mxu1 %v2717_v6 }
 0x148   : > { %2400 = vmatpush1.bf16.msra.mxu0 %v2399_v13  ;;  %v1767_v13 = vld [vmem:[%s3860_s3 + $0x180] sm:$0xff] (!%p2020_p6) }
 0x149   : > { %2720 = vmatpush1.bf16.msra.mxu1 %v2719_v46  ;;  %2402 = vmatprep.subr.bf16.mxu0 %v2401_v14  ;;  %v1768_v46 = vld [vmem:[%s3860_s3 + $0x188] sm:$0xff] (!%p2020_p6)  ;;  %v2739_v14 = vpack.c.bf16 (!%p2020_p6), %v1720_v11, %v1719_v9  ;;  %v1730_v11 = vld [vmem:[%s3860_s3 + $0x58] sm:$0xff] (!%p2020_p6) }
 0x14a   : > { %2722 = vmatprep.subr.bf16.mxu1 %v2721_v18  ;;  %v2769_v15 = vpack.c.bf16 (!%p2020_p6), %v1768_v46, %v1767_v13  ;;  %v1737_v18 = vld [vmem:[%s3860_s3 + $0x90] sm:$0xff] (!%p2020_p6) }
 0x14b   : > { %v2741_v23 = vpack.c.bf16 (!%p2020_p6), %v1738_v20, %v1737_v18  ;;  %v1761_v13 = vld [vmem:[%s3860_s3 + $0x150] sm:$0xff] (!%p2020_p6)  ;;  %v1689_v18 = vsub.s32 (!%p2020_p6), 1, %v3014_v63  ;;  %v1779_v20 = vld [vmem:[%s3860_s3 + $0x1e0] sm:$0xff] (!%p2020_p6) }
 0x14c   : > { %2404 = vmatpush1.bf16.msra.mxu0 %v2403_v26  ;;  %v2743_v26 = vpack.c.bf16 (!%p2020_p6), %v1722_v22, %v1721_v21  ;;  %v1780_v21 = vld [vmem:[%s3860_s3 + $0x1e8] sm:$0xff] (!%p2020_p6)  ;;  %v1697_v22 = vsub.s32 (!%p2020_p6), 3, %v3014_v63 }
 0x14d   : > { %2724 = vmatpush1.bf16.msra.mxu1 %v2723_v24  ;;  %2406 = vmatprep.subr.bf16.mxu0 %v2405_v27  ;;  %v1769_v24 = vld [vmem:[%s3860_s3 + $0x190] sm:$0xff] (!%p2020_p6)  ;;  %v1770_v27 = vld [vmem:[%s3860_s3 + $0x198] sm:$0xff] (!%p2020_p6)  ;;  %v2793_v30 = vpack.c.bf16 (!%p2020_p6), %v1780_v21, %v1779_v20 }
 0x14e   : > { %2726 = vmatprep.subr.bf16.mxu1 %v2725_v31  ;;  %v2773_v29 = vpack.c.bf16 (!%p2020_p6), %v1770_v27, %v1769_v24  ;;  %v1739_v31 = vld [vmem:[%s3860_s3 + $0xa0] sm:$0xff] (!%p2020_p6) }
 0x14f   : > { %v2745_v34 = vpack.c.bf16 (!%p2020_p6), %v1740_v32, %v1739_v31  ;;  %v1764_v31 = vld [vmem:[%s3860_s3 + $0x168] sm:$0xff] (!%p2020_p6)  ;;  %v1749_v32 = vld [vmem:[%s3860_s3 + $0xf0] sm:$0xff] (!%p2020_p6) }
 0x150   : > { %2408 = vmatpush1.bf16.msra.mxu0 %v2407_v37  ;;  %v1771_v37 = vld [vmem:[%s3860_s3 + $0x1a0] sm:$0xff] (!%p2020_p6) }
 0x151   : > { %2728 = vmatpush1.bf16.msra.mxu1 %v2727_v38  ;;  %2410 = vmatprep.subr.bf16.mxu0 %v2409_v39  ;;  %v1772_v38 = vld [vmem:[%s3860_s3 + $0x1a8] sm:$0xff] (!%p2020_p6)  ;;  %v1755_v39 = vld [vmem:[%s3860_s3 + $0x120] sm:$0xff] (!%p2020_p6) }
 0x152   : > { %2730 = vmatprep.subr.bf16.mxu1 %v2729_v44  ;;  %v2777_v43 = vpack.c.bf16 (!%p2020_p6), %v1772_v38, %v1771_v37  ;;  %v1741_v44 = vld [vmem:[%s3860_s3 + $0xb0] sm:$0xff] (!%p2020_p6)  ;;  %v2779_v48 = vpack.c.bf16 (!%p2020_p6), %v1756_v41, %v1755_v39  ;;  %v1782_v38 = vld [vmem:[%s3860_s3 + $0x1f8] sm:$0xff] (!%p2020_p6) }
 0x153   : > { %v2749_v49 = vpack.c.bf16 (!%p2020_p6), %v1742_v45, %v1741_v44  ;;  %v1781_v37 = vld [vmem:[%s3860_s3 + $0x1f0] sm:$0xff] (!%p2020_p6) }
 0x154   : > { %2412 = vmatpush1.bf16.msra.mxu0 %v2411_v50  ;;  %v1773_v50 = vld [vmem:[%s3860_s3 + $0x1b0] sm:$0xff] (!%p2020_p6) }
 0x155   : > { %2732 = vmatpush1.bf16.msra.mxu1 %v2731_v51  ;;  %2414 = vmatprep.subr.bf16.mxu0 %v2413_v52  ;;  %v1774_v51 = vld [vmem:[%s3860_s3 + $0x1b8] sm:$0xff] (!%p2020_p6)  ;;  %v1733_v45 = vld [vmem:[%s3860_s3 + $0x70] sm:$0xff] (!%p2020_p6) }
 0x156   : > { %2734 = vmatprep.subr.bf16.mxu1 %v2733_v55  ;;  %v2781_v52 = vpack.c.bf16 (!%p2020_p6), %v1774_v51, %v1773_v50  ;;  %v1743_v55 = vld [vmem:[%s3860_s3 + $0xc0] sm:$0xff] (!%p2020_p6)  ;;  %v1766_v50 = vld [vmem:[%s3860_s3 + $0x178] sm:$0xff] (!%p2020_p6) }
 0x158   : > { %2416 = vmatpush1.bf16.msra.mxu0 %v2415_v58  ;;  %v1775_v58 = vld [vmem:[%s3860_s3 + $0x1c0] sm:$0xff] (!%p2020_p6) }
 0x159   : > { %2736 = vmatpush1.bf16.msra.mxu1 %v2735_v59  ;;  %v1776_v59 = vld [vmem:[%s3860_s3 + $0x1c8] sm:$0xff] (!%p2020_p6) }
 0x15a   : > { %2770 = vmatprep.subr.bf16.mxu1 (!%p2020_p6), %v2769_v15  ;;  %v1747_v15 = vld [vmem:[%s3860_s3 + $0xe0] sm:$0xff] (!%p2020_p6) }
 0x15b   : > { %1291 = vmatmul.mubr.f32.vlgmr.msra.gmra.mrb[0].mxu0 %v3498_v0  ;;  %v2761_v27 = vpack.c.bf16 (!%p2020_p6), %v1748_v16, %v1747_v15 }
 0x15c   : > { %1646 = vmatmul.mubr.f32.vlgmr.msra.gmra.mrb[0].mxu1 %v3498_v0  ;;  %v1735_v0 = vld [vmem:[%s3860_s3 + $0x80] sm:$0xff] (!%p2020_p6) }
 0x15d   : > { %v2737_v10 = vpack.c.bf16 (!%p2020_p6), %v1736_v8, %v1735_v0  ;;  %2772 = vmatpush3.bf16.msra.mxu1 (!%p2020_p6), %v2771_v19  ;;  %v1693_v19 = vsub.s32 (!%p2020_p6), 2, %v3014_v63  ;;  %v1681_v63 = vld [vmem:[%s3859_s2] sm:$0xf] (!%p2020_p6) }
 0x15e   : > { %2774 = vmatprep.subr.bf16.mxu1 (!%p2020_p6), %v2773_v29  ;;  %v1763_v29 = vld [vmem:[%s3860_s3 + $0x160] sm:$0xff] (!%p2020_p6)  ;;  %v1690_v35 = vrot.slane (!%p2020_p6), %v1681_v63, %v1689_v18  ;;  %v1698_v39 = vrot.slane (!%p2020_p6), %v1681_v63, %v1697_v22 }
 0x15f   : > { %2738 = vmatprep.subr.bf16.mxu0 (!%p2020_p6), %v2737_v10  ;;  %v1729_v10 = vld [vmem:[%s3860_s3 + $0x50] sm:$0xff] (!%p2020_p6)  ;;  %v1694_v36 = vrot.slane (!%p2020_p6), %v1681_v63, %v1693_v19 }
 0x160   : > { %2740 = vmatpush3.bf16.msra.mxu0 (!%p2020_p6), %v2739_v14  ;;  %v1762_v14 = vld [vmem:[%s3860_s3 + $0x158] sm:$0xff] (!%p2020_p6) }
 0x161   : > { %2742 = vmatprep.subr.bf16.mxu0 (!%p2020_p6), %v2741_v23  ;;  %2776 = vmatpush3.bf16.msra.mxu1 (!%p2020_p6), %v2775_v33  ;;  %v2759_v23 = vpack.c.bf16 (!%p2020_p6), %v1730_v11, %v1729_v10  ;;  %v2791_v24 = vpack.c.bf16 (!%p2020_p6), %v1762_v14, %v1761_v13  ;;  %v1750_v33 = vld [vmem:[%s3860_s3 + $0xf8] sm:$0xff] (!%p2020_p6) }
 0x162   : > { %2778 = vmatprep.subr.bf16.mxu1 (!%p2020_p6), %v2777_v43  ;;  %v2795_v43 = vpack.c.bf16 (!%p2020_p6), %v1764_v31, %v1763_v29  ;;  %v2765_v44 = vpack.c.bf16 (!%p2020_p6), %v1750_v33, %v1749_v32 }
 0x164   : > { %2744 = vmatpush3.bf16.msra.mxu0 (!%p2020_p6), %v2743_v26  ;;  %v1731_v26 = vld [vmem:[%s3860_s3 + $0x60] sm:$0xff] (!%p2020_p6) }
 0x165   : > { %2746 = vmatprep.subr.bf16.mxu0 (!%p2020_p6), %v2745_v34  ;;  %2780 = vmatpush3.bf16.msra.mxu1 (!%p2020_p6), %v2779_v48  ;;  %v1686_v34 = vrot.slane (!%p2020_p6), %v1681_v63, %v1685_v17  ;;  %v2763_v41 = vpack.c.bf16 (!%p2020_p6), %v1732_v28, %v1731_v26  ;;  %v1700_v48 = vcombine.low (!%p2020_p6), %v1694_v36, %v1698_v39 }
 0x166   : > { %2782 = vmatprep.subr.bf16.mxu1 (!%p2020_p6), %v2781_v52 }
 0x167   : > { %v1714_v52 = vrot.slane (!%p2020_p6), %v1700_v48, %v3025_v12 }
 0x168   : > { %2748 = vmatpush3.bf16.msra.mxu0 (!%p2020_p6), %v2747_v42  ;;  %v1699_v42 = vcombine.low (!%p2020_p6), %v1686_v34, %v1690_v35 }
 0x169   : > { %2750 = vmatprep.subr.bf16.mxu0 (!%p2020_p6), %v2749_v49  ;;  %v2797_v49 = vpack.c.bf16 (!%p2020_p6), %v1782_v38, %v1781_v37 }
 0x16a   : > { %v1707_v51 = vrot.slane (!%p2020_p6), %v1699_v42, %v3025_v12 }
 0x16c   : > { %2752 = vmatpush3.bf16.msra.mxu0 (!%p2020_p6), %v2751_v57 }
 0x22e   : > { %v1292_v60 = vpop.f32.mrb[0].mxu0 }
 0x22f   : > { %v1647_v61 = vpop.f32.mrb[0].mxu1  ;;  %v1294_v62 = vpop.f32.mrb[1].mxu0 }
 0x230   : > { %v1656_v25 = vcombine.low %v1292_v60, %v1294_v62  ;;  %v1649_v1 = vpop.f32.mrb[1].mxu1  ;;  %v2783_v60 = vpack.c.bf16 (!%p2020_p6), %v1758_v54, %v1757_v53  ;;  %v1727_v62 = vld [vmem:[%s3860_s3 + $0x40] sm:$0xff] (!%p2020_p6)  ;;  %v2767_v53 = vpack.c.bf16 (!%p2020_p6), %v1734_v47, %v1733_v45 }
 0x231   : > { %v1657_v2 = vcombine.low %v1647_v61, %v1649_v1  ;;  %v2753_v61 = vpack.c.bf16 (!%p2020_p6), %v1744_v56, %v1743_v55  ;;  %v1759_v1 = vld [vmem:[%s3860_s3 + $0x140] sm:$0xff] (!%p2020_p6)  ;;  %v2799_v55 = vpack.c.bf16 (!%p2020_p6), %v1766_v50, %v1765_v40  ;;  %v1715_v56 = vcombine.low (!%p2020_p6), %v1707_v51, %v1714_v52 }
 0x232   : > { %v1664_v3 = vrot.slane %v1656_v25, %v3025_v12  ;;  %v1728_v25 = vld [vmem:[%s3860_s3 + $0x48] sm:$0xff] (!%p2020_p6)  ;;  %2784 = vmatpush3.bf16.msra.mxu1 (!%p2020_p6), %v2783_v60 }
 0x233   : > { %v1671_v4 = vrot.slane %v1657_v2, %v3025_v12  ;;  %1679 = sbr.rel (%p2020_p6) target bundleno = 806 (0x326), region = 48  ;;  %v2785_v2 = vpack.c.bf16 (!%p2020_p6), %v1776_v59, %v1775_v58  ;;  %v2755_v0 = vpack.c.bf16 (!%p2020_p6), %v1728_v25, %v1727_v62  ;;  %2754 = vmatprep.subr.bf16.mxu0 (!%p2020_p6), %v2753_v61 }
 0x235   : > { %v1672_v6 = vcombine.low %v1664_v3, %v1671_v4  ;;  %v1760_v3 = vld [vmem:[%s3860_s3 + $0x148] sm:$0xff] (!%p2020_p6)  ;;  %v1745_v4 = vld [vmem:[%s3860_s3 + $0xd0] sm:$0xff] (!%p2020_p6)  ;;  %2786 = vmatprep.subr.bf16.mxu1 (!%p2020_p6), %v2785_v2  ;;  %2756 = vmatpush3.bf16.msra.mxu0 (!%p2020_p6), %v2755_v0  ;;  %v2021_v2 = vld [vmem:[%s3861_s4] ss:$0 sm:$0xff] (!%p2020_p6) }
 0x236   : > { %v2787_v8 = vpack.c.bf16 (!%p2020_p6), %v1760_v3, %v1759_v1 }
 0x237   : > { %v1674_v7 = vadd.f32 %v1672_v6, %v243_v5  ;;  %v1746_v5 = vld [vmem:[%s3860_s3 + $0xd8] sm:$0xff] (!%p2020_p6)  ;;  %v1777_v6 = vld [vmem:[%s3860_s3 + $0x1d0] sm:$0xff] (!%p2020_p6) }
 0x238   : > { %v2757_v9 = vpack.c.bf16 (!%p2020_p6), %v1746_v5, %v1745_v4  ;;  %2788 = vmatpush3.bf16.msra.mxu1 (!%p2020_p6), %v2787_v8 }
 0x239   : > { %1675 = vst [vmem:[#allocation2] sm:$0xff] %v1674_v7  ;;  %v1778_v7 = vld [vmem:[%s3860_s3 + $0x1d8] sm:$0xff] (!%p2020_p6) }
 0x23a   : > { %v2789_v46 = vpack.c.bf16 %v1778_v7, %v1777_v6  ;;  %2758 = vmatprep.subr.bf16.mxu0 %v2757_v9 }
 0x23b   : > { %2760 = vmatpush3.bf16.msra.mxu0 %v2759_v23 }
 0x23c   : > { %2790 = vmatprep.subr.bf16.mxu1 %v2789_v46  ;;  %2762 = vmatprep.subr.bf16.mxu0 %v2761_v27 }
 0x23d   : > { %2792 = vmatpush3.bf16.msra.mxu1 %v2791_v24 }
 0x23e   : > { %2794 = vmatprep.subr.bf16.mxu1 %v2793_v30 }
 0x23f   : > { %2764 = vmatpush3.bf16.msra.mxu0 %v2763_v41 }
 0x240   : > { %v1680_v54 = vld [vmem:[#allocation2] sm:$0xff]  ;;  %2766 = vmatprep.subr.bf16.mxu0 %v2765_v44 }
 0x241   : > { %2796 = vmatpush3.bf16.msra.mxu1 %v2795_v43  ;;  %v1717_v57 = vadd.f32 %v1715_v56, %v1680_v54 }
 0x242   : > { %2798 = vmatprep.subr.bf16.mxu1 %v2797_v49 }
 0x243   : > { %2768 = vmatpush3.bf16.msra.mxu0 %v2767_v53  ;;  %v1718_v58 = vmax.f32 %v1717_v57, 0.0 }
 0x245   : > { %2800 = vmatpush3.bf16.msra.mxu1 %v2799_v55  ;;  %v1798_v59 = vrot.slane %v1718_v58, %v3025_v12  ;;  %v1791_v60 = vcombine.high %v1718_v58, %v1718_v58 }
 0x247   : > { %v1806_v61 = vcombine.high %v1798_v59, %v1798_v59  ;;  %v1805_v62 = vrot.slane %v1791_v60, %v3025_v12 }
 0x249   : > { %1876 = vmatprep.mubr.f32.mxu0 %v1806_v61  ;;  %v1807_v25 = vcombine.high %v1805_v62, %v1805_v62 }
 0x24a   : > { %1877 = vmatmul.mubr.f32.vlgmr.msra.gmra.mrb[0].mxu0 %v1798_v59 }
 0x24b   : > { %1946 = vmatprep.mubr.f32.mxu1 %v1807_v25 }
 0x24c   : > { %1947 = vmatmul.mubr.f32.vlgmr.msra.gmra.mrb[0].mxu1 %v1805_v62 }
 0x31d   : > { %v2059_v1 = vpop.f32.mrb[0].mxu0 }
 0x31e   : > { %v2060_v3 = vpop.f32.mrb[1].mxu0 }
 0x31f   : > { %v2061_v4 = vadd.f32 %v2060_v3, %v2059_v1  ;;  %v2094_v5 = vpop.f32.mrb[0].mxu1 }
 0x320   : > { %v2095_v6 = vpop.f32.mrb[1].mxu1 }
 0x321   : > { %v1879_v7 = vadd.f32 %v2061_v4, %v2021_v2  ;;  %v2096_v0 = vadd.f32 %v2095_v6, %v2094_v5 }
 0x323   : > { %v1949_v8 = vadd.f32 %v2096_v0, %v1879_v7 }
 0x325   : > { %1952 = vst [vmem:[#allocation3] sm:$0x3] %v1949_v8 }
 0x326 PF: > { %p2821_p7 = scmp.eq.s32.totalorder %s2913_s19, 4  ;;  %s2876_s24 = smov [#allocation3]  }
 0x327   : > { %s1960_s25 = sshll.u32 %s2876_s24, 4  ;;  %s1961_s25 = int_to_ptr.vmem [resolvable:$true] %s1960_s25 }
 0x328   : > { %s2836_s26 = scalar_lea.vmem %s1961_s25, 32  ;;  %p2843_p11 = scmp.lt.s32.totalorder %s1961_s25, %s1961_s25 }
 0x329   : > { %p2837_p8 = scmp.ne.s32.totalorder %s1961_s25, %s2836_s26  ;;  %p2844_p12 = scmp.lt.s32.totalorder %s2836_s26, %s2836_s26 }
 0x32b   : > { %p2838_p9 = pnand %p2837_p8, %p2821_p7  ;;  %p2845_p13 = por %p2844_p12, %p2843_p11 }
 0x32d   : > { %p2839_p10 = pneg %p2838_p9 }
 0x32f   : > { %p2846_p0 = pnand %p2845_p13, %p2839_p10 }
 0x331   : > { %2849 = shalt.err (!%p2846_p0)
}
 0x332   : > { %s2850_s29 = scalar_lea.hbm %s3862_s5, 32 }
 0x333   : > { %p2851_p1 = scmp.ne.s32.totalorder %s3862_s5, %s2850_s29  ;;  %p2856_p4 = scmp.lt.u32.totalorder %s2850_s29, %s3862_s5 }
 0x335   : > { %p2852_p2 = pnand %p2851_p1, %p2821_p7 }
 0x337   : > { %p2853_p3 = pneg %p2852_p2 }
 0x339   : > { %p2858_p5 = pnand %p2856_p4, %p2853_p3 }
 0x33b   : > { %2861 = shalt.err (!%p2858_p5)
}
 0x33c   : > { %2818 = dma.vmem_to_hbm [thread:$0]  (%p2821_p7), %s1961_s25, 32, %s3862_s5, [#allocation4]  }
 0x33d   : > { %2867 = dma.done.wait (%p2821_p7), [#allocation4], 32  }
 0x33e   : > { %2869 = vsyncadd (%p2821_p7), [#allocation4], 4294967264 }
 0x33f PF: > { %s16_s18 = sadd.s32 1, %s2872_s18  }
 0x340   : > { %p13_p6 = scmp.ge.s32.totalorder %s16_s18, 7  }
 0x342   :  { %15 = sbr.rel (!%p13_p6) target bundleno = 1 (0x1), region = 78 }
 0x349   :  { %1973 = vsyncpa [#allocation4], 1 }
 0x34a   :  { %1975 = vsyncpa [#allocation4 + $0x1], 1 }

</bundles_post_ra>
